<compile_context>
chip_gen: v6e
topology: v6e:2x2x1
jax: 0.10.0
libtpu: 0.0.40
codegen_flags: <defaults>
</compile_context>

<pallas_src>
import math
import numpy as np
import jax
import jax.numpy as jnp
from jax.experimental import pallas as pl
from jax.experimental.pallas import tpu as pltpu

PI = math.pi
TWO_PI = 2.0 * math.pi
DOF = 6
DEG10 = PI / 18.0        # 10 degrees in radians
TB = 128                 # time steps per grid block (lane dimension)


# ---------------------------------------------------------------------------
# small angle helpers (host / reference versions)
# ---------------------------------------------------------------------------
def _pipi_np(x):
    return np.mod(x + PI, TWO_PI) - PI


def _to_pos_np(x):
    return np.where(x < 0.0, x + TWO_PI, x)


# ---------------------------------------------------------------------------
# Buffer construction (replicates WaveLoad.__init__ precompute, synthetic cfg)
# ---------------------------------------------------------------------------
def build_buffers(wave_amps, freqs, eps, angles, headings, qtf_freqs,
                  drift_amp, force_amp, force_phase_deg, g=9.81):
    wave_amps = np.asarray(wave_amps, np.float32)
    freqs = np.asarray(freqs, np.float32)
    eps = np.asarray(eps, np.float32)
    angles = np.asarray(angles, np.float32)
    headings = np.asarray(headings, np.float32)          # radians, sorted
    qtf_freqs = np.asarray(qtf_freqs, np.float32)
    drift_amp = np.asarray(drift_amp, np.float32)        # (6, F, H)
    force_amp = np.abs(np.asarray(force_amp, np.float32))
    force_phase = np.deg2rad(np.asarray(force_phase_deg, np.float32)).astype(np.float32)

    dof, F, H = drift_amp.shape
    N = freqs.shape[0]

    k = (freqs ** 2 / g).astype(np.float32)               # deep water
    W = (freqs[:, None] - freqs[None, :]).astype(np.float32)
    P = (eps[:, None] - eps[None, :]).astype(np.float32)

    # ---- QTF (Newman, freq interp, 360-heading angle interp) ----
    if freqs[0] < qtf_freqs[0]:
        qtf_freqs_mod = np.concatenate([[0.0], qtf_freqs]).astype(np.float32)
        drift_mod = np.concatenate(
            [np.zeros((dof, 1, H), np.float32), drift_amp], axis=1)
    else:
        qtf_freqs_mod, drift_mod = qtf_freqs, drift_amp

    Qdiag = np.zeros((dof, N, H), np.float32)
    for d in range(dof):
        for h in range(H):
            Qdiag[d, :, h] = np.interp(freqs, qtf_freqs_mod, drift_mod[d, :, h],
                                       left=drift_mod[d, 0, h],
                                       right=drift_mod[d, -1, h])
    M = 360
    angles_1deg = np.linspace(0.0, TWO_PI, M)
    Qdiag2 = np.zeros((dof, N, M), np.float32)
    for d in range(dof):
        for i in range(N):
            Qdiag2[d, i, :] = np.interp(angles_1deg, headings, Qdiag[d, i, :],
                                        left=Qdiag[d, i, 0],
                                        right=Qdiag[d, i, -1])
    Qdiag_final = np.transpose(Qdiag2, (0, 2, 1))         # (6, M, N)
    a = Qdiag_final[:, :, :, None]
    b = Qdiag_final[:, :, None, :]
    Q = (0.5 * (a + b)).astype(np.float32)                # Newman
    Q[5] = Q[2].copy()
    Q[2] = 0.0

    # ---- first-order force RAOs w.r.t. wave freqs ----
    raoA = np.zeros((dof, N, H), np.float32)
    raoP = np.zeros((dof, N, H), np.float32)
    for d in range(dof):
        for h in range(H):
            yA = force_amp[d, :, h]
            yP = force_phase[d, :, h]
            raoA[d, :, h] = np.interp(freqs, qtf_freqs, yA, left=yA[0], right=0.0)
            raoP[d, :, h] = np.interp(freqs, qtf_freqs, yP, left=0.0, right=yP[-1])

    return dict(
        amp=wave_amps, freqs=freqs, eps=eps, angles=angles, k=k, W=W, P=P,
        qtf_angles=headings,
        qtf_angles_deg=np.rad2deg(headings).astype(np.float32),
        forceRAOamp=raoA, forceRAOphase=raoP, Q=Q,
        Qdiag=Qdiag_final.astype(np.float32))


# ---------------------------------------------------------------------------
# Pallas kernel: one block of TB time steps per grid point
#   cols_ref : (N, 8)         columns = [angles|freqs|eps|amp|k*cosA|k*sinA|0|0]
#   rao_ref  : (2*DOF, N, H)  force-RAO amp (0:DOF) and phase (DOF:2*DOF)
#   state_ref: (8, TB)        rows    = [t | x | y | psi | 0 ...]
#   qsel_ref : (DOF, N, TB)   Newman QTF diagonal row for each step's heading
#   out_ref  : (DOF, TB)      total wave loads, lane-dense in time
# ---------------------------------------------------------------------------
def wave_load_kernel(cols_ref, rao_ref, state_ref, qsel_ref, out_ref):
    cols = cols_ref[...]                       # (N, 8)
    angles = cols[:, 0:1]                      # (N, 1)
    freqs = cols[:, 1:2]
    eps = cols[:, 2:3]
    amp = cols[:, 3:4]
    kcos = cols[:, 4:5]                        # k * cos(angles), precomputed
    ksin = cols[:, 5:6]                        # k * sin(angles), precomputed

    state = state_ref[...]                     # (8, TB)
    t = state[0:1, :]                          # (1, TB)
    x = state[1:2, :]
    y = state[2:3, :]
    psi = state[3:4, :]

    rao = rao_ref[...]                         # (2*DOF, N, H)
    n = cols.shape[0]
    h_count = rao.shape[2]
    tb = state.shape[1]

    # relative incident angle in [0, 2pi):  mod(angles - psi, 2pi)
    d = angles - psi                           # (N, TB)
    rel = d - TWO_PI * jnp.floor(d * (1.0 / TWO_PI))

    # ---- RAO interpolation on the uniform 10-degree heading grid ----
    # TODO(synk): assumes the config heading grid is uniform 0..350 deg in
    # 10-degree steps (asserted host-side); non-uniform grids would need the
    # original argmin search.
    rel_b = rel * (18.0 / PI)                  # rel in units of 10 degrees
    binf = jnp.minimum(jnp.floor(rel_b), float(h_count - 1))   # lower bin (float)
    scale = rel_b - binf                       # in [0, 1]
    w_lb = 1.0 - scale

    # Single masked-accumulate pass over the packed amp|phase table produces
    # the already-interpolated values for both (fuses the 4 one-hot gathers).
    acc = jnp.zeros((2 * DOF, n, tb), jnp.float32)
    for h in range(h_count):
        hu = h - 1 if h > 0 else h_count - 1   # lb value whose ub == h
        w = (jnp.where(binf == float(h), w_lb, 0.0)
             + jnp.where(binf == float(hu), scale, 0.0))        # (N, TB)
        acc = acc + rao[:, :, h:h + 1] * w[None, :, :]
    rao_amp = acc[:DOF]                        # (DOF, N, TB)
    rao_phase = acc[DOF:]

    # ---- first-order loads ----
    wave_phase = freqs * t - kcos * x - ksin * y - eps          # (N, TB)
    contrib = rao_amp * jnp.cos(wave_phase[None, :, :] - rao_phase)
    tau_wf = jnp.sum(contrib * amp[None, :, :], axis=1)         # (DOF, TB)

    # ---- second-order slow-drift loads (Newman, diagonal form) ----
    #   sum_ij amp_i amp_j 0.5*(q_i+q_j) cos(a_i - a_j)
    # = sum_i q_i (u_i*Sc + v_i*Ss),  u = amp*cos(a), v = amp*sin(a)
    a = freqs * t - eps                                          # (N, TB)
    u = amp * jnp.cos(a)
    v = amp * jnp.sin(a)
    s_c = jnp.sum(u, axis=0, keepdims=True)                      # (1, TB)
    s_s = jnp.sum(v, axis=0, keepdims=True)
    w2 = u * s_c + v * s_s                                       # (N, TB)
    tau_sv = jnp.sum(qsel_ref[...] * w2[None, :, :], axis=1)     # (DOF, TB)

    out_ref[...] = tau_wf + tau_sv


# ---------------------------------------------------------------------------
# Wrapper: packing + pallas_call (batched over blocks of TB time steps)
# ---------------------------------------------------------------------------
def make_wave_load(buf_np):
    N = int(buf_np['amp'].shape[0])
    H = int(buf_np['qtf_angles'].shape[0])
    M = int(buf_np['Qdiag'].shape[1])          # 360 interpolated headings

    # kernel assumes the uniform 10-degree heading grid used by the module
    assert np.allclose(buf_np['qtf_angles_deg'],
                       np.arange(0.0, 360.0, 10.0, dtype=np.float32), atol=1e-3)

    # per-component constants, column layout (N on sublanes)
    cols_np = np.zeros((N, 8), np.float32)
    cols_np[:, 0] = buf_np['angles']
    cols_np[:, 1] = buf_np['freqs']
    cols_np[:, 2] = buf_np['eps']
    cols_np[:, 3] = buf_np['amp']
    cols_np[:, 4] = buf_np['k'] * np.cos(buf_np['angles'])
    cols_np[:, 5] = buf_np['k'] * np.sin(buf_np['angles'])
    cols = jnp.asarray(cols_np)

    # packed force-RAO amp | phase, natural (dof, N, H) layout
    rao_packed = jnp.asarray(
        np.concatenate([buf_np['forceRAOamp'], buf_np['forceRAOphase']],
                       axis=0).astype(np.float32))               # (2*dof, N, H)

    # Newman QTF diagonal with the Q[5]=Q[2], Q[2]=0 shuffle applied
    # TODO(synk): the diagonal reformulation is exact only for the 'Newman'
    # QTF method; 'geo-mean' would need the full (dof, M, N, N) Q path.
    qdiag = np.asarray(buf_np['Qdiag'], np.float32)               # (dof, M, N)
    q_eff_np = qdiag.copy()
    q_eff_np[5] = qdiag[2]
    q_eff_np[2] = 0.0
    q_eff = jnp.asarray(q_eff_np)
    angles_1d = jnp.asarray(buf_np['angles'], dtype=jnp.float32)  # (N,)

    def _build_call(n_blocks):
        T_pad = n_blocks * TB
        flops = int(T_pad * (H * 6 * 2 * DOF * N + 30 * DOF * N + 40 * N))
        trans = int(T_pad * (DOF + 2) * N)
        bytes_accessed = int((cols.size + rao_packed.size) * 4
                             + T_pad * (8 + DOF * N + DOF) * 4)
        grid_spec = pltpu.PrefetchScalarGridSpec(
            num_scalar_prefetch=0,
            grid=(n_blocks,),
            in_specs=[
                pl.BlockSpec((N, 8), lambda i: (0, 0)),                 # constants
                pl.BlockSpec((2 * DOF, N, H), lambda i: (0, 0, 0)),     # RAO amp|phase
                pl.BlockSpec((8, TB), lambda i: (0, i)),                # per-step state
                pl.BlockSpec((DOF, N, TB), lambda i: (0, 0, i)),        # QTF diag rows
            ],
            out_specs=pl.BlockSpec((DOF, TB), lambda i: (0, i)),
        )
        return pl.pallas_call(
            wave_load_kernel,
            out_shape=jax.ShapeDtypeStruct((DOF, T_pad), jnp.float32),
            grid_spec=grid_spec,
            # "parallel": on v7x, >=2 time blocks will be split across the 2 TCs.
            compiler_params=pltpu.CompilerParams(
                dimension_semantics=("parallel",)),
            cost_estimate=pl.CostEstimate(flops=flops, transcendentals=trans,
                                          bytes_accessed=bytes_accessed),
        )

    @jax.jit
    def forward_batch(ts, etas):
        """ts: (T,) float32, etas: (T, 6) float32  ->  (T, 6) loads."""
        ts = ts.astype(jnp.float32)
        etas = etas.astype(jnp.float32)
        T = ts.shape[0]
        n_blocks = max(1, -(-T // TB))
        T_pad = n_blocks * TB
        pad = T_pad - T

        psi = etas[:, 5]                                            # (T,)
        # heading index on the 360-point QTF grid (linspace(0, 2pi, 360)),
        # computed analytically from the mean relative angle
        rel = jnp.mod(angles_1d[None, :] - psi[:, None], TWO_PI)    # (T, N)
        mean_angle = jnp.mean(rel, axis=1)                          # (T,)
        hidx = jnp.clip(jnp.round(mean_angle * ((M - 1) / TWO_PI)),
                        0, M - 1).astype(jnp.int32)                 # (T,)
        # wrapper-side gather of the Newman diagonal rows (index plumbing)
        qsel = jnp.transpose(q_eff[:, hidx, :], (0, 2, 1))          # (dof, N, T)

        state = jnp.stack([ts, etas[:, 0], etas[:, 1], psi], axis=0)  # (4, T)
        state = jnp.pad(state, ((0, 4), (0, pad)))                  # (8, T_pad)
        qsel = jnp.pad(qsel, ((0, 0), (0, 0), (0, pad)))            # (dof, N, T_pad)

        out = _build_call(n_blocks)(cols, rao_packed, state, qsel)  # (dof, T_pad)
        return out[:, :T].T                                         # (T, dof)

    def forward(t, eta):
        t1 = jnp.reshape(jnp.asarray(t, jnp.float32), (1,))
        eta1 = jnp.reshape(jnp.asarray(eta, jnp.float32), (1, 6))
        return forward_batch(t1, eta1)[0]

    return forward, forward_batch


# ---------------------------------------------------------------------------
# Pure numpy reference (mirrors WaveLoad.forward, uses the full Q matrices)
# ---------------------------------------------------------------------------
def reference_forward(t, eta, buf):
    angles = buf['angles']; freqs = buf['freqs']; k = buf['k']
    eps = buf['eps']; amp = buf['amp']
    qtf_ang = buf['qtf_angles']; qtf_deg = buf['qtf_angles_deg']
    raoA = buf['forceRAOamp']; raoP = buf['forceRAOphase']
    W = buf['W']; P = buf['P']; Q = buf['Q']
    N = amp.shape[0]; H = qtf_ang.shape[0]

    heading = eta[-1]
    rel = _to_pos_np(_pipi_np(angles - heading))

    rel_deg = rel * 180.0 / PI
    bin_floor = np.floor(rel_deg / 10.0) * 10.0
    diffs = np.abs(qtf_deg[None, :] - bin_floor[:, None])
    lb = np.argmin(diffs, axis=1)
    ub = np.where(lb < H - 1, lb + 1, 0)
    theta1 = qtf_ang[lb]; theta2 = qtf_ang[ub]
    diff_t = _pipi_np(theta2 - theta1)
    scale = _pipi_np(rel - theta1) / (diff_t + np.where(diff_t == 0.0, 1e-9, 0.0))
    fi = np.arange(N)
    rao_amp = raoA[:, fi, lb] + (raoA[:, fi, ub] - raoA[:, fi, lb]) * scale[None]
    rao_phase = raoP[:, fi, lb] + (raoP[:, fi, ub] - raoP[:, fi, lb]) * scale[None]

    wave_phase = (freqs * t - k * eta[0] * np.cos(angles)
                  - k * eta[1] * np.sin(angles) - eps)
    contrib = rao_amp * np.cos(wave_phase[None] - rao_phase)
    tau_wf = contrib @ amp

    mean_angle = rel.mean()
    grid360 = np.linspace(0.0, TWO_PI, 360)
    hidx = min(int(np.argmin(np.abs(grid360 - mean_angle))), Q.shape[1] - 1)
    Qsel = Q[:, hidx]
    mat = Qsel * np.cos(W * t - P)[None]
    tau_sv = np.einsum('i,dij,j->d', amp, mat, amp)
    return tau_wf + tau_sv


# ---------------------------------------------------------------------------
if __name__ == "__main__":
    key = jax.random.PRNGKey(0)
    k1, k2, k3, k4, k5, k6, k7, k8 = jax.random.split(key, 8)

    N = 8        # wave components (fills the 8 sublanes)
    H = 36       # config headings (0..350 deg, 10-deg spacing)
    F = 12       # config frequencies

    wave_amps = np.asarray(jax.random.uniform(k1, (N,), minval=0.1, maxval=1.0))
    freqs = np.linspace(0.3, 1.5, N)
    eps = np.asarray(jax.random.uniform(k2, (N,), minval=0.0, maxval=TWO_PI))
    angles = np.asarray(jax.random.uniform(k3, (N,), minval=0.0, maxval=TWO_PI))

    headings = np.deg2rad(np.arange(0, 360, 10)).astype(np.float32)
    qtf_freqs = np.linspace(0.2, 2.0, F)
    drift_amp = np.asarray(jax.random.normal(k4, (6, F, H)))
    force_amp = np.asarray(jax.random.uniform(k5, (6, F, H), minval=0.0, maxval=2.0))
    force_phase_deg = np.asarray(
        jax.random.uniform(k6, (6, F, H), minval=-180.0, maxval=180.0))

    buf = build_buffers(wave_amps, freqs, eps, angles, headings, qtf_freqs,
                        drift_amp, force_amp, force_phase_deg)

    forward, forward_batch = make_wave_load(buf)

    # ---- single-step call (original module semantics) ----
    t = jnp.float32(3.2)
    eta = jnp.array([1.5, -0.7, 0.0, 0.0, 0.0, 0.4], dtype=jnp.float32)
    tau = jax.block_until_ready(forward(t, eta))

    tau_ref = reference_forward(3.2, np.array(eta, np.float32), buf)
    err = np.max(np.abs(np.asarray(tau) - tau_ref))
    denom = np.max(np.abs(tau_ref)) + 1e-6
    assert err / denom < 1e-3, f"mismatch: kernel={np.asarray(tau)} ref={tau_ref}"

    # ---- batched call (one 128-lane time block) ----
    T = 4
    ts = jnp.array([0.0, 3.2, 7.5, 12.1], dtype=jnp.float32)
    etas_np = np.asarray(jax.random.uniform(k7, (T, 6), minval=-2.0, maxval=2.0),
                         dtype=np.float32)
    etas = jnp.asarray(etas_np)
    taus = jax.block_until_ready(forward_batch(ts, etas))

    for b in range(T):
        ref_b = reference_forward(float(ts[b]), etas_np[b], buf)
        err_b = np.max(np.abs(np.asarray(taus[b]) - ref_b))
        denom_b = np.max(np.abs(ref_b)) + 1e-6
        assert err_b / denom_b < 1e-3, (
            f"batch {b} mismatch: kernel={np.asarray(taus[b])} ref={ref_b}")

    print("KERNEL_OK")
</pallas_src>

<mosaic_0001>
module attributes {stable_mosaic.version = 11 : i64} {
  func.func @wave_load_kernel(%arg0: i32, %arg1: memref<8x8xf32, #tpu.memory_space<vmem>>, %arg2: memref<12x8x36xf32, #tpu.memory_space<vmem>>, %arg3: memref<8x128xf32, #tpu.memory_space<vmem>>, %arg4: memref<6x8x128xf32, #tpu.memory_space<vmem>>, %arg5: memref<6x128xf32, #tpu.memory_space<vmem>>) attributes {dimension_semantics = [#tpu.dimension_semantics<parallel>], iteration_bounds = array<i64: 1>, scalar_prefetch = 0 : i64, scratch_operands = 0 : i64, tpu.core_type = #tpu.core_type<tc>, window_params = [{pipeline_mode = #tpu.pipeline_mode<synchronous>, transform_indices = @transform_0, window_bounds = array<i64: 8, 8>}, {pipeline_mode = #tpu.pipeline_mode<synchronous>, transform_indices = @transform_1, window_bounds = array<i64: 12, 8, 36>}, {transform_indices = @transform_2, window_bounds = array<i64: 8, 128>}, {transform_indices = @transform_3, window_bounds = array<i64: 6, 8, 128>}, {transform_indices = @transform_4, window_bounds = array<i64: 6, 128>}]} {
    %c0 = arith.constant 0 : index
    %c0_0 = arith.constant 0 : index
    %0 = vector.load %arg1[%c0, %c0_0] : memref<8x8xf32, #tpu.memory_space<vmem>>, vector<8x8xf32>
    %1 = vector.extract_strided_slice %0 {offsets = [0, 0], sizes = [8, 1], strides = [1, 1]} : vector<8x8xf32> to vector<8x1xf32>
    %2 = vector.extract_strided_slice %0 {offsets = [0, 1], sizes = [8, 1], strides = [1, 1]} : vector<8x8xf32> to vector<8x1xf32>
    %3 = vector.extract_strided_slice %0 {offsets = [0, 2], sizes = [8, 1], strides = [1, 1]} : vector<8x8xf32> to vector<8x1xf32>
    %4 = vector.extract_strided_slice %0 {offsets = [0, 3], sizes = [8, 1], strides = [1, 1]} : vector<8x8xf32> to vector<8x1xf32>
    %5 = vector.extract_strided_slice %0 {offsets = [0, 4], sizes = [8, 1], strides = [1, 1]} : vector<8x8xf32> to vector<8x1xf32>
    %6 = vector.extract_strided_slice %0 {offsets = [0, 5], sizes = [8, 1], strides = [1, 1]} : vector<8x8xf32> to vector<8x1xf32>
    %c0_1 = arith.constant 0 : index
    %c0_2 = arith.constant 0 : index
    %7 = vector.load %arg3[%c0_1, %c0_2] : memref<8x128xf32, #tpu.memory_space<vmem>>, vector<8x128xf32>
    %8 = vector.extract_strided_slice %7 {offsets = [0, 0], sizes = [1, 128], strides = [1, 1]} : vector<8x128xf32> to vector<1x128xf32>
    %9 = vector.extract_strided_slice %7 {offsets = [1, 0], sizes = [1, 128], strides = [1, 1]} : vector<8x128xf32> to vector<1x128xf32>
    %10 = vector.extract_strided_slice %7 {offsets = [2, 0], sizes = [1, 128], strides = [1, 1]} : vector<8x128xf32> to vector<1x128xf32>
    %11 = vector.extract_strided_slice %7 {offsets = [3, 0], sizes = [1, 128], strides = [1, 1]} : vector<8x128xf32> to vector<1x128xf32>
    %c0_3 = arith.constant 0 : index
    %c0_4 = arith.constant 0 : index
    %c0_5 = arith.constant 0 : index
    %12 = vector.load %arg2[%c0_3, %c0_4, %c0_5] : memref<12x8x36xf32, #tpu.memory_space<vmem>>, vector<12x8x36xf32>
    %13 = vector.broadcast %1 : vector<8x1xf32> to vector<8x128xf32>
    %14 = vector.broadcast %11 : vector<1x128xf32> to vector<8x128xf32>
    %15 = arith.subf %13, %14 : vector<8x128xf32>
    %cst = arith.constant 0.159154937 : f32
    %16 = vector.broadcast %cst : f32 to vector<8x128xf32>
    %17 = arith.mulf %15, %16 : vector<8x128xf32>
    %18 = math.floor %17 : vector<8x128xf32>
    %cst_6 = arith.constant 6.28318548 : f32
    %19 = vector.broadcast %cst_6 : f32 to vector<8x128xf32>
    %20 = arith.mulf %19, %18 : vector<8x128xf32>
    %21 = arith.subf %15, %20 : vector<8x128xf32>
    %cst_7 = arith.constant 5.72957802 : f32
    %22 = vector.broadcast %cst_7 : f32 to vector<8x128xf32>
    %23 = arith.mulf %21, %22 : vector<8x128xf32>
    %24 = math.floor %23 : vector<8x128xf32>
    %cst_8 = arith.constant 3.500000e+01 : f32
    %25 = vector.broadcast %cst_8 : f32 to vector<8x128xf32>
    %26 = arith.minimumf %24, %25 : vector<8x128xf32>
    %27 = arith.subf %23, %26 : vector<8x128xf32>
    %cst_9 = arith.constant 1.000000e+00 : f32
    %28 = vector.broadcast %cst_9 : f32 to vector<8x128xf32>
    %29 = arith.subf %28, %27 : vector<8x128xf32>
    %cst_10 = arith.constant 0.000000e+00 : f32
    %30 = vector.broadcast %cst_10 : f32 to vector<12x8x128xf32>
    %cst_11 = arith.constant 0.000000e+00 : f32
    %31 = vector.broadcast %cst_11 : f32 to vector<8x128xf32>
    %32 = arith.cmpf oeq, %26, %31 : vector<8x128xf32>
    %cst_12 = arith.constant 0.000000e+00 : f32
    %33 = vector.broadcast %cst_12 : f32 to vector<8x128xf32>
    %34 = arith.select %32, %29, %33 : vector<8x128xi1>, vector<8x128xf32>
    %cst_13 = arith.constant 3.500000e+01 : f32
    %35 = vector.broadcast %cst_13 : f32 to vector<8x128xf32>
    %36 = arith.cmpf oeq, %26, %35 : vector<8x128xf32>
    %cst_14 = arith.constant 0.000000e+00 : f32
    %37 = vector.broadcast %cst_14 : f32 to vector<8x128xf32>
    %38 = arith.select %36, %27, %37 : vector<8x128xi1>, vector<8x128xf32>
    %39 = arith.addf %34, %38 : vector<8x128xf32>
    %40 = vector.extract_strided_slice %12 {offsets = [0, 0, 0], sizes = [12, 8, 1], strides = [1, 1, 1]} : vector<12x8x36xf32> to vector<12x8x1xf32>
    %41 = vector.shape_cast %39 : vector<8x128xf32> to vector<1x8x128xf32>
    %42 = vector.broadcast %40 : vector<12x8x1xf32> to vector<12x8x128xf32>
    %43 = vector.broadcast %41 : vector<1x8x128xf32> to vector<12x8x128xf32>
    %44 = arith.mulf %42, %43 : vector<12x8x128xf32>
    %45 = arith.addf %30, %44 : vector<12x8x128xf32>
    %cst_15 = arith.constant 1.000000e+00 : f32
    %46 = vector.broadcast %cst_15 : f32 to vector<8x128xf32>
    %47 = arith.cmpf oeq, %26, %46 : vector<8x128xf32>
    %cst_16 = arith.constant 0.000000e+00 : f32
    %48 = vector.broadcast %cst_16 : f32 to vector<8x128xf32>
    %49 = arith.select %47, %29, %48 : vector<8x128xi1>, vector<8x128xf32>
    %cst_17 = arith.constant 0.000000e+00 : f32
    %50 = vector.broadcast %cst_17 : f32 to vector<8x128xf32>
    %51 = arith.cmpf oeq, %26, %50 : vector<8x128xf32>
    %cst_18 = arith.constant 0.000000e+00 : f32
    %52 = vector.broadcast %cst_18 : f32 to vector<8x128xf32>
    %53 = arith.select %51, %27, %52 : vector<8x128xi1>, vector<8x128xf32>
    %54 = arith.addf %49, %53 : vector<8x128xf32>
    %55 = vector.extract_strided_slice %12 {offsets = [0, 0, 1], sizes = [12, 8, 1], strides = [1, 1, 1]} : vector<12x8x36xf32> to vector<12x8x1xf32>
    %56 = vector.shape_cast %54 : vector<8x128xf32> to vector<1x8x128xf32>
    %57 = vector.broadcast %55 : vector<12x8x1xf32> to vector<12x8x128xf32>
    %58 = vector.broadcast %56 : vector<1x8x128xf32> to vector<12x8x128xf32>
    %59 = arith.mulf %57, %58 : vector<12x8x128xf32>
    %60 = arith.addf %45, %59 : vector<12x8x128xf32>
    %cst_19 = arith.constant 2.000000e+00 : f32
    %61 = vector.broadcast %cst_19 : f32 to vector<8x128xf32>
    %62 = arith.cmpf oeq, %26, %61 : vector<8x128xf32>
    %cst_20 = arith.constant 0.000000e+00 : f32
    %63 = vector.broadcast %cst_20 : f32 to vector<8x128xf32>
    %64 = arith.select %62, %29, %63 : vector<8x128xi1>, vector<8x128xf32>
    %cst_21 = arith.constant 1.000000e+00 : f32
    %65 = vector.broadcast %cst_21 : f32 to vector<8x128xf32>
    %66 = arith.cmpf oeq, %26, %65 : vector<8x128xf32>
    %cst_22 = arith.constant 0.000000e+00 : f32
    %67 = vector.broadcast %cst_22 : f32 to vector<8x128xf32>
    %68 = arith.select %66, %27, %67 : vector<8x128xi1>, vector<8x128xf32>
    %69 = arith.addf %64, %68 : vector<8x128xf32>
    %70 = vector.extract_strided_slice %12 {offsets = [0, 0, 2], sizes = [12, 8, 1], strides = [1, 1, 1]} : vector<12x8x36xf32> to vector<12x8x1xf32>
    %71 = vector.shape_cast %69 : vector<8x128xf32> to vector<1x8x128xf32>
    %72 = vector.broadcast %70 : vector<12x8x1xf32> to vector<12x8x128xf32>
    %73 = vector.broadcast %71 : vector<1x8x128xf32> to vector<12x8x128xf32>
    %74 = arith.mulf %72, %73 : vector<12x8x128xf32>
    %75 = arith.addf %60, %74 : vector<12x8x128xf32>
    %cst_23 = arith.constant 3.000000e+00 : f32
    %76 = vector.broadcast %cst_23 : f32 to vector<8x128xf32>
    %77 = arith.cmpf oeq, %26, %76 : vector<8x128xf32>
    %cst_24 = arith.constant 0.000000e+00 : f32
    %78 = vector.broadcast %cst_24 : f32 to vector<8x128xf32>
    %79 = arith.select %77, %29, %78 : vector<8x128xi1>, vector<8x128xf32>
    %cst_25 = arith.constant 2.000000e+00 : f32
    %80 = vector.broadcast %cst_25 : f32 to vector<8x128xf32>
    %81 = arith.cmpf oeq, %26, %80 : vector<8x128xf32>
    %cst_26 = arith.constant 0.000000e+00 : f32
    %82 = vector.broadcast %cst_26 : f32 to vector<8x128xf32>
    %83 = arith.select %81, %27, %82 : vector<8x128xi1>, vector<8x128xf32>
    %84 = arith.addf %79, %83 : vector<8x128xf32>
    %85 = vector.extract_strided_slice %12 {offsets = [0, 0, 3], sizes = [12, 8, 1], strides = [1, 1, 1]} : vector<12x8x36xf32> to vector<12x8x1xf32>
    %86 = vector.shape_cast %84 : vector<8x128xf32> to vector<1x8x128xf32>
    %87 = vector.broadcast %85 : vector<12x8x1xf32> to vector<12x8x128xf32>
    %88 = vector.broadcast %86 : vector<1x8x128xf32> to vector<12x8x128xf32>
    %89 = arith.mulf %87, %88 : vector<12x8x128xf32>
    %90 = arith.addf %75, %89 : vector<12x8x128xf32>
    %cst_27 = arith.constant 4.000000e+00 : f32
    %91 = vector.broadcast %cst_27 : f32 to vector<8x128xf32>
    %92 = arith.cmpf oeq, %26, %91 : vector<8x128xf32>
    %cst_28 = arith.constant 0.000000e+00 : f32
    %93 = vector.broadcast %cst_28 : f32 to vector<8x128xf32>
    %94 = arith.select %92, %29, %93 : vector<8x128xi1>, vector<8x128xf32>
    %cst_29 = arith.constant 3.000000e+00 : f32
    %95 = vector.broadcast %cst_29 : f32 to vector<8x128xf32>
    %96 = arith.cmpf oeq, %26, %95 : vector<8x128xf32>
    %cst_30 = arith.constant 0.000000e+00 : f32
    %97 = vector.broadcast %cst_30 : f32 to vector<8x128xf32>
    %98 = arith.select %96, %27, %97 : vector<8x128xi1>, vector<8x128xf32>
    %99 = arith.addf %94, %98 : vector<8x128xf32>
    %100 = vector.extract_strided_slice %12 {offsets = [0, 0, 4], sizes = [12, 8, 1], strides = [1, 1, 1]} : vector<12x8x36xf32> to vector<12x8x1xf32>
    %101 = vector.shape_cast %99 : vector<8x128xf32> to vector<1x8x128xf32>
    %102 = vector.broadcast %100 : vector<12x8x1xf32> to vector<12x8x128xf32>
    %103 = vector.broadcast %101 : vector<1x8x128xf32> to vector<12x8x128xf32>
    %104 = arith.mulf %102, %103 : vector<12x8x128xf32>
    %105 = arith.addf %90, %104 : vector<12x8x128xf32>
    %cst_31 = arith.constant 5.000000e+00 : f32
    %106 = vector.broadcast %cst_31 : f32 to vector<8x128xf32>
    %107 = arith.cmpf oeq, %26, %106 : vector<8x128xf32>
    %cst_32 = arith.constant 0.000000e+00 : f32
    %108 = vector.broadcast %cst_32 : f32 to vector<8x128xf32>
    %109 = arith.select %107, %29, %108 : vector<8x128xi1>, vector<8x128xf32>
    %cst_33 = arith.constant 4.000000e+00 : f32
    %110 = vector.broadcast %cst_33 : f32 to vector<8x128xf32>
    %111 = arith.cmpf oeq, %26, %110 : vector<8x128xf32>
    %cst_34 = arith.constant 0.000000e+00 : f32
    %112 = vector.broadcast %cst_34 : f32 to vector<8x128xf32>
    %113 = arith.select %111, %27, %112 : vector<8x128xi1>, vector<8x128xf32>
    %114 = arith.addf %109, %113 : vector<8x128xf32>
    %115 = vector.extract_strided_slice %12 {offsets = [0, 0, 5], sizes = [12, 8, 1], strides = [1, 1, 1]} : vector<12x8x36xf32> to vector<12x8x1xf32>
    %116 = vector.shape_cast %114 : vector<8x128xf32> to vector<1x8x128xf32>
    %117 = vector.broadcast %115 : vector<12x8x1xf32> to vector<12x8x128xf32>
    %118 = vector.broadcast %116 : vector<1x8x128xf32> to vector<12x8x128xf32>
    %119 = arith.mulf %117, %118 : vector<12x8x128xf32>
    %120 = arith.addf %105, %119 : vector<12x8x128xf32>
    %cst_35 = arith.constant 6.000000e+00 : f32
    %121 = vector.broadcast %cst_35 : f32 to vector<8x128xf32>
    %122 = arith.cmpf oeq, %26, %121 : vector<8x128xf32>
    %cst_36 = arith.constant 0.000000e+00 : f32
    %123 = vector.broadcast %cst_36 : f32 to vector<8x128xf32>
    %124 = arith.select %122, %29, %123 : vector<8x128xi1>, vector<8x128xf32>
    %cst_37 = arith.constant 5.000000e+00 : f32
    %125 = vector.broadcast %cst_37 : f32 to vector<8x128xf32>
    %126 = arith.cmpf oeq, %26, %125 : vector<8x128xf32>
    %cst_38 = arith.constant 0.000000e+00 : f32
    %127 = vector.broadcast %cst_38 : f32 to vector<8x128xf32>
    %128 = arith.select %126, %27, %127 : vector<8x128xi1>, vector<8x128xf32>
    %129 = arith.addf %124, %128 : vector<8x128xf32>
    %130 = vector.extract_strided_slice %12 {offsets = [0, 0, 6], sizes = [12, 8, 1], strides = [1, 1, 1]} : vector<12x8x36xf32> to vector<12x8x1xf32>
    %131 = vector.shape_cast %129 : vector<8x128xf32> to vector<1x8x128xf32>
    %132 = vector.broadcast %130 : vector<12x8x1xf32> to vector<12x8x128xf32>
    %133 = vector.broadcast %131 : vector<1x8x128xf32> to vector<12x8x128xf32>
    %134 = arith.mulf %132, %133 : vector<12x8x128xf32>
    %135 = arith.addf %120, %134 : vector<12x8x128xf32>
    %cst_39 = arith.constant 7.000000e+00 : f32
    %136 = vector.broadcast %cst_39 : f32 to vector<8x128xf32>
    %137 = arith.cmpf oeq, %26, %136 : vector<8x128xf32>
    %cst_40 = arith.constant 0.000000e+00 : f32
    %138 = vector.broadcast %cst_40 : f32 to vector<8x128xf32>
    %139 = arith.select %137, %29, %138 : vector<8x128xi1>, vector<8x128xf32>
    %cst_41 = arith.constant 6.000000e+00 : f32
    %140 = vector.broadcast %cst_41 : f32 to vector<8x128xf32>
    %141 = arith.cmpf oeq, %26, %140 : vector<8x128xf32>
    %cst_42 = arith.constant 0.000000e+00 : f32
    %142 = vector.broadcast %cst_42 : f32 to vector<8x128xf32>
    %143 = arith.select %141, %27, %142 : vector<8x128xi1>, vector<8x128xf32>
    %144 = arith.addf %139, %143 : vector<8x128xf32>
    %145 = vector.extract_strided_slice %12 {offsets = [0, 0, 7], sizes = [12, 8, 1], strides = [1, 1, 1]} : vector<12x8x36xf32> to vector<12x8x1xf32>
    %146 = vector.shape_cast %144 : vector<8x128xf32> to vector<1x8x128xf32>
    %147 = vector.broadcast %145 : vector<12x8x1xf32> to vector<12x8x128xf32>
    %148 = vector.broadcast %146 : vector<1x8x128xf32> to vector<12x8x128xf32>
    %149 = arith.mulf %147, %148 : vector<12x8x128xf32>
    %150 = arith.addf %135, %149 : vector<12x8x128xf32>
    %cst_43 = arith.constant 8.000000e+00 : f32
    %151 = vector.broadcast %cst_43 : f32 to vector<8x128xf32>
    %152 = arith.cmpf oeq, %26, %151 : vector<8x128xf32>
    %cst_44 = arith.constant 0.000000e+00 : f32
    %153 = vector.broadcast %cst_44 : f32 to vector<8x128xf32>
    %154 = arith.select %152, %29, %153 : vector<8x128xi1>, vector<8x128xf32>
    %cst_45 = arith.constant 7.000000e+00 : f32
    %155 = vector.broadcast %cst_45 : f32 to vector<8x128xf32>
    %156 = arith.cmpf oeq, %26, %155 : vector<8x128xf32>
    %cst_46 = arith.constant 0.000000e+00 : f32
    %157 = vector.broadcast %cst_46 : f32 to vector<8x128xf32>
    %158 = arith.select %156, %27, %157 : vector<8x128xi1>, vector<8x128xf32>
    %159 = arith.addf %154, %158 : vector<8x128xf32>
    %160 = vector.extract_strided_slice %12 {offsets = [0, 0, 8], sizes = [12, 8, 1], strides = [1, 1, 1]} : vector<12x8x36xf32> to vector<12x8x1xf32>
    %161 = vector.shape_cast %159 : vector<8x128xf32> to vector<1x8x128xf32>
    %162 = vector.broadcast %160 : vector<12x8x1xf32> to vector<12x8x128xf32>
    %163 = vector.broadcast %161 : vector<1x8x128xf32> to vector<12x8x128xf32>
    %164 = arith.mulf %162, %163 : vector<12x8x128xf32>
    %165 = arith.addf %150, %164 : vector<12x8x128xf32>
    %cst_47 = arith.constant 9.000000e+00 : f32
    %166 = vector.broadcast %cst_47 : f32 to vector<8x128xf32>
    %167 = arith.cmpf oeq, %26, %166 : vector<8x128xf32>
    %cst_48 = arith.constant 0.000000e+00 : f32
    %168 = vector.broadcast %cst_48 : f32 to vector<8x128xf32>
    %169 = arith.select %167, %29, %168 : vector<8x128xi1>, vector<8x128xf32>
    %cst_49 = arith.constant 8.000000e+00 : f32
    %170 = vector.broadcast %cst_49 : f32 to vector<8x128xf32>
    %171 = arith.cmpf oeq, %26, %170 : vector<8x128xf32>
    %cst_50 = arith.constant 0.000000e+00 : f32
    %172 = vector.broadcast %cst_50 : f32 to vector<8x128xf32>
    %173 = arith.select %171, %27, %172 : vector<8x128xi1>, vector<8x128xf32>
    %174 = arith.addf %169, %173 : vector<8x128xf32>
    %175 = vector.extract_strided_slice %12 {offsets = [0, 0, 9], sizes = [12, 8, 1], strides = [1, 1, 1]} : vector<12x8x36xf32> to vector<12x8x1xf32>
    %176 = vector.shape_cast %174 : vector<8x128xf32> to vector<1x8x128xf32>
    %177 = vector.broadcast %175 : vector<12x8x1xf32> to vector<12x8x128xf32>
    %178 = vector.broadcast %176 : vector<1x8x128xf32> to vector<12x8x128xf32>
    %179 = arith.mulf %177, %178 : vector<12x8x128xf32>
    %180 = arith.addf %165, %179 : vector<12x8x128xf32>
    %cst_51 = arith.constant 1.000000e+01 : f32
    %181 = vector.broadcast %cst_51 : f32 to vector<8x128xf32>
    %182 = arith.cmpf oeq, %26, %181 : vector<8x128xf32>
    %cst_52 = arith.constant 0.000000e+00 : f32
    %183 = vector.broadcast %cst_52 : f32 to vector<8x128xf32>
    %184 = arith.select %182, %29, %183 : vector<8x128xi1>, vector<8x128xf32>
    %cst_53 = arith.constant 9.000000e+00 : f32
    %185 = vector.broadcast %cst_53 : f32 to vector<8x128xf32>
    %186 = arith.cmpf oeq, %26, %185 : vector<8x128xf32>
    %cst_54 = arith.constant 0.000000e+00 : f32
    %187 = vector.broadcast %cst_54 : f32 to vector<8x128xf32>
    %188 = arith.select %186, %27, %187 : vector<8x128xi1>, vector<8x128xf32>
    %189 = arith.addf %184, %188 : vector<8x128xf32>
    %190 = vector.extract_strided_slice %12 {offsets = [0, 0, 10], sizes = [12, 8, 1], strides = [1, 1, 1]} : vector<12x8x36xf32> to vector<12x8x1xf32>
    %191 = vector.shape_cast %189 : vector<8x128xf32> to vector<1x8x128xf32>
    %192 = vector.broadcast %190 : vector<12x8x1xf32> to vector<12x8x128xf32>
    %193 = vector.broadcast %191 : vector<1x8x128xf32> to vector<12x8x128xf32>
    %194 = arith.mulf %192, %193 : vector<12x8x128xf32>
    %195 = arith.addf %180, %194 : vector<12x8x128xf32>
    %cst_55 = arith.constant 1.100000e+01 : f32
    %196 = vector.broadcast %cst_55 : f32 to vector<8x128xf32>
    %197 = arith.cmpf oeq, %26, %196 : vector<8x128xf32>
    %cst_56 = arith.constant 0.000000e+00 : f32
    %198 = vector.broadcast %cst_56 : f32 to vector<8x128xf32>
    %199 = arith.select %197, %29, %198 : vector<8x128xi1>, vector<8x128xf32>
    %cst_57 = arith.constant 1.000000e+01 : f32
    %200 = vector.broadcast %cst_57 : f32 to vector<8x128xf32>
    %201 = arith.cmpf oeq, %26, %200 : vector<8x128xf32>
    %cst_58 = arith.constant 0.000000e+00 : f32
    %202 = vector.broadcast %cst_58 : f32 to vector<8x128xf32>
    %203 = arith.select %201, %27, %202 : vector<8x128xi1>, vector<8x128xf32>
    %204 = arith.addf %199, %203 : vector<8x128xf32>
    %205 = vector.extract_strided_slice %12 {offsets = [0, 0, 11], sizes = [12, 8, 1], strides = [1, 1, 1]} : vector<12x8x36xf32> to vector<12x8x1xf32>
    %206 = vector.shape_cast %204 : vector<8x128xf32> to vector<1x8x128xf32>
    %207 = vector.broadcast %205 : vector<12x8x1xf32> to vector<12x8x128xf32>
    %208 = vector.broadcast %206 : vector<1x8x128xf32> to vector<12x8x128xf32>
    %209 = arith.mulf %207, %208 : vector<12x8x128xf32>
    %210 = arith.addf %195, %209 : vector<12x8x128xf32>
    %cst_59 = arith.constant 1.200000e+01 : f32
    %211 = vector.broadcast %cst_59 : f32 to vector<8x128xf32>
    %212 = arith.cmpf oeq, %26, %211 : vector<8x128xf32>
    %cst_60 = arith.constant 0.000000e+00 : f32
    %213 = vector.broadcast %cst_60 : f32 to vector<8x128xf32>
    %214 = arith.select %212, %29, %213 : vector<8x128xi1>, vector<8x128xf32>
    %cst_61 = arith.constant 1.100000e+01 : f32
    %215 = vector.broadcast %cst_61 : f32 to vector<8x128xf32>
    %216 = arith.cmpf oeq, %26, %215 : vector<8x128xf32>
    %cst_62 = arith.constant 0.000000e+00 : f32
    %217 = vector.broadcast %cst_62 : f32 to vector<8x128xf32>
    %218 = arith.select %216, %27, %217 : vector<8x128xi1>, vector<8x128xf32>
    %219 = arith.addf %214, %218 : vector<8x128xf32>
    %220 = vector.extract_strided_slice %12 {offsets = [0, 0, 12], sizes = [12, 8, 1], strides = [1, 1, 1]} : vector<12x8x36xf32> to vector<12x8x1xf32>
    %221 = vector.shape_cast %219 : vector<8x128xf32> to vector<1x8x128xf32>
    %222 = vector.broadcast %220 : vector<12x8x1xf32> to vector<12x8x128xf32>
    %223 = vector.broadcast %221 : vector<1x8x128xf32> to vector<12x8x128xf32>
    %224 = arith.mulf %222, %223 : vector<12x8x128xf32>
    %225 = arith.addf %210, %224 : vector<12x8x128xf32>
    %cst_63 = arith.constant 1.300000e+01 : f32
    %226 = vector.broadcast %cst_63 : f32 to vector<8x128xf32>
    %227 = arith.cmpf oeq, %26, %226 : vector<8x128xf32>
    %cst_64 = arith.constant 0.000000e+00 : f32
    %228 = vector.broadcast %cst_64 : f32 to vector<8x128xf32>
    %229 = arith.select %227, %29, %228 : vector<8x128xi1>, vector<8x128xf32>
    %cst_65 = arith.constant 1.200000e+01 : f32
    %230 = vector.broadcast %cst_65 : f32 to vector<8x128xf32>
    %231 = arith.cmpf oeq, %26, %230 : vector<8x128xf32>
    %cst_66 = arith.constant 0.000000e+00 : f32
    %232 = vector.broadcast %cst_66 : f32 to vector<8x128xf32>
    %233 = arith.select %231, %27, %232 : vector<8x128xi1>, vector<8x128xf32>
    %234 = arith.addf %229, %233 : vector<8x128xf32>
    %235 = vector.extract_strided_slice %12 {offsets = [0, 0, 13], sizes = [12, 8, 1], strides = [1, 1, 1]} : vector<12x8x36xf32> to vector<12x8x1xf32>
    %236 = vector.shape_cast %234 : vector<8x128xf32> to vector<1x8x128xf32>
    %237 = vector.broadcast %235 : vector<12x8x1xf32> to vector<12x8x128xf32>
    %238 = vector.broadcast %236 : vector<1x8x128xf32> to vector<12x8x128xf32>
    %239 = arith.mulf %237, %238 : vector<12x8x128xf32>
    %240 = arith.addf %225, %239 : vector<12x8x128xf32>
    %cst_67 = arith.constant 1.400000e+01 : f32
    %241 = vector.broadcast %cst_67 : f32 to vector<8x128xf32>
    %242 = arith.cmpf oeq, %26, %241 : vector<8x128xf32>
    %cst_68 = arith.constant 0.000000e+00 : f32
    %243 = vector.broadcast %cst_68 : f32 to vector<8x128xf32>
    %244 = arith.select %242, %29, %243 : vector<8x128xi1>, vector<8x128xf32>
    %cst_69 = arith.constant 1.300000e+01 : f32
    %245 = vector.broadcast %cst_69 : f32 to vector<8x128xf32>
    %246 = arith.cmpf oeq, %26, %245 : vector<8x128xf32>
    %cst_70 = arith.constant 0.000000e+00 : f32
    %247 = vector.broadcast %cst_70 : f32 to vector<8x128xf32>
    %248 = arith.select %246, %27, %247 : vector<8x128xi1>, vector<8x128xf32>
    %249 = arith.addf %244, %248 : vector<8x128xf32>
    %250 = vector.extract_strided_slice %12 {offsets = [0, 0, 14], sizes = [12, 8, 1], strides = [1, 1, 1]} : vector<12x8x36xf32> to vector<12x8x1xf32>
    %251 = vector.shape_cast %249 : vector<8x128xf32> to vector<1x8x128xf32>
    %252 = vector.broadcast %250 : vector<12x8x1xf32> to vector<12x8x128xf32>
    %253 = vector.broadcast %251 : vector<1x8x128xf32> to vector<12x8x128xf32>
    %254 = arith.mulf %252, %253 : vector<12x8x128xf32>
    %255 = arith.addf %240, %254 : vector<12x8x128xf32>
    %cst_71 = arith.constant 1.500000e+01 : f32
    %256 = vector.broadcast %cst_71 : f32 to vector<8x128xf32>
    %257 = arith.cmpf oeq, %26, %256 : vector<8x128xf32>
    %cst_72 = arith.constant 0.000000e+00 : f32
    %258 = vector.broadcast %cst_72 : f32 to vector<8x128xf32>
    %259 = arith.select %257, %29, %258 : vector<8x128xi1>, vector<8x128xf32>
    %cst_73 = arith.constant 1.400000e+01 : f32
    %260 = vector.broadcast %cst_73 : f32 to vector<8x128xf32>
    %261 = arith.cmpf oeq, %26, %260 : vector<8x128xf32>
    %cst_74 = arith.constant 0.000000e+00 : f32
    %262 = vector.broadcast %cst_74 : f32 to vector<8x128xf32>
    %263 = arith.select %261, %27, %262 : vector<8x128xi1>, vector<8x128xf32>
    %264 = arith.addf %259, %263 : vector<8x128xf32>
    %265 = vector.extract_strided_slice %12 {offsets = [0, 0, 15], sizes = [12, 8, 1], strides = [1, 1, 1]} : vector<12x8x36xf32> to vector<12x8x1xf32>
    %266 = vector.shape_cast %264 : vector<8x128xf32> to vector<1x8x128xf32>
    %267 = vector.broadcast %265 : vector<12x8x1xf32> to vector<12x8x128xf32>
    %268 = vector.broadcast %266 : vector<1x8x128xf32> to vector<12x8x128xf32>
    %269 = arith.mulf %267, %268 : vector<12x8x128xf32>
    %270 = arith.addf %255, %269 : vector<12x8x128xf32>
    %cst_75 = arith.constant 1.600000e+01 : f32
    %271 = vector.broadcast %cst_75 : f32 to vector<8x128xf32>
    %272 = arith.cmpf oeq, %26, %271 : vector<8x128xf32>
    %cst_76 = arith.constant 0.000000e+00 : f32
    %273 = vector.broadcast %cst_76 : f32 to vector<8x128xf32>
    %274 = arith.select %272, %29, %273 : vector<8x128xi1>, vector<8x128xf32>
    %cst_77 = arith.constant 1.500000e+01 : f32
    %275 = vector.broadcast %cst_77 : f32 to vector<8x128xf32>
    %276 = arith.cmpf oeq, %26, %275 : vector<8x128xf32>
    %cst_78 = arith.constant 0.000000e+00 : f32
    %277 = vector.broadcast %cst_78 : f32 to vector<8x128xf32>
    %278 = arith.select %276, %27, %277 : vector<8x128xi1>, vector<8x128xf32>
    %279 = arith.addf %274, %278 : vector<8x128xf32>
    %280 = vector.extract_strided_slice %12 {offsets = [0, 0, 16], sizes = [12, 8, 1], strides = [1, 1, 1]} : vector<12x8x36xf32> to vector<12x8x1xf32>
    %281 = vector.shape_cast %279 : vector<8x128xf32> to vector<1x8x128xf32>
    %282 = vector.broadcast %280 : vector<12x8x1xf32> to vector<12x8x128xf32>
    %283 = vector.broadcast %281 : vector<1x8x128xf32> to vector<12x8x128xf32>
    %284 = arith.mulf %282, %283 : vector<12x8x128xf32>
    %285 = arith.addf %270, %284 : vector<12x8x128xf32>
    %cst_79 = arith.constant 1.700000e+01 : f32
    %286 = vector.broadcast %cst_79 : f32 to vector<8x128xf32>
    %287 = arith.cmpf oeq, %26, %286 : vector<8x128xf32>
    %cst_80 = arith.constant 0.000000e+00 : f32
    %288 = vector.broadcast %cst_80 : f32 to vector<8x128xf32>
    %289 = arith.select %287, %29, %288 : vector<8x128xi1>, vector<8x128xf32>
    %cst_81 = arith.constant 1.600000e+01 : f32
    %290 = vector.broadcast %cst_81 : f32 to vector<8x128xf32>
    %291 = arith.cmpf oeq, %26, %290 : vector<8x128xf32>
    %cst_82 = arith.constant 0.000000e+00 : f32
    %292 = vector.broadcast %cst_82 : f32 to vector<8x128xf32>
    %293 = arith.select %291, %27, %292 : vector<8x128xi1>, vector<8x128xf32>
    %294 = arith.addf %289, %293 : vector<8x128xf32>
    %295 = vector.extract_strided_slice %12 {offsets = [0, 0, 17], sizes = [12, 8, 1], strides = [1, 1, 1]} : vector<12x8x36xf32> to vector<12x8x1xf32>
    %296 = vector.shape_cast %294 : vector<8x128xf32> to vector<1x8x128xf32>
    %297 = vector.broadcast %295 : vector<12x8x1xf32> to vector<12x8x128xf32>
    %298 = vector.broadcast %296 : vector<1x8x128xf32> to vector<12x8x128xf32>
    %299 = arith.mulf %297, %298 : vector<12x8x128xf32>
    %300 = arith.addf %285, %299 : vector<12x8x128xf32>
    %cst_83 = arith.constant 1.800000e+01 : f32
    %301 = vector.broadcast %cst_83 : f32 to vector<8x128xf32>
    %302 = arith.cmpf oeq, %26, %301 : vector<8x128xf32>
    %cst_84 = arith.constant 0.000000e+00 : f32
    %303 = vector.broadcast %cst_84 : f32 to vector<8x128xf32>
    %304 = arith.select %302, %29, %303 : vector<8x128xi1>, vector<8x128xf32>
    %cst_85 = arith.constant 1.700000e+01 : f32
    %305 = vector.broadcast %cst_85 : f32 to vector<8x128xf32>
    %306 = arith.cmpf oeq, %26, %305 : vector<8x128xf32>
    %cst_86 = arith.constant 0.000000e+00 : f32
    %307 = vector.broadcast %cst_86 : f32 to vector<8x128xf32>
    %308 = arith.select %306, %27, %307 : vector<8x128xi1>, vector<8x128xf32>
    %309 = arith.addf %304, %308 : vector<8x128xf32>
    %310 = vector.extract_strided_slice %12 {offsets = [0, 0, 18], sizes = [12, 8, 1], strides = [1, 1, 1]} : vector<12x8x36xf32> to vector<12x8x1xf32>
    %311 = vector.shape_cast %309 : vector<8x128xf32> to vector<1x8x128xf32>
    %312 = vector.broadcast %310 : vector<12x8x1xf32> to vector<12x8x128xf32>
    %313 = vector.broadcast %311 : vector<1x8x128xf32> to vector<12x8x128xf32>
    %314 = arith.mulf %312, %313 : vector<12x8x128xf32>
    %315 = arith.addf %300, %314 : vector<12x8x128xf32>
    %cst_87 = arith.constant 1.900000e+01 : f32
    %316 = vector.broadcast %cst_87 : f32 to vector<8x128xf32>
    %317 = arith.cmpf oeq, %26, %316 : vector<8x128xf32>
    %cst_88 = arith.constant 0.000000e+00 : f32
    %318 = vector.broadcast %cst_88 : f32 to vector<8x128xf32>
    %319 = arith.select %317, %29, %318 : vector<8x128xi1>, vector<8x128xf32>
    %cst_89 = arith.constant 1.800000e+01 : f32
    %320 = vector.broadcast %cst_89 : f32 to vector<8x128xf32>
    %321 = arith.cmpf oeq, %26, %320 : vector<8x128xf32>
    %cst_90 = arith.constant 0.000000e+00 : f32
    %322 = vector.broadcast %cst_90 : f32 to vector<8x128xf32>
    %323 = arith.select %321, %27, %322 : vector<8x128xi1>, vector<8x128xf32>
    %324 = arith.addf %319, %323 : vector<8x128xf32>
    %325 = vector.extract_strided_slice %12 {offsets = [0, 0, 19], sizes = [12, 8, 1], strides = [1, 1, 1]} : vector<12x8x36xf32> to vector<12x8x1xf32>
    %326 = vector.shape_cast %324 : vector<8x128xf32> to vector<1x8x128xf32>
    %327 = vector.broadcast %325 : vector<12x8x1xf32> to vector<12x8x128xf32>
    %328 = vector.broadcast %326 : vector<1x8x128xf32> to vector<12x8x128xf32>
    %329 = arith.mulf %327, %328 : vector<12x8x128xf32>
    %330 = arith.addf %315, %329 : vector<12x8x128xf32>
    %cst_91 = arith.constant 2.000000e+01 : f32
    %331 = vector.broadcast %cst_91 : f32 to vector<8x128xf32>
    %332 = arith.cmpf oeq, %26, %331 : vector<8x128xf32>
    %cst_92 = arith.constant 0.000000e+00 : f32
    %333 = vector.broadcast %cst_92 : f32 to vector<8x128xf32>
    %334 = arith.select %332, %29, %333 : vector<8x128xi1>, vector<8x128xf32>
    %cst_93 = arith.constant 1.900000e+01 : f32
    %335 = vector.broadcast %cst_93 : f32 to vector<8x128xf32>
    %336 = arith.cmpf oeq, %26, %335 : vector<8x128xf32>
    %cst_94 = arith.constant 0.000000e+00 : f32
    %337 = vector.broadcast %cst_94 : f32 to vector<8x128xf32>
    %338 = arith.select %336, %27, %337 : vector<8x128xi1>, vector<8x128xf32>
    %339 = arith.addf %334, %338 : vector<8x128xf32>
    %340 = vector.extract_strided_slice %12 {offsets = [0, 0, 20], sizes = [12, 8, 1], strides = [1, 1, 1]} : vector<12x8x36xf32> to vector<12x8x1xf32>
    %341 = vector.shape_cast %339 : vector<8x128xf32> to vector<1x8x128xf32>
    %342 = vector.broadcast %340 : vector<12x8x1xf32> to vector<12x8x128xf32>
    %343 = vector.broadcast %341 : vector<1x8x128xf32> to vector<12x8x128xf32>
    %344 = arith.mulf %342, %343 : vector<12x8x128xf32>
    %345 = arith.addf %330, %344 : vector<12x8x128xf32>
    %cst_95 = arith.constant 2.100000e+01 : f32
    %346 = vector.broadcast %cst_95 : f32 to vector<8x128xf32>
    %347 = arith.cmpf oeq, %26, %346 : vector<8x128xf32>
    %cst_96 = arith.constant 0.000000e+00 : f32
    %348 = vector.broadcast %cst_96 : f32 to vector<8x128xf32>
    %349 = arith.select %347, %29, %348 : vector<8x128xi1>, vector<8x128xf32>
    %cst_97 = arith.constant 2.000000e+01 : f32
    %350 = vector.broadcast %cst_97 : f32 to vector<8x128xf32>
    %351 = arith.cmpf oeq, %26, %350 : vector<8x128xf32>
    %cst_98 = arith.constant 0.000000e+00 : f32
    %352 = vector.broadcast %cst_98 : f32 to vector<8x128xf32>
    %353 = arith.select %351, %27, %352 : vector<8x128xi1>, vector<8x128xf32>
    %354 = arith.addf %349, %353 : vector<8x128xf32>
    %355 = vector.extract_strided_slice %12 {offsets = [0, 0, 21], sizes = [12, 8, 1], strides = [1, 1, 1]} : vector<12x8x36xf32> to vector<12x8x1xf32>
    %356 = vector.shape_cast %354 : vector<8x128xf32> to vector<1x8x128xf32>
    %357 = vector.broadcast %355 : vector<12x8x1xf32> to vector<12x8x128xf32>
    %358 = vector.broadcast %356 : vector<1x8x128xf32> to vector<12x8x128xf32>
    %359 = arith.mulf %357, %358 : vector<12x8x128xf32>
    %360 = arith.addf %345, %359 : vector<12x8x128xf32>
    %cst_99 = arith.constant 2.200000e+01 : f32
    %361 = vector.broadcast %cst_99 : f32 to vector<8x128xf32>
    %362 = arith.cmpf oeq, %26, %361 : vector<8x128xf32>
    %cst_100 = arith.constant 0.000000e+00 : f32
    %363 = vector.broadcast %cst_100 : f32 to vector<8x128xf32>
    %364 = arith.select %362, %29, %363 : vector<8x128xi1>, vector<8x128xf32>
    %cst_101 = arith.constant 2.100000e+01 : f32
    %365 = vector.broadcast %cst_101 : f32 to vector<8x128xf32>
    %366 = arith.cmpf oeq, %26, %365 : vector<8x128xf32>
    %cst_102 = arith.constant 0.000000e+00 : f32
    %367 = vector.broadcast %cst_102 : f32 to vector<8x128xf32>
    %368 = arith.select %366, %27, %367 : vector<8x128xi1>, vector<8x128xf32>
    %369 = arith.addf %364, %368 : vector<8x128xf32>
    %370 = vector.extract_strided_slice %12 {offsets = [0, 0, 22], sizes = [12, 8, 1], strides = [1, 1, 1]} : vector<12x8x36xf32> to vector<12x8x1xf32>
    %371 = vector.shape_cast %369 : vector<8x128xf32> to vector<1x8x128xf32>
    %372 = vector.broadcast %370 : vector<12x8x1xf32> to vector<12x8x128xf32>
    %373 = vector.broadcast %371 : vector<1x8x128xf32> to vector<12x8x128xf32>
    %374 = arith.mulf %372, %373 : vector<12x8x128xf32>
    %375 = arith.addf %360, %374 : vector<12x8x128xf32>
    %cst_103 = arith.constant 2.300000e+01 : f32
    %376 = vector.broadcast %cst_103 : f32 to vector<8x128xf32>
    %377 = arith.cmpf oeq, %26, %376 : vector<8x128xf32>
    %cst_104 = arith.constant 0.000000e+00 : f32
    %378 = vector.broadcast %cst_104 : f32 to vector<8x128xf32>
    %379 = arith.select %377, %29, %378 : vector<8x128xi1>, vector<8x128xf32>
    %cst_105 = arith.constant 2.200000e+01 : f32
    %380 = vector.broadcast %cst_105 : f32 to vector<8x128xf32>
    %381 = arith.cmpf oeq, %26, %380 : vector<8x128xf32>
    %cst_106 = arith.constant 0.000000e+00 : f32
    %382 = vector.broadcast %cst_106 : f32 to vector<8x128xf32>
    %383 = arith.select %381, %27, %382 : vector<8x128xi1>, vector<8x128xf32>
    %384 = arith.addf %379, %383 : vector<8x128xf32>
    %385 = vector.extract_strided_slice %12 {offsets = [0, 0, 23], sizes = [12, 8, 1], strides = [1, 1, 1]} : vector<12x8x36xf32> to vector<12x8x1xf32>
    %386 = vector.shape_cast %384 : vector<8x128xf32> to vector<1x8x128xf32>
    %387 = vector.broadcast %385 : vector<12x8x1xf32> to vector<12x8x128xf32>
    %388 = vector.broadcast %386 : vector<1x8x128xf32> to vector<12x8x128xf32>
    %389 = arith.mulf %387, %388 : vector<12x8x128xf32>
    %390 = arith.addf %375, %389 : vector<12x8x128xf32>
    %cst_107 = arith.constant 2.400000e+01 : f32
    %391 = vector.broadcast %cst_107 : f32 to vector<8x128xf32>
    %392 = arith.cmpf oeq, %26, %391 : vector<8x128xf32>
    %cst_108 = arith.constant 0.000000e+00 : f32
    %393 = vector.broadcast %cst_108 : f32 to vector<8x128xf32>
    %394 = arith.select %392, %29, %393 : vector<8x128xi1>, vector<8x128xf32>
    %cst_109 = arith.constant 2.300000e+01 : f32
    %395 = vector.broadcast %cst_109 : f32 to vector<8x128xf32>
    %396 = arith.cmpf oeq, %26, %395 : vector<8x128xf32>
    %cst_110 = arith.constant 0.000000e+00 : f32
    %397 = vector.broadcast %cst_110 : f32 to vector<8x128xf32>
    %398 = arith.select %396, %27, %397 : vector<8x128xi1>, vector<8x128xf32>
    %399 = arith.addf %394, %398 : vector<8x128xf32>
    %400 = vector.extract_strided_slice %12 {offsets = [0, 0, 24], sizes = [12, 8, 1], strides = [1, 1, 1]} : vector<12x8x36xf32> to vector<12x8x1xf32>
    %401 = vector.shape_cast %399 : vector<8x128xf32> to vector<1x8x128xf32>
    %402 = vector.broadcast %400 : vector<12x8x1xf32> to vector<12x8x128xf32>
    %403 = vector.broadcast %401 : vector<1x8x128xf32> to vector<12x8x128xf32>
    %404 = arith.mulf %402, %403 : vector<12x8x128xf32>
    %405 = arith.addf %390, %404 : vector<12x8x128xf32>
    %cst_111 = arith.constant 2.500000e+01 : f32
    %406 = vector.broadcast %cst_111 : f32 to vector<8x128xf32>
    %407 = arith.cmpf oeq, %26, %406 : vector<8x128xf32>
    %cst_112 = arith.constant 0.000000e+00 : f32
    %408 = vector.broadcast %cst_112 : f32 to vector<8x128xf32>
    %409 = arith.select %407, %29, %408 : vector<8x128xi1>, vector<8x128xf32>
    %cst_113 = arith.constant 2.400000e+01 : f32
    %410 = vector.broadcast %cst_113 : f32 to vector<8x128xf32>
    %411 = arith.cmpf oeq, %26, %410 : vector<8x128xf32>
    %cst_114 = arith.constant 0.000000e+00 : f32
    %412 = vector.broadcast %cst_114 : f32 to vector<8x128xf32>
    %413 = arith.select %411, %27, %412 : vector<8x128xi1>, vector<8x128xf32>
    %414 = arith.addf %409, %413 : vector<8x128xf32>
    %415 = vector.extract_strided_slice %12 {offsets = [0, 0, 25], sizes = [12, 8, 1], strides = [1, 1, 1]} : vector<12x8x36xf32> to vector<12x8x1xf32>
    %416 = vector.shape_cast %414 : vector<8x128xf32> to vector<1x8x128xf32>
    %417 = vector.broadcast %415 : vector<12x8x1xf32> to vector<12x8x128xf32>
    %418 = vector.broadcast %416 : vector<1x8x128xf32> to vector<12x8x128xf32>
    %419 = arith.mulf %417, %418 : vector<12x8x128xf32>
    %420 = arith.addf %405, %419 : vector<12x8x128xf32>
    %cst_115 = arith.constant 2.600000e+01 : f32
    %421 = vector.broadcast %cst_115 : f32 to vector<8x128xf32>
    %422 = arith.cmpf oeq, %26, %421 : vector<8x128xf32>
    %cst_116 = arith.constant 0.000000e+00 : f32
    %423 = vector.broadcast %cst_116 : f32 to vector<8x128xf32>
    %424 = arith.select %422, %29, %423 : vector<8x128xi1>, vector<8x128xf32>
    %cst_117 = arith.constant 2.500000e+01 : f32
    %425 = vector.broadcast %cst_117 : f32 to vector<8x128xf32>
    %426 = arith.cmpf oeq, %26, %425 : vector<8x128xf32>
    %cst_118 = arith.constant 0.000000e+00 : f32
    %427 = vector.broadcast %cst_118 : f32 to vector<8x128xf32>
    %428 = arith.select %426, %27, %427 : vector<8x128xi1>, vector<8x128xf32>
    %429 = arith.addf %424, %428 : vector<8x128xf32>
    %430 = vector.extract_strided_slice %12 {offsets = [0, 0, 26], sizes = [12, 8, 1], strides = [1, 1, 1]} : vector<12x8x36xf32> to vector<12x8x1xf32>
    %431 = vector.shape_cast %429 : vector<8x128xf32> to vector<1x8x128xf32>
    %432 = vector.broadcast %430 : vector<12x8x1xf32> to vector<12x8x128xf32>
    %433 = vector.broadcast %431 : vector<1x8x128xf32> to vector<12x8x128xf32>
    %434 = arith.mulf %432, %433 : vector<12x8x128xf32>
    %435 = arith.addf %420, %434 : vector<12x8x128xf32>
    %cst_119 = arith.constant 2.700000e+01 : f32
    %436 = vector.broadcast %cst_119 : f32 to vector<8x128xf32>
    %437 = arith.cmpf oeq, %26, %436 : vector<8x128xf32>
    %cst_120 = arith.constant 0.000000e+00 : f32
    %438 = vector.broadcast %cst_120 : f32 to vector<8x128xf32>
    %439 = arith.select %437, %29, %438 : vector<8x128xi1>, vector<8x128xf32>
    %cst_121 = arith.constant 2.600000e+01 : f32
    %440 = vector.broadcast %cst_121 : f32 to vector<8x128xf32>
    %441 = arith.cmpf oeq, %26, %440 : vector<8x128xf32>
    %cst_122 = arith.constant 0.000000e+00 : f32
    %442 = vector.broadcast %cst_122 : f32 to vector<8x128xf32>
    %443 = arith.select %441, %27, %442 : vector<8x128xi1>, vector<8x128xf32>
    %444 = arith.addf %439, %443 : vector<8x128xf32>
    %445 = vector.extract_strided_slice %12 {offsets = [0, 0, 27], sizes = [12, 8, 1], strides = [1, 1, 1]} : vector<12x8x36xf32> to vector<12x8x1xf32>
    %446 = vector.shape_cast %444 : vector<8x128xf32> to vector<1x8x128xf32>
    %447 = vector.broadcast %445 : vector<12x8x1xf32> to vector<12x8x128xf32>
    %448 = vector.broadcast %446 : vector<1x8x128xf32> to vector<12x8x128xf32>
    %449 = arith.mulf %447, %448 : vector<12x8x128xf32>
    %450 = arith.addf %435, %449 : vector<12x8x128xf32>
    %cst_123 = arith.constant 2.800000e+01 : f32
    %451 = vector.broadcast %cst_123 : f32 to vector<8x128xf32>
    %452 = arith.cmpf oeq, %26, %451 : vector<8x128xf32>
    %cst_124 = arith.constant 0.000000e+00 : f32
    %453 = vector.broadcast %cst_124 : f32 to vector<8x128xf32>
    %454 = arith.select %452, %29, %453 : vector<8x128xi1>, vector<8x128xf32>
    %cst_125 = arith.constant 2.700000e+01 : f32
    %455 = vector.broadcast %cst_125 : f32 to vector<8x128xf32>
    %456 = arith.cmpf oeq, %26, %455 : vector<8x128xf32>
    %cst_126 = arith.constant 0.000000e+00 : f32
    %457 = vector.broadcast %cst_126 : f32 to vector<8x128xf32>
    %458 = arith.select %456, %27, %457 : vector<8x128xi1>, vector<8x128xf32>
    %459 = arith.addf %454, %458 : vector<8x128xf32>
    %460 = vector.extract_strided_slice %12 {offsets = [0, 0, 28], sizes = [12, 8, 1], strides = [1, 1, 1]} : vector<12x8x36xf32> to vector<12x8x1xf32>
    %461 = vector.shape_cast %459 : vector<8x128xf32> to vector<1x8x128xf32>
    %462 = vector.broadcast %460 : vector<12x8x1xf32> to vector<12x8x128xf32>
    %463 = vector.broadcast %461 : vector<1x8x128xf32> to vector<12x8x128xf32>
    %464 = arith.mulf %462, %463 : vector<12x8x128xf32>
    %465 = arith.addf %450, %464 : vector<12x8x128xf32>
    %cst_127 = arith.constant 2.900000e+01 : f32
    %466 = vector.broadcast %cst_127 : f32 to vector<8x128xf32>
    %467 = arith.cmpf oeq, %26, %466 : vector<8x128xf32>
    %cst_128 = arith.constant 0.000000e+00 : f32
    %468 = vector.broadcast %cst_128 : f32 to vector<8x128xf32>
    %469 = arith.select %467, %29, %468 : vector<8x128xi1>, vector<8x128xf32>
    %cst_129 = arith.constant 2.800000e+01 : f32
    %470 = vector.broadcast %cst_129 : f32 to vector<8x128xf32>
    %471 = arith.cmpf oeq, %26, %470 : vector<8x128xf32>
    %cst_130 = arith.constant 0.000000e+00 : f32
    %472 = vector.broadcast %cst_130 : f32 to vector<8x128xf32>
    %473 = arith.select %471, %27, %472 : vector<8x128xi1>, vector<8x128xf32>
    %474 = arith.addf %469, %473 : vector<8x128xf32>
    %475 = vector.extract_strided_slice %12 {offsets = [0, 0, 29], sizes = [12, 8, 1], strides = [1, 1, 1]} : vector<12x8x36xf32> to vector<12x8x1xf32>
    %476 = vector.shape_cast %474 : vector<8x128xf32> to vector<1x8x128xf32>
    %477 = vector.broadcast %475 : vector<12x8x1xf32> to vector<12x8x128xf32>
    %478 = vector.broadcast %476 : vector<1x8x128xf32> to vector<12x8x128xf32>
    %479 = arith.mulf %477, %478 : vector<12x8x128xf32>
    %480 = arith.addf %465, %479 : vector<12x8x128xf32>
    %cst_131 = arith.constant 3.000000e+01 : f32
    %481 = vector.broadcast %cst_131 : f32 to vector<8x128xf32>
    %482 = arith.cmpf oeq, %26, %481 : vector<8x128xf32>
    %cst_132 = arith.constant 0.000000e+00 : f32
    %483 = vector.broadcast %cst_132 : f32 to vector<8x128xf32>
    %484 = arith.select %482, %29, %483 : vector<8x128xi1>, vector<8x128xf32>
    %cst_133 = arith.constant 2.900000e+01 : f32
    %485 = vector.broadcast %cst_133 : f32 to vector<8x128xf32>
    %486 = arith.cmpf oeq, %26, %485 : vector<8x128xf32>
    %cst_134 = arith.constant 0.000000e+00 : f32
    %487 = vector.broadcast %cst_134 : f32 to vector<8x128xf32>
    %488 = arith.select %486, %27, %487 : vector<8x128xi1>, vector<8x128xf32>
    %489 = arith.addf %484, %488 : vector<8x128xf32>
    %490 = vector.extract_strided_slice %12 {offsets = [0, 0, 30], sizes = [12, 8, 1], strides = [1, 1, 1]} : vector<12x8x36xf32> to vector<12x8x1xf32>
    %491 = vector.shape_cast %489 : vector<8x128xf32> to vector<1x8x128xf32>
    %492 = vector.broadcast %490 : vector<12x8x1xf32> to vector<12x8x128xf32>
    %493 = vector.broadcast %491 : vector<1x8x128xf32> to vector<12x8x128xf32>
    %494 = arith.mulf %492, %493 : vector<12x8x128xf32>
    %495 = arith.addf %480, %494 : vector<12x8x128xf32>
    %cst_135 = arith.constant 3.100000e+01 : f32
    %496 = vector.broadcast %cst_135 : f32 to vector<8x128xf32>
    %497 = arith.cmpf oeq, %26, %496 : vector<8x128xf32>
    %cst_136 = arith.constant 0.000000e+00 : f32
    %498 = vector.broadcast %cst_136 : f32 to vector<8x128xf32>
    %499 = arith.select %497, %29, %498 : vector<8x128xi1>, vector<8x128xf32>
    %cst_137 = arith.constant 3.000000e+01 : f32
    %500 = vector.broadcast %cst_137 : f32 to vector<8x128xf32>
    %501 = arith.cmpf oeq, %26, %500 : vector<8x128xf32>
    %cst_138 = arith.constant 0.000000e+00 : f32
    %502 = vector.broadcast %cst_138 : f32 to vector<8x128xf32>
    %503 = arith.select %501, %27, %502 : vector<8x128xi1>, vector<8x128xf32>
    %504 = arith.addf %499, %503 : vector<8x128xf32>
    %505 = vector.extract_strided_slice %12 {offsets = [0, 0, 31], sizes = [12, 8, 1], strides = [1, 1, 1]} : vector<12x8x36xf32> to vector<12x8x1xf32>
    %506 = vector.shape_cast %504 : vector<8x128xf32> to vector<1x8x128xf32>
    %507 = vector.broadcast %505 : vector<12x8x1xf32> to vector<12x8x128xf32>
    %508 = vector.broadcast %506 : vector<1x8x128xf32> to vector<12x8x128xf32>
    %509 = arith.mulf %507, %508 : vector<12x8x128xf32>
    %510 = arith.addf %495, %509 : vector<12x8x128xf32>
    %cst_139 = arith.constant 3.200000e+01 : f32
    %511 = vector.broadcast %cst_139 : f32 to vector<8x128xf32>
    %512 = arith.cmpf oeq, %26, %511 : vector<8x128xf32>
    %cst_140 = arith.constant 0.000000e+00 : f32
    %513 = vector.broadcast %cst_140 : f32 to vector<8x128xf32>
    %514 = arith.select %512, %29, %513 : vector<8x128xi1>, vector<8x128xf32>
    %cst_141 = arith.constant 3.100000e+01 : f32
    %515 = vector.broadcast %cst_141 : f32 to vector<8x128xf32>
    %516 = arith.cmpf oeq, %26, %515 : vector<8x128xf32>
    %cst_142 = arith.constant 0.000000e+00 : f32
    %517 = vector.broadcast %cst_142 : f32 to vector<8x128xf32>
    %518 = arith.select %516, %27, %517 : vector<8x128xi1>, vector<8x128xf32>
    %519 = arith.addf %514, %518 : vector<8x128xf32>
    %520 = vector.extract_strided_slice %12 {offsets = [0, 0, 32], sizes = [12, 8, 1], strides = [1, 1, 1]} : vector<12x8x36xf32> to vector<12x8x1xf32>
    %521 = vector.shape_cast %519 : vector<8x128xf32> to vector<1x8x128xf32>
    %522 = vector.broadcast %520 : vector<12x8x1xf32> to vector<12x8x128xf32>
    %523 = vector.broadcast %521 : vector<1x8x128xf32> to vector<12x8x128xf32>
    %524 = arith.mulf %522, %523 : vector<12x8x128xf32>
    %525 = arith.addf %510, %524 : vector<12x8x128xf32>
    %cst_143 = arith.constant 3.300000e+01 : f32
    %526 = vector.broadcast %cst_143 : f32 to vector<8x128xf32>
    %527 = arith.cmpf oeq, %26, %526 : vector<8x128xf32>
    %cst_144 = arith.constant 0.000000e+00 : f32
    %528 = vector.broadcast %cst_144 : f32 to vector<8x128xf32>
    %529 = arith.select %527, %29, %528 : vector<8x128xi1>, vector<8x128xf32>
    %cst_145 = arith.constant 3.200000e+01 : f32
    %530 = vector.broadcast %cst_145 : f32 to vector<8x128xf32>
    %531 = arith.cmpf oeq, %26, %530 : vector<8x128xf32>
    %cst_146 = arith.constant 0.000000e+00 : f32
    %532 = vector.broadcast %cst_146 : f32 to vector<8x128xf32>
    %533 = arith.select %531, %27, %532 : vector<8x128xi1>, vector<8x128xf32>
    %534 = arith.addf %529, %533 : vector<8x128xf32>
    %535 = vector.extract_strided_slice %12 {offsets = [0, 0, 33], sizes = [12, 8, 1], strides = [1, 1, 1]} : vector<12x8x36xf32> to vector<12x8x1xf32>
    %536 = vector.shape_cast %534 : vector<8x128xf32> to vector<1x8x128xf32>
    %537 = vector.broadcast %535 : vector<12x8x1xf32> to vector<12x8x128xf32>
    %538 = vector.broadcast %536 : vector<1x8x128xf32> to vector<12x8x128xf32>
    %539 = arith.mulf %537, %538 : vector<12x8x128xf32>
    %540 = arith.addf %525, %539 : vector<12x8x128xf32>
    %cst_147 = arith.constant 3.400000e+01 : f32
    %541 = vector.broadcast %cst_147 : f32 to vector<8x128xf32>
    %542 = arith.cmpf oeq, %26, %541 : vector<8x128xf32>
    %cst_148 = arith.constant 0.000000e+00 : f32
    %543 = vector.broadcast %cst_148 : f32 to vector<8x128xf32>
    %544 = arith.select %542, %29, %543 : vector<8x128xi1>, vector<8x128xf32>
    %cst_149 = arith.constant 3.300000e+01 : f32
    %545 = vector.broadcast %cst_149 : f32 to vector<8x128xf32>
    %546 = arith.cmpf oeq, %26, %545 : vector<8x128xf32>
    %cst_150 = arith.constant 0.000000e+00 : f32
    %547 = vector.broadcast %cst_150 : f32 to vector<8x128xf32>
    %548 = arith.select %546, %27, %547 : vector<8x128xi1>, vector<8x128xf32>
    %549 = arith.addf %544, %548 : vector<8x128xf32>
    %550 = vector.extract_strided_slice %12 {offsets = [0, 0, 34], sizes = [12, 8, 1], strides = [1, 1, 1]} : vector<12x8x36xf32> to vector<12x8x1xf32>
    %551 = vector.shape_cast %549 : vector<8x128xf32> to vector<1x8x128xf32>
    %552 = vector.broadcast %550 : vector<12x8x1xf32> to vector<12x8x128xf32>
    %553 = vector.broadcast %551 : vector<1x8x128xf32> to vector<12x8x128xf32>
    %554 = arith.mulf %552, %553 : vector<12x8x128xf32>
    %555 = arith.addf %540, %554 : vector<12x8x128xf32>
    %cst_151 = arith.constant 3.500000e+01 : f32
    %556 = vector.broadcast %cst_151 : f32 to vector<8x128xf32>
    %557 = arith.cmpf oeq, %26, %556 : vector<8x128xf32>
    %cst_152 = arith.constant 0.000000e+00 : f32
    %558 = vector.broadcast %cst_152 : f32 to vector<8x128xf32>
    %559 = arith.select %557, %29, %558 : vector<8x128xi1>, vector<8x128xf32>
    %cst_153 = arith.constant 3.400000e+01 : f32
    %560 = vector.broadcast %cst_153 : f32 to vector<8x128xf32>
    %561 = arith.cmpf oeq, %26, %560 : vector<8x128xf32>
    %cst_154 = arith.constant 0.000000e+00 : f32
    %562 = vector.broadcast %cst_154 : f32 to vector<8x128xf32>
    %563 = arith.select %561, %27, %562 : vector<8x128xi1>, vector<8x128xf32>
    %564 = arith.addf %559, %563 : vector<8x128xf32>
    %565 = vector.extract_strided_slice %12 {offsets = [0, 0, 35], sizes = [12, 8, 1], strides = [1, 1, 1]} : vector<12x8x36xf32> to vector<12x8x1xf32>
    %566 = vector.shape_cast %564 : vector<8x128xf32> to vector<1x8x128xf32>
    %567 = vector.broadcast %565 : vector<12x8x1xf32> to vector<12x8x128xf32>
    %568 = vector.broadcast %566 : vector<1x8x128xf32> to vector<12x8x128xf32>
    %569 = arith.mulf %567, %568 : vector<12x8x128xf32>
    %570 = arith.addf %555, %569 : vector<12x8x128xf32>
    %571 = vector.extract_strided_slice %570 {offsets = [0, 0, 0], sizes = [6, 8, 128], strides = [1, 1, 1]} : vector<12x8x128xf32> to vector<6x8x128xf32>
    %572 = vector.extract_strided_slice %570 {offsets = [6, 0, 0], sizes = [6, 8, 128], strides = [1, 1, 1]} : vector<12x8x128xf32> to vector<6x8x128xf32>
    %573 = vector.broadcast %2 : vector<8x1xf32> to vector<8x128xf32>
    %574 = vector.broadcast %8 : vector<1x128xf32> to vector<8x128xf32>
    %575 = arith.mulf %573, %574 : vector<8x128xf32>
    %576 = vector.broadcast %5 : vector<8x1xf32> to vector<8x128xf32>
    %577 = vector.broadcast %9 : vector<1x128xf32> to vector<8x128xf32>
    %578 = arith.mulf %576, %577 : vector<8x128xf32>
    %579 = arith.subf %575, %578 : vector<8x128xf32>
    %580 = vector.broadcast %6 : vector<8x1xf32> to vector<8x128xf32>
    %581 = vector.broadcast %10 : vector<1x128xf32> to vector<8x128xf32>
    %582 = arith.mulf %580, %581 : vector<8x128xf32>
    %583 = arith.subf %579, %582 : vector<8x128xf32>
    %584 = vector.broadcast %3 : vector<8x1xf32> to vector<8x128xf32>
    %585 = arith.subf %583, %584 : vector<8x128xf32>
    %586 = vector.shape_cast %585 : vector<8x128xf32> to vector<1x8x128xf32>
    %587 = vector.broadcast %586 : vector<1x8x128xf32> to vector<6x8x128xf32>
    %588 = arith.subf %587, %572 : vector<6x8x128xf32>
    %589 = math.cos %588 : vector<6x8x128xf32>
    %590 = arith.mulf %571, %589 : vector<6x8x128xf32>
    %591 = vector.shape_cast %4 : vector<8x1xf32> to vector<1x8x1xf32>
    %592 = vector.broadcast %591 : vector<1x8x1xf32> to vector<6x8x128xf32>
    %593 = arith.mulf %590, %592 : vector<6x8x128xf32>
    %cst_155 = arith.constant dense<0.000000e+00> : vector<6x128xf32>
    %594 = vector.multi_reduction <add>, %593, %cst_155 [1] : vector<6x8x128xf32> to vector<6x128xf32>
    %595 = vector.broadcast %2 : vector<8x1xf32> to vector<8x128xf32>
    %596 = vector.broadcast %8 : vector<1x128xf32> to vector<8x128xf32>
    %597 = arith.mulf %595, %596 : vector<8x128xf32>
    %598 = vector.broadcast %3 : vector<8x1xf32> to vector<8x128xf32>
    %599 = arith.subf %597, %598 : vector<8x128xf32>
    %600 = math.cos %599 : vector<8x128xf32>
    %601 = vector.broadcast %4 : vector<8x1xf32> to vector<8x128xf32>
    %602 = arith.mulf %601, %600 : vector<8x128xf32>
    %603 = math.sin %599 : vector<8x128xf32>
    %604 = vector.broadcast %4 : vector<8x1xf32> to vector<8x128xf32>
    %605 = arith.mulf %604, %603 : vector<8x128xf32>
    %cst_156 = arith.constant dense<0.000000e+00> : vector<128xf32>
    %606 = vector.multi_reduction <add>, %602, %cst_156 [0] : vector<8x128xf32> to vector<128xf32>
    %607 = vector.shape_cast %606 : vector<128xf32> to vector<1x128xf32>
    %cst_157 = arith.constant dense<0.000000e+00> : vector<128xf32>
    %608 = vector.multi_reduction <add>, %605, %cst_157 [0] : vector<8x128xf32> to vector<128xf32>
    %609 = vector.shape_cast %608 : vector<128xf32> to vector<1x128xf32>
    %610 = vector.broadcast %607 : vector<1x128xf32> to vector<8x128xf32>
    %611 = arith.mulf %602, %610 : vector<8x128xf32>
    %612 = vector.broadcast %609 : vector<1x128xf32> to vector<8x128xf32>
    %613 = arith.mulf %605, %612 : vector<8x128xf32>
    %614 = arith.addf %611, %613 : vector<8x128xf32>
    %c0_158 = arith.constant 0 : index
    %c0_159 = arith.constant 0 : index
    %c0_160 = arith.constant 0 : index
    %615 = vector.load %arg4[%c0_158, %c0_159, %c0_160] : memref<6x8x128xf32, #tpu.memory_space<vmem>>, vector<6x8x128xf32>
    %616 = vector.shape_cast %614 : vector<8x128xf32> to vector<1x8x128xf32>
    %617 = vector.broadcast %616 : vector<1x8x128xf32> to vector<6x8x128xf32>
    %618 = arith.mulf %615, %617 : vector<6x8x128xf32>
    %cst_161 = arith.constant dense<0.000000e+00> : vector<6x128xf32>
    %619 = vector.multi_reduction <add>, %618, %cst_161 [1] : vector<6x8x128xf32> to vector<6x128xf32>
    %620 = arith.addf %594, %619 : vector<6x128xf32>
    %c0_162 = arith.constant 0 : index
    %c0_163 = arith.constant 0 : index
    %621 = vector.load %arg5[%c0_162, %c0_163] : memref<6x128xf32, #tpu.memory_space<vmem>>, vector<6x128xf32>
    tpu.vector_store %arg5[%c0_162, %c0_163], %620 {strides = array<i32>} : memref<6x128xf32, #tpu.memory_space<vmem>>, vector<6x128xf32>,
    return
  }
  func.func @transform_0(%arg0: i32) -> (i32, i32) {
    %c0_i32 = arith.constant 0 : i32
    %c0_i32_0 = arith.constant 0 : i32
    %c0_i32_1 = arith.constant 0 : i32
    return %c0_i32, %c0_i32_0 : i32, i32
  }
  func.func @transform_1(%arg0: i32) -> (i32, i32, i32) {
    %c0_i32 = arith.constant 0 : i32
    %c0_i32_0 = arith.constant 0 : i32
    %c0_i32_1 = arith.constant 0 : i32
    %c0_i32_2 = arith.constant 0 : i32
    return %c0_i32, %c0_i32_0, %c0_i32_1 : i32, i32, i32
  }
  func.func @transform_2(%arg0: i32) -> (i32, i32) {
    %c0_i32 = arith.constant 0 : i32
    %c0_i32_0 = arith.constant 0 : i32
    return %c0_i32, %arg0 : i32, i32
  }
  func.func @transform_3(%arg0: i32) -> (i32, i32, i32) {
    %c0_i32 = arith.constant 0 : i32
    %c0_i32_0 = arith.constant 0 : i32
    %c0_i32_1 = arith.constant 0 : i32
    return %c0_i32, %c0_i32_0, %arg0 : i32, i32, i32
  }
  func.func @transform_4(%arg0: i32) -> (i32, i32) {
    %c0_i32 = arith.constant 0 : i32
    %c0_i32_0 = arith.constant 0 : i32
    return %c0_i32, %arg0 : i32, i32
  }
}

</mosaic_0001>

<bundles_post_ra>
// kernel: forward_batch.1
= control target key start
LH: loop header
LB: loop body
LE: loop exit
PB: predicated region body
PF: predicated region fallthrough
CT: control target
= control target key end

     0   :  { %9 = vsyncpa [#allocation3], 0  ;;  %s8067_s0 = inlined_call_operand.hbm [shape: f32[8,8], index: 0, kind: input, shape index: {}]   ;;  %s8068_s1 = inlined_call_operand.hbm [shape: f32[12,8,36], index: 1, kind: input, shape index: {}]   ;;  %s8069_s2 = inlined_call_operand.vmem [shape: f32[8,128], index: 2, kind: input, shape index: {}]   ;;  %s8070_s3 = inlined_call_operand.vmem [shape: f32[6,8,128], index: 3, kind: input, shape index: {}]   ;;  %s8071_s4 = inlined_call_operand.vmem [shape: f32[6,128], index: 4, kind: output, shape index: {}]  }
   0x1   :  { %10 = vsyncpa [#allocation5], 0  ;;  %s4144_s15 = smov [#allocation2]   ;;  %s4145_s17 = smov [#allocation4]  }
   0x2   :  { %s17_s16 = sshll.u32 %s4144_s15, 4  ;;  %s26_s18 = sshll.u32 %s4145_s17, 4  ;;  %s18_s16 = int_to_ptr.vmem [resolvable:$true] %s17_s16  ;;  %s27_s18 = int_to_ptr.vmem [resolvable:$true] %s26_s18 }
   0x3   :  { %s4108_s19 = scalar_lea.vmem %s18_s16, 128  ;;  %p4113_p1 = scmp.lt.s32.totalorder %s18_s16, %s18_s16 }
   0x4   :  { %p4109_p0 = scmp.ne.s32.totalorder %s18_s16, %s4108_s19  ;;  %p4114_p2 = scmp.lt.s32.totalorder %s4108_s19, %s4108_s19 }
   0x6   :  { %p4115_p3 = por %p4114_p2, %p4113_p1 }
   0x8   :  { %p4116_p4 = pnand %p4115_p3, %p4109_p0 }
   0xa   :  { %4119 = shalt.err (!%p4116_p4)
}
   0xb   :  { %20 = dma.hbm_to_vmem [thread:$0]  %s8067_s0, 128, %s18_s16, [#allocation3]  }
   0xc   :  { %s4128_s22 = scalar_lea.vmem %s27_s18, 1536  ;;  %p4133_p6 = scmp.lt.s32.totalorder %s27_s18, %s27_s18 }
   0xd   :  { %p4129_p5 = scmp.ne.s32.totalorder %s27_s18, %s4128_s22  ;;  %p4134_p7 = scmp.lt.s32.totalorder %s4128_s22, %s4128_s22 }
   0xf   :  { %p4135_p8 = por %p4134_p7, %p4133_p6 }
  0x11   :  { %p4136_p9 = pnand %p4135_p8, %p4129_p5 }
  0x13   :  { %4139 = shalt.err (!%p4136_p9)
}
  0x14   :  { %s4146_s23 = smov 128   ;;  %s4147_s24 = smov 8  }
  0x15   :  { %32 = dma.hbm_to_vmem [thread:$0]  %s8068_s1, 1536, %s27_s18, [#allocation5], %s4146_s23, %s4146_s23, %s4147_s24  }
  0x16   :  { %4140 = dma.done.wait [#allocation3], 128  }
  0x17   :  { %4141 = vsyncadd [#allocation3], 4294967168 }
  0x18   :  { %4142 = dma.done.wait [#allocation5], 1536  }
  0x19   :  { %4143 = vsyncadd [#allocation5], 4294965760  ;;  %v4148_v0 = vmov 0   ;;  %v4221_v1 = vld [vmem:[#allocation4 + $0x8] sm:$0xff]  ;;  %v43_v2 = vld [vmem:[#allocation2] sm:$0xff]  ;;  %v8074_v14 = vmov 1   ;;  %v62_v19 = vlaneseq }
  0x1a   :  { %3944 = vset.pattern.permute.xlu1 %v4148_v0  ;;  %3943 = vset.pattern.permute.xlu0 %v4148_v0  ;;  %v4224_v3 = vld [vmem:[#allocation4 + $0x10] sm:$0xff]  ;;  %v4226_v4 = vld [vmem:[#allocation4] sm:$0xff]  ;;  %v4232_v6 = vld [vmem:[#allocation4 + $0x18] sm:$0xff]  ;;  %v8075_v15 = vmov 3   ;;  %v8077_v16 = vmov 2   ;;  %v8073_v17 = vmov 4  }
  0x1b   :  { %88 = vperm.xlu1 %3944, %v4221_v1   ;;  %59 = vperm.xlu0 %3943, %v43_v2   ;;  %v4230_v5 = vld [vmem:[#allocation4 + $0x20] sm:$0xff]  ;;  %v4236_v7 = vld [vmem:[#allocation4 + $0x30] sm:$0xff]  ;;  %v4238_v8 = vld [vmem:[#allocation4 + $0x28] sm:$0xff]  ;;  %v8072_v18 = vmov 5   ;;  %v4308_v20 = vshrl.u32 %v62_v19, 7  ;;  %v4154_v21 = vmov 6  }
  0x1c   :  { %v4242_v9 = vld [vmem:[#allocation4 + $0x40] sm:$0xff]  ;;  %v4244_v10 = vld [vmem:[#allocation4 + $0x38] sm:$0xff]  ;;  %v4248_v11 = vld [vmem:[#allocation4 + $0x50] sm:$0xff]  ;;  %v4155_v44 = vmov 7  }
  0x1d   :  { %v4250_v12 = vld [vmem:[#allocation4 + $0x48] sm:$0xff]  ;;  %v4254_v13 = vld [vmem:[#allocation4 + $0x58] sm:$0xff]  ;;  %8176 = vst [vmem:[#allocation8_spill] sm:$0xff] %v4308_v20  ;;  %v64_v22 = vsub.s32 3, %v4308_v20 }
  0x1e   :  { %v44_v23 = vld [vmem:[%s8069_s2] sm:$0xff] }
  0x1f   :  { %93 = vperm.xlu1 %3944, %v4224_v3   ;;  %83 = vperm.xlu0 %3943, %v4226_v4   ;;  %v65_v24 = vrot.slane %v44_v23, %v64_v22 }
  0x23   :  { %103 = vperm.xlu1 %3944, %v4230_v5   ;;  %98 = vperm.xlu0 %3943, %v4232_v6  }
  0x27   :  { %113 = vperm.xlu1 %3944, %v4236_v7   ;;  %108 = vperm.xlu0 %3943, %v4238_v8  }
  0x2b   :  { %123 = vperm.xlu1 %3944, %v4242_v9   ;;  %118 = vperm.xlu0 %3943, %v4244_v10  }
  0x2f   :  { %133 = vperm.xlu1 %3944, %v4248_v11   ;;  %128 = vperm.xlu0 %3943, %v4250_v12  }
  0x33   :  { %3945 = vset.pattern.permute.xlu1 %v8074_v14  ;;  %138 = vperm.xlu0 %3943, %v4254_v13  }
  0x34   :  { %170 = vperm.xlu1 %3945, %v4226_v4  }
  0x37   :  { %3946 = vset.pattern.permute.xlu0 %v8074_v14 }
  0x38   :  { %178 = vperm.xlu1 %3945, %v4224_v3   ;;  %174 = vperm.xlu0 %3946, %v4221_v1  }
  0x3c   :  { %182 = vperm.xlu1 %3945, %v4232_v6   ;;  %186 = vperm.xlu0 %3946, %v4230_v5  }
  0x40   :  { %190 = vperm.xlu1 %3945, %v4238_v8   ;;  %194 = vperm.xlu0 %3946, %v4236_v7  }
  0x44   :  { %198 = vperm.xlu1 %3945, %v4244_v10   ;;  %202 = vperm.xlu0 %3946, %v4242_v9  }
  0x48   :  { %206 = vperm.xlu1 %3945, %v4250_v12   ;;  %210 = vperm.xlu0 %3946, %v4248_v11  }
  0x4c   :  { %214 = vperm.xlu1 %3945, %v4254_v13   ;;  %3949 = vset.pattern.permute.xlu0 %v8075_v15 }
  0x4d   :  { %326 = vperm.xlu0 %3949, %v4221_v1  }
  0x50   :  { %3947 = vset.pattern.permute.xlu1 %v8077_v16 }
  0x51   :  { %250 = vperm.xlu1 %3947, %v4221_v1   ;;  %338 = vperm.xlu0 %3949, %v4230_v5  }
  0x55   :  { %254 = vperm.xlu1 %3947, %v4224_v3   ;;  %346 = vperm.xlu0 %3949, %v4236_v7  }
  0x59   :  { %262 = vperm.xlu1 %3947, %v4230_v5   ;;  %354 = vperm.xlu0 %3949, %v4242_v9  }
  0x5d   :  { %270 = vperm.xlu1 %3947, %v4236_v7   ;;  %362 = vperm.xlu0 %3949, %v4248_v11  }
  0x61   :  { %278 = vperm.xlu1 %3947, %v4242_v9   ;;  %3950 = vset.pattern.permute.xlu0 %v8073_v17 }
  0x62   :  { %398 = vperm.xlu0 %3950, %v4226_v4  }
  0x65   :  { %286 = vperm.xlu1 %3947, %v4248_v11  }
  0x66   :  { %410 = vperm.xlu0 %3950, %v4232_v6  }
  0x69   :  { %3948 = vset.pattern.permute.xlu1 %v8075_v15 }
  0x6a   :  { %322 = vperm.xlu1 %3948, %v4226_v4   ;;  %418 = vperm.xlu0 %3950, %v4238_v8  }
  0x6e   :  { %330 = vperm.xlu1 %3948, %v4224_v3   ;;  %426 = vperm.xlu0 %3950, %v4244_v10  }
  0x72   :  { %334 = vperm.xlu1 %3948, %v4232_v6   ;;  %434 = vperm.xlu0 %3950, %v4250_v12  }
  0x76   :  { %342 = vperm.xlu1 %3948, %v4238_v8   ;;  %442 = vperm.xlu0 %3950, %v4254_v13  }
  0x7a   :  { %350 = vperm.xlu1 %3948, %v4244_v10   ;;  %3953 = vset.pattern.permute.xlu0 %v8072_v18 }
  0x7b   :  { %478 = vperm.xlu0 %3953, %v4221_v1  }
  0x7e   :  { %358 = vperm.xlu1 %3948, %v4250_v12  }
  0x7f   :  { %490 = vperm.xlu0 %3953, %v4230_v5  }
  0x82   :  { %366 = vperm.xlu1 %3948, %v4254_v13  }
  0x83   :  { %498 = vperm.xlu0 %3953, %v4236_v7  }
  0x86   :  { %3951 = vset.pattern.permute.xlu1 %v8073_v17  ;;  %v8078_v17 = vmov 10  }
  0x87   :  { %402 = vperm.xlu1 %3951, %v4221_v1   ;;  %506 = vperm.xlu0 %3953, %v4242_v9  }
  0x8b   :  { %406 = vperm.xlu1 %3951, %v4224_v3   ;;  %514 = vperm.xlu0 %3953, %v4248_v11  }
  0x8f   :  { %414 = vperm.xlu1 %3951, %v4230_v5   ;;  %3954 = vset.pattern.permute.xlu0 %v4154_v21 }
  0x90   :  { %550 = vperm.xlu0 %3954, %v4226_v4  }
  0x93   :  { %422 = vperm.xlu1 %3951, %v4236_v7  }
  0x94   :  { %562 = vperm.xlu0 %3954, %v4232_v6  }
  0x96   :  { %v89_v25 = vpop.permute.xlu1 %88  ;;  %v60_v26 = vpop.permute.xlu0 %59 }
  0x97   :  { %v66_v27 = vsub.f32 %v60_v26, %v65_v24  ;;  %430 = vperm.xlu1 %3951, %v4242_v9  }
  0x98   :  { %570 = vperm.xlu0 %3954, %v4238_v8  }
  0x99   :  { %v67_v28 = vmul.f32 0.15915494, %v66_v27 }
  0x9a   :  { %v94_v29 = vpop.permute.xlu1 %93  ;;  %v84_v30 = vpop.permute.xlu0 %83 }
  0x9b   :  { %v68_v31 = vfloor.f32 %v67_v28  ;;  %438 = vperm.xlu1 %3951, %v4248_v11  }
  0x9c   :  { %578 = vperm.xlu0 %3954, %v4244_v10  }
  0x9d   :  { %v69_v32 = vmul.f32 6.2831855, %v68_v31 }
  0x9e   :  { %v104_v33 = vpop.permute.xlu1 %103  ;;  %v99_v34 = vpop.permute.xlu0 %98 }
  0x9f   :  { %v70_v35 = vsub.f32 %v66_v27, %v69_v32  ;;  %3952 = vset.pattern.permute.xlu1 %v8072_v18 }
  0xa0   :  { %474 = vperm.xlu1 %3952, %v4226_v4   ;;  %586 = vperm.xlu0 %3954, %v4250_v12  }
  0xa1   :  { %v71_v36 = vmul.f32 5.729578, %v70_v35 }
  0xa2   :  { %v4326_v37 = vpop.permute.xlu1 %113  ;;  %v109_v38 = vpop.permute.xlu0 %108 }
  0xa3   :  { %v72_v39 = vfloor.f32 %v71_v36 }
  0xa4   :  { %482 = vperm.xlu1 %3952, %v4224_v3   ;;  %594 = vperm.xlu0 %3954, %v4254_v13  }
  0xa5   :  { %v4330_v40 = vmin.f32 %v72_v39, 35.0 }
  0xa6   :  { %v4332_v41 = vpop.permute.xlu1 %123  ;;  %v4334_v42 = vpop.permute.xlu0 %118 }
  0xa7   :  { %v4337_v43 = vsub.f32 %v71_v36, %v4330_v40  ;;  %vm78_vm0 = vcmp.eq.f32.partialorder %v4330_v40, 35.0  ;;  %vm76_vm1 = vcmp.eq.f32.partialorder %v4330_v40, 0.0  ;;  %vm165_vm2 = vcmp.eq.f32.partialorder %v4330_v40, 1.0 }
  0xa8   :  { %486 = vperm.xlu1 %3952, %v4232_v6   ;;  %3957 = vset.pattern.permute.xlu0 %v4155_v44  ;;  %vm241_vm3 = vcmp.eq.f32.partialorder %v4330_v40, 2.0  ;;  %vm317_vm4 = vcmp.eq.f32.partialorder %v4330_v40, 3.0  ;;  %vm2445_vm5 = vcmp.eq.f32.partialorder %v4330_v40, 31.0  ;;  %vm2521_vm6 = vcmp.eq.f32.partialorder %v4330_v40, 32.0 }
  0xa9   :  { %v4345_v45 = vsub.f32 1.0, %v4337_v43  ;;  %v79_v46 = vsel %vm78_vm0, %v4337_v43, 0.0  ;;  %630 = vperm.xlu0 %3957, %v4221_v1   ;;  %v167_v47 = vsel %vm76_vm1, %v4337_v43, 0.0  ;;  %vm2597_vm7 = vcmp.eq.f32.partialorder %v4330_v40, 33.0 }
  0xaa   :  { %v4352_v48 = vpop.permute.xlu1 %133  ;;  %v4354_v49 = vpop.permute.xlu0 %128  ;;  %vm2673_vm8 = vcmp.eq.f32.partialorder %v4330_v40, 34.0  ;;  %vm393_vm9 = vcmp.eq.f32.partialorder %v4330_v40, 4.0  ;;  %vm469_vm10 = vcmp.eq.f32.partialorder %v4330_v40, 5.0  ;;  %vm545_vm11 = vcmp.eq.f32.partialorder %v4330_v40, 6.0 }
  0xab   :  { %v77_v50 = vsel %vm76_vm1, %v4345_v45, 0.0  ;;  %v166_v51 = vsel %vm165_vm2, %v4345_v45, 0.0  ;;  %vm621_vm12 = vcmp.eq.f32.partialorder %v4330_v40, 7.0  ;;  %vm697_vm13 = vcmp.eq.f32.partialorder %v4330_v40, 8.0 }
  0xac   :  { %v4360_v52 = vadd.f32 %v79_v46, %v77_v50  ;;  %494 = vperm.xlu1 %3952, %v4238_v8   ;;  %v4363_v53 = vadd.f32 %v167_v47, %v166_v51  ;;  %v242_v46 = vsel %vm241_vm3, %v4345_v45, 0.0  ;;  %v243_v47 = vsel %vm165_vm2, %v4337_v43, 0.0 }
  0xad   :  { %642 = vperm.xlu0 %3957, %v4230_v5   ;;  %v318_v50 = vsel %vm317_vm4, %v4345_v45, 0.0  ;;  %v319_v51 = vsel %vm241_vm3, %v4337_v43, 0.0  ;;  %vm773_vm14 = vcmp.eq.f32.partialorder %v4330_v40, 9.0  ;;  %vm849_vm15 = vcmp.eq.f32.partialorder %v4330_v40, 10.0 }
  0xae   :  { %v141_v54 = vmul.f32 %v84_v30, %v4360_v52  ;;  %v4367_v55 = vpop.permute.xlu0 %138  ;;  %v143_v61 = vmul.f32 %v94_v29, %v4360_v52  ;;  %v142_v63 = vmul.f32 %v89_v25, %v4360_v52  ;;  %v144_v2 = vmul.f32 %v99_v34, %v4360_v52 }
  0xaf   :  { %v171_v56 = vpop.permute.xlu1 %170  ;;  %v145_v26 = vmul.f32 %v104_v33, %v4360_v52  ;;  %v146_v25 = vmul.f32 %v109_v38, %v4360_v52  ;;  %v4156_v33 = vmov 8   ;;  %vm1001_vm1 = vcmp.eq.f32.partialorder %v4330_v40, 12.0 }
  0xb0   :  { %v217_v57 = vmul.f32 %v171_v56, %v4363_v53  ;;  %502 = vperm.xlu1 %3952, %v4244_v10   ;;  %vm1077_vm2 = vcmp.eq.f32.partialorder %v4330_v40, 13.0  ;;  %vm1153_vm3 = vcmp.eq.f32.partialorder %v4330_v40, 14.0 }
  0xb1   :  { %650 = vperm.xlu0 %3957, %v4236_v7  }
  0xb2   :  { %v4372_v58 = vadd.f32 %v217_v57, %v141_v54  ;;  %v4425_v57 = vadd.f32 %v243_v47, %v242_v46  ;;  %v2523_v46 = vsel %vm2445_vm5, %v4337_v43, 0.0 }
  0xb3   :  { %v179_v59 = vpop.permute.xlu1 %178  ;;  %v175_v60 = vpop.permute.xlu0 %174 }
  0xb4   :  { %8177 = vst [vmem:[#allocation9_spill] sm:$0xff] %v4372_v58  ;;  %v219_v62 = vmul.f32 %v179_v59, %v4363_v53  ;;  %v218_v0 = vmul.f32 %v175_v60, %v4363_v53  ;;  %510 = vperm.xlu1 %3952, %v4250_v12   ;;  %v4427_v59 = vadd.f32 %v319_v51, %v318_v50  ;;  %v2599_v51 = vsel %vm2521_vm6, %v4337_v43, 0.0 }
  0xb5   :  { %658 = vperm.xlu0 %3957, %v4242_v9  }
  0xb6   :  { %v4381_v19 = vadd.f32 %v219_v62, %v143_v61  ;;  %v230_v22 = vadd.f32 %v218_v0, %v142_v63 }
  0xb7   :  { %v183_v23 = vpop.permute.xlu1 %182  ;;  %v187_v24 = vpop.permute.xlu0 %186 }
  0xb8   :  { %v220_v27 = vmul.f32 %v183_v23, %v4363_v53  ;;  %v221_v28 = vmul.f32 %v187_v24, %v4363_v53  ;;  %518 = vperm.xlu1 %3952, %v4254_v13  }
  0xb9   :  { %666 = vperm.xlu0 %3957, %v4248_v11  }
  0xba   :  { %v4389_v29 = vadd.f32 %v220_v27, %v144_v2  ;;  %v233_v30 = vadd.f32 %v221_v28, %v145_v26 }
  0xbb   :  { %v191_v31 = vpop.permute.xlu1 %190  ;;  %v4391_v32 = vpop.permute.xlu0 %194 }
  0xbc   :  { %8178 = vst [vmem:[#allocation10_spill] sm:$0xff] %v4389_v29  ;;  %v222_v34 = vmul.f32 %v191_v31, %v4363_v53  ;;  %3955 = vset.pattern.permute.xlu1 %v4154_v21 }
  0xbd   :  { %554 = vperm.xlu1 %3955, %v4221_v1   ;;  %3958 = vset.pattern.permute.xlu0 %v4156_v33 }
  0xbe   :  { %v4397_v35 = vadd.f32 %v222_v34, %v146_v25  ;;  %702 = vperm.xlu0 %3958, %v4226_v4   ;;  %v2522_v34 = vsel %vm2521_vm6, %v4345_v45, 0.0  ;;  %vm1305_vm6 = vcmp.eq.f32.partialorder %v4330_v40, 16.0 }
  0xbf   :  { %v4400_v36 = vpop.permute.xlu1 %198  ;;  %v4402_v38 = vpop.permute.xlu0 %202  ;;  %v4458_v50 = vadd.f32 %v2523_v46, %v2522_v34 }
  0xc0   :  { %8179 = vst [vmem:[#allocation11_spill] sm:$0xff] %v4397_v35 }
  0xc1   :  { %558 = vperm.xlu1 %3955, %v4224_v3   ;;  %8180 = vst [vmem:[#allocation12_spill] sm:$0xff] %v4458_v50 }
  0xc2   :  { %714 = vperm.xlu0 %3958, %v4232_v6  }
  0xc3   :  { %v4406_v39 = vpop.permute.xlu1 %206  ;;  %v4410_v21 = vpop.permute.xlu0 %210 }
  0xc5   :  { %566 = vperm.xlu1 %3955, %v4230_v5  }
  0xc6   :  { %722 = vperm.xlu0 %3958, %v4238_v8  }
  0xc7   :  { %v4422_v54 = vpop.permute.xlu1 %214 }
  0xc8   :  { %v327_v56 = vpop.permute.xlu0 %326 }
  0xc9   :  { %574 = vperm.xlu1 %3955, %v4236_v7   ;;  %v370_v63 = vmul.f32 %v327_v56, %v4427_v59 }
  0xca   :  { %730 = vperm.xlu0 %3958, %v4244_v10  }
  0xcc   :  { %v251_v60 = vpop.permute.xlu1 %250  ;;  %v339_v61 = vpop.permute.xlu0 %338 }
  0xcd   :  { %v294_v62 = vmul.f32 %v251_v60, %v4425_v57  ;;  %582 = vperm.xlu1 %3955, %v4242_v9   ;;  %v373_v28 = vmul.f32 %v339_v61, %v4427_v59  ;;  %v2675_v61 = vsel %vm2597_vm7, %v4337_v43, 0.0 }
  0xce   :  { %738 = vperm.xlu0 %3958, %v4250_v12  }
  0xcf   :  { %v306_v0 = vadd.f32 %v294_v62, %v230_v22  ;;  %v8079_v22 = vmov 9   ;;  %v2749_v62 = vsel %vm78_vm0, %v4345_v45, 0.0  ;;  %vm925_vm0 = vcmp.eq.f32.partialorder %v4330_v40, 11.0 }
  0xd0   :  { %v255_v2 = vpop.permute.xlu1 %254  ;;  %v4434_v23 = vpop.permute.xlu0 %346 }
  0xd1   :  { %v4436_v24 = vadd.f32 %v370_v63, %v306_v0  ;;  %590 = vperm.xlu1 %3955, %v4248_v11   ;;  %v2674_v63 = vsel %vm2673_vm8, %v4345_v45, 0.0  ;;  %v2750_v0 = vsel %vm2673_vm8, %v4337_v43, 0.0  ;;  %vm1457_vm8 = vcmp.eq.f32.partialorder %v4330_v40, 18.0 }
  0xd2   :  { %746 = vperm.xlu0 %3958, %v4254_v13  }
  0xd4   :  { %v263_v26 = vpop.permute.xlu1 %262  ;;  %v4440_v27 = vpop.permute.xlu0 %354 }
  0xd5   :  { %v297_v25 = vmul.f32 %v263_v26, %v4425_v57  ;;  %3956 = vset.pattern.permute.xlu1 %v4155_v44 }
  0xd6   :  { %626 = vperm.xlu1 %3956, %v4226_v4   ;;  %3961 = vset.pattern.permute.xlu0 %v8079_v22  ;;  %v470_v22 = vsel %vm469_vm10, %v4345_v45, 0.0 }
  0xd7   :  { %v309_v31 = vadd.f32 %v297_v25, %v233_v30  ;;  %782 = vperm.xlu0 %3961, %v4221_v1   ;;  %v2598_v30 = vsel %vm2597_vm7, %v4345_v45, 0.0  ;;  %v4480_v25 = vadd.f32 %v2750_v0, %v2749_v62  ;;  %vm1381_vm7 = vcmp.eq.f32.partialorder %v4330_v40, 17.0 }
  0xd8   :  { %v4454_v47 = vpop.permute.xlu1 %270  ;;  %v4456_v44 = vpop.permute.xlu0 %362  ;;  %v4466_v60 = vadd.f32 %v2599_v51, %v2598_v30 }
  0xd9   :  { %v4462_v56 = vadd.f32 %v373_v28, %v309_v31  ;;  %v4478_v28 = vadd.f32 %v2675_v61, %v2674_v63  ;;  %8183 = vst [vmem:[#allocation15_spill] sm:$0xff] %v4480_v25  ;;  %v295_v61 = vmul.f32 %v255_v2, %v4425_v57  ;;  %v471_v25 = vsel %vm393_vm9, %v4337_v43, 0.0 }
  0xda   :  { %634 = vperm.xlu1 %3956, %v4224_v3   ;;  %8181 = vst [vmem:[#allocation13_spill] sm:$0xff] %v4466_v60  ;;  %v4543_v50 = vadd.f32 %v471_v25, %v470_v22 }
  0xdb   :  { %794 = vperm.xlu0 %3961, %v4230_v5   ;;  %8182 = vst [vmem:[#allocation14_spill] sm:$0xff] %v4478_v28  ;;  %v307_v0 = vadd.f32 %v295_v61, %v4381_v19 }
  0xdc   :  { %v4476_v26 = vpop.permute.xlu1 %278 }
  0xdd   :  { %v4482_v31 = vpop.permute.xlu0 %398 }
  0xde   :  { %638 = vperm.xlu1 %3956, %v4232_v6  }
  0xdf   :  { %802 = vperm.xlu0 %3961, %v4236_v7  }
  0xe0   :  { %v4486_v34 = vpop.permute.xlu1 %286 }
  0xe1   :  { %v4488_v46 = vpop.permute.xlu0 %410 }
  0xe2   :  { %646 = vperm.xlu1 %3956, %v4238_v8  }
  0xe3   :  { %810 = vperm.xlu0 %3961, %v4242_v9  }
  0xe5   :  { %v4492_v51 = vpop.permute.xlu1 %322  ;;  %v4494_v30 = vpop.permute.xlu0 %418 }
  0xe6   :  { %654 = vperm.xlu1 %3956, %v4244_v10  }
  0xe7   :  { %818 = vperm.xlu0 %3961, %v4248_v11  }
  0xe9   :  { %v331_v62 = vpop.permute.xlu1 %330  ;;  %v4499_v63 = vpop.permute.xlu0 %426 }
  0xea   :  { %v371_v18 = vmul.f32 %v331_v62, %v4427_v59  ;;  %662 = vperm.xlu1 %3956, %v4250_v12  }
  0xeb   :  { %3962 = vset.pattern.permute.xlu0 %v8078_v17  ;;  %v395_v17 = vsel %vm317_vm4, %v4337_v43, 0.0  ;;  %vm1229_vm4 = vcmp.eq.f32.partialorder %v4330_v40, 15.0 }
  0xec   :  { %v383_v14 = vadd.f32 %v371_v18, %v307_v0  ;;  %854 = vperm.xlu0 %3962, %v4226_v4  }
  0xed   :  { %v4506_v2 = vpop.permute.xlu1 %334  ;;  %v4508_v15 = vpop.permute.xlu0 %434 }
  0xee   :  { %8184 = vst [vmem:[#allocation16_spill] sm:$0xff] %v4508_v15  ;;  %670 = vperm.xlu1 %3956, %v4254_v13  }
  0xf0   :  { %866 = vperm.xlu0 %3962, %v4232_v6  }
  0xf1   :  { %v4512_v16 = vpop.permute.xlu1 %342  ;;  %v4514_v19 = vpop.permute.xlu0 %442 }
  0xf2   :  { %8185 = vst [vmem:[#allocation17_spill] sm:$0xff] %v4512_v16  ;;  %8186 = vst [vmem:[#allocation18_spill] sm:$0xff] %v4514_v19  ;;  %3959 = vset.pattern.permute.xlu1 %v4156_v33  ;;  %v394_v33 = vsel %vm393_vm9, %v4345_v45, 0.0  ;;  %vm1533_vm9 = vcmp.eq.f32.partialorder %v4330_v40, 19.0 }
  0xf3   :  { %706 = vperm.xlu1 %3959, %v4221_v1   ;;  %v4541_v20 = vadd.f32 %v395_v17, %v394_v33 }
  0xf4   :  { %874 = vperm.xlu0 %3962, %v4238_v8  }
  0xf5   :  { %v4519_v18 = vpop.permute.xlu1 %350 }
  0xf6   :  { %8187 = vst [vmem:[#allocation19_spill] sm:$0xff] %v4519_v18  ;;  %v479_v61 = vpop.permute.xlu0 %478 }
  0xf7   :  { %710 = vperm.xlu1 %3959, %v4224_v3   ;;  %v522_v58 = vmul.f32 %v479_v61, %v4543_v50 }
  0xf8   :  { %882 = vperm.xlu0 %3962, %v4244_v10  }
  0xf9   :  { %v4524_v62 = vpop.permute.xlu1 %358 }
  0xfa   :  { %8188 = vst [vmem:[#allocation20_spill] sm:$0xff] %v4524_v62  ;;  %v491_v0 = vpop.permute.xlu0 %490 }
  0xfb   :  { %718 = vperm.xlu1 %3959, %v4230_v5   ;;  %v525_v19 = vmul.f32 %v491_v0, %v4543_v50 }
  0xfc   :  { %890 = vperm.xlu0 %3962, %v4250_v12  }
  0xfd   :  { %v4537_v28 = vpop.permute.xlu1 %366 }
  0xfe   :  { %8189 = vst [vmem:[#allocation21_spill] sm:$0xff] %v4537_v28  ;;  %v4539_v60 = vpop.permute.xlu0 %498  ;;  %v8086_v28 = vmov 11  }
  0xff   :  { %726 = vperm.xlu1 %3959, %v4236_v7  }
 0x100   :  { %898 = vperm.xlu0 %3962, %v4254_v13  }
 0x102   :  { %v403_v35 = vpop.permute.xlu1 %402  ;;  %v4547_v29 = vpop.permute.xlu0 %506 }
 0x103   :  { %v446_v62 = vmul.f32 %v403_v35, %v4541_v20  ;;  %734 = vperm.xlu1 %3959, %v4242_v9  }
 0x104   :  { %3965 = vset.pattern.permute.xlu0 %v8086_v28 }
 0x105   :  { %v458_v17 = vadd.f32 %v446_v62, %v4436_v24  ;;  %934 = vperm.xlu0 %3965, %v4221_v1   ;;  %v8191_v24 = vmov 9  }
 0x106   :  { %v407_v22 = vpop.permute.xlu1 %406  ;;  %v4555_v25 = vpop.permute.xlu0 %514 }
 0x107   :  { %v447_v33 = vmul.f32 %v407_v22, %v4541_v20  ;;  %742 = vperm.xlu1 %3959, %v4248_v11   ;;  %v4559_v18 = vadd.f32 %v522_v58, %v458_v17 }
 0x109   :  { %8190 = vst [vmem:[#allocation22_spill] sm:$0xff] %v4559_v18  ;;  %v459_v61 = vadd.f32 %v447_v33, %v383_v14  ;;  %946 = vperm.xlu0 %3965, %v4230_v5  }
 0x10a   :  { %v415_v35 = vpop.permute.xlu1 %414 }
 0x10b   :  { %v449_v28 = vmul.f32 %v415_v35, %v4541_v20  ;;  %3960 = vset.pattern.permute.xlu1 %v8191_v24  ;;  %v4565_v62 = vpop.permute.xlu0 %550 }
 0x10c   :  { %8192 = vst [vmem:[#allocation23_spill] sm:$0xff] %v4565_v62  ;;  %778 = vperm.xlu1 %3960, %v4226_v4  }
 0x10d   :  { %v461_v22 = vadd.f32 %v449_v28, %v4462_v56  ;;  %954 = vperm.xlu0 %3965, %v4236_v7  }
 0x10e   :  { %v4570_v58 = vpop.permute.xlu1 %422 }
 0x10f   :  { %v4572_v14 = vpop.permute.xlu0 %562  ;;  %v4574_v17 = vadd.f32 %v525_v19, %v461_v22  ;;  %v8087_v19 = vmov 12  }
 0x110   :  { %8193 = vst [vmem:[#allocation24_spill] sm:$0xff] %v4572_v14  ;;  %786 = vperm.xlu1 %3960, %v4224_v3  }
 0x111   :  { %8194 = vst [vmem:[#allocation25_spill] sm:$0xff] %v4574_v17  ;;  %962 = vperm.xlu0 %3965, %v4242_v9  }
 0x112   :  { %v4578_v0 = vpop.permute.xlu1 %430 }
 0x113   :  { %v4580_v33 = vpop.permute.xlu0 %570 }
 0x114   :  { %8195 = vst [vmem:[#allocation26_spill] sm:$0xff] %v4580_v33  ;;  %790 = vperm.xlu1 %3960, %v4232_v6   ;;  %v8204_v33 = vmov 10  }
 0x115   :  { %970 = vperm.xlu0 %3965, %v4248_v11  }
 0x116   :  { %v4584_v56 = vpop.permute.xlu1 %438 }
 0x117   :  { %v4586_v28 = vpop.permute.xlu0 %578 }
 0x118   :  { %8196 = vst [vmem:[#allocation27_spill] sm:$0xff] %v4586_v28  ;;  %798 = vperm.xlu1 %3960, %v4238_v8  }
 0x119   :  { %3966 = vset.pattern.permute.xlu0 %v8087_v19 }
 0x11a   :  { %1006 = vperm.xlu0 %3966, %v4226_v4  }
 0x11b   :  { %v4591_v35 = vpop.permute.xlu1 %474  ;;  %v4593_v24 = vpop.permute.xlu0 %586 }
 0x11c   :  { %8197 = vst [vmem:[#allocation28_spill] sm:$0xff] %v4591_v35  ;;  %8198 = vst [vmem:[#allocation29_spill] sm:$0xff] %v4593_v24  ;;  %806 = vperm.xlu1 %3960, %v4244_v10  }
 0x11e   :  { %1018 = vperm.xlu0 %3966, %v4232_v6  }
 0x11f   :  { %v483_v22 = vpop.permute.xlu1 %482  ;;  %v4597_v17 = vpop.permute.xlu0 %594 }
 0x120   :  { %8199 = vst [vmem:[#allocation30_spill] sm:$0xff] %v4597_v17  ;;  %v523_v18 = vmul.f32 %v483_v22, %v4543_v50  ;;  %814 = vperm.xlu1 %3960, %v4250_v12  }
 0x122   :  { %v4601_v28 = vadd.f32 %v523_v18, %v459_v61  ;;  %1026 = vperm.xlu0 %3966, %v4238_v8  }
 0x123   :  { %v4604_v19 = vpop.permute.xlu1 %486 }
 0x124   :  { %8200 = vst [vmem:[#allocation31_spill] sm:$0xff] %v4601_v28  ;;  %8201 = vst [vmem:[#allocation32_spill] sm:$0xff] %v4604_v19  ;;  %822 = vperm.xlu1 %3960, %v4254_v13   ;;  %v4607_v24 = vpop.permute.xlu0 %630 }
 0x125   :  { %8202 = vst [vmem:[#allocation33_spill] sm:$0xff] %v4607_v24 }
 0x126   :  { %1034 = vperm.xlu0 %3966, %v4244_v10  }
 0x127   :  { %v4610_v35 = vpop.permute.xlu1 %494 }
 0x128   :  { %8203 = vst [vmem:[#allocation34_spill] sm:$0xff] %v4610_v35  ;;  %3963 = vset.pattern.permute.xlu1 %v8204_v33  ;;  %v4613_v17 = vpop.permute.xlu0 %642  ;;  %v8088_v33 = vmov 13  }
 0x129   :  { %8205 = vst [vmem:[#allocation35_spill] sm:$0xff] %v4613_v17  ;;  %858 = vperm.xlu1 %3963, %v4221_v1  }
 0x12a   :  { %1042 = vperm.xlu0 %3966, %v4250_v12  }
 0x12b   :  { %v4617_v18 = vpop.permute.xlu1 %502 }
 0x12c   :  { %8206 = vst [vmem:[#allocation36_spill] sm:$0xff] %v4617_v18  ;;  %v4619_v61 = vpop.permute.xlu0 %650 }
 0x12d   :  { %8207 = vst [vmem:[#allocation37_spill] sm:$0xff] %v4619_v61  ;;  %862 = vperm.xlu1 %3963, %v4224_v3  }
 0x12e   :  { %1050 = vperm.xlu0 %3966, %v4254_v13  }
 0x12f   :  { %v4623_v22 = vpop.permute.xlu1 %510 }
 0x130   :  { %8208 = vst [vmem:[#allocation38_spill] sm:$0xff] %v4623_v22  ;;  %v4625_v28 = vpop.permute.xlu0 %658 }
 0x131   :  { %8209 = vst [vmem:[#allocation39_spill] sm:$0xff] %v4625_v28  ;;  %870 = vperm.xlu1 %3963, %v4230_v5  }
 0x132   :  { %3969 = vset.pattern.permute.xlu0 %v8088_v33 }
 0x133   :  { %v4629_v17 = vpop.permute.xlu1 %518  ;;  %1086 = vperm.xlu0 %3969, %v4221_v1  }
 0x134   :  { %8210 = vst [vmem:[#allocation40_spill] sm:$0xff] %v4629_v17  ;;  %v4632_v18 = vpop.permute.xlu0 %666  ;;  %v8217_v17 = vmov 11  }
 0x135   :  { %8211 = vst [vmem:[#allocation41_spill] sm:$0xff] %v4632_v18  ;;  %878 = vperm.xlu1 %3963, %v4236_v7  }
 0x137   :  { %1098 = vperm.xlu0 %3969, %v4230_v5  }
 0x138   :  { %v4636_v61 = vpop.permute.xlu1 %554 }
 0x139   :  { %8212 = vst [vmem:[#allocation42_spill] sm:$0xff] %v4636_v61  ;;  %886 = vperm.xlu1 %3963, %v4242_v9   ;;  %v4639_v28 = vpop.permute.xlu0 %702  ;;  %v223_v61 = vmul.f32 %v4391_v32, %v4363_v53 }
 0x13a   :  { %8213 = vst [vmem:[#allocation43_spill] sm:$0xff] %v4639_v28 }
 0x13b   :  { %1106 = vperm.xlu0 %3969, %v4236_v7  }
 0x13c   :  { %v4642_v22 = vpop.permute.xlu1 %558 }
 0x13d   :  { %8214 = vst [vmem:[#allocation44_spill] sm:$0xff] %v4642_v22  ;;  %894 = vperm.xlu1 %3963, %v4248_v11   ;;  %v4645_v33 = vpop.permute.xlu0 %714  ;;  %v8089_v22 = vmov 14  }
 0x13e   :  { %8215 = vst [vmem:[#allocation45_spill] sm:$0xff] %v4645_v33 }
 0x13f   :  { %1114 = vperm.xlu0 %3969, %v4242_v9  }
 0x140   :  { %v4648_v18 = vpop.permute.xlu1 %566 }
 0x141   :  { %8216 = vst [vmem:[#allocation46_spill] sm:$0xff] %v4648_v18  ;;  %3964 = vset.pattern.permute.xlu1 %v8217_v17  ;;  %v4651_v35 = vpop.permute.xlu0 %722  ;;  %v5407_v18 = vmul.f32 %v4354_v49, %v4360_v52  ;;  %v850_v49 = vsel %vm849_vm15, %v4345_v45, 0.0 }
 0x142   :  { %8218 = vst [vmem:[#allocation47_spill] sm:$0xff] %v4651_v35  ;;  %930 = vperm.xlu1 %3964, %v4226_v4  }
 0x143   :  { %1122 = vperm.xlu0 %3969, %v4248_v11  }
 0x144   :  { %v4655_v28 = vpop.permute.xlu1 %574 }
 0x145   :  { %8219 = vst [vmem:[#allocation48_spill] sm:$0xff] %v4655_v28  ;;  %v4657_v24 = vpop.permute.xlu0 %730 }
 0x146   :  { %8220 = vst [vmem:[#allocation49_spill] sm:$0xff] %v4657_v24  ;;  %938 = vperm.xlu1 %3964, %v4224_v3  }
 0x147   :  { %3970 = vset.pattern.permute.xlu0 %v8089_v22 }
 0x148   :  { %v4661_v33 = vpop.permute.xlu1 %582  ;;  %1158 = vperm.xlu0 %3970, %v4226_v4  }
 0x149   :  { %8221 = vst [vmem:[#allocation50_spill] sm:$0xff] %v4661_v33  ;;  %v4664_v17 = vpop.permute.xlu0 %738 }
 0x14a   :  { %8222 = vst [vmem:[#allocation51_spill] sm:$0xff] %v4664_v17  ;;  %942 = vperm.xlu1 %3964, %v4232_v6  }
 0x14c   :  { %v4667_v35 = vpop.permute.xlu1 %590  ;;  %1170 = vperm.xlu0 %3970, %v4232_v6  }
 0x14d   :  { %8223 = vst [vmem:[#allocation52_spill] sm:$0xff] %v4667_v35  ;;  %v4670_v19 = vpop.permute.xlu0 %746 }
 0x14e   :  { %8224 = vst [vmem:[#allocation53_spill] sm:$0xff] %v4670_v19  ;;  %950 = vperm.xlu1 %3964, %v4238_v8  }
 0x150   :  { %1178 = vperm.xlu0 %3970, %v4238_v8  }
 0x151   :  { %v4674_v24 = vpop.permute.xlu1 %626 }
 0x152   :  { %8225 = vst [vmem:[#allocation54_spill] sm:$0xff] %v4674_v24  ;;  %958 = vperm.xlu1 %3964, %v4244_v10   ;;  %v4677_v22 = vpop.permute.xlu0 %782 }
 0x153   :  { %8226 = vst [vmem:[#allocation55_spill] sm:$0xff] %v4677_v22  ;;  %v8232_v22 = vmov 12  }
 0x154   :  { %1186 = vperm.xlu0 %3970, %v4244_v10  }
 0x155   :  { %v4680_v17 = vpop.permute.xlu1 %634 }
 0x156   :  { %8227 = vst [vmem:[#allocation56_spill] sm:$0xff] %v4680_v17  ;;  %966 = vperm.xlu1 %3964, %v4250_v12   ;;  %v4683_v35 = vpop.permute.xlu0 %794  ;;  %v8090_v17 = vmov 15  }
 0x157   :  { %8228 = vst [vmem:[#allocation57_spill] sm:$0xff] %v4683_v35 }
 0x158   :  { %1194 = vperm.xlu0 %3970, %v4250_v12  }
 0x159   :  { %v4686_v19 = vpop.permute.xlu1 %638 }
 0x15a   :  { %8229 = vst [vmem:[#allocation58_spill] sm:$0xff] %v4686_v19  ;;  %974 = vperm.xlu1 %3964, %v4254_v13   ;;  %v4689_v33 = vpop.permute.xlu0 %802 }
 0x15b   :  { %8230 = vst [vmem:[#allocation59_spill] sm:$0xff] %v4689_v33 }
 0x15c   :  { %1202 = vperm.xlu0 %3970, %v4254_v13  }
 0x15d   :  { %v4692_v24 = vpop.permute.xlu1 %646 }
 0x15e   :  { %8231 = vst [vmem:[#allocation60_spill] sm:$0xff] %v4692_v24  ;;  %3967 = vset.pattern.permute.xlu1 %v8232_v22  ;;  %v4695_v28 = vpop.permute.xlu0 %810  ;;  %v8245_v24 = vmov 13  }
 0x15f   :  { %8233 = vst [vmem:[#allocation61_spill] sm:$0xff] %v4695_v28  ;;  %1010 = vperm.xlu1 %3967, %v4221_v1  }
 0x160   :  { %3973 = vset.pattern.permute.xlu0 %v8090_v17 }
 0x161   :  { %v4699_v35 = vpop.permute.xlu1 %654  ;;  %1238 = vperm.xlu0 %3973, %v4221_v1  }
 0x162   :  { %8234 = vst [vmem:[#allocation62_spill] sm:$0xff] %v4699_v35  ;;  %v4702_v19 = vpop.permute.xlu0 %818 }
 0x163   :  { %8235 = vst [vmem:[#allocation63_spill] sm:$0xff] %v4702_v19  ;;  %1014 = vperm.xlu1 %3967, %v4224_v3  }
 0x165   :  { %v4705_v33 = vpop.permute.xlu1 %662  ;;  %1250 = vperm.xlu0 %3973, %v4230_v5  }
 0x166   :  { %8236 = vst [vmem:[#allocation64_spill] sm:$0xff] %v4705_v33 }
 0x167   :  { %1022 = vperm.xlu1 %3967, %v4230_v5   ;;  %v4709_v22 = vpop.permute.xlu0 %854 }
 0x168   :  { %8237 = vst [vmem:[#allocation65_spill] sm:$0xff] %v4709_v22  ;;  %v8091_v22 = vmov 16  }
 0x169   :  { %v4711_v28 = vpop.permute.xlu1 %670  ;;  %1258 = vperm.xlu0 %3973, %v4236_v7  }
 0x16a   :  { %8238 = vst [vmem:[#allocation66_spill] sm:$0xff] %v4711_v28 }
 0x16b   :  { %1030 = vperm.xlu1 %3967, %v4236_v7   ;;  %v4715_v17 = vpop.permute.xlu0 %866 }
 0x16c   :  { %8239 = vst [vmem:[#allocation67_spill] sm:$0xff] %v4715_v17 }
 0x16d   :  { %1266 = vperm.xlu0 %3973, %v4242_v9  }
 0x16e   :  { %v4718_v19 = vpop.permute.xlu1 %706 }
 0x16f   :  { %8240 = vst [vmem:[#allocation68_spill] sm:$0xff] %v4718_v19  ;;  %1038 = vperm.xlu1 %3967, %v4242_v9   ;;  %v4721_v33 = vpop.permute.xlu0 %874 }
 0x170   :  { %8241 = vst [vmem:[#allocation69_spill] sm:$0xff] %v4721_v33 }
 0x171   :  { %1274 = vperm.xlu0 %3973, %v4248_v11  }
 0x172   :  { %v4724_v35 = vpop.permute.xlu1 %710 }
 0x173   :  { %8242 = vst [vmem:[#allocation70_spill] sm:$0xff] %v4724_v35  ;;  %1046 = vperm.xlu1 %3967, %v4248_v11   ;;  %v4727_v28 = vpop.permute.xlu0 %882 }
 0x174   :  { %8243 = vst [vmem:[#allocation71_spill] sm:$0xff] %v4727_v28 }
 0x175   :  { %3974 = vset.pattern.permute.xlu0 %v8091_v22 }
 0x176   :  { %v4730_v17 = vpop.permute.xlu1 %718  ;;  %1310 = vperm.xlu0 %3974, %v4226_v4  }
 0x177   :  { %8244 = vst [vmem:[#allocation72_spill] sm:$0xff] %v4730_v17  ;;  %3968 = vset.pattern.permute.xlu1 %v8245_v24  ;;  %v4734_v19 = vpop.permute.xlu0 %890 }
 0x178   :  { %8246 = vst [vmem:[#allocation73_spill] sm:$0xff] %v4734_v19  ;;  %1082 = vperm.xlu1 %3968, %v4226_v4  }
 0x17a   :  { %v4737_v33 = vpop.permute.xlu1 %726  ;;  %1322 = vperm.xlu0 %3974, %v4232_v6  }
 0x17b   :  { %8247 = vst [vmem:[#allocation74_spill] sm:$0xff] %v4737_v33  ;;  %v4740_v35 = vpop.permute.xlu0 %898 }
 0x17c   :  { %8248 = vst [vmem:[#allocation75_spill] sm:$0xff] %v4740_v35  ;;  %1090 = vperm.xlu1 %3968, %v4224_v3  }
 0x17e   :  { %v4743_v28 = vpop.permute.xlu1 %734  ;;  %1330 = vperm.xlu0 %3974, %v4238_v8  }
 0x17f   :  { %8249 = vst [vmem:[#allocation76_spill] sm:$0xff] %v4743_v28 }
 0x180   :  { %1094 = vperm.xlu1 %3968, %v4232_v6   ;;  %v4747_v22 = vpop.permute.xlu0 %934 }
 0x181   :  { %8250 = vst [vmem:[#allocation77_spill] sm:$0xff] %v4747_v22 }
 0x182   :  { %v4749_v24 = vpop.permute.xlu1 %742  ;;  %1338 = vperm.xlu0 %3974, %v4244_v10  }
 0x183   :  { %8251 = vst [vmem:[#allocation78_spill] sm:$0xff] %v4749_v24  ;;  %v8092_v24 = vmov 17  }
 0x184   :  { %1102 = vperm.xlu1 %3968, %v4238_v8   ;;  %v4753_v19 = vpop.permute.xlu0 %946 }
 0x185   :  { %8252 = vst [vmem:[#allocation79_spill] sm:$0xff] %v4753_v19 }
 0x186   :  { %1346 = vperm.xlu0 %3974, %v4250_v12  }
 0x187   :  { %v4756_v35 = vpop.permute.xlu1 %778 }
 0x188   :  { %8253 = vst [vmem:[#allocation80_spill] sm:$0xff] %v4756_v35  ;;  %1110 = vperm.xlu1 %3968, %v4244_v10   ;;  %v4759_v28 = vpop.permute.xlu0 %954 }
 0x189   :  { %8254 = vst [vmem:[#allocation81_spill] sm:$0xff] %v4759_v28 }
 0x18a   :  { %1354 = vperm.xlu0 %3974, %v4254_v13  }
 0x18b   :  { %v4762_v33 = vpop.permute.xlu1 %786 }
 0x18c   :  { %8255 = vst [vmem:[#allocation82_spill] sm:$0xff] %v4762_v33  ;;  %1118 = vperm.xlu1 %3968, %v4250_v12   ;;  %v4765_v22 = vpop.permute.xlu0 %962  ;;  %v8260_v33 = vmov 14  }
 0x18d   :  { %8256 = vst [vmem:[#allocation83_spill] sm:$0xff] %v4765_v22 }
 0x18e   :  { %3977 = vset.pattern.permute.xlu0 %v8092_v24 }
 0x18f   :  { %v4768_v19 = vpop.permute.xlu1 %790  ;;  %1390 = vperm.xlu0 %3977, %v4221_v1  }
 0x190   :  { %8257 = vst [vmem:[#allocation84_spill] sm:$0xff] %v4768_v19  ;;  %1126 = vperm.xlu1 %3968, %v4254_v13   ;;  %v4772_v35 = vpop.permute.xlu0 %970 }
 0x191   :  { %8258 = vst [vmem:[#allocation85_spill] sm:$0xff] %v4772_v35 }
 0x193   :  { %v4774_v28 = vpop.permute.xlu1 %798  ;;  %1402 = vperm.xlu0 %3977, %v4230_v5  }
 0x194   :  { %8259 = vst [vmem:[#allocation86_spill] sm:$0xff] %v4774_v28  ;;  %3971 = vset.pattern.permute.xlu1 %v8260_v33 }
 0x195   :  { %1162 = vperm.xlu1 %3971, %v4221_v1   ;;  %v4779_v22 = vpop.permute.xlu0 %1006 }
 0x196   :  { %8261 = vst [vmem:[#allocation87_spill] sm:$0xff] %v4779_v22  ;;  %v8093_v22 = vmov 18  }
 0x197   :  { %v4781_v17 = vpop.permute.xlu1 %806  ;;  %1410 = vperm.xlu0 %3977, %v4236_v7  }
 0x198   :  { %8262 = vst [vmem:[#allocation88_spill] sm:$0xff] %v4781_v17 }
 0x199   :  { %1166 = vperm.xlu1 %3971, %v4224_v3   ;;  %v4785_v24 = vpop.permute.xlu0 %1018 }
 0x19a   :  { %8263 = vst [vmem:[#allocation89_spill] sm:$0xff] %v4785_v24 }
 0x19b   :  { %v4787_v19 = vpop.permute.xlu1 %814  ;;  %1418 = vperm.xlu0 %3977, %v4242_v9  }
 0x19c   :  { %8264 = vst [vmem:[#allocation90_spill] sm:$0xff] %v4787_v19 }
 0x19d   :  { %1174 = vperm.xlu1 %3971, %v4230_v5   ;;  %v4791_v28 = vpop.permute.xlu0 %1026 }
 0x19e   :  { %8265 = vst [vmem:[#allocation91_spill] sm:$0xff] %v4791_v28 }
 0x19f   :  { %v4793_v33 = vpop.permute.xlu1 %822  ;;  %1426 = vperm.xlu0 %3977, %v4248_v11  }
 0x1a0   :  { %8266 = vst [vmem:[#allocation92_spill] sm:$0xff] %v4793_v33 }
 0x1a1   :  { %1182 = vperm.xlu1 %3971, %v4236_v7   ;;  %v4797_v17 = vpop.permute.xlu0 %1034 }
 0x1a2   :  { %8267 = vst [vmem:[#allocation93_spill] sm:$0xff] %v4797_v17 }
 0x1a3   :  { %3978 = vset.pattern.permute.xlu0 %v8093_v22  ;;  %v8273_v22 = vmov 15  }
 0x1a4   :  { %v4800_v24 = vpop.permute.xlu1 %858  ;;  %1462 = vperm.xlu0 %3978, %v4226_v4  }
 0x1a5   :  { %8268 = vst [vmem:[#allocation94_spill] sm:$0xff] %v4800_v24  ;;  %1190 = vperm.xlu1 %3971, %v4242_v9   ;;  %v4804_v19 = vpop.permute.xlu0 %1042 }
 0x1a6   :  { %8269 = vst [vmem:[#allocation95_spill] sm:$0xff] %v4804_v19 }
 0x1a8   :  { %v4806_v28 = vpop.permute.xlu1 %862  ;;  %1474 = vperm.xlu0 %3978, %v4232_v6  }
 0x1a9   :  { %8270 = vst [vmem:[#allocation96_spill] sm:$0xff] %v4806_v28  ;;  %1198 = vperm.xlu1 %3971, %v4248_v11   ;;  %v4810_v33 = vpop.permute.xlu0 %1050 }
 0x1aa   :  { %8271 = vst [vmem:[#allocation97_spill] sm:$0xff] %v4810_v33 }
 0x1ac   :  { %v4812_v17 = vpop.permute.xlu1 %870  ;;  %1482 = vperm.xlu0 %3978, %v4238_v8  }
 0x1ad   :  { %8272 = vst [vmem:[#allocation98_spill] sm:$0xff] %v4812_v17  ;;  %3972 = vset.pattern.permute.xlu1 %v8273_v22  ;;  %v8097_v17 = vmov 22  }
 0x1ae   :  { %1234 = vperm.xlu1 %3972, %v4226_v4   ;;  %v4817_v35 = vpop.permute.xlu0 %1086 }
 0x1af   :  { %8274 = vst [vmem:[#allocation99_spill] sm:$0xff] %v4817_v35  ;;  %v8094_v35 = vmov 19  }
 0x1b0   :  { %v4819_v24 = vpop.permute.xlu1 %878  ;;  %1490 = vperm.xlu0 %3978, %v4244_v10  }
 0x1b1   :  { %8275 = vst [vmem:[#allocation100_spill] sm:$0xff] %v4819_v24  ;;  %v8096_v24 = vmov 21  }
 0x1b2   :  { %1242 = vperm.xlu1 %3972, %v4224_v3   ;;  %v4823_v19 = vpop.permute.xlu0 %1098 }
 0x1b3   :  { %8276 = vst [vmem:[#allocation101_spill] sm:$0xff] %v4823_v19  ;;  %v4909_v19 = vld [vmem:[#allocation4 + $0x50] sm:$0xff] }
 0x1b4   :  { %v4825_v28 = vpop.permute.xlu1 %886  ;;  %1498 = vperm.xlu0 %3978, %v4250_v12  }
 0x1b5   :  { %8277 = vst [vmem:[#allocation102_spill] sm:$0xff] %v4825_v28  ;;  %v4925_v28 = vld [vmem:[#allocation4 + $0x58] sm:$0xff] }
 0x1b6   :  { %1246 = vperm.xlu1 %3972, %v4232_v6   ;;  %v4829_v33 = vpop.permute.xlu0 %1106 }
 0x1b7   :  { %8278 = vst [vmem:[#allocation103_spill] sm:$0xff] %v4829_v33 }
 0x1b8   :  { %v4831_v22 = vpop.permute.xlu1 %894  ;;  %1506 = vperm.xlu0 %3978, %v4254_v13  }
 0x1b9   :  { %8279 = vst [vmem:[#allocation104_spill] sm:$0xff] %v4831_v22  ;;  %v8301_v22 = vmov 17  }
 0x1ba   :  { %1254 = vperm.xlu1 %3972, %v4238_v8   ;;  %v4835_v4 = vpop.permute.xlu0 %1114 }
 0x1bb   :  { %8280 = vst [vmem:[#allocation105_spill] sm:$0xff] %v4835_v4 }
 0x1bc   :  { %3981 = vset.pattern.permute.xlu0 %v8094_v35 }
 0x1bd   :  { %v4838_v3 = vpop.permute.xlu1 %930  ;;  %1542 = vperm.xlu0 %3981, %v4221_v1  }
 0x1be   :  { %8281 = vst [vmem:[#allocation106_spill] sm:$0xff] %v4838_v3  ;;  %1262 = vperm.xlu1 %3972, %v4244_v10   ;;  %v4842_v6 = vpop.permute.xlu0 %1122  ;;  %v8288_v10 = vmov 16   ;;  %v4906_v3 = vld [vmem:[#allocation4 + $0x38] sm:$0xff] }
 0x1bf   :  { %8282 = vst [vmem:[#allocation107_spill] sm:$0xff] %v4842_v6  ;;  %v4860_v6 = vld [vmem:[#allocation4 + $0x8] sm:$0xff] }
 0x1c1   :  { %v4844_v33 = vpop.permute.xlu1 %938  ;;  %1554 = vperm.xlu0 %3981, %v4230_v5  }
 0x1c2   :  { %8283 = vst [vmem:[#allocation108_spill] sm:$0xff] %v4844_v33  ;;  %1270 = vperm.xlu1 %3972, %v4250_v12   ;;  %v4916_v33 = vld [vmem:[#allocation4 + $0x48] sm:$0xff] }
 0x1c3   :  { %v4848_v8 = vpop.permute.xlu0 %1158 }
 0x1c4   :  { %8284 = vst [vmem:[#allocation109_spill] sm:$0xff] %v4848_v8  ;;  %v4899_v8 = vld [vmem:[#allocation4 + $0x40] sm:$0xff] }
 0x1c5   :  { %v4850_v4 = vpop.permute.xlu1 %942  ;;  %1562 = vperm.xlu0 %3981, %v4236_v7   ;;  %v4868_v7 = vld [vmem:[#allocation4 + $0x10] sm:$0xff] }
 0x1c6   :  { %8285 = vst [vmem:[#allocation110_spill] sm:$0xff] %v4850_v4  ;;  %1278 = vperm.xlu1 %3972, %v4254_v13   ;;  %v4896_v4 = vld [vmem:[#allocation4 + $0x28] sm:$0xff] }
 0x1c7   :  { %v4854_v35 = vpop.permute.xlu0 %1170 }
 0x1c8   :  { %8286 = vst [vmem:[#allocation111_spill] sm:$0xff] %v4854_v35  ;;  %v4886_v35 = vld [vmem:[#allocation4 + $0x18] sm:$0xff] }
 0x1c9   :  { %v4856_v1 = vpop.permute.xlu1 %950  ;;  %1570 = vperm.xlu0 %3981, %v4242_v9   ;;  %v8095_v9 = vmov 20  }
 0x1ca   :  { %8287 = vst [vmem:[#allocation112_spill] sm:$0xff] %v4856_v1  ;;  %3975 = vset.pattern.permute.xlu1 %v8288_v10  ;;  %v4876_v10 = vld [vmem:[#allocation4] sm:$0xff] }
 0x1cb   :  { %1314 = vperm.xlu1 %3975, %v4860_v6   ;;  %v4863_v5 = vpop.permute.xlu0 %1178 }
 0x1cc   :  { %8289 = vst [vmem:[#allocation113_spill] sm:$0xff] %v4863_v5  ;;  %v4879_v5 = vld [vmem:[#allocation4 + $0x20] sm:$0xff] }
 0x1cd   :  { %v4865_v12 = vpop.permute.xlu1 %958  ;;  %1578 = vperm.xlu0 %3981, %v4248_v11  }
 0x1ce   :  { %8290 = vst [vmem:[#allocation114_spill] sm:$0xff] %v4865_v12 }
 0x1cf   :  { %1318 = vperm.xlu1 %3975, %v4868_v7   ;;  %v4871_v13 = vpop.permute.xlu0 %1186 }
 0x1d0   :  { %8291 = vst [vmem:[#allocation115_spill] sm:$0xff] %v4871_v13 }
 0x1d1   :  { %v4873_v1 = vpop.permute.xlu1 %966  ;;  %3982 = vset.pattern.permute.xlu0 %v8095_v9 }
 0x1d2   :  { %8292 = vst [vmem:[#allocation116_spill] sm:$0xff] %v4873_v1  ;;  %1614 = vperm.xlu0 %3982, %v4876_v10   ;;  %v4889_v1 = vld [vmem:[#allocation4 + $0x30] sm:$0xff] }
 0x1d3   :  { %1326 = vperm.xlu1 %3975, %v4879_v5   ;;  %v4882_v11 = vpop.permute.xlu0 %1194 }
 0x1d4   :  { %8293 = vst [vmem:[#allocation117_spill] sm:$0xff] %v4882_v11 }
 0x1d5   :  { %v4884_v12 = vpop.permute.xlu1 %974 }
 0x1d6   :  { %8294 = vst [vmem:[#allocation118_spill] sm:$0xff] %v4884_v12  ;;  %1626 = vperm.xlu0 %3982, %v4886_v35  }
 0x1d7   :  { %1334 = vperm.xlu1 %3975, %v4889_v1   ;;  %v4892_v9 = vpop.permute.xlu0 %1202 }
 0x1d8   :  { %8295 = vst [vmem:[#allocation119_spill] sm:$0xff] %v4892_v9 }
 0x1da   :  { %v4894_v13 = vpop.permute.xlu1 %1010  ;;  %1634 = vperm.xlu0 %3982, %v4896_v4  }
 0x1db   :  { %8296 = vst [vmem:[#allocation120_spill] sm:$0xff] %v4894_v13  ;;  %1342 = vperm.xlu1 %3975, %v4899_v8  }
 0x1dc   :  { %v4902_v12 = vpop.permute.xlu0 %1238 }
 0x1dd   :  { %8297 = vst [vmem:[#allocation121_spill] sm:$0xff] %v4902_v12 }
 0x1de   :  { %v4904_v11 = vpop.permute.xlu1 %1014  ;;  %1642 = vperm.xlu0 %3982, %v4906_v3  }
 0x1df   :  { %8298 = vst [vmem:[#allocation122_spill] sm:$0xff] %v4904_v11  ;;  %1350 = vperm.xlu1 %3975, %v4909_v19  }
 0x1e0   :  { %v4912_v9 = vpop.permute.xlu0 %1250 }
 0x1e1   :  { %8299 = vst [vmem:[#allocation123_spill] sm:$0xff] %v4912_v9 }
 0x1e2   :  { %v4914_v13 = vpop.permute.xlu1 %1022  ;;  %1650 = vperm.xlu0 %3982, %v4916_v33  }
 0x1e3   :  { %8300 = vst [vmem:[#allocation124_spill] sm:$0xff] %v4914_v13  ;;  %3976 = vset.pattern.permute.xlu1 %v8301_v22 }
 0x1e4   :  { %1386 = vperm.xlu1 %3976, %v4876_v10   ;;  %v4921_v12 = vpop.permute.xlu0 %1258 }
 0x1e5   :  { %8302 = vst [vmem:[#allocation125_spill] sm:$0xff] %v4921_v12 }
 0x1e6   :  { %v4923_v11 = vpop.permute.xlu1 %1030  ;;  %1658 = vperm.xlu0 %3982, %v4925_v28  }
 0x1e7   :  { %8303 = vst [vmem:[#allocation126_spill] sm:$0xff] %v4923_v11 }
 0x1e8   :  { %1394 = vperm.xlu1 %3976, %v4868_v7   ;;  %v4929_v9 = vpop.permute.xlu0 %1266 }
 0x1e9   :  { %8304 = vst [vmem:[#allocation127_spill] sm:$0xff] %v4929_v9 }
 0x1ea   :  { %v4931_v13 = vpop.permute.xlu1 %1038  ;;  %3985 = vset.pattern.permute.xlu0 %v8096_v24 }
 0x1eb   :  { %8305 = vst [vmem:[#allocation128_spill] sm:$0xff] %v4931_v13  ;;  %1694 = vperm.xlu0 %3985, %v4860_v6  }
 0x1ec   :  { %1398 = vperm.xlu1 %3976, %v4886_v35   ;;  %v4936_v22 = vpop.permute.xlu0 %1274 }
 0x1ed   :  { %8306 = vst [vmem:[#allocation129_spill] sm:$0xff] %v4936_v22 }
 0x1ee   :  { %v4938_v12 = vpop.permute.xlu1 %1046 }
 0x1ef   :  { %8307 = vst [vmem:[#allocation130_spill] sm:$0xff] %v4938_v12  ;;  %1706 = vperm.xlu0 %3985, %v4879_v5  }
 0x1f0   :  { %1406 = vperm.xlu1 %3976, %v4896_v4  }
 0x1f1   :  { %v4942_v11 = vpop.permute.xlu0 %1310 }
 0x1f2   :  { %8308 = vst [vmem:[#allocation131_spill] sm:$0xff] %v4942_v11 }
 0x1f3   :  { %v4944_v9 = vpop.permute.xlu1 %1082  ;;  %1714 = vperm.xlu0 %3985, %v4889_v1  }
 0x1f4   :  { %8309 = vst [vmem:[#allocation132_spill] sm:$0xff] %v4944_v9  ;;  %1414 = vperm.xlu1 %3976, %v4906_v3  }
 0x1f5   :  { %v4948_v24 = vpop.permute.xlu0 %1322 }
 0x1f6   :  { %8310 = vst [vmem:[#allocation133_spill] sm:$0xff] %v4948_v24  ;;  %v8316_v24 = vmov 18  }
 0x1f7   :  { %v4950_v13 = vpop.permute.xlu1 %1090  ;;  %1722 = vperm.xlu0 %3985, %v4899_v8  }
 0x1f8   :  { %8311 = vst [vmem:[#allocation134_spill] sm:$0xff] %v4950_v13  ;;  %1422 = vperm.xlu1 %3976, %v4916_v33   ;;  %v8098_v13 = vmov 23  }
 0x1f9   :  { %v4954_v22 = vpop.permute.xlu0 %1330 }
 0x1fa   :  { %8312 = vst [vmem:[#allocation135_spill] sm:$0xff] %v4954_v22 }
 0x1fb   :  { %v4956_v12 = vpop.permute.xlu1 %1094  ;;  %1730 = vperm.xlu0 %3985, %v4909_v19  }
 0x1fc   :  { %8313 = vst [vmem:[#allocation136_spill] sm:$0xff] %v4956_v12  ;;  %1430 = vperm.xlu1 %3976, %v4925_v28  }
 0x1fd   :  { %v4960_v9 = vpop.permute.xlu0 %1338 }
 0x1fe   :  { %8314 = vst [vmem:[#allocation137_spill] sm:$0xff] %v4960_v9 }
 0x1ff   :  { %v4962_v11 = vpop.permute.xlu1 %1102  ;;  %3986 = vset.pattern.permute.xlu0 %v8097_v17 }
 0x200   :  { %8315 = vst [vmem:[#allocation138_spill] sm:$0xff] %v4962_v11  ;;  %3979 = vset.pattern.permute.xlu1 %v8316_v24  ;;  %1766 = vperm.xlu0 %3986, %v4876_v10  }
 0x201   :  { %1466 = vperm.xlu1 %3979, %v4860_v6   ;;  %v4968_v22 = vpop.permute.xlu0 %1346 }
 0x202   :  { %8317 = vst [vmem:[#allocation139_spill] sm:$0xff] %v4968_v22 }
 0x203   :  { %v4970_v12 = vpop.permute.xlu1 %1110 }
 0x204   :  { %8318 = vst [vmem:[#allocation140_spill] sm:$0xff] %v4970_v12  ;;  %1778 = vperm.xlu0 %3986, %v4886_v35  }
 0x205   :  { %1470 = vperm.xlu1 %3979, %v4868_v7   ;;  %v4974_v9 = vpop.permute.xlu0 %1354 }
 0x206   :  { %8319 = vst [vmem:[#allocation141_spill] sm:$0xff] %v4974_v9 }
 0x207   :  { %v4976_v11 = vpop.permute.xlu1 %1118 }
 0x208   :  { %8320 = vst [vmem:[#allocation142_spill] sm:$0xff] %v4976_v11  ;;  %1786 = vperm.xlu0 %3986, %v4896_v4  }
 0x209   :  { %1478 = vperm.xlu1 %3979, %v4879_v5  }
 0x20a   :  { %v4980_v24 = vpop.permute.xlu0 %1390 }
 0x20b   :  { %8321 = vst [vmem:[#allocation143_spill] sm:$0xff] %v4980_v24  ;;  %v4982_v17 = vpop.permute.xlu1 %1126 }
 0x20c   :  { %8322 = vst [vmem:[#allocation144_spill] sm:$0xff] %v4982_v17  ;;  %1794 = vperm.xlu0 %3986, %v4906_v3  }
 0x20d   :  { %1486 = vperm.xlu1 %3979, %v4889_v1  }
 0x20e   :  { %v4986_v12 = vpop.permute.xlu0 %1402 }
 0x20f   :  { %8323 = vst [vmem:[#allocation145_spill] sm:$0xff] %v4986_v12  ;;  %v8329_v12 = vmov 19  }
 0x210   :  { %v4988_v22 = vpop.permute.xlu1 %1162  ;;  %1802 = vperm.xlu0 %3986, %v4916_v33  }
 0x211   :  { %8324 = vst [vmem:[#allocation146_spill] sm:$0xff] %v4988_v22  ;;  %1494 = vperm.xlu1 %3979, %v4899_v8   ;;  %v8099_v22 = vmov 24  }
 0x212   :  { %v4992_v11 = vpop.permute.xlu0 %1410 }
 0x213   :  { %8325 = vst [vmem:[#allocation147_spill] sm:$0xff] %v4992_v11 }
 0x214   :  { %v4994_v9 = vpop.permute.xlu1 %1166  ;;  %1810 = vperm.xlu0 %3986, %v4925_v28  }
 0x215   :  { %8326 = vst [vmem:[#allocation148_spill] sm:$0xff] %v4994_v9  ;;  %1502 = vperm.xlu1 %3979, %v4909_v19  }
 0x216   :  { %v4998_v17 = vpop.permute.xlu0 %1418 }
 0x217   :  { %8327 = vst [vmem:[#allocation149_spill] sm:$0xff] %v4998_v17 }
 0x218   :  { %v5000_v24 = vpop.permute.xlu1 %1174  ;;  %3989 = vset.pattern.permute.xlu0 %v8098_v13 }
 0x219   :  { %8328 = vst [vmem:[#allocation150_spill] sm:$0xff] %v5000_v24  ;;  %3980 = vset.pattern.permute.xlu1 %v8329_v12  ;;  %1846 = vperm.xlu0 %3989, %v4860_v6  }
 0x21a   :  { %1538 = vperm.xlu1 %3980, %v4876_v10   ;;  %v5006_v11 = vpop.permute.xlu0 %1426 }
 0x21b   :  { %8330 = vst [vmem:[#allocation151_spill] sm:$0xff] %v5006_v11 }
 0x21c   :  { %v5008_v9 = vpop.permute.xlu1 %1182 }
 0x21d   :  { %8331 = vst [vmem:[#allocation152_spill] sm:$0xff] %v5008_v9  ;;  %1858 = vperm.xlu0 %3989, %v4879_v5  }
 0x21e   :  { %1546 = vperm.xlu1 %3980, %v4868_v7  }
 0x21f   :  { %v5012_v17 = vpop.permute.xlu0 %1462 }
 0x220   :  { %8332 = vst [vmem:[#allocation153_spill] sm:$0xff] %v5012_v17  ;;  %v5014_v24 = vpop.permute.xlu1 %1190 }
 0x221   :  { %8333 = vst [vmem:[#allocation154_spill] sm:$0xff] %v5014_v24  ;;  %1866 = vperm.xlu0 %3989, %v4889_v1  }
 0x222   :  { %1550 = vperm.xlu1 %3980, %v4886_v35  }
 0x223   :  { %v5018_v12 = vpop.permute.xlu0 %1474 }
 0x224   :  { %8334 = vst [vmem:[#allocation155_spill] sm:$0xff] %v5018_v12  ;;  %v5020_v13 = vpop.permute.xlu1 %1198 }
 0x225   :  { %8335 = vst [vmem:[#allocation156_spill] sm:$0xff] %v5020_v13  ;;  %1874 = vperm.xlu0 %3989, %v4899_v8  }
 0x226   :  { %1558 = vperm.xlu1 %3980, %v4896_v4  }
 0x227   :  { %v5024_v11 = vpop.permute.xlu0 %1482 }
 0x228   :  { %8336 = vst [vmem:[#allocation157_spill] sm:$0xff] %v5024_v11 }
 0x229   :  { %v5026_v9 = vpop.permute.xlu1 %1234  ;;  %1882 = vperm.xlu0 %3989, %v4909_v19  }
 0x22a   :  { %8337 = vst [vmem:[#allocation158_spill] sm:$0xff] %v5026_v9  ;;  %1566 = vperm.xlu1 %3980, %v4906_v3  }
 0x22b   :  { %v5030_v17 = vpop.permute.xlu0 %1490 }
 0x22c   :  { %8338 = vst [vmem:[#allocation159_spill] sm:$0xff] %v5030_v17 }
 0x22d   :  { %v5032_v24 = vpop.permute.xlu1 %1242  ;;  %3990 = vset.pattern.permute.xlu0 %v8099_v22 }
 0x22e   :  { %8339 = vst [vmem:[#allocation160_spill] sm:$0xff] %v5032_v24  ;;  %1574 = vperm.xlu1 %3980, %v4916_v33   ;;  %1918 = vperm.xlu0 %3990, %v4876_v10   ;;  %v8344_v24 = vmov 20  }
 0x22f   :  { %v5037_v12 = vpop.permute.xlu0 %1498 }
 0x230   :  { %8340 = vst [vmem:[#allocation161_spill] sm:$0xff] %v5037_v12 }
 0x231   :  { %v5039_v11 = vpop.permute.xlu1 %1246 }
 0x232   :  { %8341 = vst [vmem:[#allocation162_spill] sm:$0xff] %v5039_v11  ;;  %1582 = vperm.xlu1 %3980, %v4925_v28   ;;  %1930 = vperm.xlu0 %3990, %v4886_v35  }
 0x233   :  { %v5043_v9 = vpop.permute.xlu0 %1506 }
 0x234   :  { %8342 = vst [vmem:[#allocation163_spill] sm:$0xff] %v5043_v9  ;;  %v8100_v9 = vmov 25  }
 0x235   :  { %v5045_v17 = vpop.permute.xlu1 %1254 }
 0x236   :  { %8343 = vst [vmem:[#allocation164_spill] sm:$0xff] %v5045_v17  ;;  %3983 = vset.pattern.permute.xlu1 %v8344_v24  ;;  %1938 = vperm.xlu0 %3990, %v4896_v4  }
 0x237   :  { %1618 = vperm.xlu1 %3983, %v4860_v6  }
 0x238   :  { %v5050_v22 = vpop.permute.xlu0 %1542 }
 0x239   :  { %8345 = vst [vmem:[#allocation165_spill] sm:$0xff] %v5050_v22  ;;  %v5052_v13 = vpop.permute.xlu1 %1262 }
 0x23a   :  { %8346 = vst [vmem:[#allocation166_spill] sm:$0xff] %v5052_v13  ;;  %1946 = vperm.xlu0 %3990, %v4906_v3  }
 0x23b   :  { %1622 = vperm.xlu1 %3983, %v4868_v7  }
 0x23c   :  { %v5056_v11 = vpop.permute.xlu0 %1554 }
 0x23d   :  { %8347 = vst [vmem:[#allocation167_spill] sm:$0xff] %v5056_v11  ;;  %v5058_v12 = vpop.permute.xlu1 %1270  ;;  %v8357_v11 = vmov 21  }
 0x23e   :  { %8348 = vst [vmem:[#allocation168_spill] sm:$0xff] %v5058_v12  ;;  %1954 = vperm.xlu0 %3990, %v4916_v33  }
 0x23f   :  { %1630 = vperm.xlu1 %3983, %v4879_v5  }
 0x240   :  { %v5062_v24 = vpop.permute.xlu0 %1562 }
 0x241   :  { %8349 = vst [vmem:[#allocation169_spill] sm:$0xff] %v5062_v24  ;;  %v5064_v17 = vpop.permute.xlu1 %1278 }
 0x242   :  { %8350 = vst [vmem:[#allocation170_spill] sm:$0xff] %v5064_v17  ;;  %1962 = vperm.xlu0 %3990, %v4925_v28  }
 0x243   :  { %1638 = vperm.xlu1 %3983, %v4889_v1  }
 0x244   :  { %v5068_v13 = vpop.permute.xlu0 %1570 }
 0x245   :  { %8351 = vst [vmem:[#allocation171_spill] sm:$0xff] %v5068_v13 }
 0x246   :  { %v5070_v22 = vpop.permute.xlu1 %1314  ;;  %3993 = vset.pattern.permute.xlu0 %v8100_v9 }
 0x247   :  { %8352 = vst [vmem:[#allocation172_spill] sm:$0xff] %v5070_v22  ;;  %1646 = vperm.xlu1 %3983, %v4899_v8   ;;  %1998 = vperm.xlu0 %3993, %v4860_v6  }
 0x248   :  { %v5075_v12 = vpop.permute.xlu0 %1578 }
 0x249   :  { %8353 = vst [vmem:[#allocation173_spill] sm:$0xff] %v5075_v12 }
 0x24a   :  { %v5077_v24 = vpop.permute.xlu1 %1318 }
 0x24b   :  { %8354 = vst [vmem:[#allocation174_spill] sm:$0xff] %v5077_v24  ;;  %1654 = vperm.xlu1 %3983, %v4909_v19   ;;  %2010 = vperm.xlu0 %3993, %v4879_v5  }
 0x24d   :  { %v5081_v17 = vpop.permute.xlu0 %1614 }
 0x24e   :  { %8355 = vst [vmem:[#allocation175_spill] sm:$0xff] %v5081_v17  ;;  %v5083_v13 = vpop.permute.xlu1 %1326 }
 0x24f   :  { %8356 = vst [vmem:[#allocation176_spill] sm:$0xff] %v5083_v13  ;;  %3984 = vset.pattern.permute.xlu1 %v8357_v11  ;;  %2018 = vperm.xlu0 %3993, %v4889_v1   ;;  %v8101_v13 = vmov 26  }
 0x250   :  { %1690 = vperm.xlu1 %3984, %v4876_v10  }
 0x251   :  { %v5088_v9 = vpop.permute.xlu0 %1626 }
 0x252   :  { %8358 = vst [vmem:[#allocation177_spill] sm:$0xff] %v5088_v9  ;;  %v5090_v22 = vpop.permute.xlu1 %1334  ;;  %v8372_v9 = vmov 22  }
 0x253   :  { %8359 = vst [vmem:[#allocation178_spill] sm:$0xff] %v5090_v22  ;;  %2026 = vperm.xlu0 %3993, %v4899_v8  }
 0x254   :  { %1698 = vperm.xlu1 %3984, %v4868_v7  }
 0x255   :  { %v5094_v12 = vpop.permute.xlu0 %1634 }
 0x256   :  { %8360 = vst [vmem:[#allocation179_spill] sm:$0xff] %v5094_v12  ;;  %v5096_v24 = vpop.permute.xlu1 %1342 }
 0x257   :  { %8361 = vst [vmem:[#allocation180_spill] sm:$0xff] %v5096_v24  ;;  %2034 = vperm.xlu0 %3993, %v4909_v19  }
 0x258   :  { %1702 = vperm.xlu1 %3984, %v4886_v35  }
 0x259   :  { %v5100_v11 = vpop.permute.xlu0 %1642 }
 0x25a   :  { %8362 = vst [vmem:[#allocation181_spill] sm:$0xff] %v5100_v11  ;;  %v5102_v17 = vpop.permute.xlu1 %1350 }
 0x25b   :  { %8363 = vst [vmem:[#allocation182_spill] sm:$0xff] %v5102_v17  ;;  %3994 = vset.pattern.permute.xlu0 %v8101_v13 }
 0x25c   :  { %1710 = vperm.xlu1 %3984, %v4896_v4   ;;  %2070 = vperm.xlu0 %3994, %v4876_v10  }
 0x25d   :  { %v5107_v22 = vpop.permute.xlu0 %1650 }
 0x25e   :  { %8364 = vst [vmem:[#allocation183_spill] sm:$0xff] %v5107_v22 }
 0x25f   :  { %v5109_v12 = vpop.permute.xlu1 %1386 }
 0x260   :  { %8365 = vst [vmem:[#allocation184_spill] sm:$0xff] %v5109_v12  ;;  %1718 = vperm.xlu1 %3984, %v4906_v3   ;;  %2082 = vperm.xlu0 %3994, %v4886_v35  }
 0x261   :  { %v5113_v24 = vpop.permute.xlu0 %1658 }
 0x262   :  { %8366 = vst [vmem:[#allocation185_spill] sm:$0xff] %v5113_v24 }
 0x263   :  { %v5115_v11 = vpop.permute.xlu1 %1394 }
 0x264   :  { %8367 = vst [vmem:[#allocation186_spill] sm:$0xff] %v5115_v11  ;;  %1726 = vperm.xlu1 %3984, %v4916_v33   ;;  %2090 = vperm.xlu0 %3994, %v4896_v4  }
 0x266   :  { %v5119_v13 = vpop.permute.xlu0 %1694 }
 0x267   :  { %8368 = vst [vmem:[#allocation187_spill] sm:$0xff] %v5119_v13  ;;  %v5121_v17 = vpop.permute.xlu1 %1398 }
 0x268   :  { %8369 = vst [vmem:[#allocation188_spill] sm:$0xff] %v5121_v17  ;;  %1734 = vperm.xlu1 %3984, %v4925_v28   ;;  %2098 = vperm.xlu0 %3994, %v4906_v3  }
 0x26a   :  { %v5125_v12 = vpop.permute.xlu0 %1706 }
 0x26b   :  { %8370 = vst [vmem:[#allocation189_spill] sm:$0xff] %v5125_v12  ;;  %v5127_v22 = vpop.permute.xlu1 %1406  ;;  %v8102_v12 = vmov 27  }
 0x26c   :  { %8371 = vst [vmem:[#allocation190_spill] sm:$0xff] %v5127_v22  ;;  %3987 = vset.pattern.permute.xlu1 %v8372_v9  ;;  %2106 = vperm.xlu0 %3994, %v4916_v33   ;;  %v8385_v22 = vmov 23  }
 0x26d   :  { %1770 = vperm.xlu1 %3987, %v4860_v6  }
 0x26e   :  { %v5132_v11 = vpop.permute.xlu0 %1714 }
 0x26f   :  { %8373 = vst [vmem:[#allocation191_spill] sm:$0xff] %v5132_v11  ;;  %v5134_v24 = vpop.permute.xlu1 %1414 }
 0x270   :  { %8374 = vst [vmem:[#allocation192_spill] sm:$0xff] %v5134_v24  ;;  %2114 = vperm.xlu0 %3994, %v4925_v28  }
 0x271   :  { %1774 = vperm.xlu1 %3987, %v4868_v7  }
 0x272   :  { %v5138_v17 = vpop.permute.xlu0 %1722 }
 0x273   :  { %8375 = vst [vmem:[#allocation193_spill] sm:$0xff] %v5138_v17  ;;  %v5140_v13 = vpop.permute.xlu1 %1422 }
 0x274   :  { %8376 = vst [vmem:[#allocation194_spill] sm:$0xff] %v5140_v13  ;;  %3997 = vset.pattern.permute.xlu0 %v8102_v12 }
 0x275   :  { %1782 = vperm.xlu1 %3987, %v4879_v5   ;;  %2150 = vperm.xlu0 %3997, %v4860_v6  }
 0x276   :  { %v5145_v9 = vpop.permute.xlu0 %1730 }
 0x277   :  { %8377 = vst [vmem:[#allocation195_spill] sm:$0xff] %v5145_v9  ;;  %v5147_v11 = vpop.permute.xlu1 %1430 }
 0x278   :  { %8378 = vst [vmem:[#allocation196_spill] sm:$0xff] %v5147_v11 }
 0x279   :  { %1790 = vperm.xlu1 %3987, %v4889_v1   ;;  %2162 = vperm.xlu0 %3997, %v4879_v5  }
 0x27b   :  { %v5151_v24 = vpop.permute.xlu0 %1766 }
 0x27c   :  { %8379 = vst [vmem:[#allocation197_spill] sm:$0xff] %v5151_v24  ;;  %v5153_v17 = vpop.permute.xlu1 %1466 }
 0x27d   :  { %8380 = vst [vmem:[#allocation198_spill] sm:$0xff] %v5153_v17  ;;  %1798 = vperm.xlu1 %3987, %v4899_v8   ;;  %2170 = vperm.xlu0 %3997, %v4889_v1  }
 0x27f   :  { %v5157_v12 = vpop.permute.xlu0 %1778 }
 0x280   :  { %8381 = vst [vmem:[#allocation199_spill] sm:$0xff] %v5157_v12  ;;  %v5159_v13 = vpop.permute.xlu1 %1470  ;;  %v8103_v12 = vmov 28  }
 0x281   :  { %8382 = vst [vmem:[#allocation200_spill] sm:$0xff] %v5159_v13  ;;  %1806 = vperm.xlu1 %3987, %v4909_v19   ;;  %2178 = vperm.xlu0 %3997, %v4899_v8  }
 0x283   :  { %v5163_v9 = vpop.permute.xlu0 %1786 }
 0x284   :  { %8383 = vst [vmem:[#allocation201_spill] sm:$0xff] %v5163_v9  ;;  %v5165_v11 = vpop.permute.xlu1 %1478 }
 0x285   :  { %8384 = vst [vmem:[#allocation202_spill] sm:$0xff] %v5165_v11  ;;  %3988 = vset.pattern.permute.xlu1 %v8385_v22  ;;  %2186 = vperm.xlu0 %3997, %v4909_v19   ;;  %v8400_v11 = vmov 24  }
 0x286   :  { %1842 = vperm.xlu1 %3988, %v4876_v10  }
 0x287   :  { %v5170_v24 = vpop.permute.xlu0 %1794 }
 0x288   :  { %8386 = vst [vmem:[#allocation203_spill] sm:$0xff] %v5170_v24  ;;  %v5172_v17 = vpop.permute.xlu1 %1486 }
 0x289   :  { %8387 = vst [vmem:[#allocation204_spill] sm:$0xff] %v5172_v17  ;;  %3998 = vset.pattern.permute.xlu0 %v8103_v12 }
 0x28a   :  { %1850 = vperm.xlu1 %3988, %v4868_v7   ;;  %2222 = vperm.xlu0 %3998, %v4876_v10  }
 0x28b   :  { %v5177_v13 = vpop.permute.xlu0 %1802 }
 0x28c   :  { %8388 = vst [vmem:[#allocation205_spill] sm:$0xff] %v5177_v13  ;;  %v5179_v9 = vpop.permute.xlu1 %1494 }
 0x28d   :  { %8389 = vst [vmem:[#allocation206_spill] sm:$0xff] %v5179_v9 }
 0x28e   :  { %1854 = vperm.xlu1 %3988, %v4886_v35   ;;  %2234 = vperm.xlu0 %3998, %v4886_v35  }
 0x28f   :  { %v5183_v22 = vpop.permute.xlu0 %1810 }
 0x290   :  { %8390 = vst [vmem:[#allocation207_spill] sm:$0xff] %v5183_v22  ;;  %v5185_v24 = vpop.permute.xlu1 %1502 }
 0x291   :  { %8391 = vst [vmem:[#allocation208_spill] sm:$0xff] %v5185_v24 }
 0x292   :  { %1862 = vperm.xlu1 %3988, %v4896_v4   ;;  %2242 = vperm.xlu0 %3998, %v4896_v4  }
 0x294   :  { %v5189_v12 = vpop.permute.xlu0 %1846 }
 0x295   :  { %8392 = vst [vmem:[#allocation209_spill] sm:$0xff] %v5189_v12  ;;  %v5191_v17 = vpop.permute.xlu1 %1538 }
 0x296   :  { %8393 = vst [vmem:[#allocation210_spill] sm:$0xff] %v5191_v17  ;;  %1870 = vperm.xlu1 %3988, %v4906_v3   ;;  %2250 = vperm.xlu0 %3998, %v4906_v3  }
 0x298   :  { %v5195_v9 = vpop.permute.xlu0 %1858 }
 0x299   :  { %8394 = vst [vmem:[#allocation211_spill] sm:$0xff] %v5195_v9  ;;  %v5197_v13 = vpop.permute.xlu1 %1546  ;;  %v8104_v9 = vmov 29  }
 0x29a   :  { %8395 = vst [vmem:[#allocation212_spill] sm:$0xff] %v5197_v13  ;;  %1878 = vperm.xlu1 %3988, %v4916_v33   ;;  %2258 = vperm.xlu0 %3998, %v4916_v33  }
 0x29c   :  { %v5201_v24 = vpop.permute.xlu0 %1866 }
 0x29d   :  { %8396 = vst [vmem:[#allocation213_spill] sm:$0xff] %v5201_v24  ;;  %v5203_v22 = vpop.permute.xlu1 %1550 }
 0x29e   :  { %8397 = vst [vmem:[#allocation214_spill] sm:$0xff] %v5203_v22  ;;  %1886 = vperm.xlu1 %3988, %v4925_v28   ;;  %2266 = vperm.xlu0 %3998, %v4925_v28   ;;  %v8413_v22 = vmov 25  }
 0x2a0   :  { %v5207_v17 = vpop.permute.xlu0 %1874 }
 0x2a1   :  { %8398 = vst [vmem:[#allocation215_spill] sm:$0xff] %v5207_v17  ;;  %v5209_v12 = vpop.permute.xlu1 %1558 }
 0x2a2   :  { %8399 = vst [vmem:[#allocation216_spill] sm:$0xff] %v5209_v12  ;;  %3991 = vset.pattern.permute.xlu1 %v8400_v11  ;;  %4001 = vset.pattern.permute.xlu0 %v8104_v9 }
 0x2a3   :  { %1922 = vperm.xlu1 %3991, %v4860_v6   ;;  %2302 = vperm.xlu0 %4001, %v4860_v6  }
 0x2a4   :  { %v5215_v24 = vpop.permute.xlu0 %1882 }
 0x2a5   :  { %8401 = vst [vmem:[#allocation217_spill] sm:$0xff] %v5215_v24  ;;  %v5217_v13 = vpop.permute.xlu1 %1566 }
 0x2a6   :  { %8402 = vst [vmem:[#allocation218_spill] sm:$0xff] %v5217_v13 }
 0x2a7   :  { %1926 = vperm.xlu1 %3991, %v4868_v7   ;;  %2314 = vperm.xlu0 %4001, %v4879_v5  }
 0x2a9   :  { %v5221_v17 = vpop.permute.xlu1 %1574  ;;  %v5223_v12 = vpop.permute.xlu0 %1918 }
 0x2aa   :  { %8403 = vst [vmem:[#allocation219_spill] sm:$0xff] %v5221_v17  ;;  %8404 = vst [vmem:[#allocation220_spill] sm:$0xff] %v5223_v12 }
 0x2ab   :  { %1934 = vperm.xlu1 %3991, %v4879_v5   ;;  %2322 = vperm.xlu0 %4001, %v4889_v1  }
 0x2ad   :  { %v5227_v11 = vpop.permute.xlu1 %1582  ;;  %v5229_v9 = vpop.permute.xlu0 %1930 }
 0x2ae   :  { %8405 = vst [vmem:[#allocation221_spill] sm:$0xff] %v5227_v11  ;;  %8406 = vst [vmem:[#allocation222_spill] sm:$0xff] %v5229_v9  ;;  %v8105_v11 = vmov 30  }
 0x2af   :  { %1942 = vperm.xlu1 %3991, %v4889_v1   ;;  %2330 = vperm.xlu0 %4001, %v4899_v8  }
 0x2b1   :  { %v5233_v24 = vpop.permute.xlu0 %1938 }
 0x2b2   :  { %8407 = vst [vmem:[#allocation223_spill] sm:$0xff] %v5233_v24  ;;  %v5235_v13 = vpop.permute.xlu1 %1618 }
 0x2b3   :  { %8408 = vst [vmem:[#allocation224_spill] sm:$0xff] %v5235_v13  ;;  %1950 = vperm.xlu1 %3991, %v4899_v8   ;;  %2338 = vperm.xlu0 %4001, %v4909_v19  }
 0x2b5   :  { %v5239_v12 = vpop.permute.xlu0 %1946 }
 0x2b6   :  { %8409 = vst [vmem:[#allocation225_spill] sm:$0xff] %v5239_v12  ;;  %v5241_v17 = vpop.permute.xlu1 %1622 }
 0x2b7   :  { %8410 = vst [vmem:[#allocation226_spill] sm:$0xff] %v5241_v17  ;;  %1958 = vperm.xlu1 %3991, %v4909_v19   ;;  %4002 = vset.pattern.permute.xlu0 %v8105_v11 }
 0x2b8   :  { %2374 = vperm.xlu0 %4002, %v4876_v10  }
 0x2b9   :  { %v5246_v9 = vpop.permute.xlu0 %1954 }
 0x2ba   :  { %8411 = vst [vmem:[#allocation227_spill] sm:$0xff] %v5246_v9  ;;  %v5248_v24 = vpop.permute.xlu1 %1630 }
 0x2bb   :  { %8412 = vst [vmem:[#allocation228_spill] sm:$0xff] %v5248_v24  ;;  %3992 = vset.pattern.permute.xlu1 %v8413_v22 }
 0x2bc   :  { %1994 = vperm.xlu1 %3992, %v4876_v10   ;;  %2386 = vperm.xlu0 %4002, %v4886_v35  }
 0x2bd   :  { %v5253_v12 = vpop.permute.xlu0 %1962 }
 0x2be   :  { %8414 = vst [vmem:[#allocation229_spill] sm:$0xff] %v5253_v12  ;;  %v5255_v17 = vpop.permute.xlu1 %1638 }
 0x2bf   :  { %8415 = vst [vmem:[#allocation230_spill] sm:$0xff] %v5255_v17 }
 0x2c0   :  { %2002 = vperm.xlu1 %3992, %v4868_v7   ;;  %2394 = vperm.xlu0 %4002, %v4896_v4  }
 0x2c2   :  { %v5259_v11 = vpop.permute.xlu1 %1646  ;;  %v5261_v13 = vpop.permute.xlu0 %1998 }
 0x2c3   :  { %8416 = vst [vmem:[#allocation231_spill] sm:$0xff] %v5259_v11  ;;  %8417 = vst [vmem:[#allocation232_spill] sm:$0xff] %v5261_v13 }
 0x2c4   :  { %2006 = vperm.xlu1 %3992, %v4886_v35   ;;  %2402 = vperm.xlu0 %4002, %v4906_v3  }
 0x2c6   :  { %v5265_v22 = vpop.permute.xlu1 %1654  ;;  %v5267_v9 = vpop.permute.xlu0 %2010 }
 0x2c7   :  { %8418 = vst [vmem:[#allocation233_spill] sm:$0xff] %v5265_v22  ;;  %8419 = vst [vmem:[#allocation234_spill] sm:$0xff] %v5267_v9  ;;  %v8106_v22 = vmov 31  }
 0x2c8   :  { %2014 = vperm.xlu1 %3992, %v4896_v4   ;;  %2410 = vperm.xlu0 %4002, %v4916_v33  }
 0x2ca   :  { %v5271_v12 = vpop.permute.xlu0 %2018 }
 0x2cb   :  { %8420 = vst [vmem:[#allocation235_spill] sm:$0xff] %v5271_v12  ;;  %v5273_v17 = vpop.permute.xlu1 %1690 }
 0x2cc   :  { %8421 = vst [vmem:[#allocation236_spill] sm:$0xff] %v5273_v17  ;;  %2022 = vperm.xlu1 %3992, %v4906_v3   ;;  %2418 = vperm.xlu0 %4002, %v4925_v28  }
 0x2ce   :  { %v5277_v11 = vpop.permute.xlu0 %2026 }
 0x2cf   :  { %8422 = vst [vmem:[#allocation237_spill] sm:$0xff] %v5277_v11  ;;  %v5279_v13 = vpop.permute.xlu1 %1698 }
 0x2d0   :  { %8423 = vst [vmem:[#allocation238_spill] sm:$0xff] %v5279_v13  ;;  %2030 = vperm.xlu1 %3992, %v4916_v33   ;;  %4005 = vset.pattern.permute.xlu0 %v8106_v22  ;;  %v8428_v13 = vmov 26  }
 0x2d1   :  { %2454 = vperm.xlu0 %4005, %v4860_v6  }
 0x2d2   :  { %v5284_v9 = vpop.permute.xlu0 %2034 }
 0x2d3   :  { %8424 = vst [vmem:[#allocation239_spill] sm:$0xff] %v5284_v9  ;;  %v5286_v12 = vpop.permute.xlu1 %1702 }
 0x2d4   :  { %8425 = vst [vmem:[#allocation240_spill] sm:$0xff] %v5286_v12  ;;  %2038 = vperm.xlu1 %3992, %v4925_v28  }
 0x2d5   :  { %2466 = vperm.xlu0 %4005, %v4879_v5  }
 0x2d7   :  { %v5290_v17 = vpop.permute.xlu1 %1710  ;;  %v5292_v11 = vpop.permute.xlu0 %2070 }
 0x2d8   :  { %8426 = vst [vmem:[#allocation241_spill] sm:$0xff] %v5290_v17  ;;  %8427 = vst [vmem:[#allocation242_spill] sm:$0xff] %v5292_v11  ;;  %3995 = vset.pattern.permute.xlu1 %v8428_v13 }
 0x2d9   :  { %2074 = vperm.xlu1 %3995, %v4860_v6   ;;  %2474 = vperm.xlu0 %4005, %v4889_v1  }
 0x2db   :  { %v5297_v22 = vpop.permute.xlu1 %1718  ;;  %v5299_v24 = vpop.permute.xlu0 %2082 }
 0x2dc   :  { %8429 = vst [vmem:[#allocation243_spill] sm:$0xff] %v5297_v22  ;;  %8430 = vst [vmem:[#allocation244_spill] sm:$0xff] %v5299_v24  ;;  %v8435_v22 = vmov 2  }
 0x2dd   :  { %2078 = vperm.xlu1 %3995, %v4868_v7   ;;  %2482 = vperm.xlu0 %4005, %v4899_v8  }
 0x2df   :  { %v5303_v9 = vpop.permute.xlu1 %1726  ;;  %v5305_v12 = vpop.permute.xlu0 %2090 }
 0x2e0   :  { %8431 = vst [vmem:[#allocation245_spill] sm:$0xff] %v5303_v9  ;;  %8432 = vst [vmem:[#allocation246_spill] sm:$0xff] %v5305_v12 }
 0x2e1   :  { %2086 = vperm.xlu1 %3995, %v4879_v5   ;;  %2490 = vperm.xlu0 %4005, %v4909_v19  }
 0x2e3   :  { %v5309_v13 = vpop.permute.xlu1 %1734  ;;  %v5311_v11 = vpop.permute.xlu0 %2098 }
 0x2e4   :  { %8433 = vst [vmem:[#allocation247_spill] sm:$0xff] %v5309_v13  ;;  %8434 = vst [vmem:[#allocation248_spill] sm:$0xff] %v5311_v11  ;;  %v8442_v13 = vmov 27  }
 0x2e5   :  { %2094 = vperm.xlu1 %3995, %v4889_v1   ;;  %4006 = vset.pattern.permute.xlu0 %v8435_v22 }
 0x2e6   :  { %246 = vperm.xlu0 %4006, %v4876_v10  }
 0x2e7   :  { %v5316_v24 = vpop.permute.xlu0 %2106 }
 0x2e8   :  { %8436 = vst [vmem:[#allocation249_spill] sm:$0xff] %v5316_v24  ;;  %v5318_v17 = vpop.permute.xlu1 %1770 }
 0x2e9   :  { %8437 = vst [vmem:[#allocation250_spill] sm:$0xff] %v5318_v17  ;;  %2102 = vperm.xlu1 %3995, %v4899_v8  }
 0x2ea   :  { %258 = vperm.xlu0 %4006, %v4886_v35  }
 0x2eb   :  { %v5322_v12 = vpop.permute.xlu0 %2114 }
 0x2ec   :  { %8438 = vst [vmem:[#allocation251_spill] sm:$0xff] %v5322_v12  ;;  %v5324_v9 = vpop.permute.xlu1 %1774 }
 0x2ed   :  { %8439 = vst [vmem:[#allocation252_spill] sm:$0xff] %v5324_v9  ;;  %2110 = vperm.xlu1 %3995, %v4909_v19  }
 0x2ee   :  { %266 = vperm.xlu0 %4006, %v4896_v4  }
 0x2f0   :  { %v5328_v11 = vpop.permute.xlu1 %1782  ;;  %v5330_v22 = vpop.permute.xlu0 %2150 }
 0x2f1   :  { %8440 = vst [vmem:[#allocation253_spill] sm:$0xff] %v5328_v11  ;;  %8441 = vst [vmem:[#allocation254_spill] sm:$0xff] %v5330_v22  ;;  %3996 = vset.pattern.permute.xlu1 %v8442_v13 }
 0x2f2   :  { %2146 = vperm.xlu1 %3996, %v4876_v10   ;;  %274 = vperm.xlu0 %4006, %v4906_v3  }
 0x2f4   :  { %v5335_v24 = vpop.permute.xlu1 %1790  ;;  %v5337_v17 = vpop.permute.xlu0 %2162 }
 0x2f5   :  { %8443 = vst [vmem:[#allocation255_spill] sm:$0xff] %v5335_v24  ;;  %8444 = vst [vmem:[#allocation256_spill] sm:$0xff] %v5337_v17  ;;  %v4074_v24 = vld [vmem:[#allocation2] sm:$0xff] }
 0x2f6   :  { %2154 = vperm.xlu1 %3996, %v4868_v7   ;;  %282 = vperm.xlu0 %4006, %v4916_v33  }
 0x2f8   :  { %v5341_v9 = vpop.permute.xlu1 %1798  ;;  %v5343_v12 = vpop.permute.xlu0 %2170 }
 0x2f9   :  { %8445 = vst [vmem:[#allocation257_spill] sm:$0xff] %v5341_v9  ;;  %8446 = vst [vmem:[#allocation258_spill] sm:$0xff] %v5343_v12  ;;  %v8107_v12 = vmov 32   ;;  %v148_v9 = vmul.f32 %v4334_v42, %v4360_v52  ;;  %v699_v42 = vsel %vm621_vm12, %v4337_v43, 0.0 }
 0x2fa   :  { %2158 = vperm.xlu1 %3996, %v4886_v35   ;;  %290 = vperm.xlu0 %4006, %v4925_v28  }
 0x2fc   :  { %v5347_v13 = vpop.permute.xlu1 %1806  ;;  %v5349_v22 = vpop.permute.xlu0 %2178 }
 0x2fd   :  { %8447 = vst [vmem:[#allocation259_spill] sm:$0xff] %v5347_v13  ;;  %8448 = vst [vmem:[#allocation260_spill] sm:$0xff] %v5349_v22 }
 0x2fe   :  { %2166 = vperm.xlu1 %3996, %v4896_v4   ;;  %2854 = vperm.xlu0 %4006, %v4074_v24   ;;  %v546_v24 = vsel %vm545_vm11, %v4345_v45, 0.0 }
 0x300   :  { %v5352_v17 = vpop.permute.xlu0 %2186 }
 0x301   :  { %8449 = vst [vmem:[#allocation261_spill] sm:$0xff] %v5352_v17  ;;  %v5354_v11 = vpop.permute.xlu1 %1842  ;;  %v547_v17 = vsel %vm469_vm10, %v4337_v43, 0.0  ;;  %vm1609_vm10 = vcmp.eq.f32.partialorder %v4330_v40, 20.0 }
 0x302   :  { %8450 = vst [vmem:[#allocation262_spill] sm:$0xff] %v5354_v11  ;;  %2174 = vperm.xlu1 %3996, %v4906_v3   ;;  %4009 = vset.pattern.permute.xlu0 %v8107_v12  ;;  %v149_v12 = vmul.f32 %v4332_v41, %v4360_v52  ;;  %v5381_v11 = vmul.f32 %v4352_v48, %v4360_v52  ;;  %v698_v41 = vsel %vm697_vm13, %v4345_v45, 0.0  ;;  %v774_v48 = vsel %vm773_vm14, %v4345_v45, 0.0 }
 0x303   :  { %2526 = vperm.xlu0 %4009, %v4876_v10   ;;  %v147_v10 = vmul.f32 %v4326_v37, %v4360_v52  ;;  %v623_v37 = vsel %vm545_vm11, %v4337_v43, 0.0  ;;  %v5420_v15 = vadd.f32 %v547_v17, %v546_v24  ;;  %v926_v17 = vsel %vm925_vm0, %v4345_v45, 0.0 }
 0x304   :  { %vm1685_vm11 = vcmp.eq.f32.partialorder %v4330_v40, 21.0 }
 0x305   :  { %v5369_v22 = vpop.permute.xlu1 %1850  ;;  %v5371_v13 = vpop.permute.xlu0 %2222  ;;  %v5450_v24 = vadd.f32 %v223_v61, %v147_v10  ;;  %v1079_v61 = vsel %vm1001_vm1, %v4337_v43, 0.0 }
 0x306   :  { %8451 = vst [vmem:[#allocation263_spill] sm:$0xff] %v5369_v22  ;;  %8452 = vst [vmem:[#allocation264_spill] sm:$0xff] %v5371_v13  ;;  %2182 = vperm.xlu1 %3996, %v4916_v33   ;;  %v622_v22 = vsel %vm621_vm12, %v4345_v45, 0.0  ;;  %v775_v13 = vsel %vm697_vm13, %v4337_v43, 0.0  ;;  %vm1761_vm12 = vcmp.eq.f32.partialorder %v4330_v40, 22.0  ;;  %vm1837_vm13 = vcmp.eq.f32.partialorder %v4330_v40, 23.0 }
 0x307   :  { %2538 = vperm.xlu0 %4009, %v4886_v35   ;;  %v5411_v35 = vmul.f32 %v4367_v55, %v4360_v52  ;;  %v5422_v16 = vadd.f32 %v623_v37, %v622_v22  ;;  %v851_v52 = vsel %vm773_vm14, %v4337_v43, 0.0  ;;  %v5431_v55 = vadd.f32 %v699_v42, %v698_v41 }
 0x308   :  { %v5433_v32 = vadd.f32 %v775_v13, %v774_v48  ;;  %v927_v22 = vsel %vm849_vm15, %v4337_v43, 0.0  ;;  %v1003_v13 = vsel %vm925_vm0, %v4337_v43, 0.0  ;;  %v224_v37 = vmul.f32 %v4400_v36, %v4363_v53 }
 0x309   :  { %v5416_v14 = vpop.permute.xlu1 %1854  ;;  %v5418_v62 = vpop.permute.xlu0 %2234  ;;  %v225_v48 = vmul.f32 %v4402_v38, %v4363_v53  ;;  %v8457_v36 = vmov 28   ;;  %v5471_v10 = vadd.f32 %v927_v22, %v926_v17  ;;  %v1154_v38 = vsel %vm1153_vm3, %v4345_v45, 0.0 }
 0x30a   :  { %8453 = vst [vmem:[#allocation265_spill] sm:$0xff] %v5416_v14  ;;  %8454 = vst [vmem:[#allocation266_spill] sm:$0xff] %v5418_v62  ;;  %2190 = vperm.xlu1 %3996, %v4925_v28   ;;  %v1002_v28 = vsel %vm1001_vm1, %v4345_v45, 0.0  ;;  %v1078_v62 = vsel %vm1077_vm2, %v4345_v45, 0.0  ;;  %v1231_v17 = vsel %vm1153_vm3, %v4337_v43, 0.0  ;;  %v5490_v22 = vadd.f32 %v224_v37, %v148_v9 }
 0x30b   :  { %2546 = vperm.xlu0 %4009, %v4896_v4   ;;  %v5454_v4 = vadd.f32 %v851_v52, %v850_v49  ;;  %8458 = vst [vmem:[#allocation269_spill] sm:$0xff] %v5471_v10  ;;  %v5473_v49 = vadd.f32 %v1003_v13, %v1002_v28  ;;  %v1155_v52 = vsel %vm1077_vm2, %v4337_v43, 0.0  ;;  %v5492_v28 = vadd.f32 %v1079_v61, %v1078_v62 }
 0x30c   :  { %8460 = vst [vmem:[#allocation271_spill] sm:$0xff] %v5490_v22  ;;  %v1307_v13 = vsel %vm1229_vm4, %v4337_v43, 0.0  ;;  %v5504_v14 = vadd.f32 %v225_v48, %v149_v12  ;;  %v226_v9 = vmul.f32 %v4406_v39, %v4363_v53  ;;  %v5508_v37 = vadd.f32 %v1155_v52, %v1154_v38 }
 0x30d   :  { %v5457_v41 = vpop.permute.xlu1 %1862  ;;  %v5459_v42 = vpop.permute.xlu0 %2242  ;;  %8459 = vst [vmem:[#allocation270_spill] sm:$0xff] %v5473_v49  ;;  %8461 = vst [vmem:[#allocation272_spill] sm:$0xff] %v5492_v28  ;;  %v227_v62 = vmul.f32 %v4410_v21, %v4363_v53  ;;  %v8109_v12 = vmov 33   ;;  %v1383_v48 = vsel %vm1305_vm6, %v4337_v43, 0.0  ;;  %v1458_v21 = vsel %vm1457_vm8, %v4345_v45, 0.0 }
 0x30e   :  { %8455 = vst [vmem:[#allocation267_spill] sm:$0xff] %v5457_v41  ;;  %8456 = vst [vmem:[#allocation268_spill] sm:$0xff] %v5459_v42  ;;  %3999 = vset.pattern.permute.xlu1 %v8457_v36  ;;  %v1230_v36 = vsel %vm1229_vm4, %v4345_v45, 0.0  ;;  %vm1913_vm14 = vcmp.eq.f32.partialorder %v4330_v40, 24.0  ;;  %vm1989_vm15 = vcmp.eq.f32.partialorder %v4330_v40, 25.0  ;;  %vm2065_vm0 = vcmp.eq.f32.partialorder %v4330_v40, 26.0 }
 0x30f   :  { %2226 = vperm.xlu1 %3999, %v4860_v6   ;;  %2558 = vperm.xlu0 %4009, %v4899_v8   ;;  %v1306_v6 = vsel %vm1305_vm6, %v4345_v45, 0.0  ;;  %8464 = vst [vmem:[#allocation275_spill] sm:$0xff] %v5508_v37  ;;  %v5513_v61 = vadd.f32 %v1231_v17, %v1230_v36  ;;  %v5542_v36 = vadd.f32 %v226_v9, %v5407_v18  ;;  %v1611_v18 = vsel %vm1533_vm9, %v4337_v43, 0.0 }
 0x310   :  { %v5521_v39 = vadd.f32 %v1307_v13, %v1306_v6  ;;  %v228_v17 = vmul.f32 %v4422_v54, %v4363_v53  ;;  %v1534_v6 = vsel %vm1533_vm9, %v4345_v45, 0.0  ;;  %v1535_v13 = vsel %vm1457_vm8, %v4337_v43, 0.0 }
 0x311   :  { %v5500_v42 = vpop.permute.xlu1 %1870  ;;  %v5502_v41 = vpop.permute.xlu0 %2250  ;;  %8465 = vst [vmem:[#allocation276_spill] sm:$0xff] %v5513_v61  ;;  %8469 = vst [vmem:[#allocation280_spill] sm:$0xff] %v5542_v36  ;;  %v1686_v53 = vsel %vm1685_vm11, %v4345_v45, 0.0  ;;  %v1687_v54 = vsel %vm1609_vm10, %v4337_v43, 0.0  ;;  %v1762_v9 = vsel %vm1761_vm12, %v4345_v45, 0.0  ;;  %v5591_v28 = vadd.f32 %v1535_v13, %v1534_v6 }
 0x312   :  { %8462 = vst [vmem:[#allocation273_spill] sm:$0xff] %v5500_v42  ;;  %8463 = vst [vmem:[#allocation274_spill] sm:$0xff] %v5502_v41  ;;  %v1382_v42 = vsel %vm1381_vm7, %v4345_v45, 0.0  ;;  %v1838_v41 = vsel %vm1837_vm13, %v4345_v45, 0.0  ;;  %v5589_v37 = vadd.f32 %v228_v17, %v5411_v35  ;;  %v5595_v10 = vadd.f32 %v1687_v54, %v1686_v53 }
 0x313   :  { %2230 = vperm.xlu1 %3999, %v4868_v7   ;;  %4012 = vset.pattern.permute.xlu0 %v8109_v12  ;;  %8466 = vst [vmem:[#allocation277_spill] sm:$0xff] %v5521_v39  ;;  %v1459_v7 = vsel %vm1381_vm7, %v4337_v43, 0.0  ;;  %v1610_v12 = vsel %vm1609_vm10, %v4345_v45, 0.0  ;;  %v5579_v36 = vadd.f32 %v1383_v48, %v1382_v42  ;;  %8475 = vst [vmem:[#allocation286_spill] sm:$0xff] %v5591_v28  ;;  %v1915_v35 = vsel %vm1837_vm13, %v4337_v43, 0.0 }
 0x314   :  { %2630 = vperm.xlu0 %4012, %v4906_v3   ;;  %v5581_v22 = vadd.f32 %v1459_v7, %v1458_v21  ;;  %8474 = vst [vmem:[#allocation285_spill] sm:$0xff] %v5589_v37  ;;  %v5593_v49 = vadd.f32 %v1611_v18, %v1610_v12  ;;  %8477 = vst [vmem:[#allocation288_spill] sm:$0xff] %v5595_v10  ;;  %v1991_v12 = vsel %vm1913_vm14, %v4337_v43, 0.0  ;;  %vm2141_vm1 = vcmp.eq.f32.partialorder %v4330_v40, 27.0 }
 0x315   :  { %v5537_v38 = vpop.permute.xlu1 %1878  ;;  %v5539_v52 = vpop.permute.xlu0 %2258  ;;  %8470 = vst [vmem:[#allocation281_spill] sm:$0xff] %v5579_v36  ;;  %vm2217_vm2 = vcmp.eq.f32.partialorder %v4330_v40, 28.0  ;;  %vm2293_vm3 = vcmp.eq.f32.partialorder %v4330_v40, 29.0  ;;  %v303_v48 = vmul.f32 %v4486_v34, %v4425_v57  ;;  %v1990_v21 = vsel %vm1989_vm15, %v4345_v45, 0.0 }
 0x316   :  { %8467 = vst [vmem:[#allocation278_spill] sm:$0xff] %v5537_v38  ;;  %8468 = vst [vmem:[#allocation279_spill] sm:$0xff] %v5539_v52  ;;  %v1763_v52 = vsel %vm1685_vm11, %v4337_v43, 0.0  ;;  %v1839_v38 = vsel %vm1761_vm12, %v4337_v43, 0.0  ;;  %v2066_v7 = vsel %vm2065_vm0, %v4345_v45, 0.0  ;;  %v2143_v34 = vsel %vm2065_vm0, %v4337_v43, 0.0 }
 0x317   :  { %2238 = vperm.xlu1 %3999, %v4879_v5   ;;  %v239_v5 = vadd.f32 %v227_v62, %v5381_v11  ;;  %8471 = vst [vmem:[#allocation282_spill] sm:$0xff] %v5581_v22  ;;  %8476 = vst [vmem:[#allocation287_spill] sm:$0xff] %v5593_v49  ;;  %v5597_v11 = vadd.f32 %v1763_v52, %v1762_v9  ;;  %v5599_v42 = vadd.f32 %v1839_v38, %v1838_v41  ;;  %v8117_v18 = vmov 34  }
 0x318   :  { %2634 = vperm.xlu0 %4012, %v4899_v8   ;;  %v1914_v62 = vsel %vm1913_vm14, %v4345_v45, 0.0  ;;  %v299_v41 = vmul.f32 %v4454_v47, %v4425_v57  ;;  %v375_v52 = vmul.f32 %v4434_v23, %v4427_v59  ;;  %vm2369_vm4 = vcmp.eq.f32.partialorder %v4330_v40, 30.0 }
 0x319   :  { %v5584_v39 = vpop.permute.xlu1 %1886  ;;  %v5586_v61 = vpop.permute.xlu0 %2266  ;;  %8478 = vst [vmem:[#allocation289_spill] sm:$0xff] %v5597_v11  ;;  %v2142_v17 = vsel %vm2141_vm1, %v4345_v45, 0.0  ;;  %v2218_v23 = vsel %vm2217_vm2, %v4345_v45, 0.0  ;;  %v2219_v6 = vsel %vm2141_vm1, %v4337_v43, 0.0  ;;  %v2294_v13 = vsel %vm2293_vm3, %v4345_v45, 0.0 }
 0x31a   :  { %8472 = vst [vmem:[#allocation283_spill] sm:$0xff] %v5584_v39  ;;  %8473 = vst [vmem:[#allocation284_spill] sm:$0xff] %v5586_v61  ;;  %v311_v53 = vadd.f32 %v299_v41, %v5450_v24  ;;  %v377_v54 = vmul.f32 %v4440_v27, %v4427_v59  ;;  %v2295_v9 = vsel %vm2217_vm2, %v4337_v43, 0.0  ;;  %v2371_v61 = vsel %vm2293_vm3, %v4337_v43, 0.0 }
 0x31b   :  { %2246 = vperm.xlu1 %3999, %v4889_v1   ;;  %v301_v1 = vmul.f32 %v4476_v26, %v4425_v57  ;;  %v2067_v26 = vsel %vm1989_vm15, %v4337_v43, 0.0  ;;  %v2370_v27 = vsel %vm2369_vm4, %v4345_v45, 0.0  ;;  %v5676_v37 = vadd.f32 %v1991_v12, %v1990_v21 }
 0x31c   :  { %2638 = vperm.xlu0 %4012, %v4916_v33  }
 0x31d   :  { %v313_v39 = vadd.f32 %v301_v1, %v5504_v14  ;;  %v5678_v14 = vadd.f32 %v2067_v26, %v2066_v7  ;;  %v5685_v1 = vadd.f32 %v2143_v34, %v2142_v17 }
 0x31e   :  { %v5625_v38 = vpop.permute.xlu1 %1922  ;;  %v5627_v47 = vpop.permute.xlu0 %2302 }
 0x31f   :  { %8479 = vst [vmem:[#allocation290_spill] sm:$0xff] %v5625_v38  ;;  %8480 = vst [vmem:[#allocation291_spill] sm:$0xff] %v5627_v47  ;;  %2254 = vperm.xlu1 %3999, %v4899_v8   ;;  %v315_v47 = vadd.f32 %v303_v48, %v239_v5  ;;  %v5674_v38 = vadd.f32 %v1915_v35, %v1914_v62  ;;  %v455_v5 = vmul.f32 %v4584_v56, %v4541_v20 }
 0x320   :  { %4016 = vset.pattern.permute.xlu0 %v8117_v18  ;;  %v379_v18 = vmul.f32 %v4456_v44, %v4427_v59  ;;  %8483 = vst [vmem:[#allocation294_spill] sm:$0xff] %v5678_v14  ;;  %v453_v44 = vmul.f32 %v4578_v0, %v4541_v20  ;;  %8484 = vst [vmem:[#allocation295_spill] sm:$0xff] %v5685_v1  ;;  %v5687_v48 = vadd.f32 %v2219_v6, %v2218_v23  ;;  %v8493_v23 = vld [vmem:[#allocation16_spill] sm:$0xff] }
 0x321   :  { %2706 = vperm.xlu0 %4016, %v4906_v3   ;;  %v451_v3 = vmul.f32 %v4570_v58, %v4541_v20  ;;  %v5691_v58 = vmul.f32 %v4482_v31, %v4541_v20  ;;  %v387_v62 = vadd.f32 %v375_v52, %v311_v53  ;;  %v5693_v35 = vadd.f32 %v2295_v9, %v2294_v13  ;;  %v8497_v13 = vld [vmem:[#allocation19_spill] sm:$0xff] }
 0x322   :  { %v5665_v24 = vpop.permute.xlu1 %1926  ;;  %v5667_v41 = vpop.permute.xlu0 %2314  ;;  %8485 = vst [vmem:[#allocation296_spill] sm:$0xff] %v5687_v48  ;;  %v5700_v0 = vmul.f32 %v4492_v51, %v4427_v59  ;;  %v5704_v56 = vmul.f32 %v4488_v46, %v4541_v20  ;;  %v389_v12 = vadd.f32 %v377_v54, %v313_v39  ;;  %v391_v21 = vadd.f32 %v379_v18, %v315_v47  ;;  %v8501_v54 = vld [vmem:[#allocation21_spill] sm:$0xff] }
 0x323   :  { %8481 = vst [vmem:[#allocation292_spill] sm:$0xff] %v5665_v24  ;;  %8482 = vst [vmem:[#allocation293_spill] sm:$0xff] %v5667_v41  ;;  %2262 = vperm.xlu1 %3999, %v4909_v19   ;;  %v5696_v19 = vadd.f32 %v2371_v61, %v2370_v27  ;;  %v5712_v52 = vmul.f32 %v4494_v30, %v4541_v20  ;;  %v527_v51 = vmul.f32 %v4539_v60, %v4543_v50  ;;  %v8491_v46 = vmov 29   ;;  %v5725_v30 = vld [vmem:[#allocation4] sm:$0xff]  ;;  %v8492_v60 = vld [vmem:[#allocation17_spill] sm:$0xff] }
 0x324   :  { %8486 = vst [vmem:[#allocation297_spill] sm:$0xff] %v5693_v35  ;;  %v463_v61 = vadd.f32 %v451_v3, %v387_v62  ;;  %v529_v39 = vmul.f32 %v4547_v29, %v4543_v50  ;;  %v531_v47 = vmul.f32 %v4555_v25, %v4543_v50  ;;  %v465_v26 = vadd.f32 %v453_v44, %v389_v12  ;;  %v8495_v25 = vld [vmem:[#allocation18_spill] sm:$0xff]  ;;  %v8503_v27 = vld [vmem:[#allocation23_spill] sm:$0xff] }
 0x325   :  { %2710 = vperm.xlu0 %4016, %v4899_v8   ;;  %8487 = vst [vmem:[#allocation298_spill] sm:$0xff] %v5696_v19  ;;  %v5716_v8 = vmul.f32 %v4499_v63, %v4541_v20  ;;  %v467_v34 = vadd.f32 %v455_v5, %v391_v21  ;;  %v5730_v63 = vmul.f32 %v4506_v2, %v4427_v59  ;;  %v8499_v2 = vld [vmem:[#allocation20_spill] sm:$0xff]  ;;  %v8507_v62 = vld [vmem:[#allocation26_spill] sm:$0xff] }
 0x326   :  { %v5706_v7 = vpop.permute.xlu1 %1934  ;;  %v5708_v31 = vpop.permute.xlu0 %2322  ;;  %v5734_v17 = vmul.f32 %v8492_v60, %v4427_v59  ;;  %v5738_v29 = vmul.f32 %v8493_v23, %v4541_v20  ;;  %v5742_v6 = vmul.f32 %v8495_v25, %v4541_v20  ;;  %v5747_v18 = vmul.f32 %v8497_v13, %v4427_v59  ;;  %v8509_v21 = vld [vmem:[#allocation42_spill] sm:$0xff]  ;;  %v8510_v60 = vld [vmem:[#allocation27_spill] sm:$0xff] }
 0x327   :  { %8488 = vst [vmem:[#allocation299_spill] sm:$0xff] %v5706_v7  ;;  %8489 = vst [vmem:[#allocation300_spill] sm:$0xff] %v5708_v31  ;;  %4000 = vset.pattern.permute.xlu1 %v8491_v46  ;;  %v5751_v53 = vmul.f32 %v8499_v2, %v4427_v59  ;;  %v5755_v9 = vmul.f32 %v8501_v54, %v4427_v59  ;;  %v5759_v3 = vmul.f32 %v8503_v27, %v5420_v15  ;;  %v8512_v25 = vld [vmem:[#allocation46_spill] sm:$0xff]  ;;  %v8529_v7 = vld [vmem:[#allocation44_spill] sm:$0xff] }
 0x328   :  { %8490 = vst [vmem:[#allocation301_spill] sm:$0xff] %v5716_v8  ;;  %2298 = vperm.xlu1 %4000, %v5725_v30   ;;  %8494 = vst [vmem:[#allocation17_spill] sm:$0xff] %v5738_v29  ;;  %v5771_v12 = vmul.f32 %v8507_v62, %v5420_v15  ;;  %v598_v59 = vmul.f32 %v8509_v21, %v5420_v15  ;;  %v539_v46 = vadd.f32 %v527_v51, %v463_v61  ;;  %v5781_v27 = vld [vmem:[#allocation4 + $0x10] sm:$0xff]  ;;  %v8514_v21 = vld [vmem:[#allocation29_spill] sm:$0xff] }
 0x329   :  { %8496 = vst [vmem:[#allocation16_spill] sm:$0xff] %v5742_v6  ;;  %2714 = vperm.xlu0 %4016, %v4916_v33   ;;  %8498 = vst [vmem:[#allocation18_spill] sm:$0xff] %v5747_v18  ;;  %v8506_v33 = vld [vmem:[#allocation24_spill] sm:$0xff]  ;;  %v5777_v23 = vmul.f32 %v8510_v60, %v5420_v15  ;;  %v601_v13 = vmul.f32 %v8512_v25, %v5420_v15  ;;  %v541_v2 = vadd.f32 %v529_v39, %v465_v26  ;;  %v5796_v39 = vld [vmem:[#allocation4 + $0x58] sm:$0xff] }
 0x32a   :  { %8500 = vst [vmem:[#allocation19_spill] sm:$0xff] %v5751_v53  ;;  %8502 = vst [vmem:[#allocation20_spill] sm:$0xff] %v5755_v9  ;;  %v5761_v20 = vpop.permute.xlu1 %1942  ;;  %v5763_v44 = vpop.permute.xlu0 %2330  ;;  %v5767_v5 = vmul.f32 %v8506_v33, %v5420_v15  ;;  %v543_v54 = vadd.f32 %v531_v47, %v467_v34  ;;  %v8513_v33 = vld [vmem:[#allocation28_spill] sm:$0xff]  ;;  %v5790_v51 = vmul.f32 %v8514_v21, %v5420_v15  ;;  %v8519_v47 = vld [vmem:[#allocation30_spill] sm:$0xff] }
 0x32b   :  { %8504 = vst [vmem:[#allocation21_spill] sm:$0xff] %v5761_v20  ;;  %8505 = vst [vmem:[#allocation23_spill] sm:$0xff] %v5763_v44  ;;  %v5786_v62 = vmul.f32 %v8513_v33, %v4543_v50  ;;  %v8516_v61 = vld [vmem:[#allocation48_spill] sm:$0xff]  ;;  %v8517_v44 = vld [vmem:[#allocation50_spill] sm:$0xff]  ;;  %v5801_v26 = vmul.f32 %v8519_v47, %v5420_v15 }
 0x32c   :  { %8508 = vst [vmem:[#allocation24_spill] sm:$0xff] %v5771_v12  ;;  %8511 = vst [vmem:[#allocation26_spill] sm:$0xff] %v5777_v23  ;;  %2306 = vperm.xlu1 %4000, %v5781_v27   ;;  %v603_v60 = vmul.f32 %v8516_v61, %v5420_v15  ;;  %v605_v25 = vmul.f32 %v8517_v44, %v5420_v15  ;;  %v8521_v34 = vld [vmem:[#allocation32_spill] sm:$0xff]  ;;  %v8525_v44 = vld [vmem:[#allocation33_spill] sm:$0xff] }
 0x32d   :  { %8515 = vst [vmem:[#allocation42_spill] sm:$0xff] %v5790_v51  ;;  %8518 = vst [vmem:[#allocation27_spill] sm:$0xff] %v5796_v39  ;;  %2722 = vperm.xlu0 %4016, %v5796_v39   ;;  %v5805_v33 = vmul.f32 %v8521_v34, %v4543_v50  ;;  %v8522_v21 = vld [vmem:[#allocation52_spill] sm:$0xff]  ;;  %v674_v24 = vmul.f32 %v8525_v44, %v5422_v16  ;;  %v8526_v19 = vld [vmem:[#allocation34_spill] sm:$0xff]  ;;  %v599_v34 = vmul.f32 %v8529_v7, %v5420_v15 }
 0x32e   :  { %8520 = vst [vmem:[#allocation46_spill] sm:$0xff] %v5801_v26  ;;  %v607_v31 = vmul.f32 %v8522_v21, %v5420_v15  ;;  %v5809_v20 = vpop.permute.xlu1 %1950  ;;  %v5811_v61 = vpop.permute.xlu0 %2338  ;;  %v5817_v41 = vmul.f32 %v8526_v19, %v4543_v50  ;;  %v8528_v47 = vld [vmem:[#allocation22_spill] sm:$0xff]  ;;  %v8530_v26 = vld [vmem:[#allocation35_spill] sm:$0xff]  ;;  %v8531_v21 = vld [vmem:[#allocation36_spill] sm:$0xff] }
 0x32f   :  { %8523 = vst [vmem:[#allocation28_spill] sm:$0xff] %v5809_v20  ;;  %8524 = vst [vmem:[#allocation29_spill] sm:$0xff] %v5811_v61  ;;  %v610_v35 = vadd.f32 %v598_v59, %v8528_v47  ;;  %v677_v48 = vmul.f32 %v8530_v26, %v5422_v16  ;;  %v5826_v20 = vmul.f32 %v8531_v21, %v4543_v50  ;;  %v8533_v61 = vld [vmem:[#allocation37_spill] sm:$0xff]  ;;  %v5831_v9 = vld [vmem:[#allocation4 + $0x18] sm:$0xff]  ;;  %v8123_v21 = vmov 35  }
 0x330   :  { %8527 = vst [vmem:[#allocation48_spill] sm:$0xff] %v5817_v41  ;;  %v679_v6 = vmul.f32 %v8533_v61, %v5422_v16  ;;  %v8534_v44 = vld [vmem:[#allocation25_spill] sm:$0xff]  ;;  %2310 = vperm.xlu1 %4000, %v5831_v9   ;;  %v8535_v19 = vld [vmem:[#allocation38_spill] sm:$0xff]  ;;  %v8537_v15 = vld [vmem:[#allocation39_spill] sm:$0xff]  ;;  %v615_v26 = vadd.f32 %v603_v60, %v539_v46  ;;  %v617_v47 = vadd.f32 %v605_v25, %v541_v2 }
 0x331   :  { %8532 = vst [vmem:[#allocation50_spill] sm:$0xff] %v5826_v20  ;;  %v613_v51 = vadd.f32 %v601_v13, %v8534_v44  ;;  %v5836_v59 = vmul.f32 %v8535_v19, %v4543_v50  ;;  %v681_v7 = vmul.f32 %v8537_v15, %v5422_v16  ;;  %4022 = vset.pattern.permute.xlu0 %v8123_v21  ;;  %v8538_v61 = vld [vmem:[#allocation40_spill] sm:$0xff]  ;;  %v8540_v13 = vld [vmem:[#allocation41_spill] sm:$0xff]  ;;  %v8541_v29 = vld [vmem:[#allocation43_spill] sm:$0xff] }
 0x332   :  { %v5843_v1 = vmul.f32 %v8538_v61, %v4543_v50  ;;  %v683_v44 = vmul.f32 %v8540_v13, %v5422_v16  ;;  %v5849_v23 = vmul.f32 %v8541_v29, %v5431_v55  ;;  %v619_v19 = vadd.f32 %v607_v31, %v543_v54  ;;  %v5853_v15 = vld [vmem:[#allocation4 + $0x38] sm:$0xff]  ;;  %v8544_v60 = vld [vmem:[#allocation45_spill] sm:$0xff]  ;;  %v8551_v21 = vld [vmem:[#allocation56_spill] sm:$0xff] }
 0x333   :  { %8536 = vst [vmem:[#allocation30_spill] sm:$0xff] %v5836_v59  ;;  %v5851_v59 = vpop.permute.xlu1 %1958  ;;  %2781 = vperm.xlu0 %4022, %v5853_v15   ;;  %v8543_v46 = vld [vmem:[#allocation31_spill] sm:$0xff]  ;;  %v5859_v50 = vmul.f32 %v8544_v60, %v5431_v55  ;;  %v686_v13 = vadd.f32 %v674_v24, %v610_v35  ;;  %v5865_v29 = vpop.permute.xlu0 %2374  ;;  %v8549_v31 = vld [vmem:[#allocation49_spill] sm:$0xff]  ;;  %v8555_v35 = vld [vmem:[#allocation72_spill] sm:$0xff] }
 0x334   :  { %8539 = vst [vmem:[#allocation32_spill] sm:$0xff] %v5843_v1  ;;  %8542 = vst [vmem:[#allocation52_spill] sm:$0xff] %v5851_v59  ;;  %v611_v2 = vadd.f32 %v599_v34, %v8543_v46  ;;  %v8546_v25 = vld [vmem:[#allocation47_spill] sm:$0xff]  ;;  %v5869_v54 = vmul.f32 %v8549_v31, %v5431_v55  ;;  %v675_v59 = vmul.f32 %v8551_v21, %v5422_v16  ;;  %v8552_v34 = vld [vmem:[#allocation68_spill] sm:$0xff] }
 0x335   :  { %8545 = vst [vmem:[#allocation33_spill] sm:$0xff] %v5859_v50  ;;  %v5863_v61 = vmul.f32 %v8546_v25, %v5431_v55  ;;  %8548 = vst [vmem:[#allocation22_spill] sm:$0xff] %v5865_v29  ;;  %v750_v46 = vmul.f32 %v8552_v34, %v5431_v55  ;;  %v689_v1 = vadd.f32 %v677_v48, %v613_v51  ;;  %v5875_v60 = vld [vmem:[#allocation4 + $0x28] sm:$0xff]  ;;  %v8553_v25 = vld [vmem:[#allocation51_spill] sm:$0xff] }
 0x336   :  { %8550 = vst [vmem:[#allocation44_spill] sm:$0xff] %v5869_v54  ;;  %2318 = vperm.xlu1 %4000, %v5875_v60   ;;  %v5880_v24 = vmul.f32 %v8553_v25, %v5431_v55  ;;  %v753_v29 = vmul.f32 %v8555_v35, %v5431_v55  ;;  %v691_v31 = vadd.f32 %v679_v6, %v615_v26  ;;  %v8558_v34 = vld [vmem:[#allocation54_spill] sm:$0xff]  ;;  %v8560_v25 = vld [vmem:[#allocation55_spill] sm:$0xff]  ;;  %v8561_v6 = vld [vmem:[#allocation57_spill] sm:$0xff] }
 0x337   :  { %8547 = vst [vmem:[#allocation34_spill] sm:$0xff] %v5863_v61  ;;  %v693_v54 = vadd.f32 %v681_v7, %v617_v47  ;;  %v8556_v61 = vld [vmem:[#allocation53_spill] sm:$0xff]  ;;  %v5890_v48 = vmul.f32 %v8558_v34, %v5422_v16  ;;  %v8559_v51 = vld [vmem:[#allocation74_spill] sm:$0xff]  ;;  %v695_v20 = vadd.f32 %v683_v44, %v619_v19  ;;  %2797 = vperm.xlu0 %4022, %v5796_v39   ;;  %v8562_v26 = vld [vmem:[#allocation76_spill] sm:$0xff]  ;;  %v5903_v34 = vpop.permute.xlu1 %1994 }
 0x338   :  { %8554 = vst [vmem:[#allocation35_spill] sm:$0xff] %v5880_v24  ;;  %v5886_v21 = vmul.f32 %v8556_v61, %v5431_v55  ;;  %v755_v53 = vmul.f32 %v8559_v51, %v5431_v55  ;;  %v826_v24 = vmul.f32 %v8560_v25, %v5433_v32  ;;  %v829_v7 = vmul.f32 %v8561_v6, %v5433_v32  ;;  %v8563_v61 = vld [vmem:[#allocation78_spill] sm:$0xff]  ;;  %v8568_v25 = vld [vmem:[#allocation59_spill] sm:$0xff]  ;;  %v8569_v6 = vld [vmem:[#allocation60_spill] sm:$0xff] }
 0x339   :  { %v757_v47 = vmul.f32 %v8562_v26, %v5431_v55  ;;  %v759_v35 = vmul.f32 %v8563_v61, %v5431_v55  ;;  %8564 = vst [vmem:[#allocation37_spill] sm:$0xff] %v5903_v34  ;;  %v687_v51 = vadd.f32 %v675_v59, %v611_v2  ;;  %v8566_v44 = vld [vmem:[#allocation58_spill] sm:$0xff]  ;;  %v831_v8 = vmul.f32 %v8568_v25, %v5433_v32  ;;  %v8571_v61 = vld [vmem:[#allocation61_spill] sm:$0xff]  ;;  %v8575_v25 = vld [vmem:[#allocation63_spill] sm:$0xff] }
 0x33a   :  { %8557 = vst [vmem:[#allocation36_spill] sm:$0xff] %v5886_v21  ;;  %v5905_v21 = vpop.permute.xlu0 %2386  ;;  %v5909_v19 = vmul.f32 %v8566_v44, %v5422_v16  ;;  %v762_v14 = vadd.f32 %v750_v46, %v686_v13  ;;  %2326 = vperm.xlu1 %4000, %v5853_v15   ;;  %v5916_v26 = vmul.f32 %v8569_v6, %v5422_v16  ;;  %v8573_v44 = vld [vmem:[#allocation62_spill] sm:$0xff]  ;;  %v8576_v46 = vld [vmem:[#allocation64_spill] sm:$0xff] }
 0x33b   :  { %8565 = vst [vmem:[#allocation25_spill] sm:$0xff] %v5905_v21  ;;  %v833_v34 = vmul.f32 %v8571_v61, %v5433_v32  ;;  %v8572_v21 = vld [vmem:[#allocation70_spill] sm:$0xff]  ;;  %v765_v2 = vadd.f32 %v753_v29, %v689_v1  ;;  %v5924_v12 = vmul.f32 %v8573_v44, %v5422_v16  ;;  %v835_v13 = vmul.f32 %v8575_v25, %v5433_v32  ;;  %v8579_v61 = vld [vmem:[#allocation65_spill] sm:$0xff]  ;;  %v5941_v44 = vpop.permute.xlu1 %2002 }
 0x33c   :  { %8567 = vst [vmem:[#allocation38_spill] sm:$0xff] %v5909_v19  ;;  %8570 = vst [vmem:[#allocation39_spill] sm:$0xff] %v5916_v26  ;;  %v751_v59 = vmul.f32 %v8572_v21, %v5431_v55  ;;  %v5930_v50 = vmul.f32 %v8576_v46, %v5422_v16  ;;  %v767_v6 = vadd.f32 %v755_v53, %v691_v31  ;;  %v8578_v26 = vmov 33   ;;  %v8581_v55 = vld [vmem:[#allocation66_spill] sm:$0xff]  ;;  %v5943_v25 = vld [vmem:[#allocation4 + $0x8] sm:$0xff] }
 0x33d   :  { %8574 = vst [vmem:[#allocation40_spill] sm:$0xff] %v5924_v12  ;;  %4025 = vset.pattern.permute.xlu0 %v8578_v26  ;;  %v5935_v18 = vmul.f32 %v8579_v61, %v5454_v4  ;;  %v5939_v1 = vmul.f32 %v8581_v55, %v5422_v16  ;;  %v769_v29 = vadd.f32 %v757_v47, %v693_v54  ;;  %8583 = vst [vmem:[#allocation45_spill] sm:$0xff] %v5941_v44  ;;  %v8586_v53 = vld [vmem:[#allocation67_spill] sm:$0xff]  ;;  %v8588_v61 = vld [vmem:[#allocation69_spill] sm:$0xff] }
 0x33e   :  { %8577 = vst [vmem:[#allocation41_spill] sm:$0xff] %v5930_v50  ;;  %v771_v21 = vadd.f32 %v759_v35, %v695_v20  ;;  %8584 = vst [vmem:[#allocation47_spill] sm:$0xff] %v5943_v25  ;;  %2606 = vperm.xlu0 %4025, %v5943_v25   ;;  %v5946_v46 = vpop.permute.xlu0 %2394  ;;  %v5950_v31 = vmul.f32 %v8586_v53, %v5454_v4  ;;  %v5954_v26 = vmul.f32 %v8588_v61, %v5454_v4  ;;  %v8590_v16 = vld [vmem:[#allocation71_spill] sm:$0xff]  ;;  %v5960_v47 = vld [vmem:[#allocation4 + $0x48] sm:$0xff] }
 0x33f   :  { %8580 = vst [vmem:[#allocation43_spill] sm:$0xff] %v5935_v18  ;;  %8582 = vst [vmem:[#allocation31_spill] sm:$0xff] %v5939_v1  ;;  %v5958_v54 = vmul.f32 %v8590_v16, %v5454_v4  ;;  %v838_v20 = vadd.f32 %v826_v24, %v762_v14  ;;  %2334 = vperm.xlu1 %4000, %v5960_v47   ;;  %v763_v35 = vadd.f32 %v751_v59, %v687_v51  ;;  %v8593_v55 = vld [vmem:[#allocation73_spill] sm:$0xff]  ;;  %v8595_v53 = vld [vmem:[#allocation82_spill] sm:$0xff] }
 0x340   :  { %8585 = vst [vmem:[#allocation49_spill] sm:$0xff] %v5946_v46  ;;  %8587 = vst [vmem:[#allocation56_spill] sm:$0xff] %v5950_v31  ;;  %v5965_v44 = vmul.f32 %v8593_v55, %v5454_v4  ;;  %v827_v46 = vmul.f32 %v8595_v53, %v5433_v32  ;;  %v841_v1 = vadd.f32 %v829_v7, %v765_v2  ;;  %v8596_v61 = vld [vmem:[#allocation75_spill] sm:$0xff]  ;;  %v8598_v16 = vld [vmem:[#allocation269_spill] sm:$0xff]  ;;  %v5981_v7 = vpop.permute.xlu1 %2006  ;;  %v8604_v2 = vmov 34  }
 0x341   :  { %8589 = vst [vmem:[#allocation68_spill] sm:$0xff] %v5954_v26  ;;  %8591 = vst [vmem:[#allocation51_spill] sm:$0xff] %v5958_v54  ;;  %v5971_v50 = vmul.f32 %v8596_v61, %v5454_v4  ;;  %v8599_v54 = vld [vmem:[#allocation77_spill] sm:$0xff]  ;;  %v8600_v24 = vld [vmem:[#allocation94_spill] sm:$0xff]  ;;  %v843_v12 = vadd.f32 %v831_v8, %v767_v6  ;;  %v845_v31 = vadd.f32 %v833_v34, %v769_v29 }
 0x342   :  { %8592 = vst [vmem:[#allocation72_spill] sm:$0xff] %v5960_v47  ;;  %8594 = vst [vmem:[#allocation53_spill] sm:$0xff] %v5965_v44  ;;  %v978_v14 = vmul.f32 %v8599_v54, %v8598_v16  ;;  %v902_v26 = vmul.f32 %v8600_v24, %v5454_v4  ;;  %v8601_v51 = vld [vmem:[#allocation79_spill] sm:$0xff]  ;;  %v8602_v55 = vld [vmem:[#allocation98_spill] sm:$0xff]  ;;  %v847_v53 = vadd.f32 %v835_v13, %v771_v21  ;;  %4026 = vset.pattern.permute.xlu0 %v8604_v2  ;;  %v5984_v61 = vpop.permute.xlu0 %2402 }
 0x343   :  { %8597 = vst [vmem:[#allocation54_spill] sm:$0xff] %v5971_v50  ;;  %v981_v59 = vmul.f32 %v8601_v51, %v8598_v16  ;;  %v905_v44 = vmul.f32 %v8602_v55, %v5454_v4  ;;  %8603 = vst [vmem:[#allocation74_spill] sm:$0xff] %v5981_v7  ;;  %v8606_v54 = vld [vmem:[#allocation80_spill] sm:$0xff]  ;;  %v8607_v8 = vld [vmem:[#allocation81_spill] sm:$0xff]  ;;  %2342 = vperm.xlu1 %4000, %v5796_v39   ;;  %2678 = vperm.xlu0 %4026, %v5725_v30  }
 0x344   :  { %8605 = vst [vmem:[#allocation55_spill] sm:$0xff] %v5984_v61  ;;  %v5988_v50 = vmul.f32 %v8606_v54, %v5433_v32  ;;  %v983_v6 = vmul.f32 %v8607_v8, %v8598_v16  ;;  %v8608_v24 = vld [vmem:[#allocation100_spill] sm:$0xff]  ;;  %v839_v34 = vadd.f32 %v827_v46, %v763_v35  ;;  %v8609_v13 = vld [vmem:[#allocation83_spill] sm:$0xff]  ;;  %v8610_v21 = vld [vmem:[#allocation102_spill] sm:$0xff]  ;;  %v914_v46 = vadd.f32 %v902_v26, %v838_v20  ;;  %v6022_v19 = vpop.permute.xlu1 %2014 }
 0x345   :  { %v907_v51 = vmul.f32 %v8608_v24, %v5454_v4  ;;  %v985_v29 = vmul.f32 %v8609_v13, %v8598_v16  ;;  %v909_v55 = vmul.f32 %v8610_v21, %v5454_v4  ;;  %v8611_v54 = vld [vmem:[#allocation104_spill] sm:$0xff]  ;;  %v8614_v24 = vld [vmem:[#allocation85_spill] sm:$0xff]  ;;  %v8615_v39 = vld [vmem:[#allocation86_spill] sm:$0xff]  ;;  %8623 = vst [vmem:[#allocation59_spill] sm:$0xff] %v6022_v19 }
 0x346   :  { %v911_v61 = vmul.f32 %v8611_v54, %v5454_v4  ;;  %v8612_v2 = vld [vmem:[#allocation84_spill] sm:$0xff]  ;;  %v987_v7 = vmul.f32 %v8614_v24, %v8598_v16  ;;  %v6010_v18 = vmul.f32 %v8615_v39, %v5433_v32  ;;  %v8617_v35 = vld [vmem:[#allocation270_spill] sm:$0xff]  ;;  %v8618_v13 = vld [vmem:[#allocation87_spill] sm:$0xff]  ;;  %v6024_v24 = vpop.permute.xlu0 %2410  ;;  %v990_v19 = vadd.f32 %v978_v14, %v914_v46 }
 0x347   :  { %v6004_v8 = vmul.f32 %v8612_v2, %v5433_v32  ;;  %v6014_v47 = vmul.f32 %v8618_v13, %v8617_v35  ;;  %v8620_v21 = vld [vmem:[#allocation88_spill] sm:$0xff]  ;;  %8624 = vst [vmem:[#allocation60_spill] sm:$0xff] %v6024_v24  ;;  %v8625_v39 = vld [vmem:[#allocation89_spill] sm:$0xff]  ;;  %v8627_v26 = vld [vmem:[#allocation90_spill] sm:$0xff]  ;;  %v919_v13 = vadd.f32 %v907_v51, %v843_v12  ;;  %2686 = vperm.xlu0 %4026, %v5781_v27  }
 0x348   :  { %8616 = vst [vmem:[#allocation76_spill] sm:$0xff] %v6010_v18  ;;  %v6018_v41 = vmul.f32 %v8620_v21, %v5433_v32  ;;  %v8622_v54 = vld [vmem:[#allocation96_spill] sm:$0xff]  ;;  %v6028_v18 = vmul.f32 %v8625_v39, %v8617_v35  ;;  %v6032_v20 = vmul.f32 %v8627_v26, %v5433_v32  ;;  %v923_v39 = vadd.f32 %v911_v61, %v847_v53  ;;  %v8634_v26 = vld [vmem:[#allocation93_spill] sm:$0xff]  ;;  %v8636_v12 = vld [vmem:[#allocation95_spill] sm:$0xff] }
 0x349   :  { %8613 = vst [vmem:[#allocation57_spill] sm:$0xff] %v6004_v8  ;;  %8619 = vst [vmem:[#allocation78_spill] sm:$0xff] %v6014_v47  ;;  %v903_v2 = vmul.f32 %v8622_v54, %v5454_v4  ;;  %v917_v8 = vadd.f32 %v905_v44, %v841_v1  ;;  %v8629_v47 = vmov 30   ;;  %v8630_v4 = vld [vmem:[#allocation91_spill] sm:$0xff]  ;;  %v8632_v44 = vld [vmem:[#allocation92_spill] sm:$0xff]  ;;  %v921_v54 = vadd.f32 %v909_v55, %v845_v31 }
 0x34a   :  { %8621 = vst [vmem:[#allocation58_spill] sm:$0xff] %v6018_v41  ;;  %8626 = vst [vmem:[#allocation61_spill] sm:$0xff] %v6028_v18  ;;  %4003 = vset.pattern.permute.xlu1 %v8629_v47  ;;  %v6038_v1 = vmul.f32 %v8630_v4, %v8617_v35  ;;  %v6042_v21 = vmul.f32 %v8632_v44, %v5433_v32  ;;  %v6047_v24 = vmul.f32 %v8634_v26, %v8617_v35  ;;  %v8638_v51 = vld [vmem:[#allocation97_spill] sm:$0xff]  ;;  %v8640_v32 = vld [vmem:[#allocation272_spill] sm:$0xff]  ;;  %v6063_v26 = vpop.permute.xlu0 %2418 }
 0x34b   :  { %8628 = vst [vmem:[#allocation70_spill] sm:$0xff] %v6032_v20  ;;  %2378 = vperm.xlu1 %4003, %v5943_v25   ;;  %v6051_v47 = vmul.f32 %v8636_v12, %v8617_v35  ;;  %v6055_v4 = vmul.f32 %v8638_v51, %v8617_v35  ;;  %v915_v20 = vadd.f32 %v903_v2, %v839_v34  ;;  %v8641_v44 = vld [vmem:[#allocation99_spill] sm:$0xff]  ;;  %v8642_v53 = vld [vmem:[#allocation108_spill] sm:$0xff]  ;;  %8644 = vst [vmem:[#allocation69_spill] sm:$0xff] %v6063_v26 }
 0x34c   :  { %8631 = vst [vmem:[#allocation62_spill] sm:$0xff] %v6038_v1  ;;  %8633 = vst [vmem:[#allocation63_spill] sm:$0xff] %v6042_v21  ;;  %v1130_v31 = vmul.f32 %v8641_v44, %v8640_v32  ;;  %v979_v61 = vmul.f32 %v8642_v53, %v8598_v16  ;;  %v993_v55 = vadd.f32 %v981_v59, %v917_v8  ;;  %v6061_v21 = vpop.permute.xlu1 %2022  ;;  %v8645_v12 = vld [vmem:[#allocation101_spill] sm:$0xff]  ;;  %v8647_v14 = vld [vmem:[#allocation120_spill] sm:$0xff]  ;;  %2690 = vperm.xlu0 %4026, %v5831_v9  }
 0x34d   :  { %8635 = vst [vmem:[#allocation64_spill] sm:$0xff] %v6047_v24  ;;  %8637 = vst [vmem:[#allocation65_spill] sm:$0xff] %v6051_v47  ;;  %v1133_v47 = vmul.f32 %v8645_v12, %v8640_v32  ;;  %v8646_v24 = vld [vmem:[#allocation103_spill] sm:$0xff]  ;;  %v1054_v34 = vmul.f32 %v8647_v14, %v8617_v35  ;;  %v995_v46 = vadd.f32 %v983_v6, %v919_v13  ;;  %v8648_v2 = vld [vmem:[#allocation105_spill] sm:$0xff] }
 0x34e   :  { %8639 = vst [vmem:[#allocation66_spill] sm:$0xff] %v6055_v4  ;;  %8643 = vst [vmem:[#allocation67_spill] sm:$0xff] %v6061_v21  ;;  %v1135_v51 = vmul.f32 %v8646_v24, %v8640_v32  ;;  %v1137_v44 = vmul.f32 %v8648_v2, %v8640_v32  ;;  %v8649_v59 = vld [vmem:[#allocation124_spill] sm:$0xff]  ;;  %v997_v53 = vadd.f32 %v985_v29, %v921_v54  ;;  %v8650_v12 = vld [vmem:[#allocation106_spill] sm:$0xff] }
 0x34f   :  { %v1057_v8 = vmul.f32 %v8649_v59, %v8617_v35  ;;  %v999_v26 = vadd.f32 %v987_v7, %v923_v39  ;;  %2382 = vperm.xlu1 %4003, %v5781_v27   ;;  %v6079_v21 = vmul.f32 %v8650_v12, %v8598_v16  ;;  %v8652_v24 = vld [vmem:[#allocation107_spill] sm:$0xff]  ;;  %v8653_v6 = vld [vmem:[#allocation126_spill] sm:$0xff]  ;;  %v8654_v4 = vld [vmem:[#allocation128_spill] sm:$0xff]  ;;  %v991_v1 = vadd.f32 %v979_v61, %v915_v20 }
 0x350   :  { %v1139_v14 = vmul.f32 %v8652_v24, %v8640_v32  ;;  %v1059_v13 = vmul.f32 %v8653_v6, %v8617_v35  ;;  %v1061_v2 = vmul.f32 %v8654_v4, %v8617_v35  ;;  %v8655_v41 = vld [vmem:[#allocation275_spill] sm:$0xff]  ;;  %v8656_v59 = vld [vmem:[#allocation109_spill] sm:$0xff]  ;;  %v8658_v7 = vld [vmem:[#allocation110_spill] sm:$0xff]  ;;  %v6097_v18 = vpop.permute.xlu1 %2030  ;;  %v1066_v61 = vadd.f32 %v1054_v34, %v990_v19  ;;  %2698 = vperm.xlu0 %4026, %v5875_v60  }
 0x351   :  { %8651 = vst [vmem:[#allocation71_spill] sm:$0xff] %v6079_v21  ;;  %v6089_v29 = vmul.f32 %v8656_v59, %v8655_v41  ;;  %v6093_v54 = vmul.f32 %v8658_v7, %v8598_v16  ;;  %v8660_v39 = vld [vmem:[#allocation130_spill] sm:$0xff]  ;;  %8661 = vst [vmem:[#allocation75_spill] sm:$0xff] %v6097_v18  ;;  %v8662_v24 = vld [vmem:[#allocation111_spill] sm:$0xff]  ;;  %v6110_v7 = vpop.permute.xlu0 %2454  ;;  %v1069_v19 = vadd.f32 %v1057_v8, %v993_v55 }
 0x352   :  { %v1063_v12 = vmul.f32 %v8660_v39, %v8617_v35  ;;  %v6101_v6 = vmul.f32 %v8662_v24, %v8655_v41  ;;  %v8664_v4 = vld [vmem:[#allocation112_spill] sm:$0xff]  ;;  %v8666_v59 = vld [vmem:[#allocation122_spill] sm:$0xff]  ;;  %8667 = vst [vmem:[#allocation94_spill] sm:$0xff] %v6110_v7  ;;  %v8668_v39 = vld [vmem:[#allocation113_spill] sm:$0xff] }
 0x353   :  { %8657 = vst [vmem:[#allocation73_spill] sm:$0xff] %v6089_v29  ;;  %8659 = vst [vmem:[#allocation82_spill] sm:$0xff] %v6093_v54  ;;  %v6105_v20 = vmul.f32 %v8664_v4, %v8598_v16  ;;  %v1055_v29 = vmul.f32 %v8666_v59, %v8617_v35  ;;  %v6114_v54 = vmul.f32 %v8668_v39, %v8655_v41  ;;  %v8670_v18 = vld [vmem:[#allocation114_spill] sm:$0xff]  ;;  %v6124_v34 = vld [vmem:[#allocation4 + $0x20] sm:$0xff] }
 0x354   :  { %8663 = vst [vmem:[#allocation269_spill] sm:$0xff] %v6101_v6  ;;  %v6118_v24 = vmul.f32 %v8670_v18, %v8598_v16  ;;  %v8672_v6 = vld [vmem:[#allocation115_spill] sm:$0xff]  ;;  %8674 = vst [vmem:[#allocation81_spill] sm:$0xff] %v6124_v34  ;;  %2390 = vperm.xlu1 %4003, %v6124_v34   ;;  %v8675_v35 = vld [vmem:[#allocation116_spill] sm:$0xff]  ;;  %v1073_v18 = vadd.f32 %v1061_v2, %v997_v53  ;;  %v1075_v21 = vadd.f32 %v1063_v12, %v999_v26 }
 0x355   :  { %8665 = vst [vmem:[#allocation77_spill] sm:$0xff] %v6105_v20  ;;  %8669 = vst [vmem:[#allocation79_spill] sm:$0xff] %v6114_v54  ;;  %v6122_v4 = vmul.f32 %v8672_v6, %v8655_v41  ;;  %v6129_v59 = vmul.f32 %v8675_v35, %v8598_v16  ;;  %v8677_v39 = vld [vmem:[#allocation117_spill] sm:$0xff]  ;;  %v1071_v54 = vadd.f32 %v1059_v13, %v995_v46  ;;  %v8681_v55 = vld [vmem:[#allocation119_spill] sm:$0xff]  ;;  %v6145_v35 = vpop.permute.xlu1 %2038  ;;  %v8688_v13 = vmov 35   ;;  %v6154_v2 = vpop.permute.xlu0 %2466 }
 0x356   :  { %8671 = vst [vmem:[#allocation98_spill] sm:$0xff] %v6118_v24  ;;  %v6133_v7 = vmul.f32 %v8677_v39, %v8655_v41  ;;  %v8679_v24 = vld [vmem:[#allocation118_spill] sm:$0xff]  ;;  %v6141_v8 = vmul.f32 %v8681_v55, %v8655_v41  ;;  %v8683_v6 = vld [vmem:[#allocation276_spill] sm:$0xff]  ;;  %8685 = vst [vmem:[#allocation84_spill] sm:$0xff] %v6145_v35  ;;  %4032 = vset.pattern.permute.xlu0 %v8688_v13 }
 0x357   :  { %8673 = vst [vmem:[#allocation80_spill] sm:$0xff] %v6122_v4  ;;  %8676 = vst [vmem:[#allocation100_spill] sm:$0xff] %v6129_v59  ;;  %v6137_v20 = vmul.f32 %v8679_v24, %v8598_v16  ;;  %v8684_v4 = vld [vmem:[#allocation121_spill] sm:$0xff]  ;;  %v1067_v59 = vadd.f32 %v1055_v29, %v991_v1  ;;  %v8686_v39 = vld [vmem:[#allocation123_spill] sm:$0xff]  ;;  %v1142_v16 = vadd.f32 %v1130_v31, %v1066_v61  ;;  %2757 = vperm.xlu0 %4032, %v5943_v25  }
 0x358   :  { %8678 = vst [vmem:[#allocation83_spill] sm:$0xff] %v6133_v7  ;;  %8682 = vst [vmem:[#allocation104_spill] sm:$0xff] %v6141_v8  ;;  %v1282_v34 = vmul.f32 %v8684_v4, %v8683_v6  ;;  %v6149_v7 = vmul.f32 %v8686_v39, %v8683_v6  ;;  %v8687_v46 = vld [vmem:[#allocation134_spill] sm:$0xff]  ;;  %v8690_v24 = vld [vmem:[#allocation125_spill] sm:$0xff]  ;;  %v1145_v1 = vadd.f32 %v1133_v47, %v1069_v19 }
 0x359   :  { %8680 = vst [vmem:[#allocation102_spill] sm:$0xff] %v6137_v20  ;;  %v1131_v53 = vmul.f32 %v8687_v46, %v8640_v32  ;;  %8689 = vst [vmem:[#allocation85_spill] sm:$0xff] %v6154_v2  ;;  %v1287_v55 = vmul.f32 %v8690_v24, %v8683_v6  ;;  %v8691_v26 = vld [vmem:[#allocation127_spill] sm:$0xff]  ;;  %v6162_v29 = vld [vmem:[#allocation4 + $0x30] sm:$0xff]  ;;  %v1147_v46 = vadd.f32 %v1135_v51, %v1071_v54 }
 0x35a   :  { %v6160_v12 = vmul.f32 %v8691_v26, %v8683_v6  ;;  %8692 = vst [vmem:[#allocation86_spill] sm:$0xff] %v6162_v29  ;;  %2398 = vperm.xlu1 %4003, %v6162_v29   ;;  %v8693_v31 = vld [vmem:[#allocation129_spill] sm:$0xff]  ;;  %v8694_v4 = vld [vmem:[#allocation146_spill] sm:$0xff]  ;;  %v1149_v2 = vadd.f32 %v1137_v44, %v1073_v18  ;;  %v8696_v13 = vld [vmem:[#allocation131_spill] sm:$0xff]  ;;  %v1151_v29 = vadd.f32 %v1139_v14, %v1075_v21 }
 0x35b   :  { %v1291_v61 = vmul.f32 %v8693_v31, %v8683_v6  ;;  %v1206_v39 = vmul.f32 %v8694_v4, %v8655_v41  ;;  %v8695_v24 = vld [vmem:[#allocation277_spill] sm:$0xff]  ;;  %v8698_v47 = vld [vmem:[#allocation132_spill] sm:$0xff]  ;;  %v1143_v20 = vadd.f32 %v1131_v53, %v1067_v59  ;;  %v8701_v31 = vld [vmem:[#allocation135_spill] sm:$0xff]  ;;  %v6192_v4 = vpop.permute.xlu0 %2474  ;;  %2773 = vperm.xlu0 %4032, %v5875_v60  }
 0x35c   :  { %v6172_v35 = vmul.f32 %v8696_v13, %v8695_v24  ;;  %v6176_v19 = vmul.f32 %v8698_v47, %v8640_v32  ;;  %v8699_v26 = vld [vmem:[#allocation133_spill] sm:$0xff]  ;;  %v6184_v25 = vmul.f32 %v8701_v31, %v8695_v24  ;;  %v8703_v51 = vld [vmem:[#allocation150_spill] sm:$0xff]  ;;  %v8704_v54 = vld [vmem:[#allocation152_spill] sm:$0xff]  ;;  %v6190_v13 = vpop.permute.xlu1 %2074  ;;  %8706 = vst [vmem:[#allocation89_spill] sm:$0xff] %v6192_v4  ;;  %v6205_v31 = vsel %vm2369_vm4, %v4337_v43, 0.0 }
 0x35d   :  { %v6180_v8 = vmul.f32 %v8699_v26, %v8695_v24  ;;  %v1209_v44 = vmul.f32 %v8703_v51, %v8655_v41  ;;  %v1211_v18 = vmul.f32 %v8704_v54, %v8655_v41  ;;  %8705 = vst [vmem:[#allocation96_spill] sm:$0xff] %v6190_v13  ;;  %v8707_v47 = vld [vmem:[#allocation136_spill] sm:$0xff]  ;;  %v8709_v21 = vld [vmem:[#allocation154_spill] sm:$0xff]  ;;  %8711 = vst [vmem:[#allocation91_spill] sm:$0xff] %v6205_v31 }
 0x35e   :  { %8697 = vst [vmem:[#allocation270_spill] sm:$0xff] %v6172_v35  ;;  %8702 = vst [vmem:[#allocation88_spill] sm:$0xff] %v6184_v25  ;;  %v6196_v26 = vmul.f32 %v8707_v47, %v8640_v32  ;;  %v1213_v14 = vmul.f32 %v8709_v21, %v8655_v41  ;;  %v8710_v59 = vld [vmem:[#allocation156_spill] sm:$0xff]  ;;  %v8712_v54 = vld [vmem:[#allocation137_spill] sm:$0xff] }
 0x35f   :  { %8700 = vst [vmem:[#allocation87_spill] sm:$0xff] %v6180_v8  ;;  %v1215_v53 = vmul.f32 %v8710_v59, %v8655_v41  ;;  %v4085_v51 = vld [vmem:[#allocation4 + $0x40] sm:$0xff]  ;;  %v6210_v4 = vmul.f32 %v8712_v54, %v8695_v24  ;;  %v8714_v47 = vld [vmem:[#allocation138_spill] sm:$0xff]  ;;  %v8716_v21 = vld [vmem:[#allocation139_spill] sm:$0xff]  ;;  %v1218_v8 = vadd.f32 %v1206_v39, %v1142_v16 }
 0x360   :  { %8708 = vst [vmem:[#allocation90_spill] sm:$0xff] %v6196_v26  ;;  %2406 = vperm.xlu1 %4003, %v4085_v51   ;;  %v6214_v25 = vmul.f32 %v8714_v47, %v8640_v32  ;;  %v6218_v59 = vmul.f32 %v8716_v21, %v8695_v24  ;;  %v8718_v43 = vld [vmem:[#allocation140_spill] sm:$0xff]  ;;  %v8720_v51 = vld [vmem:[#allocation141_spill] sm:$0xff]  ;;  %v8722_v54 = vld [vmem:[#allocation142_spill] sm:$0xff] }
 0x361   :  { %8713 = vst [vmem:[#allocation92_spill] sm:$0xff] %v6210_v4  ;;  %v6222_v31 = vmul.f32 %v8718_v43, %v8640_v32  ;;  %v6226_v13 = vmul.f32 %v8720_v51, %v8695_v24  ;;  %v6230_v4 = vmul.f32 %v8722_v54, %v8640_v32  ;;  %v8724_v47 = vld [vmem:[#allocation148_spill] sm:$0xff]  ;;  %v8725_v35 = vld [vmem:[#allocation143_spill] sm:$0xff]  ;;  %v1221_v43 = vadd.f32 %v1209_v44, %v1145_v1  ;;  %v6242_v51 = vpop.permute.xlu0 %2482  ;;  %v8733_v1 = vld [vmem:[#allocation145_spill] sm:$0xff] }
 0x362   :  { %8715 = vst [vmem:[#allocation93_spill] sm:$0xff] %v6214_v25  ;;  %8717 = vst [vmem:[#allocation95_spill] sm:$0xff] %v6218_v59  ;;  %v1207_v25 = vmul.f32 %v8724_v47, %v8655_v41  ;;  %v1434_v21 = vmul.f32 %v8725_v35, %v5579_v36  ;;  %v8726_v16 = vld [vmem:[#allocation144_spill] sm:$0xff]  ;;  %v1223_v59 = vadd.f32 %v1211_v18, %v1147_v46  ;;  %v6249_v41 = vsel %vm2445_vm5, %v4345_v45, 0.0  ;;  %v6251_v35 = vld [vmem:[#allocation4 + $0x50] sm:$0xff] }
 0x363   :  { %8719 = vst [vmem:[#allocation97_spill] sm:$0xff] %v6222_v31  ;;  %8721 = vst [vmem:[#allocation272_spill] sm:$0xff] %v6226_v13  ;;  %v6238_v39 = vmul.f32 %v8726_v16, %v8640_v32  ;;  %v6240_v31 = vpop.permute.xlu1 %2078  ;;  %v1225_v13 = vadd.f32 %v1213_v14, %v1149_v2  ;;  %v1227_v26 = vadd.f32 %v1215_v53, %v1151_v29  ;;  %v8729_v54 = vld [vmem:[#allocation172_spill] sm:$0xff]  ;;  %v8732_v32 = vmov 3   ;;  %v8734_v2 = vld [vmem:[#allocation147_spill] sm:$0xff] }
 0x364   :  { %8723 = vst [vmem:[#allocation99_spill] sm:$0xff] %v6230_v4  ;;  %8727 = vst [vmem:[#allocation108_spill] sm:$0xff] %v6240_v31  ;;  %v1358_v4 = vmul.f32 %v8729_v54, %v8695_v24  ;;  %2414 = vperm.xlu1 %4003, %v6251_v35   ;;  %4033 = vset.pattern.permute.xlu0 %v8732_v32  ;;  %v1437_v46 = vmul.f32 %v8733_v1, %v5579_v36  ;;  %v8736_v44 = vld [vmem:[#allocation160_spill] sm:$0xff]  ;;  %v8737_v45 = vld [vmem:[#allocation149_spill] sm:$0xff] }
 0x365   :  { %8728 = vst [vmem:[#allocation101_spill] sm:$0xff] %v6242_v51  ;;  %8730 = vst [vmem:[#allocation103_spill] sm:$0xff] %v6249_v41  ;;  %v6259_v29 = vmul.f32 %v8734_v2, %v5579_v36  ;;  %v1283_v18 = vmul.f32 %v8736_v44, %v8683_v6  ;;  %v1294_v14 = vadd.f32 %v1282_v34, %v1218_v8  ;;  %v8739_v47 = vld [vmem:[#allocation151_spill] sm:$0xff]  ;;  %v8741_v54 = vld [vmem:[#allocation176_spill] sm:$0xff]  ;;  %v6286_v8 = vpop.permute.xlu0 %2490 }
 0x366   :  { %8731 = vst [vmem:[#allocation120_spill] sm:$0xff] %v6251_v35  ;;  %v1219_v40 = vadd.f32 %v1207_v25, %v1143_v20  ;;  %v6265_v53 = vmul.f32 %v8737_v45, %v5579_v36  ;;  %v6269_v16 = vmul.f32 %v8739_v47, %v5579_v36  ;;  %v1361_v1 = vmul.f32 %v8741_v54, %v8695_v24  ;;  %v8742_v32 = vld [vmem:[#allocation153_spill] sm:$0xff]  ;;  %v8743_v51 = vld [vmem:[#allocation155_spill] sm:$0xff]  ;;  %v8763_v31 = vld [vmem:[#allocation168_spill] sm:$0xff] }
 0x367   :  { %8735 = vst [vmem:[#allocation105_spill] sm:$0xff] %v6259_v29  ;;  %v6275_v2 = vmul.f32 %v8742_v32, %v5581_v22  ;;  %v6279_v44 = vmul.f32 %v8743_v51, %v5581_v22  ;;  %v1297_v25 = vadd.f32 %v6149_v7, %v1221_v43  ;;  %v6282_v20 = vadd.f32 %v1287_v55, %v1223_v59  ;;  %v6284_v34 = vpop.permute.xlu1 %2086  ;;  %v8746_v45 = vld [vmem:[#allocation157_spill] sm:$0xff]  ;;  %v8750_v7 = vld [vmem:[#allocation158_spill] sm:$0xff]  ;;  %v8751_v59 = vld [vmem:[#allocation159_spill] sm:$0xff] }
 0x368   :  { %8738 = vst [vmem:[#allocation124_spill] sm:$0xff] %v6265_v53  ;;  %8740 = vst [vmem:[#allocation106_spill] sm:$0xff] %v6269_v16  ;;  %v6290_v47 = vmul.f32 %v8746_v45, %v5581_v22  ;;  %v1370_v54 = vadd.f32 %v1358_v4, %v1294_v14  ;;  %v6293_v32 = vadd.f32 %v6160_v12, %v1225_v13  ;;  %v8749_v51 = vmov 31   ;;  %v8754_v45 = vld [vmem:[#allocation161_spill] sm:$0xff]  ;;  %v8756_v12 = vld [vmem:[#allocation162_spill] sm:$0xff] }
 0x369   :  { %8744 = vst [vmem:[#allocation107_spill] sm:$0xff] %v6282_v20  ;;  %8745 = vst [vmem:[#allocation126_spill] sm:$0xff] %v6286_v8  ;;  %v6295_v41 = vadd.f32 %v1291_v61, %v1227_v26  ;;  %4004 = vset.pattern.permute.xlu1 %v8749_v51  ;;  %v6300_v55 = vmul.f32 %v8750_v7, %v8683_v6  ;;  %v6304_v43 = vmul.f32 %v8751_v59, %v5581_v22  ;;  %v8757_v13 = vld [vmem:[#allocation163_spill] sm:$0xff]  ;;  %v8759_v14 = vld [vmem:[#allocation164_spill] sm:$0xff]  ;;  %v247_v29 = vpop.permute.xlu0 %246 }
 0x36a   :  { %8747 = vst [vmem:[#allocation128_spill] sm:$0xff] %v6293_v32  ;;  %v6306_v8 = vadd.f32 %v1283_v18, %v1219_v40  ;;  %v6310_v4 = vmul.f32 %v8754_v45, %v5581_v22  ;;  %2450 = vperm.xlu1 %4004, %v5725_v30   ;;  %v6315_v61 = vmul.f32 %v8756_v12, %v8683_v6  ;;  %v8760_v40 = vld [vmem:[#allocation165_spill] sm:$0xff]  ;;  %v8761_v59 = vld [vmem:[#allocation166_spill] sm:$0xff]  ;;  %v8762_v30 = vld [vmem:[#allocation167_spill] sm:$0xff] }
 0x36b   :  { %8748 = vst [vmem:[#allocation275_spill] sm:$0xff] %v6295_v41  ;;  %8752 = vst [vmem:[#allocation109_spill] sm:$0xff] %v6304_v43  ;;  %v6319_v26 = vmul.f32 %v8757_v13, %v5581_v22  ;;  %v6323_v51 = vmul.f32 %v8759_v14, %v8683_v6  ;;  %v1373_v18 = vadd.f32 %v1361_v1, %v1297_v25  ;;  %v6337_v13 = vpop.permute.xlu1 %2094  ;;  %v8765_v14 = vld [vmem:[#allocation170_spill] sm:$0xff] }
 0x36c   :  { %8753 = vst [vmem:[#allocation110_spill] sm:$0xff] %v6306_v8  ;;  %8755 = vst [vmem:[#allocation130_spill] sm:$0xff] %v6310_v4  ;;  %v1586_v7 = vmul.f32 %v8760_v40, %v5591_v28  ;;  %v6329_v45 = vmul.f32 %v8761_v59, %v8683_v6  ;;  %v1589_v12 = vmul.f32 %v8762_v30, %v5591_v28  ;;  %v8767_v25 = vld [vmem:[#allocation198_spill] sm:$0xff]  ;;  %v8769_v30 = vld [vmem:[#allocation175_spill] sm:$0xff] }
 0x36d   :  { %8758 = vst [vmem:[#allocation111_spill] sm:$0xff] %v6319_v26  ;;  %v6335_v35 = vmul.f32 %v8763_v31, %v8683_v6  ;;  %8764 = vst [vmem:[#allocation112_spill] sm:$0xff] %v6337_v13  ;;  %v6341_v16 = vmul.f32 %v8765_v14, %v8683_v6  ;;  %v1446_v1 = vadd.f32 %v1434_v21, %v1370_v54  ;;  %v8768_v59 = vld [vmem:[#allocation202_spill] sm:$0xff]  ;;  %v8770_v31 = vld [vmem:[#allocation177_spill] sm:$0xff] }
 0x36e   :  { %v1510_v40 = vmul.f32 %v8767_v25, %v5581_v22  ;;  %v1513_v53 = vmul.f32 %v8768_v59, %v5581_v22  ;;  %v6349_v8 = vmul.f32 %v8769_v30, %v5593_v49  ;;  %v6353_v41 = vmul.f32 %v8770_v31, %v5593_v49  ;;  %v8771_v13 = vld [vmem:[#allocation178_spill] sm:$0xff]  ;;  %2458 = vperm.xlu1 %4004, %v5781_v27   ;;  %v8773_v54 = vld [vmem:[#allocation179_spill] sm:$0xff]  ;;  %v8775_v25 = vld [vmem:[#allocation180_spill] sm:$0xff] }
 0x36f   :  { %8766 = vst [vmem:[#allocation122_spill] sm:$0xff] %v6341_v16  ;;  %v6357_v6 = vmul.f32 %v8771_v13, %v8695_v24  ;;  %v293_v21 = vmul.f32 %v247_v29, %v4425_v57  ;;  %v6363_v14 = vmul.f32 %v8773_v54, %v5593_v49  ;;  %v6367_v59 = vmul.f32 %v8775_v25, %v8695_v24  ;;  %v8777_v30 = vld [vmem:[#allocation181_spill] sm:$0xff]  ;;  %v8779_v13 = vld [vmem:[#allocation183_spill] sm:$0xff]  ;;  %v8781_v29 = vld [vmem:[#allocation184_spill] sm:$0xff]  ;;  %v6384_v25 = vpop.permute.xlu1 %2102 }
 0x370   :  { %v6371_v31 = vmul.f32 %v8777_v30, %v5593_v49  ;;  %v1449_v22 = vadd.f32 %v1437_v46, %v1373_v18  ;;  %v6375_v32 = vmul.f32 %v8779_v13, %v5593_v49  ;;  %v8782_v54 = vld [vmem:[#allocation187_spill] sm:$0xff]  ;;  %v8783_v26 = vld [vmem:[#allocation9_spill] sm:$0xff]  ;;  %8784 = vst [vmem:[#allocation118_spill] sm:$0xff] %v6384_v25  ;;  %v1522_v13 = vadd.f32 %v1510_v40, %v1446_v1  ;;  %v8798_v25 = vld [vmem:[#allocation10_spill] sm:$0xff] }
 0x371   :  { %8772 = vst [vmem:[#allocation113_spill] sm:$0xff] %v6357_v6  ;;  %8774 = vst [vmem:[#allocation114_spill] sm:$0xff] %v6363_v14  ;;  %v6379_v6 = vmul.f32 %v8781_v29, %v5579_v36  ;;  %v1738_v20 = vmul.f32 %v8782_v54, %v5595_v10  ;;  %v305_v4 = vadd.f32 %v293_v21, %v8783_v26  ;;  %v8786_v46 = vld [vmem:[#allocation189_spill] sm:$0xff]  ;;  %v8787_v29 = vld [vmem:[#allocation190_spill] sm:$0xff] }
 0x372   :  { %8776 = vst [vmem:[#allocation115_spill] sm:$0xff] %v6367_v59  ;;  %8778 = vst [vmem:[#allocation116_spill] sm:$0xff] %v6371_v31  ;;  %v8785_v59 = vld [vmem:[#allocation188_spill] sm:$0xff]  ;;  %v1741_v18 = vmul.f32 %v8786_v46, %v5595_v10  ;;  %v1525_v24 = vadd.f32 %v1513_v53, %v1449_v22  ;;  %v6394_v31 = vmul.f32 %v8787_v29, %v5579_v36  ;;  %2462 = vperm.xlu1 %4004, %v5831_v9   ;;  %v8793_v1 = vld [vmem:[#allocation197_spill] sm:$0xff] }
 0x373   :  { %8780 = vst [vmem:[#allocation117_spill] sm:$0xff] %v6375_v32  ;;  %v6388_v30 = vmul.f32 %v8785_v59, %v5579_v36  ;;  %v259_v32 = vpop.permute.xlu0 %258  ;;  %v8788_v54 = vld [vmem:[#allocation192_spill] sm:$0xff]  ;;  %v381_v26 = vadd.f32 %v5700_v0, %v305_v4  ;;  %v8789_v59 = vld [vmem:[#allocation194_spill] sm:$0xff]  ;;  %v6413_v40 = vmul.f32 %v8793_v1, %v5597_v11  ;;  %v8795_v0 = vld [vmem:[#allocation199_spill] sm:$0xff]  ;;  %v1598_v43 = vadd.f32 %v1586_v7, %v1522_v13 }
 0x374   :  { %v6398_v16 = vmul.f32 %v8788_v54, %v5579_v36  ;;  %v296_v21 = vmul.f32 %v259_v32, %v4425_v57  ;;  %v6405_v46 = vmul.f32 %v8789_v59, %v5579_v36  ;;  %v8791_v22 = vld [vmem:[#allocation196_spill] sm:$0xff]  ;;  %v6419_v32 = vmul.f32 %v8795_v0, %v5597_v11  ;;  %v8806_v7 = vld [vmem:[#allocation211_spill] sm:$0xff] }
 0x375   :  { %v6409_v53 = vmul.f32 %v8791_v22, %v5579_v36  ;;  %v8794_v29 = vld [vmem:[#allocation224_spill] sm:$0xff]  ;;  %v457_v59 = vadd.f32 %v5691_v58, %v381_v26  ;;  %v6425_v22 = vpop.permute.xlu1 %2110  ;;  %v8800_v36 = vld [vmem:[#allocation201_spill] sm:$0xff]  ;;  %v1601_v0 = vadd.f32 %v1589_v12, %v1525_v24  ;;  %v6449_v24 = vmul.f32 %v8806_v7, %v5599_v42  ;;  %v8807_v12 = vld [vmem:[#allocation214_spill] sm:$0xff] }
 0x376   :  { %8790 = vst [vmem:[#allocation119_spill] sm:$0xff] %v6405_v46  ;;  %v1662_v54 = vmul.f32 %v8794_v29, %v5593_v49  ;;  %8796 = vst [vmem:[#allocation121_spill] sm:$0xff] %v6419_v32  ;;  %v8797_v9 = vld [vmem:[#allocation228_spill] sm:$0xff]  ;;  %v308_v46 = vadd.f32 %v296_v21, %v8798_v25  ;;  %v6429_v1 = vmul.f32 %v8800_v36, %v5597_v11  ;;  %v8804_v32 = vld [vmem:[#allocation209_spill] sm:$0xff]  ;;  %2470 = vperm.xlu1 %4004, %v5875_v60  }
 0x377   :  { %8792 = vst [vmem:[#allocation276_spill] sm:$0xff] %v6409_v53  ;;  %v1665_v4 = vmul.f32 %v8797_v9, %v5593_v49  ;;  %8799 = vst [vmem:[#allocation123_spill] sm:$0xff] %v6425_v22  ;;  %v8802_v53 = vld [vmem:[#allocation203_spill] sm:$0xff]  ;;  %v267_v14 = vpop.permute.xlu0 %266  ;;  %v6437_v9 = vmul.f32 %v8804_v32, %v5599_v42  ;;  %v533_v58 = vadd.f32 %v5786_v62, %v457_v59  ;;  %v8805_v36 = vld [vmem:[#allocation210_spill] sm:$0xff] }
 0x378   :  { %8801 = vst [vmem:[#allocation134_spill] sm:$0xff] %v6429_v1  ;;  %v6433_v29 = vmul.f32 %v8802_v53, %v5597_v11  ;;  %v384_v25 = vadd.f32 %v5730_v63, %v308_v46  ;;  %v298_v26 = vmul.f32 %v267_v14, %v4425_v57  ;;  %v6445_v21 = vmul.f32 %v8805_v36, %v5591_v28  ;;  %v8808_v46 = vld [vmem:[#allocation11_spill] sm:$0xff]  ;;  %v8809_v32 = vld [vmem:[#allocation216_spill] sm:$0xff]  ;;  %v8810_v36 = vld [vmem:[#allocation218_spill] sm:$0xff] }
 0x379   :  { %v6453_v13 = vmul.f32 %v8807_v12, %v5591_v28  ;;  %v1674_v53 = vadd.f32 %v1662_v54, %v1598_v43  ;;  %v1677_v62 = vadd.f32 %v1665_v4, %v1601_v0  ;;  %v609_v63 = vadd.f32 %v5759_v3, %v533_v58  ;;  %v8812_v22 = vld [vmem:[#allocation219_spill] sm:$0xff]  ;;  %v8814_v43 = vld [vmem:[#allocation220_spill] sm:$0xff]  ;;  %v6474_v3 = vpop.permute.xlu1 %2146  ;;  %v8816_v4 = vld [vmem:[#allocation221_spill] sm:$0xff] }
 0x37a   :  { %8803 = vst [vmem:[#allocation125_spill] sm:$0xff] %v6433_v29  ;;  %v460_v14 = vadd.f32 %v5704_v56, %v384_v25  ;;  %v310_v60 = vadd.f32 %v298_v26, %v8808_v46  ;;  %v6460_v59 = vmul.f32 %v8809_v32, %v5591_v28  ;;  %v6464_v7 = vmul.f32 %v8810_v36, %v5591_v28  ;;  %v8820_v32 = vld [vmem:[#allocation223_spill] sm:$0xff]  ;;  %v8837_v49 = vld [vmem:[#allocation24_spill] sm:$0xff] }
 0x37b   :  { %v6468_v12 = vmul.f32 %v8812_v22, %v5591_v28  ;;  %v6472_v54 = vmul.f32 %v8814_v43, %v5674_v38  ;;  %8815 = vst [vmem:[#allocation146_spill] sm:$0xff] %v6474_v3  ;;  %v275_v56 = vpop.permute.xlu0 %274  ;;  %v6478_v0 = vmul.f32 %v8816_v4, %v5591_v28  ;;  %v685_v58 = vadd.f32 %v5890_v48, %v609_v63  ;;  %v8818_v22 = vld [vmem:[#allocation222_spill] sm:$0xff]  ;;  %v8822_v63 = vld [vmem:[#allocation232_spill] sm:$0xff] }
 0x37c   :  { %8811 = vst [vmem:[#allocation127_spill] sm:$0xff] %v6464_v7  ;;  %v536_v25 = vadd.f32 %v5805_v33, %v460_v14  ;;  %v386_v26 = vadd.f32 %v5734_v17, %v310_v60  ;;  %2478 = vperm.xlu1 %4004, %v5853_v15   ;;  %v6486_v46 = vmul.f32 %v8818_v22, %v5674_v38  ;;  %v8823_v60 = vld [vmem:[#allocation234_spill] sm:$0xff]  ;;  %v8842_v3 = vld [vmem:[#allocation280_spill] sm:$0xff] }
 0x37d   :  { %8813 = vst [vmem:[#allocation129_spill] sm:$0xff] %v6468_v12  ;;  %8817 = vst [vmem:[#allocation131_spill] sm:$0xff] %v6478_v0  ;;  %v6490_v36 = vmul.f32 %v8820_v32, %v5674_v38  ;;  %v1750_v43 = vadd.f32 %v1738_v20, %v1674_v53  ;;  %v300_v4 = vmul.f32 %v275_v56, %v4425_v57  ;;  %v8824_v32 = vld [vmem:[#allocation250_spill] sm:$0xff]  ;;  %v8825_v53 = vld [vmem:[#allocation271_spill] sm:$0xff] }
 0x37e   :  { %8819 = vst [vmem:[#allocation132_spill] sm:$0xff] %v6486_v46  ;;  %v1753_v28 = vadd.f32 %v1741_v18, %v1677_v62  ;;  %v761_v48 = vadd.f32 %v5849_v23, %v685_v58  ;;  %v612_v33 = vadd.f32 %v5767_v5, %v536_v25  ;;  %v462_v17 = vadd.f32 %v5712_v52, %v386_v26  ;;  %v6507_v18 = vpop.permute.xlu1 %2154  ;;  %v8827_v5 = vld [vmem:[#allocation236_spill] sm:$0xff]  ;;  %v8828_v58 = vld [vmem:[#allocation38_spill] sm:$0xff] }
 0x37f   :  { %8821 = vst [vmem:[#allocation133_spill] sm:$0xff] %v6490_v36  ;;  %v6498_v14 = vmul.f32 %v8822_v63, %v5676_v37  ;;  %v6502_v22 = vmul.f32 %v8823_v60, %v5676_v37  ;;  %v1814_v20 = vmul.f32 %v8824_v32, %v5597_v11  ;;  %v312_v56 = vadd.f32 %v300_v4, %v8825_v53  ;;  %v283_v23 = vpop.permute.xlu0 %282  ;;  %v8829_v26 = vld [vmem:[#allocation48_spill] sm:$0xff]  ;;  %v8832_v4 = vld [vmem:[#allocation241_spill] sm:$0xff]  ;;  %v8838_v12 = vld [vmem:[#allocation294_spill] sm:$0xff] }
 0x380   :  { %8826 = vst [vmem:[#allocation135_spill] sm:$0xff] %v6507_v18  ;;  %v6511_v62 = vmul.f32 %v8827_v5, %v5595_v10  ;;  %v837_v52 = vadd.f32 %v5988_v50, %v761_v48  ;;  %v688_v25 = vadd.f32 %v8828_v58, %v612_v33  ;;  %v538_v63 = vadd.f32 %v8829_v26, %v462_v17  ;;  %v8830_v60 = vld [vmem:[#allocation72_spill] sm:$0xff]  ;;  %v8833_v18 = vld [vmem:[#allocation18_spill] sm:$0xff]  ;;  %v8834_v50 = vld [vmem:[#allocation253_spill] sm:$0xff] }
 0x381   :  { %2486 = vperm.xlu1 %4004, %v8830_v60   ;;  %v8831_v0 = vld [vmem:[#allocation240_spill] sm:$0xff]  ;;  %v6523_v53 = vmul.f32 %v8832_v4, %v5595_v10  ;;  %v388_v29 = vadd.f32 %v8833_v18, %v312_v56  ;;  %v302_v5 = vmul.f32 %v283_v23, %v4425_v57  ;;  %v1817_v48 = vmul.f32 %v8834_v50, %v5597_v11  ;;  %v8835_v33 = vld [vmem:[#allocation43_spill] sm:$0xff]  ;;  %v8836_v17 = vld [vmem:[#allocation33_spill] sm:$0xff] }
 0x382   :  { %v6519_v32 = vmul.f32 %v8831_v0, %v5595_v10  ;;  %v913_v58 = vadd.f32 %v8835_v33, %v837_v52  ;;  %v764_v26 = vadd.f32 %v8836_v17, %v688_v25  ;;  %v614_v36 = vadd.f32 %v8837_v49, %v538_v63  ;;  %v8839_v0 = vld [vmem:[#allocation242_spill] sm:$0xff]  ;;  %v8841_v4 = vld [vmem:[#allocation301_spill] sm:$0xff]  ;;  %v6538_v18 = vpop.permute.xlu1 %2158  ;;  %v8844_v50 = vld [vmem:[#allocation243_spill] sm:$0xff] }
 0x383   :  { %v6534_v60 = vmul.f32 %v8839_v0, %v8838_v12  ;;  %v1826_v1 = vadd.f32 %v1814_v20, %v1750_v43  ;;  %v464_v46 = vadd.f32 %v8841_v4, %v388_v29  ;;  %v314_v56 = vadd.f32 %v302_v5, %v8842_v3  ;;  %8843 = vst [vmem:[#allocation152_spill] sm:$0xff] %v6538_v18  ;;  %v291_v23 = vpop.permute.xlu0 %290  ;;  %v8846_v52 = vld [vmem:[#allocation71_spill] sm:$0xff]  ;;  %v8847_v33 = vld [vmem:[#allocation57_spill] sm:$0xff]  ;;  %v8850_v43 = vld [vmem:[#allocation244_spill] sm:$0xff] }
 0x384   :  { %v6542_v11 = vmul.f32 %v8844_v50, %v5595_v10  ;;  %v989_v25 = vadd.f32 %v8846_v52, %v913_v58  ;;  %v840_v49 = vadd.f32 %v8847_v33, %v764_v26  ;;  %v8848_v63 = vld [vmem:[#allocation39_spill] sm:$0xff]  ;;  %v6550_v29 = vmul.f32 %v8850_v43, %v8838_v12  ;;  %v8852_v3 = vld [vmem:[#allocation50_spill] sm:$0xff]  ;;  %v8855_v58 = vld [vmem:[#allocation56_spill] sm:$0xff] }
 0x385   :  { %8840 = vst [vmem:[#allocation150_spill] sm:$0xff] %v6534_v60  ;;  %v690_v17 = vadd.f32 %v8848_v63, %v614_v36  ;;  %v8849_v0 = vld [vmem:[#allocation27_spill] sm:$0xff]  ;;  %v540_v20 = vadd.f32 %v8852_v3, %v464_v46  ;;  %v304_v18 = vmul.f32 %v291_v23, %v4425_v57  ;;  %v1829_v50 = vadd.f32 %v1817_v48, %v1753_v28  ;;  %v8854_v10 = vld [vmem:[#allocation78_spill] sm:$0xff]  ;;  %v8858_v60 = vld [vmem:[#allocation17_spill] sm:$0xff] }
 0x386   :  { %8845 = vst [vmem:[#allocation136_spill] sm:$0xff] %v6542_v11  ;;  %2494 = vperm.xlu1 %4004, %v8849_v0   ;;  %8851 = vst [vmem:[#allocation154_spill] sm:$0xff] %v6550_v29  ;;  %v8853_v5 = vld [vmem:[#allocation19_spill] sm:$0xff]  ;;  %v1065_v11 = vadd.f32 %v8854_v10, %v989_v25  ;;  %v916_v52 = vadd.f32 %v8855_v58, %v840_v49  ;;  %v8856_v26 = vld [vmem:[#allocation34_spill] sm:$0xff]  ;;  %v1902_v36 = vadd.f32 %v6437_v9, %v1826_v1  ;;  %v6562_v46 = vpop.permute.xlu1 %2166  ;;  %v8865_v49 = vmov 32  }
 0x387   :  { %v390_v4 = vadd.f32 %v8853_v5, %v314_v56  ;;  %v766_v33 = vadd.f32 %v8856_v26, %v690_v17  ;;  %v8857_v63 = vld [vmem:[#allocation26_spill] sm:$0xff]  ;;  %v8859_v29 = vld [vmem:[#allocation285_spill] sm:$0xff]  ;;  %8860 = vst [vmem:[#allocation156_spill] sm:$0xff] %v6562_v46  ;;  %v8861_v56 = vld [vmem:[#allocation295_spill] sm:$0xff] }
 0x388   :  { %v616_v0 = vadd.f32 %v8857_v63, %v540_v20  ;;  %v316_v7 = vadd.f32 %v304_v18, %v8859_v29  ;;  %v8862_v3 = vld [vmem:[#allocation254_spill] sm:$0xff]  ;;  %v1141_v10 = vadd.f32 %v6176_v19, %v1065_v11  ;;  %v8864_v23 = vld [vmem:[#allocation76_spill] sm:$0xff]  ;;  %v1905_v11 = vadd.f32 %v6449_v24, %v1829_v50  ;;  %v8871_v19 = vld [vmem:[#allocation73_spill] sm:$0xff] }
 0x389   :  { %v466_v43 = vadd.f32 %v8858_v60, %v390_v4  ;;  %v6566_v57 = vmul.f32 %v8862_v3, %v8861_v56  ;;  %v8863_v28 = vld [vmem:[#allocation82_spill] sm:$0xff]  ;;  %v842_v25 = vadd.f32 %v8864_v23, %v766_v33  ;;  %v8866_v1 = vld [vmem:[#allocation256_spill] sm:$0xff]  ;;  %v8870_v4 = vld [vmem:[#allocation47_spill] sm:$0xff] }
 0x38a   :  { %v992_v48 = vadd.f32 %v8863_v28, %v916_v52  ;;  %4007 = vset.pattern.permute.xlu1 %v8865_v49  ;;  %v6574_v9 = vmul.f32 %v8866_v1, %v8861_v56  ;;  %v8867_v60 = vld [vmem:[#allocation40_spill] sm:$0xff]  ;;  %v8868_v17 = vld [vmem:[#allocation30_spill] sm:$0xff]  ;;  %v1217_v58 = vadd.f32 %v8871_v19, %v1141_v10  ;;  %v8872_v52 = vld [vmem:[#allocation61_spill] sm:$0xff] }
 0x38b   :  { %v692_v18 = vadd.f32 %v8867_v60, %v616_v0  ;;  %v542_v29 = vadd.f32 %v8868_v17, %v466_v43  ;;  %v8869_v20 = vld [vmem:[#allocation20_spill] sm:$0xff]  ;;  %2530 = vperm.xlu1 %4007, %v8870_v4   ;;  %v8874_v3 = vld [vmem:[#allocation290_spill] sm:$0xff] }
 0x38c   :  { %v392_v5 = vadd.f32 %v8869_v20, %v316_v7  ;;  %v1068_v26 = vadd.f32 %v8872_v52, %v992_v48  ;;  %v8873_v33 = vld [vmem:[#allocation68_spill] sm:$0xff]  ;;  %v1966_v28 = vmul.f32 %v8874_v3, %v5674_v38  ;;  %v8876_v0 = vld [vmem:[#allocation42_spill] sm:$0xff]  ;;  %v6589_v7 = vpop.permute.xlu1 %2174  ;;  %v8881_v48 = vld [vmem:[#allocation77_spill] sm:$0xff] }
 0x38d   :  { %v918_v63 = vadd.f32 %v8873_v33, %v842_v25  ;;  %v8875_v23 = vld [vmem:[#allocation44_spill] sm:$0xff]  ;;  %v618_v60 = vadd.f32 %v8876_v0, %v542_v29  ;;  %8878 = vst [vmem:[#allocation137_spill] sm:$0xff] %v6589_v7  ;;  %v8879_v20 = vld [vmem:[#allocation262_spill] sm:$0xff]  ;;  %v1293_v25 = vadd.f32 %v6300_v55, %v1217_v58  ;;  %v8886_v3 = vld [vmem:[#allocation41_spill] sm:$0xff] }
 0x38e   :  { %v768_v1 = vadd.f32 %v8875_v23, %v692_v18  ;;  %v8877_v43 = vld [vmem:[#allocation16_spill] sm:$0xff]  ;;  %v6593_v24 = vmul.f32 %v8879_v20, %v5599_v42  ;;  %v8880_v50 = vld [vmem:[#allocation90_spill] sm:$0xff]  ;;  %v8892_v7 = vld [vmem:[#allocation51_spill] sm:$0xff] }
 0x38f   :  { %v468_v17 = vadd.f32 %v8877_v43, %v392_v5  ;;  %v1144_v10 = vadd.f32 %v8880_v50, %v1068_v26  ;;  %v994_v4 = vadd.f32 %v8881_v48, %v918_v63  ;;  %v8882_v19 = vld [vmem:[#allocation296_spill] sm:$0xff]  ;;  %v8885_v18 = vld [vmem:[#allocation58_spill] sm:$0xff]  ;;  %v694_v5 = vadd.f32 %v8886_v3, %v618_v60  ;;  %2534 = vperm.xlu1 %4007, %v5781_v27   ;;  %v8888_v43 = vld [vmem:[#allocation265_spill] sm:$0xff] }
 0x390   :  { %v8883_v52 = vld [vmem:[#allocation264_spill] sm:$0xff]  ;;  %v844_v29 = vadd.f32 %v8885_v18, %v768_v1  ;;  %v6608_v20 = vmul.f32 %v8888_v43, %v5599_v42  ;;  %v8889_v26 = vld [vmem:[#allocation269_spill] sm:$0xff]  ;;  %v8890_v50 = vld [vmem:[#allocation62_spill] sm:$0xff] }
 0x391   :  { %v6600_v33 = vmul.f32 %v8883_v52, %v8882_v19  ;;  %v8887_v23 = vld [vmem:[#allocation32_spill] sm:$0xff]  ;;  %v1220_v63 = vadd.f32 %v8889_v26, %v1144_v10  ;;  %v1070_v55 = vadd.f32 %v8890_v50, %v994_v4  ;;  %v8891_v58 = vld [vmem:[#allocation270_spill] sm:$0xff]  ;;  %v1978_v52 = vadd.f32 %v1966_v28, %v1902_v36  ;;  %v8893_v1 = vld [vmem:[#allocation35_spill] sm:$0xff] }
 0x392   :  { %v544_v0 = vadd.f32 %v8887_v23, %v468_v17  ;;  %v1369_v48 = vadd.f32 %v8891_v58, %v1293_v25  ;;  %v920_v46 = vadd.f32 %v8892_v7, %v844_v29  ;;  %v770_v18 = vadd.f32 %v8893_v1, %v694_v5  ;;  %v8894_v60 = vld [vmem:[#allocation46_spill] sm:$0xff]  ;;  %v6616_v17 = vpop.permute.xlu1 %2182  ;;  %v8895_v27 = vld [vmem:[#allocation299_spill] sm:$0xff]  ;;  %v8896_v43 = vld [vmem:[#allocation93_spill] sm:$0xff] }
 0x393   :  { %8884 = vst [vmem:[#allocation138_spill] sm:$0xff] %v6600_v33  ;;  %v1969_v23 = vmul.f32 %v8895_v27, %v5674_v38  ;;  %v1146_v33 = vadd.f32 %v8896_v43, %v1070_v55  ;;  %v1296_v4 = vadd.f32 %v6315_v61, %v1220_v63  ;;  %v8897_v25 = vld [vmem:[#allocation267_spill] sm:$0xff]  ;;  %v8898_v28 = vld [vmem:[#allocation98_spill] sm:$0xff]  ;;  %v8901_v50 = vld [vmem:[#allocation81_spill] sm:$0xff] }
 0x394   :  { %v620_v3 = vadd.f32 %v8894_v60, %v544_v0  ;;  %v1445_v10 = vadd.f32 %v6379_v6, %v1369_v48  ;;  %v6625_v36 = vmul.f32 %v8897_v25, %v5599_v42  ;;  %v996_v7 = vadd.f32 %v8898_v28, %v920_v46  ;;  %v8899_v29 = vld [vmem:[#allocation70_spill] sm:$0xff]  ;;  %v8900_v0 = vld [vmem:[#allocation31_spill] sm:$0xff]  ;;  %2542 = vperm.xlu1 %4007, %v8901_v50   ;;  %v8902_v58 = vld [vmem:[#allocation96_spill] sm:$0xff] }
 0x395   :  { %v846_v5 = vadd.f32 %v8899_v29, %v770_v18  ;;  %v2118_v1 = vmul.f32 %v8902_v58, %v8838_v12  ;;  %v8903_v55 = vld [vmem:[#allocation79_spill] sm:$0xff]  ;;  %v2054_v48 = vadd.f32 %v6498_v14, %v1978_v52  ;;  %v8905_v27 = vld [vmem:[#allocation64_spill] sm:$0xff]  ;;  %v8906_v46 = vld [vmem:[#allocation53_spill] sm:$0xff]  ;;  %v1981_v29 = vadd.f32 %v1969_v23, %v1905_v11 }
 0x396   :  { %v696_v26 = vadd.f32 %v8900_v0, %v620_v3  ;;  %v1222_v60 = vadd.f32 %v8903_v55, %v1146_v33  ;;  %v1521_v6 = vadd.f32 %v6275_v2, %v1445_v10  ;;  %v8904_v61 = vld [vmem:[#allocation87_spill] sm:$0xff]  ;;  %v1072_v43 = vadd.f32 %v8905_v27, %v996_v7  ;;  %v8907_v18 = vld [vmem:[#allocation36_spill] sm:$0xff]  ;;  %v6640_v3 = vpop.permute.xlu1 %2190  ;;  %v8908_v2 = vld [vmem:[#allocation297_spill] sm:$0xff] }
 0x397   :  { %v1372_v63 = vadd.f32 %v8904_v61, %v1296_v4  ;;  %v922_v25 = vadd.f32 %v8906_v46, %v846_v5  ;;  %v8909_v10 = vld [vmem:[#allocation291_spill] sm:$0xff]  ;;  %v8910_v58 = vld [vmem:[#allocation97_spill] sm:$0xff]  ;;  %v8911_v52 = vld [vmem:[#allocation100_spill] sm:$0xff]  ;;  %v8913_v61 = vmov 1  }
 0x398   :  { %v772_v28 = vadd.f32 %v8907_v18, %v696_v26  ;;  %v1597_v0 = vadd.f32 %v6445_v21, %v1521_v6  ;;  %v1298_v33 = vadd.f32 %v6323_v51, %v1222_v60  ;;  %v2346_v4 = vmul.f32 %v8909_v10, %v8908_v2  ;;  %v8912_v55 = vld [vmem:[#allocation63_spill] sm:$0xff]  ;;  %4008 = vset.pattern.permute.xlu1 %v8913_v61  ;;  %v8914_v23 = vld [vmem:[#allocation88_spill] sm:$0xff]  ;;  %v8916_v27 = vld [vmem:[#allocation65_spill] sm:$0xff] }
 0x399   :  { %v1448_v50 = vadd.f32 %v6388_v30, %v1372_v63  ;;  %v1148_v14 = vadd.f32 %v8910_v58, %v1072_v43  ;;  %v998_v7 = vadd.f32 %v8911_v52, %v922_v25  ;;  %v2130_v26 = vadd.f32 %v2118_v1, %v2054_v48  ;;  %v6654_v6 = vld [vmem:[#allocation2] sm:$0xff]  ;;  %v8915_v60 = vld [vmem:[#allocation80_spill] sm:$0xff]  ;;  %v8917_v46 = vld [vmem:[#allocation54_spill] sm:$0xff] }
 0x39a   :  { %v848_v5 = vadd.f32 %v8912_v55, %v772_v28  ;;  %v1673_v11 = vadd.f32 %v6349_v8, %v1597_v0  ;;  %v1374_v30 = vadd.f32 %v8914_v23, %v1298_v33  ;;  %2825 = vperm.xlu1 %4008, %v6654_v6   ;;  %v2121_v51 = vmul.f32 %v6284_v34, %v8838_v12  ;;  %v2227_v18 = vpop.permute.xlu1 %2226  ;;  %v8918_v28 = vld [vmem:[#allocation99_spill] sm:$0xff]  ;;  %v8921_v52 = vld [vmem:[#allocation66_spill] sm:$0xff]  ;;  %v8922_v55 = vld [vmem:[#allocation92_spill] sm:$0xff] }
 0x39b   :  { %v1524_v21 = vadd.f32 %v6279_v44, %v1448_v50  ;;  %v1224_v63 = vadd.f32 %v8915_v60, %v1148_v14  ;;  %v1074_v43 = vadd.f32 %v8916_v27, %v998_v7  ;;  %v2057_v1 = vadd.f32 %v6502_v22, %v1981_v29  ;;  %v8919_v50 = vld [vmem:[#allocation102_spill] sm:$0xff] }
 0x39c   :  { %v924_v25 = vadd.f32 %v8917_v46, %v848_v5  ;;  %v1749_v8 = vadd.f32 %v6511_v62, %v1673_v11  ;;  %v1450_v48 = vadd.f32 %v6394_v31, %v1374_v30  ;;  %v2270_v10 = vmul.f32 %v2227_v18, %v8882_v19 }
 0x39d   :  { %v1600_v44 = vadd.f32 %v6453_v13, %v1524_v21  ;;  %v1150_v0 = vadd.f32 %v8918_v28, %v1074_v43  ;;  %v1300_v34 = vadd.f32 %v6329_v45, %v1224_v63  ;;  %v2206_v62 = vadd.f32 %v6566_v57, %v2130_v26  ;;  %v8920_v13 = vld [vmem:[#allocation83_spill] sm:$0xff]  ;;  %v8923_v45 = vld [vmem:[#allocation86_spill] sm:$0xff]  ;;  %v8924_v57 = vld [vmem:[#allocation37_spill] sm:$0xff] }
 0x39e   :  { %v1000_v33 = vadd.f32 %v8919_v50, %v924_v25  ;;  %v1825_v58 = vadd.f32 %v6413_v40, %v1749_v8  ;;  %v1526_v22 = vadd.f32 %v6290_v47, %v1450_v48  ;;  %4010 = vset.pattern.permute.xlu1 %v8865_v49  ;;  %v2133_v31 = vadd.f32 %v2121_v51, %v2057_v1  ;;  %v6682_v11 = vpop.permute.xlu1 %2230  ;;  %v8925_v51 = vld [vmem:[#allocation74_spill] sm:$0xff]  ;;  %v8928_v43 = vld [vmem:[#allocation104_spill] sm:$0xff]  ;;  %v8929_v25 = vld [vmem:[#allocation109_spill] sm:$0xff] }
 0x39f   :  { %v1676_v14 = vadd.f32 %v6353_v41, %v1600_v44  ;;  %v1226_v29 = vadd.f32 %v8920_v13, %v1150_v0  ;;  %v1376_v5 = vadd.f32 %v8922_v55, %v1300_v34  ;;  %2550 = vperm.xlu1 %4010, %v8923_v45   ;;  %v2282_v47 = vadd.f32 %v2270_v10, %v2206_v62  ;;  %v8930_v8 = vld [vmem:[#allocation95_spill] sm:$0xff]  ;;  %v8933_v34 = vld [vmem:[#allocation122_spill] sm:$0xff]  ;;  %v8936_v62 = vld [vmem:[#allocation132_spill] sm:$0xff] }
 0x3a0   :  { %v1076_v7 = vadd.f32 %v8921_v52, %v1000_v33  ;;  %v1901_v61 = vadd.f32 %v6593_v24, %v1825_v58  ;;  %v1602_v41 = vadd.f32 %v6460_v59, %v1526_v22  ;;  %v2041_v26 = vmul.f32 %v8924_v57, %v5676_v37  ;;  %v8927_v59 = vld [vmem:[#allocation114_spill] sm:$0xff]  ;;  %v8931_v28 = vld [vmem:[#allocation127_spill] sm:$0xff] }
 0x3a1   :  { %v1752_v40 = vadd.f32 %v6519_v32, %v1676_v14  ;;  %v1452_v23 = vadd.f32 %v6398_v16, %v1376_v5  ;;  %v1302_v30 = vadd.f32 %v6335_v35, %v1226_v29  ;;  %v2044_v60 = vmul.f32 %v8925_v51, %v5676_v37  ;;  %v8926_v32 = vld [vmem:[#allocation121_spill] sm:$0xff]  ;;  %v8932_v50 = vld [vmem:[#allocation119_spill] sm:$0xff]  ;;  %v8934_v14 = vld [vmem:[#allocation150_spill] sm:$0xff] }
 0x3a2   :  { %v1152_v21 = vadd.f32 %v6238_v39, %v1076_v7  ;;  %v1977_v24 = vadd.f32 %v6472_v54, %v1901_v61  ;;  %v1678_v27 = vadd.f32 %v8927_v59, %v1602_v41  ;;  %v2209_v39 = vadd.f32 %v6574_v9, %v2133_v31  ;;  %v2239_v54 = vpop.permute.xlu1 %2238  ;;  %v8935_v9 = vld [vmem:[#allocation146_spill] sm:$0xff]  ;;  %v8939_v29 = vld [vmem:[#allocation116_spill] sm:$0xff] }
 0x3a3   :  { %v1828_v63 = vadd.f32 %v8926_v32, %v1752_v40  ;;  %v1528_v1 = vadd.f32 %v8929_v25, %v1452_v23  ;;  %v1378_v44 = vadd.f32 %v8930_v8, %v1302_v30  ;;  %2554 = vperm.xlu1 %4010, %v5853_v15   ;;  %v6701_v18 = vadd.f32 %v2346_v4, %v2282_v47  ;;  %v8937_v31 = vld [vmem:[#allocation134_spill] sm:$0xff]  ;;  %v8938_v4 = vld [vmem:[#allocation293_spill] sm:$0xff]  ;;  %v8941_v5 = vld [vmem:[#allocation272_spill] sm:$0xff] }
 0x3a4   :  { %v1228_v46 = vadd.f32 %v8928_v43, %v1152_v21  ;;  %v2053_v35 = vadd.f32 %v2041_v26, %v1977_v24  ;;  %v1754_v48 = vadd.f32 %v6523_v53, %v1678_v27  ;;  %v2273_v58 = vmul.f32 %v2239_v54, %v8882_v19  ;;  %v8940_v7 = vld [vmem:[#allocation130_spill] sm:$0xff]  ;;  %v8942_v40 = vld [vmem:[#allocation72_spill] sm:$0xff]  ;;  %v8943_v23 = vld [vmem:[#allocation59_spill] sm:$0xff] }
 0x3a5   :  { %v1904_v16 = vadd.f32 %v6608_v20, %v1828_v63  ;;  %v1604_v0 = vadd.f32 %v8931_v28, %v1528_v1  ;;  %v1454_v33 = vadd.f32 %v8932_v50, %v1378_v44  ;;  %v2193_v22 = vmul.f32 %v8935_v9, %v8861_v56  ;;  %v8944_v51 = vld [vmem:[#allocation136_spill] sm:$0xff]  ;;  %v8945_v32 = vld [vmem:[#allocation129_spill] sm:$0xff]  ;;  %v8947_v43 = vld [vmem:[#allocation154_spill] sm:$0xff] }
 0x3a6   :  { %v1304_v10 = vadd.f32 %v8933_v34, %v1228_v46  ;;  %v2129_v15 = vadd.f32 %v8934_v14, %v2053_v35  ;;  %v1830_v53 = vadd.f32 %v8937_v31, %v1754_v48  ;;  %v2349_v13 = vmul.f32 %v8938_v4, %v8908_v2  ;;  %v6719_v21 = vpop.permute.xlu1 %2246  ;;  %v8946_v59 = vld [vmem:[#allocation276_spill] sm:$0xff]  ;;  %v8952_v35 = vld [vmem:[#allocation245_spill] sm:$0xff]  ;;  %v8953_v48 = vld [vmem:[#allocation246_spill] sm:$0xff] }
 0x3a7   :  { %v1980_v20 = vadd.f32 %v8936_v62, %v1904_v16  ;;  %v1680_v52 = vadd.f32 %v8939_v29, %v1604_v0  ;;  %v1530_v55 = vadd.f32 %v8940_v7, %v1454_v33  ;;  %2562 = vperm.xlu1 %4010, %v8942_v40   ;;  %v2285_v26 = vadd.f32 %v2273_v58, %v2209_v39  ;;  %v8948_v25 = vld [vmem:[#allocation152_spill] sm:$0xff]  ;;  %v8954_v28 = vld [vmem:[#allocation117_spill] sm:$0xff]  ;;  %v8955_v50 = vld [vmem:[#allocation111_spill] sm:$0xff] }
 0x3a8   :  { %v1380_v61 = vadd.f32 %v8941_v5, %v1304_v10  ;;  %v2205_v41 = vadd.f32 %v2193_v22, %v2129_v15  ;;  %v1906_v57 = vadd.f32 %v6625_v36, %v1830_v53  ;;  %v2046_v30 = vmul.f32 %v8943_v23, %v5676_v37  ;;  %v8950_v36 = vld [vmem:[#allocation138_spill] sm:$0xff]  ;;  %v8951_v39 = vld [vmem:[#allocation288_spill] sm:$0xff]  ;;  %v8958_v62 = vld [vmem:[#allocation277_spill] sm:$0xff] }
 0x3a9   :  { %v2056_v47 = vadd.f32 %v2044_v60, %v1980_v20  ;;  %v1756_v24 = vadd.f32 %v8944_v51, %v1680_v52  ;;  %v1606_v63 = vadd.f32 %v8945_v32, %v1530_v55  ;;  %v2196_v1 = vmul.f32 %v8948_v25, %v8861_v56  ;;  %v8949_v60 = vld [vmem:[#allocation133_spill] sm:$0xff]  ;;  %v8957_v10 = vld [vmem:[#allocation266_spill] sm:$0xff]  ;;  %v8960_v53 = vld [vmem:[#allocation287_spill] sm:$0xff] }
 0x3aa   :  { %v1456_v27 = vadd.f32 %v8946_v59, %v1380_v61  ;;  %v1982_v8 = vadd.f32 %v8949_v60, %v1906_v57  ;;  %v6731_v44 = vadd.f32 %v8950_v36, %v2205_v41  ;;  %v1746_v16 = vmul.f32 %v8952_v35, %v8951_v39  ;;  %v6742_v9 = vpop.permute.xlu1 %2254  ;;  %v8959_v20 = vld [vmem:[#allocation182_spill] sm:$0xff]  ;;  %v8961_v4 = vld [vmem:[#allocation185_spill] sm:$0xff]  ;;  %v8963_v55 = vld [vmem:[#allocation131_spill] sm:$0xff] }
 0x3ab   :  { %v2132_v46 = vadd.f32 %v8947_v43, %v2056_v47  ;;  %v2122_v54 = vmul.f32 %v8953_v48, %v8838_v12  ;;  %v1682_v0 = vadd.f32 %v8954_v28, %v1606_v63  ;;  %v8956_v34 = vmov 33   ;;  %v8962_v52 = vld [vmem:[#allocation125_spill] sm:$0xff]  ;;  %v8964_v40 = vld [vmem:[#allocation156_spill] sm:$0xff]  ;;  %v8966_v23 = vld [vmem:[#allocation107_spill] sm:$0xff] }
 0x3ac   :  { %v1532_v33 = vadd.f32 %v8955_v50, %v1456_v27  ;;  %4011 = vset.pattern.permute.xlu1 %v8956_v34  ;;  %v2272_v58 = vmul.f32 %v8957_v10, %v8882_v19  ;;  %v2058_v15 = vadd.f32 %v2046_v30, %v1982_v8  ;;  %v6745_v22 = vadd.f32 %v2349_v13, %v2285_v26  ;;  %v8965_v13 = vld [vmem:[#allocation174_spill] sm:$0xff]  ;;  %v8967_v30 = vld [vmem:[#allocation113_spill] sm:$0xff]  ;;  %v8976_v28 = vld [vmem:[#allocation128_spill] sm:$0xff] }
 0x3ad   :  { %v2208_v14 = vadd.f32 %v2196_v1, %v2132_v46  ;;  %2626 = vperm.xlu1 %4011, %v8923_v45   ;;  %v1367_v31 = vmul.f32 %v8959_v20, %v8958_v62  ;;  %v1672_v29 = vmul.f32 %v8961_v4, %v8960_v53  ;;  %v1832_v7 = vadd.f32 %v8962_v52, %v1756_v24  ;;  %v8968_v32 = vld [vmem:[#allocation273_spill] sm:$0xff]  ;;  %v8971_v46 = vld [vmem:[#allocation247_spill] sm:$0xff]  ;;  %v8972_v1 = vld [vmem:[#allocation268_spill] sm:$0xff] }
 0x3ae   :  { %v1608_v5 = vadd.f32 %v8963_v55, %v1532_v33  ;;  %v2134_v61 = vadd.f32 %v2122_v54, %v2058_v15  ;;  %v2198_v41 = vmul.f32 %v8964_v40, %v8861_v56  ;;  %v1758_v47 = vadd.f32 %v1746_v16, %v1682_v0  ;;  %v8969_v24 = vld [vmem:[#allocation289_spill] sm:$0xff]  ;;  %v6769_v36 = vpop.permute.xlu1 %2262  ;;  %v8974_v16 = vld [vmem:[#allocation286_spill] sm:$0xff]  ;;  %v8977_v0 = vld [vmem:[#allocation115_spill] sm:$0xff] }
 0x3af   :  { %v6755_v57 = vadd.f32 %v2272_v58, %v2208_v14  ;;  %v1359_v26 = vmul.f32 %v8965_v13, %v8958_v62  ;;  %v1375_v51 = vadd.f32 %v8967_v30, %v8966_v23  ;;  %v1896_v63 = vmul.f32 %v8968_v32, %v5599_v42  ;;  %v8970_v27 = vld [vmem:[#allocation205_spill] sm:$0xff]  ;;  %v8978_v33 = vld [vmem:[#allocation275_spill] sm:$0xff]  ;;  %v8983_v40 = vld [vmem:[#allocation282_spill] sm:$0xff] }
 0x3b0   :  { %v1684_v59 = vadd.f32 %v1672_v29, %v1608_v5  ;;  %v1822_v43 = vmul.f32 %v8970_v27, %v8969_v24  ;;  %v1748_v25 = vmul.f32 %v8971_v46, %v8951_v39  ;;  %v2274_v60 = vmul.f32 %v8972_v1, %v8882_v19  ;;  %v8975_v48 = vld [vmem:[#allocation169_spill] sm:$0xff]  ;;  %v8979_v14 = vld [vmem:[#allocation171_spill] sm:$0xff]  ;;  %v8982_v5 = vld [vmem:[#allocation186_spill] sm:$0xff] }
 0x3b1   :  { %v2210_v8 = vadd.f32 %v2198_v41, %v2134_v61  ;;  %v8973_v35 = vmov 4   ;;  %v1591_v54 = vmul.f32 %v8975_v48, %v8974_v16  ;;  %v1377_v50 = vadd.f32 %v8977_v0, %v8976_v28  ;;  %v8980_v29 = vld [vmem:[#allocation173_spill] sm:$0xff]  ;;  %v8984_v41 = vld [vmem:[#allocation204_spill] sm:$0xff]  ;;  %v8986_v23 = vld [vmem:[#allocation110_spill] sm:$0xff] }
 0x3b2   :  { %4013 = vset.pattern.permute.xlu1 %v8973_v35  ;;  %v1379_v10 = vadd.f32 %v1367_v31, %v8978_v33  ;;  %v1908_v58 = vadd.f32 %v1896_v63, %v1832_v7  ;;  %v1593_v15 = vmul.f32 %v8979_v14, %v8974_v16  ;;  %v1834_v62 = vadd.f32 %v1822_v43, %v1758_v47  ;;  %v8981_v55 = vld [vmem:[#allocation281_spill] sm:$0xff]  ;;  %v8988_v47 = vld [vmem:[#allocation207_spill] sm:$0xff]  ;;  %v8989_v27 = vld [vmem:[#allocation278_spill] sm:$0xff]  ;;  %v2299_v28 = vpop.permute.xlu1 %2298 }
 0x3b3   :  { %2834 = vperm.xlu1 %4013, %v6654_v6   ;;  %v1760_v20 = vadd.f32 %v1748_v25, %v1684_v59  ;;  %v6780_v4 = vadd.f32 %v2274_v60, %v2210_v8  ;;  %v1595_v52 = vmul.f32 %v8980_v29, %v8974_v16  ;;  %v1435_v61 = vmul.f32 %v8982_v5, %v8981_v55  ;;  %v8985_v31 = vld [vmem:[#allocation225_spill] sm:$0xff]  ;;  %v8990_v46 = vld [vmem:[#allocation124_spill] sm:$0xff]  ;;  %v8991_v1 = vld [vmem:[#allocation206_spill] sm:$0xff] }
 0x3b4   :  { %v1515_v13 = vmul.f32 %v8984_v41, %v8983_v40  ;;  %v1972_v7 = vmul.f32 %v8985_v31, %v5674_v38  ;;  %v1371_v30 = vadd.f32 %v1359_v26, %v8986_v23  ;;  %v8987_v32 = vld [vmem:[#allocation105_spill] sm:$0xff]  ;;  %v1824_v59 = vmul.f32 %v8988_v47, %v8969_v24  ;;  %v8992_v8 = vld [vmem:[#allocation106_spill] sm:$0xff]  ;;  %v8993_v26 = vld [vmem:[#allocation208_spill] sm:$0xff] }
 0x3b5   :  { %v1451_v63 = vadd.f32 %v8987_v32, %v1375_v51  ;;  %v1898_v43 = vmul.f32 %v8989_v27, %v5599_v42  ;;  %v1453_v25 = vadd.f32 %v8990_v46, %v1377_v50  ;;  %v1517_v60 = vmul.f32 %v8991_v1, %v8983_v40  ;;  %v8994_v29 = vld [vmem:[#allocation120_spill] sm:$0xff]  ;;  %v8997_v31 = vld [vmem:[#allocation227_spill] sm:$0xff] }
 0x3b6   :  { %v1455_v35 = vadd.f32 %v8992_v8, %v1379_v10  ;;  %v1984_v48 = vadd.f32 %v1972_v7, %v1908_v58  ;;  %v1519_v51 = vmul.f32 %v8993_v26, %v8983_v40  ;;  %v1836_v33 = vadd.f32 %v1824_v59, %v1760_v20  ;;  %v8995_v50 = vld [vmem:[#allocation200_spill] sm:$0xff]  ;;  %v8996_v10 = vld [vmem:[#allocation67_spill] sm:$0xff]  ;;  %v9000_v20 = vld [vmem:[#allocation22_spill] sm:$0xff]  ;;  %v6820_v27 = vpop.permute.xlu1 %2306 }
 0x3b7   :  { %4014 = vset.pattern.permute.xlu1 %v8865_v49  ;;  %v1910_v0 = vadd.f32 %v1898_v43, %v1834_v62  ;;  %v2345_v14 = vmul.f32 %v2299_v28, %v8908_v2  ;;  %v1447_v55 = vadd.f32 %v1435_v61, %v1371_v30  ;;  %v1511_v5 = vmul.f32 %v8995_v50, %v8983_v40  ;;  %v8998_v7 = vld [vmem:[#allocation283_spill] sm:$0xff]  ;;  %v8999_v62 = vld [vmem:[#allocation298_spill] sm:$0xff]  ;;  %v9002_v40 = vld [vmem:[#allocation193_spill] sm:$0xff] }
 0x3b8   :  { %2566 = vperm.xlu1 %4014, %v8994_v29   ;;  %v1527_v41 = vadd.f32 %v1515_v13, %v1451_v63  ;;  %v2048_v58 = vmul.f32 %v8996_v10, %v5676_v37  ;;  %v1974_v49 = vmul.f32 %v8997_v31, %v5674_v38  ;;  %v1900_v23 = vmul.f32 %v8998_v7, %v5599_v42  ;;  %v9001_v61 = vld [vmem:[#allocation191_spill] sm:$0xff] }
 0x3b9   :  { %v2421_v32 = vmul.f32 %v9000_v20, %v8999_v62  ;;  %v2357_v47 = vadd.f32 %v2345_v14, %v6731_v44  ;;  %v1743_v30 = vmul.f32 %v9001_v61, %v8951_v39  ;;  %v1745_v13 = vmul.f32 %v9002_v40, %v8951_v39  ;;  %v6822_v8 = vld [vmem:[#allocation4 + $0x58] sm:$0xff]  ;;  %v9004_v14 = vld [vmem:[#allocation212_spill] sm:$0xff] }
 0x3ba   :  { %v1529_v63 = vadd.f32 %v1517_v60, %v1453_v25  ;;  %v2060_v59 = vadd.f32 %v2048_v58, %v1984_v48  ;;  %v1531_v43 = vadd.f32 %v1519_v51, %v1455_v35  ;;  %v1986_v46 = vadd.f32 %v1974_v49, %v1910_v0  ;;  %v9003_v44 = vld [vmem:[#allocation195_spill] sm:$0xff]  ;;  %v9005_v25 = vld [vmem:[#allocation230_spill] sm:$0xff]  ;;  %v9006_v35 = vld [vmem:[#allocation248_spill] sm:$0xff] }
 0x3bb   :  { %v1912_v1 = vadd.f32 %v1900_v23, %v1836_v33  ;;  %v6825_v28 = vadd.f32 %v2421_v32, %v2357_v47  ;;  %v6829_v26 = vmul.f32 %v9003_v44, %v8951_v39  ;;  %v1587_v50 = vmul.f32 %v9004_v14, %v8974_v16  ;;  %v9007_v0 = vld [vmem:[#allocation229_spill] sm:$0xff]  ;;  %v9008_v58 = vld [vmem:[#allocation75_spill] sm:$0xff]  ;;  %v9009_v49 = vld [vmem:[#allocation226_spill] sm:$0xff]  ;;  %v2311_v47 = vpop.permute.xlu1 %2310 }
 0x3bc   :  { %2570 = vperm.xlu1 %4014, %v6822_v8   ;;  %v1667_v60 = vmul.f32 %v9005_v25, %v8960_v53  ;;  %v2124_v48 = vmul.f32 %v9006_v35, %v8838_v12  ;;  %v1523_v51 = vadd.f32 %v1511_v5, %v1447_v55  ;;  %v1976_v33 = vmul.f32 %v9007_v0, %v5674_v38  ;;  %v9010_v16 = vld [vmem:[#allocation231_spill] sm:$0xff]  ;;  %v9013_v35 = vld [vmem:[#allocation137_spill] sm:$0xff] }
 0x3bd   :  { %v1603_v10 = vadd.f32 %v1591_v54, %v1527_v41  ;;  %v2050_v31 = vmul.f32 %v9008_v58, %v5676_v37  ;;  %v1663_v7 = vmul.f32 %v9009_v49, %v8960_v53  ;;  %v1605_v23 = vadd.f32 %v1593_v15, %v1529_v63  ;;  %v9012_v41 = vld [vmem:[#allocation213_spill] sm:$0xff] }
 0x3be   :  { %v1669_v20 = vmul.f32 %v9010_v16, %v8960_v53  ;;  %v2136_v32 = vadd.f32 %v2124_v48, %v2060_v59  ;;  %v1607_v61 = vadd.f32 %v1595_v52, %v1531_v43  ;;  %v1988_v44 = vadd.f32 %v1976_v33, %v1912_v1  ;;  %v9014_v63 = vld [vmem:[#allocation249_spill] sm:$0xff]  ;;  %v9017_v48 = vld [vmem:[#allocation215_spill] sm:$0xff]  ;;  %v9018_v16 = vld [vmem:[#allocation238_spill] sm:$0xff] }
 0x3bf   :  { %v2062_v40 = vadd.f32 %v2050_v31, %v1986_v46  ;;  %v2348_v55 = vmul.f32 %v2311_v47, %v8908_v2  ;;  %v9011_v5 = vmov 34   ;;  %v1599_v54 = vadd.f32 %v1587_v50, %v1523_v51  ;;  %v9015_v52 = vld [vmem:[#allocation25_spill] sm:$0xff]  ;;  %v9016_v46 = vld [vmem:[#allocation84_spill] sm:$0xff] }
 0x3c0   :  { %4015 = vset.pattern.permute.xlu1 %v9011_v5  ;;  %v1895_v14 = vmul.f32 %v9012_v41, %v5599_v42  ;;  %v1679_v25 = vadd.f32 %v1667_v60, %v1603_v10  ;;  %v2200_v15 = vmul.f32 %v9013_v35, %v8861_v56  ;;  %v2126_v59 = vmul.f32 %v9014_v63, %v8838_v12  ;;  %v2319_v10 = vpop.permute.xlu1 %2318  ;;  %v9020_v35 = vld [vmem:[#allocation274_spill] sm:$0xff] }
 0x3c1   :  { %2702 = vperm.xlu1 %4015, %v8923_v45   ;;  %v2424_v43 = vmul.f32 %v9015_v52, %v8999_v62  ;;  %v2052_v1 = vmul.f32 %v9016_v46, %v5676_v37  ;;  %v2360_v50 = vadd.f32 %v2348_v55, %v6755_v57  ;;  %v6861_v51 = vmul.f32 %v9017_v48, %v5599_v42  ;;  %v9019_v57 = vld [vmem:[#allocation255_spill] sm:$0xff] }
 0x3c2   :  { %v1675_v60 = vadd.f32 %v1663_v7, %v1599_v54  ;;  %v1681_v0 = vadd.f32 %v1669_v20, %v1605_v23  ;;  %v2212_v33 = vadd.f32 %v2200_v15, %v2136_v32  ;;  %v2138_v45 = vadd.f32 %v2126_v59, %v2062_v40  ;;  %v9022_v23 = vld [vmem:[#allocation251_spill] sm:$0xff]  ;;  %v9023_v32 = vld [vmem:[#allocation49_spill] sm:$0xff] }
 0x3c3   :  { %v2064_v58 = vadd.f32 %v2052_v1, %v1988_v44  ;;  %v2350_v31 = vmul.f32 %v2319_v10, %v8908_v2  ;;  %v6864_v49 = vadd.f32 %v2424_v43, %v2360_v50  ;;  %v1739_v47 = vmul.f32 %v9018_v16, %v8951_v39  ;;  %v9027_v16 = vld [vmem:[#allocation263_spill] sm:$0xff] }
 0x3c4   :  { %v1755_v41 = vadd.f32 %v1743_v30, %v1679_v25  ;;  %v1819_v55 = vmul.f32 %v9019_v57, %v8969_v24  ;;  %v2276_v63 = vmul.f32 %v9020_v35, %v8882_v19  ;;  %v9021_v7 = vmov 5   ;;  %v9024_v30 = vld [vmem:[#allocation233_spill] sm:$0xff]  ;;  %v9025_v25 = vld [vmem:[#allocation252_spill] sm:$0xff]  ;;  %v2327_v52 = vpop.permute.xlu1 %2326  ;;  %v9028_v57 = vld [vmem:[#allocation279_spill] sm:$0xff] }
 0x3c5   :  { %4017 = vset.pattern.permute.xlu1 %v9021_v7  ;;  %v2128_v20 = vmul.f32 %v9022_v23, %v8838_v12  ;;  %v2426_v40 = vmul.f32 %v9023_v32, %v8999_v62  ;;  %v2202_v44 = vmul.f32 %v6616_v17, %v8861_v56  ;;  %v2362_v39 = vadd.f32 %v2350_v31, %v6780_v4  ;;  %v9026_v4 = vld [vmem:[#allocation257_spill] sm:$0xff] }
 0x3c6   :  { %2844 = vperm.xlu1 %4017, %v6654_v6   ;;  %v1671_v54 = vmul.f32 %v9024_v30, %v8960_v53  ;;  %v1815_v15 = vmul.f32 %v9025_v25, %v8969_v24  ;;  %v1757_v59 = vadd.f32 %v1745_v13, %v1681_v0  ;;  %v2288_v43 = vadd.f32 %v2276_v63, %v2212_v33  ;;  %v9029_v13 = vld [vmem:[#allocation55_spill] sm:$0xff] }
 0x3c7   :  { %v2214_v46 = vadd.f32 %v2202_v44, %v2138_v45  ;;  %v2140_v1 = vadd.f32 %v2128_v20, %v2064_v58  ;;  %v2352_v50 = vmul.f32 %v2327_v52, %v8908_v2  ;;  %v6886_v48 = vadd.f32 %v2426_v40, %v2362_v39 }
 0x3c8   :  { %v1751_v17 = vadd.f32 %v1739_v47, %v1675_v60  ;;  %v1831_v10 = vadd.f32 %v1819_v55, %v1755_v41  ;;  %v1821_v31 = vmul.f32 %v9026_v4, %v8969_v24  ;;  %v1891_v53 = vmul.f32 %v9027_v16, %v5599_v42  ;;  %v9030_v47 = vld [vmem:[#allocation292_spill] sm:$0xff]  ;;  %v9031_v55 = vld [vmem:[#allocation21_spill] sm:$0xff]  ;;  %v2335_v7 = vpop.permute.xlu1 %2334 }
 0x3c9   :  { %v2278_v35 = vmul.f32 %v9028_v57, %v8882_v19  ;;  %v2428_v0 = vmul.f32 %v9029_v13, %v8999_v62  ;;  %v2204_v33 = vmul.f32 %v6640_v3, %v8861_v56  ;;  %v2364_v45 = vadd.f32 %v2352_v50, %v2288_v43  ;;  %v9035_v43 = vld [vmem:[#allocation60_spill] sm:$0xff] }
 0x3ca   :  { %4018 = vset.pattern.permute.xlu1 %v8956_v34  ;;  %v1683_v60 = vadd.f32 %v1671_v54, %v1607_v61  ;;  %v1827_v58 = vadd.f32 %v1815_v15, %v1751_v17  ;;  %v1967_v41 = vmul.f32 %v9030_v47, %v5674_v38  ;;  %v1971_v63 = vmul.f32 %v9031_v55, %v5674_v38  ;;  %v9032_v61 = vld [vmem:[#allocation45_spill] sm:$0xff]  ;;  %v9033_v54 = vld [vmem:[#allocation259_spill] sm:$0xff]  ;;  %v9034_v15 = vld [vmem:[#allocation284_spill] sm:$0xff] }
 0x3cb   :  { %2642 = vperm.xlu1 %4018, %v8994_v29   ;;  %v2216_v23 = vadd.f32 %v2204_v33, %v2140_v1  ;;  %v2290_v20 = vadd.f32 %v2278_v35, %v2214_v46  ;;  %v2354_v32 = vmul.f32 %v2335_v7, %v8908_v2  ;;  %v6905_v40 = vadd.f32 %v2428_v0, %v2364_v45  ;;  %v9038_v35 = vld [vmem:[#allocation235_spill] sm:$0xff]  ;;  %v9041_v47 = vld [vmem:[#allocation112_spill] sm:$0xff] }
 0x3cc   :  { %v1833_v3 = vadd.f32 %v1821_v31, %v1757_v59  ;;  %v1903_v44 = vadd.f32 %v1891_v53, %v1827_v58  ;;  %v1907_v39 = vadd.f32 %v1895_v14, %v1831_v10  ;;  %v2043_v30 = vmul.f32 %v9032_v61, %v5676_v37  ;;  %v9036_v59 = vld [vmem:[#allocation108_spill] sm:$0xff]  ;;  %v2343_v10 = vpop.permute.xlu1 %2342  ;;  %v9039_v33 = vld [vmem:[#allocation135_spill] sm:$0xff] }
 0x3cd   :  { %v1823_v25 = vmul.f32 %v9033_v54, %v8969_v24  ;;  %v2280_v52 = vmul.f32 %v9034_v15, %v8882_v19  ;;  %v2430_v1 = vmul.f32 %v9035_v43, %v8999_v62  ;;  %v2366_v46 = vadd.f32 %v2354_v32, %v2290_v20  ;;  %v9037_v31 = vld [vmem:[#allocation28_spill] sm:$0xff]  ;;  %v9043_v7 = vld [vmem:[#allocation91_spill] sm:$0xff]  ;;  %v4089_v54 = vld [vmem:[#allocation4 + $0x30] sm:$0xff] }
 0x3ce   :  { %v1759_v50 = vadd.f32 %v6829_v26, %v1683_v60  ;;  %v1979_v17 = vadd.f32 %v1967_v41, %v1903_v44  ;;  %v1983_v4 = vadd.f32 %v1971_v63, %v1907_v39  ;;  %v2119_v14 = vmul.f32 %v9036_v59, %v8838_v12  ;;  %v9042_v63 = vld [vmem:[#allocation103_spill] sm:$0xff]  ;;  %v9046_v15 = vld [vmem:[#allocation52_spill] sm:$0xff] }
 0x3cf   :  { %2646 = vperm.xlu1 %4018, %v6822_v8   ;;  %v1973_v24 = vmul.f32 %v9037_v31, %v5674_v38  ;;  %v2292_v16 = vadd.f32 %v2280_v52, %v2216_v23  ;;  %v2356_v53 = vmul.f32 %v2343_v10, %v8908_v2  ;;  %v6922_v57 = vadd.f32 %v2430_v1, %v2366_v46  ;;  %v9040_v8 = vld [vmem:[#allocation69_spill] sm:$0xff] }
 0x3d0   :  { %v2047_v13 = vmul.f32 %v9038_v35, %v5676_v37  ;;  %v1909_v26 = vadd.f32 %v6861_v51, %v1833_v3  ;;  %v2055_v0 = vadd.f32 %v2043_v30, %v1979_v17  ;;  %v2195_v45 = vmul.f32 %v9039_v33, %v8861_v56  ;;  %v9045_v3 = vld [vmem:[#allocation217_spill] sm:$0xff]  ;;  %v2379_v30 = vpop.permute.xlu1 %2378 }
 0x3d1   :  { %v1835_v60 = vadd.f32 %v1823_v25, %v1759_v50  ;;  %v2432_v58 = vmul.f32 %v9040_v8, %v8999_v62  ;;  %v2123_v41 = vmul.f32 %v9041_v47, %v8838_v12  ;;  %v2368_v55 = vadd.f32 %v2356_v53, %v2292_v16  ;;  %v9047_v46 = vld [vmem:[#allocation237_spill] sm:$0xff] }
 0x3d2   :  { %v6935_v23 = vadd.f32 %v9043_v7, %v9042_v63  ;;  %v2131_v20 = vadd.f32 %v2119_v14, %v2055_v0  ;;  %v2271_v51 = vmul.f32 %v6682_v11, %v8882_v19  ;;  %v9044_v32 = vmov 35   ;;  %v9049_v14 = vld [vmem:[#allocation118_spill] sm:$0xff]  ;;  %v9053_v63 = vld [vmem:[#allocation260_spill] sm:$0xff] }
 0x3d3   :  { %4019 = vset.pattern.permute.xlu1 %v9044_v32  ;;  %v1899_v44 = vmul.f32 %v9045_v3, %v5599_v42  ;;  %v1985_v39 = vadd.f32 %v1973_v24, %v1909_v26  ;;  %v2059_v61 = vadd.f32 %v2047_v13, %v1983_v4  ;;  %v6942_v25 = vadd.f32 %v2432_v58, %v2368_v55  ;;  %v9048_v4 = vld [vmem:[#allocation94_spill] sm:$0xff]  ;;  %v9052_v58 = vld [vmem:[#allocation123_spill] sm:$0xff] }
 0x3d4   :  { %2777 = vperm.xlu1 %4019, %v4089_v54   ;;  %v1975_v52 = vmul.f32 %v9046_v15, %v5674_v38  ;;  %v2207_v43 = vadd.f32 %v2195_v45, %v2131_v20  ;;  %v2347_v1 = vmul.f32 %v6820_v27, %v8908_v2  ;;  %v2422_v11 = vmul.f32 %v2379_v30, %v8999_v62  ;;  %v9050_v24 = vld [vmem:[#allocation258_spill] sm:$0xff]  ;;  %v2383_v35 = vpop.permute.xlu1 %2382  ;;  %v9056_v15 = vld [vmem:[#allocation261_spill] sm:$0xff] }
 0x3d5   :  { %v2049_v50 = vmul.f32 %v9047_v46, %v5676_v37  ;;  %v1911_v42 = vadd.f32 %v1899_v44, %v1835_v60  ;;  %v2135_v17 = vadd.f32 %v2123_v41, %v2059_v61  ;;  %v2498_v59 = vmul.f32 %v9048_v4, %v6935_v23  ;;  %v4090_v44 = vld [vmem:[#allocation4 + $0x40] sm:$0xff] }
 0x3d6   :  { %v2125_v10 = vmul.f32 %v9049_v14, %v8838_v12  ;;  %v2283_v31 = vadd.f32 %v2271_v51, %v2207_v43  ;;  %v2434_v38 = vadd.f32 %v2422_v11, %v6701_v18  ;;  %v2199_v16 = vmul.f32 %v9050_v24, %v8861_v56  ;;  %v9051_v18 = vld [vmem:[#allocation239_spill] sm:$0xff] }
 0x3d7   :  { %v2061_v27 = vadd.f32 %v2049_v50, %v1985_v39  ;;  %v2275_v53 = vmul.f32 %v6719_v21, %v8882_v19  ;;  %v1987_v13 = vadd.f32 %v1975_v52, %v1911_v42  ;;  %v2423_v0 = vmul.f32 %v2383_v35, %v8999_v62  ;;  %v4091_v42 = vld [vmem:[#allocation4 + $0x48] sm:$0xff] }
 0x3d8   :  { %4020 = vset.pattern.permute.xlu1 %v9011_v5  ;;  %v2359_v26 = vadd.f32 %v2347_v1, %v2283_v31  ;;  %v6963_v33 = vadd.f32 %v2498_v59, %v2434_v38  ;;  %v2211_v45 = vadd.f32 %v2199_v16, %v2135_v17  ;;  %v2051_v60 = vmul.f32 %v9051_v18, %v5676_v37  ;;  %v2391_v55 = vpop.permute.xlu1 %2390  ;;  %v9054_v37 = vld [vmem:[#allocation300_spill] sm:$0xff]  ;;  %v9057_v17 = vld [vmem:[#allocation23_spill] sm:$0xff]  ;;  %v9059_v16 = vld [vmem:[#allocation29_spill] sm:$0xff] }
 0x3d9   :  { %2718 = vperm.xlu1 %4020, %v8994_v29   ;;  %v2137_v8 = vadd.f32 %v2125_v10, %v2061_v27  ;;  %v2127_v47 = vmul.f32 %v9052_v58, %v8838_v12  ;;  %v2201_v7 = vmul.f32 %v9053_v63, %v8861_v56  ;;  %v2277_v29 = vmul.f32 %v6742_v9, %v8882_v19  ;;  %v9055_v12 = vld [vmem:[#allocation85_spill] sm:$0xff]  ;;  %v9062_v58 = vld [vmem:[#allocation126_spill] sm:$0xff] }
 0x3da   :  { %v2435_v21 = vadd.f32 %v2423_v0, %v2359_v26  ;;  %v2287_v41 = vadd.f32 %v2275_v53, %v2211_v45  ;;  %v2063_v20 = vadd.f32 %v2051_v60, %v1987_v13  ;;  %v2425_v51 = vmul.f32 %v2391_v55, %v8999_v62  ;;  %v9060_v53 = vld [vmem:[#allocation101_spill] sm:$0xff]  ;;  %v6998_v13 = vpop.permute.xlu0 %2854 }
 0x3db   :  { %v2351_v3 = vmul.f32 %v9054_v37, %v8908_v2  ;;  %v2501_v39 = vmul.f32 %v9055_v12, %v6935_v23  ;;  %v2213_v30 = vadd.f32 %v2201_v7, %v2137_v8  ;;  %v2203_v52 = vmul.f32 %v9056_v15, %v8861_v56 }
 0x3dc   :  { %v2139_v61 = vadd.f32 %v2127_v47, %v2063_v20  ;;  %v2437_v54 = vadd.f32 %v2425_v51, %v6745_v22  ;;  %v2399_v9 = vpop.permute.xlu1 %2398  ;;  %v2279_v11 = vmul.f32 %v6769_v36, %v8882_v19  ;;  %v2353_v4 = vmul.f32 %v9057_v17, %v8908_v2  ;;  %v9058_v22 = vld [vmem:[#allocation89_spill] sm:$0xff]  ;;  %v4092_v36 = vld [vmem:[#allocation4 + $0x50] sm:$0xff]  ;;  %v9063_v20 = vld [vmem:[#allocation12_spill] sm:$0xff] }
 0x3dd   :  { %4021 = vset.pattern.permute.xlu1 %v9044_v32  ;;  %v2363_v43 = vadd.f32 %v2351_v3, %v2287_v41  ;;  %v2289_v1 = vadd.f32 %v2277_v29, %v2213_v30  ;;  %v2427_v46 = vmul.f32 %v2399_v9, %v8999_v62  ;;  %v2503_v59 = vmul.f32 %v9058_v22, %v6935_v23  ;;  %v4093_v51 = vld [vmem:[#allocation4] sm:$0xff] }
 0x3de   :  { %2785 = vperm.xlu1 %4021, %v4090_v44   ;;  %v6985_v50 = vadd.f32 %v2501_v39, %v2437_v54  ;;  %v2215_v14 = vadd.f32 %v2203_v52, %v2139_v61  ;;  %v2355_v27 = vmul.f32 %v9059_v16, %v8908_v2  ;;  %v2505_v35 = vmul.f32 %v9060_v53, %v6935_v23  ;;  %v2527_v2 = vpop.permute.xlu0 %2526  ;;  %v4094_v39 = vld [vmem:[#allocation4 + $0x10] sm:$0xff]  ;;  %v4095_v52 = vld [vmem:[#allocation4 + $0x18] sm:$0xff]  ;;  %v9065_v53 = vld [vmem:[#allocation8_spill] sm:$0xff] }
 0x3df   :  { %v2439_v56 = vadd.f32 %v2427_v46, %v2363_v43  ;;  %v2365_v38 = vadd.f32 %v2353_v4, %v2289_v1  ;;  %v9061_v8 = vmov 3   ;;  %v2507_v47 = vmul.f32 %v9062_v58, %v6935_v23 }
 0x3e0   :  { %v2407_v10 = vpop.permute.xlu1 %2406  ;;  %v2291_v31 = vadd.f32 %v2279_v11, %v2215_v14  ;;  %v2573_v29 = vmul.f32 %v2527_v2, %v9063_v20 }
 0x3e1   :  { %v2429_v24 = vmul.f32 %v2407_v10, %v8999_v62  ;;  %v6992_v19 = vadd.f32 %v2503_v59, %v2439_v56 }
 0x3e2   :  { %2789 = vperm.xlu1 %4021, %v4091_v42   ;;  %v2367_v18 = vadd.f32 %v2355_v27, %v2291_v31  ;;  %v4096_v42 = vld [vmem:[#allocation4 + $0x8] sm:$0xff] }
 0x3e3   :  { %v2441_v26 = vadd.f32 %v2429_v24, %v2365_v38  ;;  %v4098_v38 = vld [vmem:[#allocation4 + $0x28] sm:$0xff] }
 0x3e4   :  { %v2415_v0 = vpop.permute.xlu1 %2414 }
 0x3e5   :  { %v7000_v45 = vadd.f32 %v2505_v35, %v2441_v26  ;;  %v2431_v60 = vmul.f32 %v2415_v0, %v8999_v62 }
 0x3e6   :  { %2793 = vperm.xlu1 %4021, %v4092_v36  }
 0x3e7   :  { %v2443_v41 = vadd.f32 %v2431_v60, %v2367_v18 }
 0x3e8   :  { %v2451_v55 = vpop.permute.xlu1 %2450 }
 0x3e9   :  { %v7007_v63 = vadd.f32 %v2507_v47, %v2443_v41  ;;  %v2497_v7 = vmul.f32 %v2451_v55, %v6935_v23 }
 0x3ea   :  { %4023 = vset.pattern.permute.xlu1 %v9061_v8 }
 0x3eb   :  { %3489 = vperm.xlu1 %4023, %v6654_v6   ;;  %v2509_v62 = vadd.f32 %v2497_v7, %v6825_v28  ;;  %v2539_v6 = vpop.permute.xlu0 %2538 }
 0x3ec   :  { %v2459_v37 = vpop.permute.xlu1 %2458  ;;  %v2576_v54 = vmul.f32 %v2539_v6, %v9063_v20 }
 0x3ed   :  { %v2499_v3 = vmul.f32 %v2459_v37, %v6935_v23  ;;  %v7014_v44 = vadd.f32 %v2573_v29, %v2509_v62 }
 0x3ef   :  { %4024 = vset.pattern.permute.xlu1 %v8956_v34  ;;  %v2511_v12 = vadd.f32 %v2499_v3, %v2435_v21  ;;  %v2547_v28 = vpop.permute.xlu0 %2546 }
 0x3f0   :  { %2602 = vperm.xlu1 %4024, %v4093_v51   ;;  %v2463_v61 = vpop.permute.xlu1 %2462  ;;  %v2578_v11 = vmul.f32 %v2547_v28, %v9063_v20 }
 0x3f1   :  { %v2500_v30 = vmul.f32 %v2463_v61, %v6935_v23 }
 0x3f3   :  { %v2512_v15 = vadd.f32 %v2500_v30, %v6864_v49  ;;  %v7032_v59 = vpop.permute.xlu0 %2558 }
 0x3f4   :  { %2610 = vperm.xlu1 %4024, %v4094_v39   ;;  %v2471_v9 = vpop.permute.xlu1 %2470 }
 0x3f5   :  { %v2502_v43 = vmul.f32 %v2471_v9, %v6935_v23  ;;  %v7020_v1 = vadd.f32 %v2576_v54, %v2512_v15  ;;  %v8154_v54 = vmov 683565275  }
 0x3f7   :  { %9064 = vst [vmem:[#allocation139_spill] sm:$0xff] %v7020_v1  ;;  %v2514_v21 = vadd.f32 %v2502_v43, %v6886_v48  ;;  %v4097_v48 = vld [vmem:[#allocation4 + $0x20] sm:$0xff]  ;;  %v7039_v24 = vpop.permute.xlu0 %2630 }
 0x3f8   :  { %2614 = vperm.xlu1 %4024, %v4095_v52   ;;  %v2479_v46 = vpop.permute.xlu1 %2478 }
 0x3f9   :  { %v2504_v17 = vmul.f32 %v2479_v46, %v6935_v23  ;;  %v7026_v49 = vadd.f32 %v2578_v11, %v2514_v21  ;;  %v8150_v11 = vmov 2131351028  }
 0x3fb   :  { %v7029_v4 = vadd.f32 %v2504_v17, %v6905_v40 }
 0x3fc   :  { %4027 = vset.pattern.permute.xlu1 %v9011_v5  ;;  %v2487_v22 = vpop.permute.xlu1 %2486 }
 0x3fd   :  { %2682 = vperm.xlu1 %4027, %v4096_v42   ;;  %v2506_v14 = vmul.f32 %v2487_v22, %v6935_v23  ;;  %v8158_v42 = vmov 2102212464  }
 0x3ff   :  { %v7036_v56 = vadd.f32 %v2506_v14, %v6922_v57  ;;  %v7049_v57 = vpop.permute.xlu0 %2634  ;;  %v8156_v14 = vmov 920167782  }
 0x401   :  { %4028 = vset.pattern.permute.xlu1 %v8956_v34  ;;  %v2495_v10 = vpop.permute.xlu1 %2494 }
 0x402   :  { %2618 = vperm.xlu1 %4028, %v4097_v48   ;;  %v2508_v31 = vmul.f32 %v2495_v10, %v6935_v23 }
 0x403   :  { %v7057_v18 = vpop.permute.xlu0 %2638 }
 0x404   :  { %v7042_v40 = vadd.f32 %v2508_v31, %v6942_v25  ;;  %v2830_v25 = vsub.s32 0, %v9065_v53  ;;  %v8147_v31 = vmov 1326507024  }
 0x406   :  { %2622 = vperm.xlu1 %4028, %v4098_v38   ;;  %v2531_v34 = vpop.permute.xlu1 %2530 }
 0x407   :  { %v2574_v36 = vmul.f32 %v2531_v34, %v9063_v20  ;;  %v7071_v47 = vpop.permute.xlu0 %2706 }
 0x409   :  { %v7047_v16 = vadd.f32 %v2574_v36, %v6963_v33  ;;  %v7063_v33 = vld [vmem:[%s8069_s2] sm:$0xff] }
 0x40a   :  { %4029 = vset.pattern.permute.xlu1 %v9044_v32  ;;  %v2535_v27 = vpop.permute.xlu1 %2534  ;;  %v2831_v60 = vrot.slane %v7063_v33, %v2830_v25 }
 0x40b   :  { %2753 = vperm.xlu1 %4029, %v4093_v51   ;;  %v2575_v23 = vmul.f32 %v2535_v27, %v9063_v20  ;;  %v7080_v7 = vpop.permute.xlu0 %2710 }
 0x40d   :  { %v7054_v35 = vadd.f32 %v2575_v23, %v2511_v12 }
 0x40f   :  { %4030 = vset.pattern.permute.xlu1 %v9011_v5  ;;  %9066 = vst [vmem:[#allocation140_spill] sm:$0xff] %v7054_v35  ;;  %v2543_v26 = vpop.permute.xlu1 %2542  ;;  %v7087_v6 = vpop.permute.xlu0 %2714 }
 0x410   :  { %2694 = vperm.xlu1 %4030, %v4097_v48   ;;  %v2577_v0 = vmul.f32 %v2543_v26, %v9063_v20 }
 0x412   :  { %v7067_v5 = vadd.f32 %v2577_v0, %v6985_v50 }
 0x413   :  { %v7103_v34 = vpop.permute.xlu0 %2722 }
 0x414   :  { %4031 = vset.pattern.permute.xlu1 %v9044_v32  ;;  %9067 = vst [vmem:[#allocation141_spill] sm:$0xff] %v7067_v5 }
 0x415   :  { %2761 = vperm.xlu1 %4031, %v4094_v39   ;;  %v2826_v8 = vpop.permute.xlu1 %2825 }
 0x416   :  { %v7069_v58 = vmul.f32 %v2831_v60, %v2826_v8 }
 0x418   :  { %v7075_v32 = vsub.f32 %v7069_v58, %v6998_v13 }
 0x419   :  { %2765 = vperm.xlu1 %4031, %v4095_v52   ;;  %v8152_v52 = vmov 2475754826  }
 0x41a   :  { %v3538_v41 = vand.u32 2139095040, %v7075_v32  ;;  %v7078_v2 = vpop.permute.xlu1 %2550  ;;  %v3535_v51 = vand.u32 2147483647, %v7075_v32  ;;  %vm3537_vm12 = vcmp.lt.s32.totalorder %v7075_v32, 0  ;;  %vm3627_vm3 = vweird.f32 %v7075_v32 }
 0x41c   :  { %v3539_v55 = vshrl.u32 %v3538_v41, 23  ;;  %v3542_v39 = vand.u32 8388607, %v3535_v51  ;;  %vm3536_vm13 = vcmp.le.f32.partialorder %v3535_v51, 0.7853982 }
 0x41d   :  { %2769 = vperm.xlu1 %4031, %v4097_v48  }
 0x41e   :  { %v3861_v50 = vadd.s32 4294967169, %v3539_v55  ;;  %v7082_v29 = vpop.permute.xlu1 %2554  ;;  %v3543_v36 = vor.u32 8388608, %v3542_v39 }
 0x420   :  { %v3545_v62 = vadd.s32 1, %v3861_v50  ;;  %v3583_v39 = vshll.u32 %v3543_v36, 8  ;;  %v2839_v36 = vsub.s32 1, %v9065_v53 }
 0x422   :  { %vm3546_vm5 = vcmp.gt.s32.totalorder %v3545_v62, 0  ;;  %v7085_v37 = vpop.permute.xlu1 %2562 }
 0x423   :  { %v3547_v3 = vsel %vm3546_vm5, %v3545_v62, 0 }
 0x424   :  { %v3549_v12 = vand.u32 31, %v3547_v3  ;;  %v3548_v30 = vshrl.u32 %v3547_v3, 5 }
 0x426   :  { %v3550_v61 = vsub.s32 32, %v3549_v12  ;;  %v3552_v15 = vshll.u32 %v8154_v54, %v3549_v12  ;;  %v3555_v28 = vshll.u32 %v8152_v52, %v3549_v12  ;;  %v3558_v46 = vshll.u32 %v8150_v11, %v3549_v12 }
 0x427   :  { %v3561_v22 = vshll.u32 %v8158_v42, %v3549_v12  ;;  %v3564_v10 = vshll.u32 %v8156_v14, %v3549_v12  ;;  %vm3567_vm6 = vcmp.lt.s32.totalorder %v3548_v30, 1  ;;  %vm3570_vm7 = vcmp.lt.s32.totalorder %v3548_v30, 4 }
 0x428   :  { %v7093_v9 = vpop.permute.xlu1 %2626  ;;  %v3553_v43 = vshrl.u32 %v8152_v52, %v3550_v61  ;;  %v3556_v21 = vshrl.u32 %v8150_v11, %v3550_v61  ;;  %v3559_v17 = vshrl.u32 %v8158_v42, %v3550_v61  ;;  %v3562_v48 = vshrl.u32 %v8156_v14, %v3550_v61 }
 0x429   :  { %v3565_v38 = vshrl.u32 %v8147_v31, %v3550_v61  ;;  %v3551_v50 = vshrl.u32 %v8154_v54, %v3550_v61  ;;  %vm3569_vm8 = vcmp.lt.s32.totalorder %v3548_v30, 3  ;;  %vm3568_vm9 = vcmp.lt.s32.totalorder %v3548_v30, 2 }
 0x42a   :  { %v3554_v27 = vor.u32 %v3553_v43, %v3552_v15  ;;  %v3557_v23 = vor.u32 %v3556_v21, %v3555_v28  ;;  %v3560_v25 = vor.u32 %v3559_v17, %v3558_v46  ;;  %v3563_v26 = vor.u32 %v3562_v48, %v3561_v22  ;;  %v2782_v46 = vpop.permute.xlu0 %2781 }
 0x42b   :  { %v3566_v0 = vor.u32 %v3565_v38, %v3564_v10 }
 0x42c   :  { %v3572_v60 = vsel %vm3570_vm7, %v3560_v25, 2102212464  ;;  %v3575_v8 = vsel %vm3567_vm6, %v3554_v27, %v3557_v23  ;;  %v3579_v41 = vsel %vm3567_vm6, %v3557_v23, %v3560_v25  ;;  %v3576_v62 = vsel %vm3570_vm7, %v3563_v26, 920167782 }
 0x42d   :  { %v3580_v3 = vsel %vm3570_vm7, %v3566_v0, 1326507024  ;;  %v3577_v12 = vsel %vm3569_vm8, %v3560_v25, %v3576_v62  ;;  %v3571_v15 = vsel %vm3567_vm6, %v3551_v50, %v3554_v27  ;;  %v3573_v28 = vsel %vm3569_vm8, %v3557_v23, %v3572_v60 }
 0x42e   :  { %v2835_v55 = vpop.permute.xlu1 %2834  ;;  %v3581_v31 = vsel %vm3569_vm8, %v3563_v26, %v3580_v3  ;;  %v3578_v43 = vsel %vm3568_vm9, %v3575_v8, %v3577_v12  ;;  %v3574_v61 = vsel %vm3568_vm9, %v3571_v15, %v3573_v28  ;;  %v2798_v25 = vpop.permute.xlu0 %2797  ;;  %v2580_v26 = vmul.f32 %v7082_v29, %v9063_v20  ;;  %v9068_v12 = vld [vmem:[#allocation13_spill] sm:$0xff] }
 0x42f   :  { %v3582_v21 = vsel %vm3568_vm9, %v3579_v41, %v3581_v31  ;;  %v7109_v48 = vmul.u32.u64.low %v3583_v39, %v3578_v43  ;;  %v7110_v10 = vmul.u32.u64.high %v3583_v39, %v3578_v43, %v7109_v48  ;;  %v3590_v27 = vmul.u32 %v3583_v39, %v3574_v61 }
 0x430   :  { %v7106_v17 = vmul.u32.u64.low %v3583_v39, %v3582_v21  ;;  %v7107_v22 = vmul.u32.u64.high %v3583_v39, %v3582_v21, %v7106_v17  ;;  %v2840_v60 = vrot.slane %v7063_v33, %v2839_v36  ;;  %v2849_v8 = vsub.s32 2, %v9065_v53  ;;  %v9069_v53 = vld [vmem:[#allocation14_spill] sm:$0xff] }
 0x431   :  { %v3593_v30 = vadd.s32 1, %v7110_v10  ;;  %v2592_v50 = vadd.f32 %v2580_v26, %v7029_v4  ;;  %v2656_v39 = vmul.f32 %v7039_v24, %v9068_v12  ;;  %v2732_v61 = vmul.f32 %v7071_v47, %v9069_v53 }
 0x432   :  { %vm3592_vm10 = vc.u32 %v7107_v22, %v7109_v48  ;;  %v7127_v15 = vpop.permute.xlu0 %2606  ;;  %v2841_v28 = vmul.f32 %v2840_v60, %v2835_v55  ;;  %v2850_v43 = vrot.slane %v7063_v33, %v2849_v8  ;;  %v9070_v55 = vld [vmem:[#allocation15_spill] sm:$0xff]  ;;  %v2658_v51 = vmul.f32 %v7057_v18, %v9068_v12 }
 0x433   :  { %v7112_v38 = vpop.permute.xlu1 %2566  ;;  %v3594_v31 = vsel %vm3592_vm10, %v3593_v30, %v7110_v10  ;;  %v2668_v21 = vadd.f32 %v2656_v39, %v2592_v50  ;;  %v2807_v60 = vmul.f32 %v2782_v46, %v9070_v55 }
 0x434   :  { %v3595_v0 = vadd.s32 %v3594_v31, %v3590_v27  ;;  %v2842_v4 = vsub.f32 %v7069_v58, %v2841_v28  ;;  %v2579_v58 = vmul.f32 %v7078_v2, %v9063_v20  ;;  %v2655_v28 = vmul.f32 %v7093_v9, %v9068_v12 }
 0x435   :  { %v2744_v24 = vadd.f32 %v2732_v61, %v2668_v21  ;;  %v3591_v61 = vadd.s32 %v7109_v48, %v7107_v22 }
 0x436   :  { %v3596_v41 = vadd.s32 536870912, %v3595_v0  ;;  %v7134_v27 = vpop.permute.xlu0 %2678  ;;  %v2591_v21 = vadd.f32 %v2579_v58, %v6992_v19 }
 0x437   :  { %v2571_v23 = vpop.permute.xlu1 %2570  ;;  %v2819_v47 = vadd.f32 %v2807_v60, %v2744_v24 }
 0x438   :  { %v7123_v3 = vshrl.u32 %v3596_v41, 30  ;;  %v2584_v41 = vmul.f32 %v2571_v23, %v9063_v20  ;;  %v2736_v23 = vmul.f32 %v7103_v34, %v9069_v53  ;;  %v2667_v24 = vadd.f32 %v2655_v28, %v2591_v21 }
 0x439   :  { %v2657_v21 = vmul.f32 %v7049_v57, %v9068_v12  ;;  %v2582_v57 = vmul.f32 %v7085_v37, %v9063_v20 }
 0x43a   :  { %v3598_v29 = vshll.u32 %v7123_v3, 30  ;;  %v7145_v39 = vpop.permute.xlu0 %2686 }
 0x43b   :  { %v2594_v37 = vadd.f32 %v2582_v57, %v7036_v56  ;;  %v2583_v56 = vmul.f32 %v7112_v38, %v9063_v20 }
 0x43c   :  { %v2703_v62 = vpop.permute.xlu1 %2702  ;;  %v3599_v17 = vsub.s32 %v3595_v0, %v3598_v29 }
 0x43e   :  { %v3601_v36 = vsub.s32 0, %v3599_v17 }
 0x440   :  { %v3862_v26 = vmin.u32 %v3601_v36, %v3599_v17  ;;  %v2811_v36 = vmul.f32 %v2798_v25, %v9070_v55 }
 0x441   :  { %v2845_v10 = vpop.permute.xlu1 %2844 }
 0x442   :  { %v2851_v30 = vmul.f32 %v2850_v43, %v2845_v10  ;;  %v3603_v0 = vclz %v3862_v26  ;;  %v2731_v10 = vmul.f32 %v2703_v62, %v9069_v53 }
 0x444   :  { %v2852_v31 = vsub.f32 %v2842_v4, %v2851_v30  ;;  %v3863_v50 = vadd.s32 4294967294, %v3603_v0  ;;  %v2743_v19 = vadd.f32 %v2731_v10, %v2667_v24 }
 0x446   :  { %v7138_v33 = vsub.f32 %v2852_v31, %v6998_v13  ;;  %v7140_v8 = vpop.permute.xlu1 %2642  ;;  %vm3864_vm11 = vcmp.lt.s32.totalorder %v3863_v50, 0  ;;  %v2596_v13 = vadd.f32 %v2584_v41, %v7042_v40  ;;  %v7161_v41 = vpop.permute.xlu0 %2690 }
 0x447   :  { %v3606_v2 = vsel %vm3864_vm11, 0, %v3863_v50  ;;  %9071 = vst [vmem:[#allocation142_spill] sm:$0xff] %v7161_v41 }
 0x448   :  { %v7150_v46 = vsub.f32 %v7138_v33, %v2819_v47  ;;  %v3607_v9 = vsub.s32 32, %v3606_v2  ;;  %v3611_v4 = vsub.s32 4294967266, %v3606_v2  ;;  %v3608_v31 = vshll.u32 %v3599_v17, %v3606_v2 }
 0x449   :  { %v2581_v47 = vmul.f32 %v7032_v59, %v9063_v20  ;;  %v3621_v59 = vsub.s32 4, %v7123_v3 }
 0x44a   :  { %v2647_v43 = vpop.permute.xlu1 %2646  ;;  %v2970_v40 = vand.u32 2139095040, %v7150_v46  ;;  %v3609_v26 = vshrl.u32 %v3591_v61, %v3607_v9  ;;  %v3612_v60 = vadd.s32 127, %v3611_v4  ;;  %v2699_v10 = vpop.permute.xlu0 %2698 }
 0x44b   :  { %v2660_v29 = vmul.f32 %v2647_v43, %v9068_v12  ;;  %v2593_v43 = vadd.f32 %v2581_v47, %v7000_v45 }
 0x44c   :  { %v3610_v58 = vor.u32 %v3609_v26, %v3608_v31  ;;  %v3613_v22 = vshll.u32 %v3612_v60, 23  ;;  %v2971_v17 = vshrl.u32 %v2970_v40, 23  ;;  %v2733_v40 = vmul.f32 %v7080_v7, %v9069_v53 }
 0x44d   :  { %v2672_v30 = vadd.f32 %v2660_v29, %v2596_v13  ;;  %v2669_v45 = vadd.f32 %v2657_v21, %v2593_v43  ;;  %v3622_v31 = vsel %vm3537_vm12, %v3621_v59, %v7123_v3  ;;  %v8149_v7 = vand.u32 2147483647, %v7150_v46 }
 0x44e   :  { %v3614_v50 = vor.u32 4788187, %v3613_v22  ;;  %v3617_v2 = vcvt.s32.f32 %v3610_v58  ;;  %v3841_v4 = vadd.s32 4294967169, %v2971_v17  ;;  %v2734_v17 = vmul.f32 %v7087_v6, %v9069_v53 }
 0x44f   :  { %v2748_v0 = vadd.f32 %v2736_v23, %v2672_v30  ;;  %v2778_v34 = vpop.permute.xlu1 %2777  ;;  %v2745_v22 = vadd.f32 %v2733_v40, %v2669_v45  ;;  %v2650_v43 = vmul.f32 %v7127_v15, %v9068_v12  ;;  %v2670_v21 = vadd.f32 %v2658_v51, %v2594_v37 }
 0x450   :  { %v2806_v62 = vmul.f32 %v2778_v34, %v9070_v55  ;;  %v3615_v23 = vand.u32 2147483647, %v3614_v50  ;;  %v2977_v34 = vadd.s32 1, %v3841_v4  ;;  %v7211_v6 = vmul.f32 %v7145_v39, %v9069_v53 }
 0x451   :  { %v2823_v48 = vadd.f32 %v2811_v36, %v2748_v0  ;;  %v7214_v4 = vmul.f32 %v2699_v10, %v9069_v53  ;;  %v2595_v39 = vadd.f32 %v2583_v56, %v7007_v63  ;;  %v2746_v10 = vadd.f32 %v2734_v17, %v2670_v21 }
 0x452   :  { %v2818_v25 = vadd.f32 %v2806_v62, %v2743_v19  ;;  %v3618_v61 = vmul.f32 %v3617_v2, %v3615_v23  ;;  %v2758_v19 = vpop.permute.xlu0 %2757  ;;  %vm2978_vm14 = vcmp.gt.s32.totalorder %v2977_v34, 0  ;;  %v2974_v23 = vand.u32 8388607, %v8149_v7  ;;  %9073 = vst [vmem:[#allocation143_spill] sm:$0xff] %v7211_v6 }
 0x453   :  { %v7167_v28 = vsub.f32 %v7138_v33, %v2823_v48  ;;  %v3624_v48 = vsel %vm3536_vm13, 0, %v3622_v31  ;;  %v2979_v18 = vsel %vm2978_vm14, %v2977_v34, 0  ;;  %9074 = vst [vmem:[#allocation144_spill] sm:$0xff] %v7214_v4  ;;  %v7227_v57 = vadd.f32 %v2650_v43, %v7047_v16 }
 0x454   :  { %v7171_v13 = vsub.f32 %v7138_v33, %v2818_v25  ;;  %v7173_v29 = vpop.permute.xlu1 %2718  ;;  %v3619_v36 = vxor.u32 2147483648, %v3618_v61  ;;  %v3732_v25 = vadd.s32 3, %v3624_v48  ;;  %v3628_v15 = vand.u32 3, %v3624_v48 }
 0x455   :  { %v3382_v9 = vand.u32 2139095040, %v7167_v28  ;;  %v9082_v6 = vmov 683565275  }
 0x456   :  { %v2867_v30 = vand.u32 2139095040, %v7171_v13  ;;  %v3620_v60 = vsel %vm3537_vm12, %v3619_v36, %v3618_v61  ;;  %v2774_v2 = vpop.permute.xlu0 %2773  ;;  %v7207_v61 = vmul.f32 %v7134_v27, %v9069_v53  ;;  %v3733_v20 = vand.u32 3, %v3732_v25 }
 0x457   :  { %v3383_v0 = vshrl.u32 %v3382_v9, 23  ;;  %v3623_v62 = vsel %vm3536_vm13, %v7075_v32, %v3620_v60  ;;  %v7220_v45 = vmul.f32 %v2774_v2, %v9070_v55  ;;  %v2659_v27 = vmul.f32 %v7140_v8, %v9068_v12 }
 0x458   :  { %v2868_v58 = vshrl.u32 %v2867_v30, 23  ;;  %4034 = vcosq.f32 %v3623_v62  ;;  %9072 = vst [vmem:[#allocation148_spill] sm:$0xff] %v7207_v61  ;;  %v7217_v30 = vmul.f32 %v2758_v19, %v9070_v55  ;;  %v2975_v36 = vor.u32 8388608, %v2974_v23 }
 0x459   :  { %v2786_v24 = vpop.permute.xlu1 %2785  ;;  %4036 = vsinq.f32 %v3623_v62  ;;  %v3857_v47 = vadd.s32 4294967169, %v3383_v0  ;;  %9075 = vst [vmem:[#allocation172_spill] sm:$0xff] %v7220_v45  ;;  %vm3629_vm15 = vcmp.lt.s32.totalorder %v3628_v15, 2  ;;  %vm3630_vm0 = vcmp.eq.s32.totalorder %v3628_v15, 0 }
 0x45a   :  { %v2808_v26 = vmul.f32 %v2786_v24, %v9070_v55  ;;  %v3837_v50 = vadd.s32 4294967169, %v2868_v58  ;;  %v2981_v24 = vand.u32 31, %v2979_v18  ;;  %vm3633_vm1 = vcmp.eq.s32.totalorder %v3628_v15, 2 }
 0x45b   :  { %v3389_v9 = vadd.s32 1, %v3857_v47  ;;  %vm3734_vm4 = vcmp.lt.s32.totalorder %v3733_v20, 2  ;;  %vm3735_vm5 = vcmp.eq.s32.totalorder %v3733_v20, 0  ;;  %v2735_v8 = vmul.f32 %v7173_v29, %v9069_v53 }
 0x45c   :  { %v2820_v3 = vadd.f32 %v2808_v26, %v2745_v22  ;;  %v2874_v38 = vadd.s32 1, %v3837_v50  ;;  %vm3738_vm7 = vcmp.eq.s32.totalorder %v3733_v20, 2  ;;  %v2671_v63 = vadd.f32 %v2659_v27, %v2595_v39 }
 0x45d   :  { %v2790_v31 = vpop.permute.xlu1 %2789  ;;  %vm3390_vm2 = vcmp.gt.s32.totalorder %v3389_v9, 0  ;;  %v2982_v26 = vsub.s32 32, %v2981_v24  ;;  %v7232_v60 = vshll.u32 %v2975_v36, 8  ;;  %v7234_v19 = vshrl.u32 %v2979_v18, 5 }
 0x45e   :  { %v7203_v59 = vsub.f32 %v7138_v33, %v2820_v3  ;;  %vm2875_vm6 = vcmp.gt.s32.totalorder %v2874_v38, 0  ;;  %v3391_v16 = vsel %vm3390_vm2, %v3389_v9, 0  ;;  %v2809_v37 = vmul.f32 %v2790_v31, %v9070_v55 }
 0x45f   :  { %v2876_v48 = vsel %vm2875_vm6, %v2874_v38, 0  ;;  %v2984_v3 = vshll.u32 %v8154_v54, %v2981_v24  ;;  %v2747_v47 = vadd.f32 %v2735_v8, %v2671_v63  ;;  %v2987_v25 = vshll.u32 %v8152_v52, %v2981_v24 }
 0x460   :  { %v3073_v40 = vand.u32 2139095040, %v7203_v59  ;;  %v2990_v50 = vshll.u32 %v8150_v11, %v2981_v24  ;;  %v7243_v23 = vand.u32 31, %v3391_v16  ;;  %v2985_v2 = vshrl.u32 %v8152_v52, %v2982_v26 }
 0x461   :  { %v2794_v51 = vpop.permute.xlu1 %2793  ;;  %v7248_v18 = vand.u32 31, %v2876_v48  ;;  %v2821_v27 = vadd.f32 %v2809_v37, %v2746_v10  ;;  %v7253_v39 = vshrl.u32 %v8154_v54, %v2982_v26  ;;  %v2988_v31 = vshrl.u32 %v8150_v11, %v2982_v26 }
 0x462   :  { %v3074_v34 = vshrl.u32 %v3073_v40, 23  ;;  %v2810_v36 = vmul.f32 %v2794_v51, %v9070_v55  ;;  %v2991_v8 = vshrl.u32 %v8158_v42, %v2982_v26  ;;  %v2994_v63 = vshrl.u32 %v8156_v14, %v2982_v26 }
 0x463   :  { %v7262_v15 = vsub.s32 32, %v7243_v23  ;;  %v2993_v10 = vshll.u32 %v8158_v42, %v2981_v24  ;;  %v2986_v37 = vor.u32 %v2985_v2, %v2984_v3  ;;  %vm2999_vm11 = vcmp.lt.s32.totalorder %v7234_v19, 1 }
 0x464   :  { %v3845_v9 = vadd.s32 4294967169, %v3074_v34  ;;  %v9076_v34 = vmov 1326507024   ;;  %v2992_v7 = vor.u32 %v2991_v8, %v2990_v50  ;;  %v3408_v50 = vshll.u32 %v8156_v14, %v7243_v23 }
 0x465   :  { %v4035_v0 = vpop.eup %4034  ;;  %v3406_v32 = vshrl.u32 %v8156_v14, %v7262_v15  ;;  %vm3002_vm12 = vcmp.lt.s32.totalorder %v7234_v19, 4  ;;  %vm3001_vm13 = vcmp.lt.s32.totalorder %v7234_v19, 3  ;;  %vm3000_vm14 = vcmp.lt.s32.totalorder %v7234_v19, 2 }
 0x466   :  { %v4037_v58 = vpop.eup %4036  ;;  %v3634_v22 = vxor.u32 2147483648, %v4035_v0  ;;  %v3080_v20 = vadd.s32 1, %v3845_v9  ;;  %v2995_v9 = vor.u32 %v2994_v63, %v2993_v10  ;;  %v3003_v62 = vsel %vm2999_vm11, %v7253_v39, %v2986_v37 }
 0x467   :  { %v3631_v29 = vxor.u32 2147483648, %v4037_v58  ;;  %v3396_v35 = vshll.u32 %v9082_v6, %v7243_v23 }
 0x468   :  { %v3635_v17 = vsel %vm3633_vm1, %v3634_v22, %v4037_v58  ;;  %v3740_v43 = vsel %vm3738_vm7, %v3634_v22, %v4037_v58  ;;  %v2997_v58 = vshrl.u32 %v9076_v34, %v2982_v26  ;;  %v7267_v22 = vsub.s32 32, %v7248_v18 }
 0x469   :  { %v3632_v21 = vsel %vm3630_vm0, %v4035_v0, %v3631_v29  ;;  %v3737_v56 = vsel %vm3735_vm5, %v4035_v0, %v3631_v29  ;;  %v2996_v29 = vshll.u32 %v8156_v14, %v2981_v24  ;;  %v3405_v24 = vshll.u32 %v8158_v42, %v7243_v23 }
 0x46a   :  { %v3636_v38 = vsel %vm3629_vm15, %v3632_v21, %v3635_v17  ;;  %v3741_v40 = vsel %vm3734_vm4, %v3737_v56, %v3740_v43  ;;  %v7272_v17 = vshrl.u32 %v3391_v16, 5  ;;  %v7275_v43 = vsub.f32 %v7138_v33, %v2821_v27  ;;  %v7277_v56 = vpop.permute.xlu1 %3489 }
 0x46b   :  { %v3637_v0 = vsel %vm3627_vm3, nan, %v3636_v38  ;;  %v3742_v51 = vsel %vm3627_vm3, nan, %v3741_v40  ;;  %v2822_v21 = vadd.f32 %v2810_v36, %v2747_v47  ;;  %9078 = vst [vmem:[#allocation147_spill] sm:$0xff] %v7277_v56  ;;  %v2989_v38 = vor.u32 %v2988_v31, %v2987_v25 }
 0x46c   :  { %9077 = vst [vmem:[#allocation145_spill] sm:$0xff] %v7275_v43  ;;  %v7280_v26 = vmul.f32 %v3637_v0, %v7277_v56  ;;  %v7286_v16 = vshrl.u32 %v2876_v48, 5  ;;  %v2998_v3 = vor.u32 %v2997_v58, %v2996_v29  ;;  %v3409_v47 = vshrl.u32 %v9076_v34, %v7262_v15 }
 0x46d   :  { %v2891_v2 = vshrl.u32 %v8156_v14, %v7267_v22  ;;  %vm3081_vm8 = vcmp.gt.s32.totalorder %v3080_v20, 0  ;;  %v7293_v25 = vmul.f32 %v3742_v51, %v7277_v56  ;;  %vm3414_vm9 = vcmp.lt.s32.totalorder %v7272_v17, 4 }
 0x46e   :  { %v3176_v27 = vand.u32 2139095040, %v7275_v43  ;;  %v7300_v48 = vsub.f32 %v7138_v33, %v2822_v21  ;;  %v2890_v36 = vshll.u32 %v8158_v42, %v7248_v18  ;;  %v7306_v40 = vshll.u32 %v8156_v14, %v7248_v18 }
 0x46f   :  { %v7310_v31 = vshrl.u32 %v9076_v34, %v7267_v22  ;;  %v3744_v8 = vrot.slane %v7280_v26, 4  ;;  %v7313_v63 = vor.u32 %v3406_v32, %v3405_v24  ;;  %vm2899_vm10 = vcmp.lt.s32.totalorder %v7286_v16, 4 }
 0x470   :  { %9079 = vst [vmem:[#allocation160_spill] sm:$0xff] %v7300_v48  ;;  %v3082_v0 = vsel %vm3081_vm8, %v3080_v20, 0  ;;  %v3410_v33 = vor.u32 %v3409_v47, %v3408_v50  ;;  %v7317_v10 = vor.u32 %v2891_v2, %v2890_v36  ;;  %v3750_v58 = vrot.slane %v7293_v25, 4 }
 0x471   :  { %v3177_v29 = vshrl.u32 %v3176_v27, 23  ;;  %v3279_v51 = vand.u32 2139095040, %v7300_v48  ;;  %v3007_v21 = vsel %vm2999_vm11, %v2986_v37, %v2989_v38  ;;  %v3008_v24 = vsel %vm3002_vm12, %v2995_v9, 920167782 }
 0x472   :  { %v7328_v32 = vand.u32 31, %v3082_v0  ;;  %v3745_v47 = vadd.f32 %v3744_v8, %v7280_v26  ;;  %v7335_v2 = vsel %vm3414_vm9, %v7313_v63, 920167782  ;;  %v3004_v50 = vsel %vm3002_vm12, %v2992_v7, 2102212464 }
 0x473   :  { %v3009_v27 = vsel %vm3001_vm13, %v2992_v7, %v3008_v24  ;;  %v3424_v36 = vsel %vm3414_vm9, %v3410_v33, 1326507024  ;;  %v3751_v8 = vadd.f32 %v3750_v58, %v7293_v25  ;;  %v3011_v11 = vsel %vm2999_vm11, %v2989_v38, %v2992_v7  ;;  %v2603_v58 = vpop.permute.xlu1 %2602 }
 0x474   :  { %v3010_v20 = vsel %vm3000_vm14, %v3007_v21, %v3009_v27  ;;  %v3849_v52 = vadd.s32 4294967169, %v3177_v29  ;;  %v3280_v54 = vshrl.u32 %v3279_v51, 23  ;;  %v3012_v24 = vsel %vm3002_vm12, %v2998_v3, 1326507024 }
 0x475   :  { %v7355_v14 = vsub.s32 32, %v7328_v32  ;;  %v3746_v33 = vrot.slane %v3745_v47, 2  ;;  %v3005_v21 = vsel %vm3001_vm13, %v2989_v38, %v3004_v50  ;;  %v3013_v7 = vsel %vm3001_vm13, %v2995_v9, %v3012_v24 }
 0x476   :  { %v7364_v29 = vsel %vm2899_vm10, %v7317_v10, 920167782  ;;  %v3014_v39 = vsel %vm3000_vm14, %v3011_v11, %v3013_v7  ;;  %v7369_v37 = vmul.u32.u64.low %v7232_v60, %v3010_v20  ;;  %v7370_v3 = vmul.u32.u64.high %v7232_v60, %v3010_v20, %v7369_v37 }
 0x477   :  { %v7373_v51 = vshrl.u32 %v3082_v0, 5  ;;  %v3752_v27 = vrot.slane %v3751_v8, 2  ;;  %v7376_v38 = vmul.u32.u64.low %v7232_v60, %v3014_v39  ;;  %v7377_v50 = vmul.u32.u64.high %v7232_v60, %v3014_v39, %v7376_v38 }
 0x478   :  { %v3096_v9 = vshll.u32 %v8158_v42, %v7328_v32  ;;  %v9080_v24 = vmov 920167782   ;;  %v7386_v11 = vmul.f32 %v2603_v58, %v9068_v12  ;;  %v3006_v20 = vsel %vm3000_vm14, %v3003_v62, %v3005_v21 }
 0x479   :  { %v7383_v5 = vshll.u32 %v9080_v24, %v7328_v32  ;;  %v3097_v0 = vshrl.u32 %v9080_v24, %v7355_v14  ;;  %v3183_v7 = vadd.s32 1, %v3849_v52  ;;  %v3853_v41 = vadd.s32 4294967169, %v3280_v54 }
 0x47a   :  { %v3747_v39 = vadd.f32 %v3746_v33, %v3745_v47  ;;  %v3025_v38 = vadd.s32 1, %v7370_v3  ;;  %v9081_v42 = vand.u32 2147483647, %v7167_v28  ;;  %v9083_v58 = vmov 2475754826  }
 0x47b   :  { %v3397_v48 = vshrl.u32 %v9083_v58, %v7262_v15  ;;  %v7401_v19 = vshrl.u32 %v9076_v34, %v7355_v14  ;;  %v3753_v62 = vadd.f32 %v3752_v27, %v3751_v8  ;;  %v3022_v52 = vmul.u32 %v7232_v60, %v3006_v20 }
 0x47c   :  { %v3386_v1 = vand.u32 8388607, %v9081_v42  ;;  %vm3024_vm15 = vc.u32 %v7377_v50, %v7369_v37  ;;  %v3399_v42 = vshll.u32 %v9083_v58, %v7243_v23  ;;  %v9084_v33 = vmov 2131351028  }
 0x47d   :  { %v3026_v54 = vsel %vm3024_vm15, %v3025_v38, %v7370_v3  ;;  %v3398_v47 = vor.u32 %v3397_v48, %v3396_v35  ;;  %v3400_v21 = vshrl.u32 %v9084_v33, %v7262_v15  ;;  %vm3184_vm0 = vcmp.gt.s32.totalorder %v3183_v7, 0 }
 0x47e   :  { %v3027_v61 = vadd.s32 %v3026_v54, %v3022_v52  ;;  %v3402_v43 = vshll.u32 %v9084_v33, %v7243_v23  ;;  %v9085_v8 = vmov 2102212464   ;;  %v3286_v27 = vadd.s32 1, %v3853_v41 }
 0x47f   :  { %v3403_v60 = vshrl.u32 %v9085_v8, %v7262_v15  ;;  %v3748_v20 = vrot.slane %v3747_v39, 1  ;;  %v3387_v55 = vor.u32 8388608, %v3386_v1  ;;  %v3401_v45 = vor.u32 %v3400_v21, %v3399_v42  ;;  %v2611_v42 = vpop.permute.xlu1 %2610 }
 0x480   :  { %v3754_v3 = vrot.slane %v3753_v62, 1  ;;  %v3028_v35 = vadd.s32 536870912, %v3027_v61  ;;  %vm3411_vm1 = vcmp.lt.s32.totalorder %v7272_v17, 1  ;;  %v3395_v38 = vshrl.u32 %v9082_v6, %v7262_v15 }
 0x481   :  { %v3404_v48 = vor.u32 %v3403_v60, %v3402_v43  ;;  %vm3412_vm2 = vcmp.lt.s32.totalorder %v7272_v17, 2  ;;  %vm3413_vm3 = vcmp.lt.s32.totalorder %v7272_v17, 3  ;;  %v3419_v23 = vsel %vm3411_vm1, %v3398_v47, %v3401_v45 }
 0x482   :  { %v7422_v52 = vshrl.u32 %v3028_v35, 30  ;;  %v3425_v43 = vsel %vm3413_vm3, %v7313_v63, %v3424_v36  ;;  %v3185_v54 = vsel %vm3184_vm0, %v3183_v7, 0  ;;  %v3427_v60 = vshll.u32 %v3387_v55, 8 }
 0x483   :  { %v3416_v1 = vsel %vm3414_vm9, %v3404_v48, 2102212464  ;;  %v3421_v41 = vsel %vm3413_vm3, %v3404_v48, %v7335_v2  ;;  %v3423_v21 = vsel %vm3411_vm1, %v3401_v45, %v3404_v48  ;;  %v7433_v56 = vor.u32 %v3097_v0, %v3096_v9 }
 0x484   :  { %v3422_v15 = vsel %vm3412_vm2, %v3419_v23, %v3421_v41  ;;  %vm3287_vm4 = vcmp.gt.s32.totalorder %v3286_v27, 0  ;;  %v3030_v35 = vshll.u32 %v7422_v52, 30  ;;  %v3415_v2 = vsel %vm3411_vm1, %v3395_v38, %v3398_v47 }
 0x485   :  { %v3417_v4 = vsel %vm3413_vm3, %v3401_v45, %v3416_v1  ;;  %v3426_v63 = vsel %vm3412_vm2, %v3423_v21, %v3425_v43  ;;  %v7440_v36 = vmul.u32.u64.low %v3427_v60, %v3422_v15  ;;  %v7441_v7 = vmul.u32.u64.high %v3427_v60, %v3422_v15, %v7440_v36 }
 0x486   :  { %v7444_v23 = vand.u32 31, %v3185_v54  ;;  %v3749_v48 = vadd.f32 %v3748_v20, %v3747_v39  ;;  %v3755_v55 = vadd.f32 %v3754_v3, %v3753_v62  ;;  %v7446_v9 = vsub.s32 %v3027_v61, %v3030_v35 }
 0x487   :  { %v9087_v0 = vor.u32 %v7310_v31, %v7306_v40  ;;  %v3101_v45 = vor.u32 %v7401_v19, %v7383_v5  ;;  %v7457_v38 = vmul.u32.u64.low %v3427_v60, %v3426_v63  ;;  %v7458_v1 = vmul.u32.u64.high %v3427_v60, %v3426_v63, %v7457_v38  ;;  %v7476_v19 = vpop.permute.xlu1 %2614 }
 0x488   :  { %9086 = vst [vmem:[#allocation149_spill] sm:$0xff] %v7444_v23  ;;  %vm3105_vm5 = vcmp.lt.s32.totalorder %v7373_v51, 4  ;;  %v3288_v41 = vsel %vm3287_vm4, %v3286_v27, 0  ;;  %v3033_v39 = vsub.s32 0, %v7446_v9  ;;  %v3418_v61 = vsel %vm3412_vm2, %v3415_v2, %v3417_v4  ;;  %9090 = vst [vmem:[#allocation153_spill] sm:$0xff] %v7476_v19 }
 0x489   :  { %v7453_v47 = vsel %vm2899_vm10, %v9087_v0, 1326507024  ;;  %v7467_v40 = vsel %vm3105_vm5, %v7433_v56, 920167782  ;;  %v7471_v31 = vadd.f32 %v7386_v11, %v7014_v44  ;;  %v7474_v5 = vmul.f32 %v2611_v42, %v9068_v12 }
 0x48a   :  { %v3437_v62 = vadd.s32 1, %v7441_v7  ;;  %v7480_v27 = vsub.s32 32, %v7444_v23  ;;  %v3756_v4 = vmul.f32 %v3749_v48, %v7280_v26  ;;  %v3757_v17 = vmul.f32 %v3755_v55, %v7293_v25  ;;  %v3760_v55 = vld [vmem:[%s8070_s3 + $0x8] sm:$0xff] }
 0x48b   :  { %9088 = vst [vmem:[#allocation151_spill] sm:$0xff] %v7471_v31  ;;  %9089 = vst [vmem:[#allocation176_spill] sm:$0xff] %v7474_v5  ;;  %v3842_v20 = vmin.u32 %v3033_v39, %v7446_v9  ;;  %v7487_v44 = vsel %vm3105_vm5, %v3101_v45, 1326507024  ;;  %v7489_v11 = vand.u32 31, %v3288_v41  ;;  %v3434_v3 = vmul.u32 %v3427_v60, %v3418_v61  ;;  %v2683_v0 = vpop.permute.xlu1 %2682 }
 0x48c   :  { %9091 = vst [vmem:[#allocation155_spill] sm:$0xff] %v7480_v27  ;;  %vm3436_vm6 = vc.u32 %v7458_v1, %v7440_v36  ;;  %v7493_v43 = vshrl.u32 %v3185_v54, 5  ;;  %v8167_v26 = vand.u32 2147483647, %v7171_v13  ;;  %v7499_v25 = vshll.u32 %v9085_v8, %v7444_v23 }
 0x48d   :  { %9092 = vst [vmem:[#allocation157_spill] sm:$0xff] %v7489_v11  ;;  %v3035_v42 = vclz %v3842_v20  ;;  %v3438_v15 = vsel %vm3436_vm6, %v3437_v62, %v7441_v7  ;;  %v7503_v21 = vshll.u32 %v9080_v24, %v7444_v23  ;;  %v7505_v35 = vshrl.u32 %v3288_v41, 5 }
 0x48e   :  { %v3439_v60 = vadd.s32 %v3438_v15, %v3434_v3  ;;  %v7509_v54 = vshrl.u32 %v9080_v24, %v7480_v27  ;;  %v7513_v2 = vshrl.u32 %v9076_v34, %v7480_v27  ;;  %v7515_v63 = vadd.f32 %v3757_v17, %v3756_v4 }
 0x48f   :  { %9093 = vst [vmem:[#allocation158_spill] sm:$0xff] %v7505_v35  ;;  %v3843_v7 = vadd.s32 4294967294, %v3035_v42  ;;  %v7518_v48 = vsub.s32 32, %v7489_v11  ;;  %v2882_v38 = vshrl.u32 %v9083_v58, %v7267_v22  ;;  %v2885_v41 = vshrl.u32 %v9084_v33, %v7267_v22 }
 0x490   :  { %v3440_v45 = vadd.s32 536870912, %v3439_v60  ;;  %v2871_v39 = vand.u32 8388607, %v8167_v26  ;;  %v2881_v61 = vshll.u32 %v9082_v6, %v7248_v18  ;;  %v2888_v62 = vshrl.u32 %v9085_v8, %v7267_v22 }
 0x491   :  { %vm3844_vm7 = vcmp.lt.s32.totalorder %v3843_v7, 0  ;;  %v2884_v20 = vshll.u32 %v9083_v58, %v7248_v18  ;;  %v2887_v3 = vshll.u32 %v9084_v33, %v7248_v18  ;;  %v3023_v42 = vadd.s32 %v7369_v37, %v7377_v50 }
 0x492   :  { %v3038_v4 = vsel %vm3844_vm7, 0, %v3843_v7  ;;  %v7533_v17 = vshrl.u32 %v3440_v45, 30  ;;  %v3766_v19 = vmul.f32 %v3760_v55, %v7515_v63  ;;  %v2883_v31 = vor.u32 %v2882_v38, %v2881_v61  ;;  %v7554_v55 = vpop.permute.xlu1 %2618 }
 0x493   :  { %v3039_v15 = vsub.s32 32, %v3038_v4  ;;  %v3043_v26 = vsub.s32 4294967266, %v3038_v4  ;;  %v2886_v35 = vor.u32 %v2885_v41, %v2884_v20  ;;  %v2889_v7 = vor.u32 %v2888_v62, %v2887_v3  ;;  %9094 = vst [vmem:[#allocation159_spill] sm:$0xff] %v7554_v55 }
 0x494   :  { %v3442_v5 = vshll.u32 %v7533_v17, 30  ;;  %v7545_v45 = vshll.u32 %v9085_v8, %v7489_v11  ;;  %vm2969_vm8 = vcmp.lt.s32.totalorder %v7150_v46, 0  ;;  %v3040_v18 = vshll.u32 %v7446_v9, %v3038_v4 }
 0x495   :  { %v3041_v23 = vshrl.u32 %v3023_v42, %v3039_v15  ;;  %v3044_v27 = vadd.s32 127, %v3043_v26  ;;  %v7551_v37 = vshll.u32 %v9080_v24, %v7489_v11  ;;  %v2726_v50 = vmul.f32 %v2683_v0, %v9069_v53 }
 0x496   :  { %v7556_v38 = vsub.s32 %v3439_v60, %v3442_v5  ;;  %v2872_v41 = vor.u32 8388608, %v2871_v39  ;;  %vm2896_vm9 = vcmp.lt.s32.totalorder %v7286_v16, 1  ;;  %vm2898_vm11 = vcmp.lt.s32.totalorder %v7286_v16, 3  ;;  %v3764_v39 = vld [vmem:[%s8070_s3 + $0x28] sm:$0xff]  ;;  %v2623_v55 = vpop.permute.xlu1 %2622 }
 0x497   :  { %v3042_v61 = vor.u32 %v3041_v23, %v3040_v18  ;;  %v3045_v62 = vshll.u32 %v3044_v27, 23  ;;  %v9095_v9 = vand.u32 2147483647, %v7150_v46  ;;  %v3777_v4 = vrot.slane %v3766_v19, 4 }
 0x498   :  { %v3445_v0 = vsub.s32 0, %v7556_v38  ;;  %v2904_v5 = vsel %vm2896_vm9, %v2883_v31, %v2886_v35  ;;  %v2906_v23 = vsel %vm2898_vm11, %v2889_v7, %v7364_v29  ;;  %v3053_v60 = vsub.s32 4, %v7422_v52 }
 0x499   :  { %vm7562_vm12 = vcmp.le.f32.partialorder %v9095_v9, 0.7853982  ;;  %v3046_v27 = vor.u32 4788187, %v3045_v62  ;;  %v2880_v20 = vshrl.u32 %v9082_v6, %v7267_v22  ;;  %v2908_v3 = vsel %vm2896_vm9, %v2886_v35, %v2889_v7 }
 0x49a   :  { %v3049_v42 = vcvt.s32.f32 %v3042_v61  ;;  %v3858_v15 = vmin.u32 %v3445_v0, %v7556_v38  ;;  %vm2897_vm13 = vcmp.lt.s32.totalorder %v7286_v16, 2  ;;  %v2901_v29 = vsel %vm2899_vm10, %v2889_v7, 2102212464 }
 0x49b   :  { %v3047_v18 = vand.u32 2147483647, %v3046_v27  ;;  %v2907_v62 = vsel %vm2897_vm13, %v2904_v5, %v2906_v23  ;;  %v2910_v22 = vsel %vm2898_vm11, %v7317_v10, %v7453_v47  ;;  %v2912_v9 = vshll.u32 %v2872_v41, 8 }
 0x49c   :  { %v3447_v53 = vclz %v3858_v15  ;;  %v3770_v61 = vmul.f32 %v3764_v39, %v7515_v63  ;;  %v2900_v0 = vsel %vm2896_vm9, %v2880_v20, %v2883_v31  ;;  %v2911_v7 = vsel %vm2897_vm13, %v2908_v3, %v2910_v22 }
 0x49d   :  { %v3050_v27 = vmul.f32 %v3049_v42, %v3047_v18  ;;  %v2902_v5 = vsel %vm2898_vm11, %v2886_v35, %v2901_v29  ;;  %v7597_v23 = vmul.u32.u64.low %v2912_v9, %v2911_v7  ;;  %v7598_v11 = vmul.u32.u64.high %v2912_v9, %v2911_v7, %v7597_v23 }
 0x49e   :  { %v3054_v10 = vsel %vm2969_vm8, %v3053_v60, %v7422_v52  ;;  %v3859_v47 = vadd.s32 4294967294, %v3447_v53  ;;  %v7603_v41 = vmul.u32.u64.low %v2912_v9, %v2907_v62  ;;  %v7604_v39 = vmul.u32.u64.high %v2912_v9, %v2907_v62, %v7603_v41 }
 0x49f   :  { %v7609_v31 = vor.u32 %v7509_v54, %v7499_v25  ;;  %v2738_v20 = vadd.f32 %v2726_v50, %v7227_v57  ;;  %v3051_v3 = vxor.u32 2147483648, %v3050_v27  ;;  %v2654_v35 = vmul.f32 %v2623_v55, %v9068_v12 }
 0x4a0   :  { %v3778_v42 = vadd.f32 %v3777_v4, %v3766_v19  ;;  %vm3860_vm10 = vcmp.lt.s32.totalorder %v3859_v47, 0  ;;  %v3801_v15 = vrot.slane %v3770_v61, 4  ;;  %v2903_v52 = vsel %vm2897_vm13, %v2900_v0, %v2902_v5 }
 0x4a1   :  { %v3052_v53 = vsel %vm2969_vm8, %v3051_v3, %v3050_v27  ;;  %v3056_v60 = vsel %vm7562_vm12, 0, %v3054_v10  ;;  %v3435_v25 = vadd.s32 %v7440_v36, %v7458_v1  ;;  %v3450_v54 = vsel %vm3860_vm10, 0, %v3859_v47 }
 0x4a2   :  { %v3055_v57 = vsel %vm7562_vm12, %v7150_v46, %v3052_v53  ;;  %v3451_v19 = vsub.s32 32, %v3450_v54  ;;  %v3455_v50 = vsub.s32 4294967266, %v3450_v54  ;;  %vm2921_vm14 = vc.u32 %v7598_v11, %v7603_v41 }
 0x4a3   :  { %4038 = vcosq.f32 %v3055_v57  ;;  %v2919_v16 = vmul.u32 %v2912_v9, %v2903_v52  ;;  %v2922_v55 = vadd.s32 1, %v7604_v39  ;;  %v3070_v4 = vand.u32 2147483647, %v7203_v59 }
 0x4a4   :  { %4040 = vsinq.f32 %v3055_v57  ;;  %v3452_v29 = vshll.u32 %v7556_v38, %v3450_v54  ;;  %v3453_v36 = vshrl.u32 %v3435_v25, %v3451_v19  ;;  %v3456_v1 = vadd.s32 127, %v3455_v50 }
 0x4a5   :  { %v3204_v26 = vor.u32 %v7513_v2, %v7503_v21  ;;  %v7633_v18 = vshrl.u32 %v9080_v24, %v7518_v48  ;;  %v7637_v62 = vshrl.u32 %v9076_v34, %v7518_v48  ;;  %v2923_v22 = vsel %vm2921_vm14, %v2922_v55, %v7604_v39 }
 0x4a6   :  { %v7641_v9 = vadd.f32 %v7217_v30, %v2738_v20  ;;  %v3454_v0 = vor.u32 %v3453_v36, %v3452_v29  ;;  %v3457_v38 = vshll.u32 %v3456_v1, 23  ;;  %v2924_v7 = vadd.s32 %v2923_v22, %v2919_v16 }
 0x4a7   :  { %v7643_v27 = vand.u32 3, %v3056_v60  ;;  %v3779_v5 = vrot.slane %v3778_v42, 2  ;;  %v7646_v23 = vadd.f32 %v2654_v35, %v7026_v49  ;;  %vm3381_vm15 = vcmp.lt.s32.totalorder %v7167_v28, 0 }
 0x4a8   :  { %v3088_v34 = vshrl.u32 %v9083_v58, %v7355_v14  ;;  %v9098_v24 = vand.u32 2147483647, %v7167_v28  ;;  %v3458_v30 = vor.u32 4788187, %v3457_v38  ;;  %v7657_v47 = vadd.f32 %v3801_v15, %v3770_v61 }
 0x4a9   :  { %v2925_v39 = vadd.s32 536870912, %v2924_v7  ;;  %v3077_v20 = vand.u32 8388607, %v3070_v4  ;;  %v3461_v49 = vcvt.s32.f32 %v3454_v0  ;;  %v3087_v3 = vshll.u32 %v9082_v6, %v7328_v32 }
 0x4aa   :  { %vm7653_vm0 = vcmp.le.f32.partialorder %v9098_v24, 0.7853982  ;;  %v3090_v35 = vshll.u32 %v9083_v58, %v7328_v32  ;;  %v3091_v52 = vshrl.u32 %v9084_v33, %v7355_v14  ;;  %v3459_v53 = vand.u32 2147483647, %v3458_v30 }
 0x4ab   :  { %v7667_v60 = vshrl.u32 %v2925_v39, 30  ;;  %v3093_v61 = vshll.u32 %v9084_v33, %v7328_v32  ;;  %v3094_v15 = vshrl.u32 %v9085_v8, %v7355_v14  ;;  %vm3062_vm1 = vcmp.eq.s32.totalorder %v7643_v27, 0 }
 0x4ac   :  { %v7674_v25 = vadd.f32 %v3779_v5, %v3778_v42  ;;  %v3089_v54 = vor.u32 %v3088_v34, %v3087_v3  ;;  %v3092_v57 = vor.u32 %v3091_v52, %v3090_v35  ;;  %vm3061_vm2 = vcmp.lt.s32.totalorder %v7643_v27, 2 }
 0x4ad   :  { %vm3065_vm3 = vcmp.eq.s32.totalorder %v7643_v27, 2  ;;  %v3462_v19 = vmul.f32 %v3461_v49, %v3459_v53  ;;  %v2927_v50 = vshll.u32 %v7667_v60, 30  ;;  %v3095_v16 = vor.u32 %v3094_v15, %v3093_v61 }
 0x4ae   :  { %vm3208_vm4 = vcmp.lt.s32.totalorder %v7493_v43, 4  ;;  %vm3059_vm6 = vweird.f32 %v7150_v46  ;;  %v3465_v32 = vsub.s32 4, %v7533_v17  ;;  %v3803_v55 = vrot.slane %v7657_v47, 2  ;;  %v9102_v46 = vld [vmem:[#allocation147_spill] sm:$0xff] }
 0x4af   :  { %v3078_v42 = vor.u32 8388608, %v3077_v20  ;;  %vm3104_vm7 = vcmp.lt.s32.totalorder %v7373_v51, 3  ;;  %v3463_v29 = vxor.u32 2147483648, %v3462_v19  ;;  %v7684_v36 = vsub.s32 %v2924_v7, %v2927_v50 }
 0x4b0   :  { %vm3102_vm8 = vcmp.lt.s32.totalorder %v7373_v51, 1  ;;  %v3116_v1 = vsel %vm3104_vm7, %v7433_v56, %v7487_v44  ;;  %v3086_v22 = vshrl.u32 %v9082_v6, %v7355_v14  ;;  %v3112_v38 = vsel %vm3104_vm7, %v3095_v16, %v7467_v40  ;;  %v4039_v5 = vpop.eup %4038 }
 0x4b1   :  { %v3110_v0 = vsel %vm3102_vm8, %v3089_v54, %v3092_v57  ;;  %v3114_v7 = vsel %vm3102_vm8, %v3092_v57, %v3095_v16  ;;  %v3464_v34 = vsel %vm3381_vm15, %v3463_v29, %v3462_v19  ;;  %v2930_v24 = vsub.s32 0, %v7684_v36  ;;  %v4041_v56 = vpop.eup %4040 }
 0x4b2   :  { %vm3103_vm9 = vcmp.lt.s32.totalorder %v7373_v51, 2  ;;  %v3107_v14 = vsel %vm3105_vm5, %v3095_v16, 2102212464  ;;  %v3066_v44 = vxor.u32 2147483648, %v4039_v5  ;;  %v3467_v40 = vsel %vm7653_vm0, %v7167_v28, %v3464_v34 }
 0x4b3   :  { %v3117_v30 = vsel %vm3103_vm9, %v3114_v7, %v3116_v1  ;;  %v3118_v39 = vshll.u32 %v3078_v42, 8  ;;  %v3063_v20 = vxor.u32 2147483648, %v4041_v56  ;;  %4042 = vcosq.f32 %v3467_v40  ;;  %v2754_v7 = vpop.permute.xlu1 %2753 }
 0x4b4   :  { %v3838_v49 = vmin.u32 %v2930_v24, %v7684_v36  ;;  %v3113_v3 = vsel %vm3103_vm9, %v3110_v0, %v3112_v38  ;;  %v3067_v35 = vsel %vm3065_vm3, %v3066_v44, %v4041_v56  ;;  %4044 = vsinq.f32 %v3467_v40  ;;  %v9101_v0 = vld [vmem:[#allocation144_spill] sm:$0xff] }
 0x4b5   :  { %v3106_v52 = vsel %vm3102_vm8, %v3086_v22, %v3089_v54  ;;  %v3108_v53 = vsel %vm3104_vm7, %v3092_v57, %v3107_v14  ;;  %v3064_v61 = vsel %vm3062_vm1, %v4039_v5, %v3063_v20  ;;  %v3466_v42 = vsel %vm3381_vm15, %v3465_v32, %v7533_v17  ;;  %v9103_v14 = vld [vmem:[#allocation172_spill] sm:$0xff] }
 0x4b6   :  { %v2932_v15 = vclz %v3838_v49  ;;  %v7722_v19 = vmul.u32.u64.low %v3118_v39, %v3117_v30  ;;  %v7723_v50 = vmul.u32.u64.high %v3118_v39, %v3117_v30, %v7722_v19  ;;  %v3068_v16 = vsel %vm3061_vm2, %v3064_v61, %v3067_v35  ;;  %v3759_v35 = vld [vmem:[%s8070_s3] sm:$0xff] }
 0x4b7   :  { %v7730_v29 = vmul.u32.u64.low %v3118_v39, %v3113_v3  ;;  %v7731_v1 = vmul.u32.u64.high %v3118_v39, %v3113_v3, %v7730_v29  ;;  %v7737_v54 = vsel %vm3208_vm4, %v7609_v31, 920167782  ;;  %v7744_v27 = vsel %vm3208_vm4, %v3204_v26, 1326507024 }
 0x4b8   :  { %v3069_v57 = vsel %vm3059_vm6, nan, %v3068_v16  ;;  %v3839_v17 = vadd.s32 4294967294, %v2932_v15  ;;  %v7750_v32 = vor.u32 %v7633_v18, %v7545_v45  ;;  %v2742_v38 = vadd.f32 %v9101_v0, %v7646_v23 }
 0x4b9   :  { %v3483_v22 = vmul.f32 %v3069_v57, %v7641_v9  ;;  %v3109_v21 = vsel %vm3103_vm9, %v3106_v52, %v3108_v53  ;;  %v3781_v2 = vrot.slane %v7674_v25, 1  ;;  %v3468_v26 = vsel %vm7653_vm0, 0, %v3466_v42 }
 0x4ba   :  { %vm3840_vm5 = vcmp.lt.s32.totalorder %v3839_v17, 0  ;;  %vm3127_vm11 = vc.u32 %v7723_v50, %v7730_v29  ;;  %v7764_v18 = vadd.f32 %v3803_v55, %v7657_v47  ;;  %v3128_v23 = vadd.s32 1, %v7731_v1 }
 0x4bb   :  { %v3493_v45 = vmul.f32 %v9102_v46, %v3483_v22  ;;  %v2935_v9 = vsel %vm3840_vm5, 0, %v3839_v17  ;;  %v2920_v51 = vadd.s32 %v7603_v41, %v7598_v11  ;;  %v3125_v10 = vmul.u32 %v3118_v39, %v3109_v21  ;;  %v9104_v11 = vld [vmem:[#allocation15_spill] sm:$0xff]  ;;  %v9108_v21 = vld [vmem:[#allocation145_spill] sm:$0xff] }
 0x4bc   :  { %v2936_v5 = vsub.s32 32, %v2935_v9  ;;  %v2940_v34 = vsub.s32 4294967266, %v2935_v9  ;;  %v2817_v56 = vadd.f32 %v9103_v14, %v2742_v38  ;;  %v3472_v44 = vand.u32 3, %v3468_v26 }
 0x4bd   :  { %v3504_v24 = vrot.slane %v3493_v45, 4  ;;  %v3129_v40 = vsel %vm3127_vm11, %v3128_v23, %v7731_v1  ;;  %vm3471_vm12 = vweird.f32 %v7167_v28  ;;  %v2937_v47 = vshll.u32 %v7684_v36, %v2935_v9 }
 0x4be   :  { %v2938_v55 = vshrl.u32 %v2920_v51, %v2936_v5  ;;  %v2941_v30 = vadd.s32 127, %v2940_v34  ;;  %v3130_v20 = vadd.s32 %v3129_v40, %v3125_v10  ;;  %v3782_v3 = vadd.f32 %v3781_v2, %v7674_v25  ;;  %v9109_v34 = vld [vmem:[#allocation155_spill] sm:$0xff] }
 0x4bf   :  { %v3505_v49 = vadd.f32 %v3504_v24, %v3493_v45  ;;  %v7775_v41 = vmul.f32 %v2754_v7, %v9104_v11  ;;  %vm2866_vm13 = vcmp.lt.s32.totalorder %v7171_v13, 0  ;;  %v3805_v39 = vrot.slane %v7764_v18, 1 }
 0x4c0   :  { %v2939_v52 = vor.u32 %v2938_v55, %v2937_v47  ;;  %v2942_v53 = vshll.u32 %v2941_v30, 23  ;;  %v3131_v36 = vadd.s32 536870912, %v3130_v20  ;;  %v4043_v61 = vpop.eup %4042  ;;  %vm3473_vm10 = vcmp.lt.s32.totalorder %v3472_v44, 2 }
 0x4c1   :  { %v3506_v15 = vrot.slane %v3505_v49, 2  ;;  %vm3474_vm14 = vcmp.eq.s32.totalorder %v3472_v44, 0  ;;  %v2950_v25 = vsub.s32 4, %v7667_v60  ;;  %v4045_v19 = vpop.eup %4044  ;;  %vm3477_vm15 = vcmp.eq.s32.totalorder %v3472_v44, 2 }
 0x4c2   :  { %v3478_v16 = vxor.u32 2147483648, %v4043_v61  ;;  %v9105_v42 = vand.u32 2147483647, %v7171_v13  ;;  %v2943_v57 = vor.u32 4788187, %v2942_v53  ;;  %v7789_v17 = vshrl.u32 %v3131_v36, 30 }
 0x4c3   :  { %v3507_v22 = vadd.f32 %v3506_v15, %v3505_v49  ;;  %v3475_v0 = vxor.u32 2147483648, %v4045_v19  ;;  %v7792_v38 = vmul.f32 %v3759_v35, %v7515_v63  ;;  %v3173_v2 = vand.u32 2147483647, %v9108_v21 }
 0x4c4   :  { %vm7785_vm0 = vcmp.le.f32.partialorder %v9105_v42, 0.7853982  ;;  %v3479_v26 = vsel %vm3477_vm15, %v3478_v16, %v4045_v19  ;;  %v2944_v45 = vand.u32 2147483647, %v2943_v57  ;;  %v2946_v9 = vcvt.s32.f32 %v2939_v52 }
 0x4c5   :  { %v3133_v23 = vshll.u32 %v7789_v17, 30  ;;  %v3508_v7 = vrot.slane %v3507_v22, 1  ;;  %v3476_v51 = vsel %vm3474_vm14, %v4043_v61, %v3475_v0  ;;  %v7800_v5 = vsel %vm2866_vm13, %v2950_v25, %v7667_v60  ;;  %v9110_v60 = vld [vmem:[#allocation149_spill] sm:$0xff] }
 0x4c6   :  { %v3191_v10 = vshrl.u32 %v9083_v58, %v9109_v34  ;;  %v3480_v24 = vsel %vm3473_vm10, %v3476_v51, %v3479_v26  ;;  %v2947_v14 = vmul.f32 %v2946_v9, %v2944_v45  ;;  %v3194_v47 = vshrl.u32 %v9084_v33, %v9109_v34 }
 0x4c7   :  { %v7805_v40 = vsub.s32 %v3130_v20, %v3133_v23  ;;  %v3509_v55 = vadd.f32 %v3508_v7, %v3507_v22  ;;  %v3481_v30 = vsel %vm3471_vm12, nan, %v3480_v24  ;;  %v3180_v49 = vand.u32 8388607, %v3173_v2  ;;  %v9111_v23 = vld [vmem:[#allocation158_spill] sm:$0xff] }
 0x4c8   :  { %v3190_v35 = vshll.u32 %v9082_v6, %v9110_v60  ;;  %v3487_v52 = vmul.f32 %v3481_v30, %v2817_v56  ;;  %v2948_v53 = vxor.u32 2147483648, %v2947_v14  ;;  %v3193_v20 = vshll.u32 %v9083_v58, %v9110_v60 }
 0x4c9   :  { %v3136_v44 = vsub.s32 0, %v7805_v40  ;;  %v7818_v36 = vadd.f32 %v3782_v3, %v3509_v55  ;;  %v3196_v28 = vshll.u32 %v9084_v33, %v9110_v60  ;;  %v3197_v15 = vshrl.u32 %v9085_v8, %v9109_v34 }
 0x4ca   :  { %v3192_v61 = vor.u32 %v3191_v10, %v3190_v35  ;;  %v3497_v25 = vmul.f32 %v9102_v46, %v3487_v52  ;;  %v2949_v56 = vsel %vm2866_vm13, %v2948_v53, %v2947_v14  ;;  %v3195_v16 = vor.u32 %v3194_v47, %v3193_v20 }
 0x4cb   :  { %v3846_v19 = vmin.u32 %v3136_v44, %v7805_v40  ;;  %v2952_v3 = vsel %vm7785_vm0, %v7171_v13, %v2949_v56  ;;  %v2953_v42 = vsel %vm7785_vm0, 0, %v7800_v5  ;;  %v3771_v57 = vrot.slane %v7792_v38, 4  ;;  %v9112_v56 = vld [vmem:[#allocation151_spill] sm:$0xff] }
 0x4cc   :  { %v3198_v22 = vor.u32 %v3197_v15, %v3196_v28  ;;  %v3528_v0 = vrot.slane %v3497_v25, 4  ;;  %4046 = vcosq.f32 %v2952_v3  ;;  %v3189_v45 = vshrl.u32 %v9082_v6, %v9109_v34 }
 0x4cd   :  { %v3138_v26 = vclz %v3846_v19  ;;  %4048 = vsinq.f32 %v2952_v3  ;;  %v3181_v9 = vor.u32 8388608, %v3180_v49  ;;  %vm3205_vm1 = vcmp.lt.s32.totalorder %v7493_v43, 1  ;;  %v9113_v19 = vld [vmem:[#allocation148_spill] sm:$0xff] }
 0x4ce   :  { %vm3206_vm2 = vcmp.lt.s32.totalorder %v7493_v43, 2  ;;  %vm3311_vm3 = vcmp.lt.s32.totalorder %v9111_v23, 4  ;;  %v3529_v7 = vadd.f32 %v3528_v0, %v3497_v25  ;;  %vm3207_vm6 = vcmp.lt.s32.totalorder %v7493_v43, 3 }
 0x4cf   :  { %v3847_v1 = vadd.s32 4294967294, %v3138_v26  ;;  %v3213_v51 = vsel %vm3205_vm1, %v3192_v61, %v3195_v16  ;;  %v3210_v5 = vsel %vm3208_vm4, %v3198_v22, 2102212464  ;;  %v3215_v34 = vsel %vm3207_vm6, %v3198_v22, %v7737_v54 }
 0x4d0   :  { %v3217_v10 = vsel %vm3205_vm1, %v3195_v16, %v3198_v22  ;;  %v3219_v24 = vsel %vm3207_vm6, %v7609_v31, %v7744_v27  ;;  %v3530_v14 = vrot.slane %v3529_v7, 2  ;;  %v3216_v47 = vsel %vm3206_vm2, %v3213_v51, %v3215_v34 }
 0x4d1   :  { %vm3848_vm7 = vcmp.lt.s32.totalorder %v3847_v1, 0  ;;  %v3220_v55 = vsel %vm3206_vm2, %v3217_v10, %v3219_v24  ;;  %v3126_v30 = vadd.s32 %v7730_v29, %v7723_v50  ;;  %v3209_v49 = vsel %vm3205_vm1, %v3189_v45, %v3192_v61 }
 0x4d2   :  { %v3141_v54 = vsel %vm3848_vm7, 0, %v3847_v1  ;;  %v3221_v60 = vshll.u32 %v3181_v9, 8  ;;  %v3531_v35 = vadd.f32 %v3530_v14, %v3529_v7  ;;  %v3211_v31 = vsel %vm3207_vm6, %v3195_v16, %v3210_v5 }
 0x4d3   :  { %v3142_v52 = vsub.s32 32, %v3141_v54  ;;  %v3146_v53 = vsub.s32 4294967266, %v3141_v54  ;;  %v3143_v50 = vshll.u32 %v7805_v40, %v3141_v54  ;;  %v3307_v61 = vor.u32 %v7637_v62, %v7551_v37 }
 0x4d4   :  { %v7864_v27 = vmul.u32.u64.low %v3221_v60, %v3220_v55  ;;  %v7865_v44 = vmul.u32.u64.high %v3221_v60, %v3220_v55, %v7864_v27  ;;  %v7867_v20 = vmul.u32.u64.low %v3221_v60, %v3216_v47  ;;  %v7868_v28 = vmul.u32.u64.high %v3221_v60, %v3216_v47, %v7867_v20  ;;  %v9116_v55 = vld [vmem:[#allocation160_spill] sm:$0xff] }
 0x4d5   :  { %v3532_v15 = vrot.slane %v3531_v35, 1  ;;  %v3144_v29 = vshrl.u32 %v3126_v30, %v3142_v52  ;;  %v3147_v25 = vadd.s32 127, %v3146_v53  ;;  %v2737_v3 = vadd.f32 %v9113_v19, %v9112_v56 }
 0x4d6   :  { %v3772_v16 = vadd.f32 %v3771_v57, %v7792_v38  ;;  %v3212_v22 = vsel %vm3206_vm2, %v3209_v49, %v3211_v31  ;;  %v3806_v26 = vadd.f32 %v3805_v39, %v7764_v18  ;;  %v7885_v9 = vsel %vm3311_vm3, %v7750_v32, 920167782 }
 0x4d7   :  { %v3533_v0 = vadd.f32 %v3532_v15, %v3531_v35  ;;  %v3145_v45 = vor.u32 %v3144_v29, %v3143_v50  ;;  %v3148_v40 = vshll.u32 %v3147_v25, 23  ;;  %v2957_v7 = vand.u32 3, %v2953_v42  ;;  %v9117_v35 = vld [vmem:[#allocation157_spill] sm:$0xff] }
 0x4d8   :  { %vm3230_vm4 = vc.u32 %v7865_v44, %v7867_v20  ;;  %v3231_v38 = vadd.s32 1, %v7868_v28  ;;  %v2812_v57 = vadd.f32 %v7775_v41, %v2737_v3  ;;  %v3228_v51 = vmul.u32 %v3221_v60, %v3212_v22 }
 0x4d9   :  { %v7890_v43 = vadd.f32 %v3806_v26, %v3533_v0  ;;  %v3149_v1 = vor.u32 4788187, %v3148_v40  ;;  %v4047_v18 = vpop.eup %4046  ;;  %vm2956_vm8 = vweird.f32 %v7171_v13  ;;  %v3773_v39 = vrot.slane %v3772_v16, 2 }
 0x4da   :  { %vm7896_vm9 = vcmp.le.f32.partialorder %v3070_v4, 0.7853982  ;;  %v3232_v42 = vsel %vm3230_vm4, %v3231_v38, %v7868_v28  ;;  %v4049_v34 = vpop.eup %4048  ;;  %v2963_v10 = vxor.u32 2147483648, %v4047_v18  ;;  %v3152_v14 = vcvt.s32.f32 %v3145_v45 }
 0x4db   :  { %v3150_v24 = vand.u32 2147483647, %v3149_v1  ;;  %v3233_v47 = vadd.s32 %v3232_v42, %v3228_v51  ;;  %v2960_v41 = vxor.u32 2147483648, %v4049_v34  ;;  %vm2962_vm5 = vcmp.eq.s32.totalorder %v2957_v7, 2  ;;  %v9119_v1 = vld [vmem:[#allocation176_spill] sm:$0xff] }
 0x4dc   :  { %vm3072_vm11 = vcmp.lt.s32.totalorder %v7203_v59, 0  ;;  %v3276_v30 = vand.u32 2147483647, %v9116_v55  ;;  %vm2959_vm12 = vcmp.eq.s32.totalorder %v2957_v7, 0  ;;  %v2964_v54 = vsel %vm2962_vm5, %v2963_v10, %v4049_v34 }
 0x4dd   :  { %v3153_v49 = vmul.f32 %v3152_v14, %v3150_v24  ;;  %v3234_v4 = vadd.s32 536870912, %v3233_v47  ;;  %vm2958_vm13 = vcmp.lt.s32.totalorder %v2957_v7, 2  ;;  %v2961_v60 = vsel %vm2959_vm12, %v4047_v18, %v2960_v41  ;;  %v7933_v18 = vpop.permute.xlu1 %2694 }
 0x4de   :  { %v3293_v52 = vshll.u32 %v9082_v6, %v9117_v35  ;;  %v3294_v53 = vshrl.u32 %v9083_v58, %v7518_v48  ;;  %v2965_v31 = vsel %vm2958_vm13, %v2961_v60, %v2964_v54  ;;  %v3297_v15 = vshrl.u32 %v9084_v33, %v7518_v48 }
 0x4df   :  { %v3154_v27 = vxor.u32 2147483648, %v3153_v49  ;;  %v7907_v28 = vshrl.u32 %v3234_v4, 30  ;;  %v2966_v50 = vsel %vm2956_vm8, nan, %v2965_v31  ;;  %v3156_v29 = vsub.s32 4, %v7789_v17 }
 0x4e0   :  { %v3283_v25 = vand.u32 8388607, %v3276_v30  ;;  %v3296_v56 = vshll.u32 %v9083_v58, %v9117_v35  ;;  %v3482_v19 = vmul.f32 %v2966_v50, %v2812_v57  ;;  %v3295_v0 = vor.u32 %v3294_v53, %v3293_v52  ;;  %v9118_v57 = vld [vmem:[#allocation140_spill] sm:$0xff] }
 0x4e1   :  { %v3155_v3 = vsel %vm3072_vm11, %v3154_v27, %v3153_v49  ;;  %v3236_v22 = vshll.u32 %v7907_v28, 30  ;;  %v3299_v45 = vshll.u32 %v9084_v33, %v9117_v35  ;;  %v3300_v40 = vshrl.u32 %v9085_v8, %v7518_v48  ;;  %v2762_v60 = vpop.permute.xlu1 %2761 }
 0x4e2   :  { %v3158_v13 = vsel %vm7896_vm9, %v7203_v59, %v3155_v3  ;;  %v3298_v26 = vor.u32 %v3297_v15, %v3296_v56  ;;  %v3492_v58 = vmul.f32 %v9102_v46, %v3482_v19  ;;  %v3774_v7 = vadd.f32 %v3773_v39, %v3772_v16  ;;  %v9120_v19 = vld [vmem:[#allocation143_spill] sm:$0xff] }
 0x4e3   :  { %4050 = vcosq.f32 %v3158_v13  ;;  %v7929_v38 = vsub.s32 %v3233_v47, %v3236_v22  ;;  %v2663_v51 = vadd.f32 %v9119_v1, %v9118_v57  ;;  %v3157_v42 = vsel %vm3072_vm11, %v3156_v29, %v7789_v17  ;;  %v3761_v47 = vld [vmem:[%s8070_s3 + $0x10] sm:$0xff] }
 0x4e4   :  { %4052 = vsinq.f32 %v3158_v13  ;;  %v3301_v33 = vor.u32 %v3300_v40, %v3299_v45  ;;  %v3498_v34 = vrot.slane %v3492_v58, 4  ;;  %vm3308_vm10 = vcmp.lt.s32.totalorder %v9111_v23, 1 }
 0x4e5   :  { %v3239_v8 = vsub.s32 0, %v7929_v38  ;;  %vm3310_vm14 = vcmp.lt.s32.totalorder %v9111_v23, 3  ;;  %v3321_v16 = vsel %vm3311_vm3, %v3307_v61, 1326507024  ;;  %v3284_v39 = vor.u32 8388608, %v3283_v25 }
 0x4e6   :  { %v3316_v10 = vsel %vm3308_vm10, %v3295_v0, %v3298_v26  ;;  %v3318_v17 = vsel %vm3310_vm14, %v3301_v33, %v7885_v9  ;;  %v3499_v24 = vadd.f32 %v3498_v34, %v3492_v58  ;;  %v3775_v14 = vrot.slane %v3774_v7, 1 }
 0x4e7   :  { %v3159_v37 = vsel %vm7896_vm9, 0, %v3157_v42  ;;  %v3850_v62 = vmin.u32 %v3239_v8, %v7929_v38  ;;  %vm3819_vm15 = vcmask 1041409   ;;  %v3292_v61 = vshrl.u32 %v9082_v6, %v7518_v48 }
 0x4e8   :  { %vm3309_vm0 = vcmp.lt.s32.totalorder %v9111_v23, 2  ;;  %v3313_v9 = vsel %vm3311_vm3, %v3301_v33, 2102212464  ;;  %v3320_v41 = vsel %vm3308_vm10, %v3298_v26, %v3301_v33  ;;  %v3500_v54 = vrot.slane %v3499_v24, 2 }
 0x4e9   :  { %v3241_v49 = vclz %v3850_v62  ;;  %v3319_v5 = vsel %vm3309_vm0, %v3316_v10, %v3318_v17  ;;  %v3322_v4 = vsel %vm3310_vm14, %v7750_v32, %v3321_v16  ;;  %v3163_v35 = vand.u32 3, %v3159_v37 }
 0x4ea   :  { %v3767_v6 = vmul.f32 %v3761_v47, %v7515_v63  ;;  %v3323_v48 = vsel %vm3309_vm0, %v3320_v41, %v3322_v4  ;;  %v3324_v52 = vshll.u32 %v3284_v39, 8  ;;  %v3501_v53 = vadd.f32 %v3500_v54, %v3499_v24 }
 0x4eb   :  { %v3851_v31 = vadd.s32 4294967294, %v3241_v49  ;;  %v3312_v27 = vsel %vm3308_vm10, %v3292_v61, %v3295_v0  ;;  %v3314_v15 = vsel %vm3310_vm14, %v3298_v26, %v3313_v9  ;;  %v2739_v3 = vadd.f32 %v9120_v19, %v2663_v51 }
 0x4ec   :  { %v7976_v50 = vmul.u32.u64.low %v3324_v52, %v3323_v48  ;;  %v7977_v29 = vmul.u32.u64.high %v3324_v52, %v3323_v48, %v7976_v50  ;;  %v7979_v32 = vmul.u32.u64.low %v3324_v52, %v3319_v5  ;;  %v7980_v25 = vmul.u32.u64.high %v3324_v52, %v3319_v5, %v7979_v32 }
 0x4ed   :  { %v3502_v56 = vrot.slane %v3501_v53, 1  ;;  %v2802_v22 = vmul.f32 %v2762_v60, %v9104_v11  ;;  %vm3852_vm1 = vcmp.lt.s32.totalorder %v3851_v31, 0  ;;  %v3776_v13 = vadd.f32 %v3775_v14, %v3774_v7 }
 0x4ee   :  { %v3783_v45 = vrot.slane %v3767_v6, 4  ;;  %v3229_v0 = vadd.s32 %v7867_v20, %v7865_v44  ;;  %v3244_v40 = vsel %vm3852_vm1, 0, %v3851_v31  ;;  %v3315_v1 = vsel %vm3309_vm0, %v3312_v27, %v3314_v15 }
 0x4ef   :  { %v3503_v26 = vadd.f32 %v3502_v56, %v3501_v53  ;;  %v3245_v58 = vsub.s32 32, %v3244_v40  ;;  %v3249_v57 = vsub.s32 4294967266, %v3244_v40  ;;  %vm3165_vm2 = vcmp.eq.s32.totalorder %v3163_v35, 0 }
 0x4f0   :  { %v4051_v42 = vpop.eup %4050  ;;  %v3246_v33 = vshll.u32 %v7929_v38, %v3244_v40  ;;  %vm3333_vm3 = vc.u32 %v7977_v29, %v7979_v32  ;;  %v3334_v7 = vadd.s32 1, %v7980_v25  ;;  %vm3168_vm6 = vcmp.eq.s32.totalorder %v3163_v35, 2 }
 0x4f1   :  { %v4053_v51 = vpop.eup %4052  ;;  %v3807_v34 = vadd.f32 %v3776_v13, %v3503_v26  ;;  %v3169_v8 = vxor.u32 2147483648, %v4051_v42  ;;  %v3247_v44 = vshrl.u32 %v3229_v0, %v3245_v58  ;;  %v3250_v20 = vadd.s32 127, %v3249_v57 }
 0x4f2   :  { %v3166_v16 = vxor.u32 2147483648, %v4053_v51  ;;  %v3331_v39 = vmul.u32 %v3324_v52, %v3315_v1  ;;  %v3335_v23 = vsel %vm3333_vm3, %v3334_v7, %v7980_v25  ;;  %v2814_v14 = vadd.f32 %v2802_v22, %v2739_v3  ;;  %v3762_v1 = vld [vmem:[%s8070_s3 + $0x18] sm:$0xff] }
 0x4f3   :  { %v3820_v10 = vsel %vm3819_vm15, %v7818_v36, %v3807_v34  ;;  %v3170_v17 = vsel %vm3168_vm6, %v3169_v8, %v4053_v51  ;;  %v3248_v38 = vor.u32 %v3247_v44, %v3246_v33  ;;  %v3251_v24 = vshll.u32 %v3250_v20, 23 }
 0x4f4   :  { %vm3164_vm7 = vcmp.lt.s32.totalorder %v3163_v35, 2  ;;  %v3167_v47 = vsel %vm3165_vm2, %v4051_v42, %v3166_v16  ;;  %v3336_v37 = vadd.s32 %v3335_v23, %v3331_v39  ;;  %vm3162_vm4 = vweird.f32 %v7203_v59  ;;  %v9123_v42 = vld [vmem:[#allocation153_spill] sm:$0xff]  ;;  %v2766_v39 = vpop.permute.xlu1 %2765 }
 0x4f5   :  { %v3171_v62 = vsel %vm3164_vm7, %v3167_v47, %v3170_v17  ;;  %v3784_v61 = vadd.f32 %v3783_v45, %v3767_v6  ;;  %v3252_v9 = vor.u32 4788187, %v3251_v24  ;;  %v3255_v4 = vcvt.s32.f32 %v3248_v38 }
 0x4f6   :  { %v3172_v41 = vsel %vm3162_vm4, nan, %v3171_v62  ;;  %v3337_v54 = vadd.s32 536870912, %v3336_v37  ;;  %vm3175_vm8 = vcmp.lt.s32.totalorder %v9108_v21, 0  ;;  %vm8005_vm9 = vcmp.le.f32.partialorder %v3173_v2, 0.7853982 }
 0x4f7   :  { %v3484_v49 = vmul.f32 %v3172_v41, %v2814_v14  ;;  %v3253_v5 = vand.u32 2147483647, %v3252_v9  ;;  %v3785_v48 = vrot.slane %v3784_v61, 2  ;;  %v3259_v3 = vsub.s32 4, %v7907_v28  ;;  %v9124_v14 = vld [vmem:[#allocation139_spill] sm:$0xff]  ;;  %v9125_v41 = vld [vmem:[#allocation14_spill] sm:$0xff] }
 0x4f8   :  { %v7998_v60 = vshrl.u32 %v3337_v54, 30  ;;  %vm3821_vm5 = vcmask 1042434   ;;  %v2652_v33 = vmul.f32 %v9123_v42, %v9068_v12  ;;  %v3768_v16 = vmul.f32 %v3762_v1, %v7515_v63  ;;  %v9126_v54 = vld [vmem:[#allocation142_spill] sm:$0xff]  ;;  %v3763_v1 = vld [vmem:[%s8070_s3 + $0x20] sm:$0xff] }
 0x4f9   :  { %v3494_v36 = vmul.f32 %v9102_v46, %v3484_v49  ;;  %v3256_v52 = vmul.f32 %v3255_v4, %v3253_v5  ;;  %v3786_v27 = vadd.f32 %v3785_v48, %v3784_v61  ;;  %v3260_v40 = vsel %vm3175_vm8, %v3259_v3, %v7907_v28 }
 0x4fa   :  { %v3339_v35 = vshll.u32 %v7998_v60, 30  ;;  %v3262_v51 = vsel %vm8005_vm9, 0, %v3260_v40  ;;  %v3332_v28 = vadd.s32 %v7979_v32, %v7977_v29  ;;  %v2664_v47 = vadd.f32 %v2652_v33, %v9124_v14 }
 0x4fb   :  { %v3510_v53 = vrot.slane %v3494_v36, 4  ;;  %v3257_v31 = vxor.u32 2147483648, %v3256_v52  ;;  %v3787_v45 = vrot.slane %v3786_v27, 1  ;;  %v3266_v23 = vand.u32 3, %v3262_v51  ;;  %v9129_v51 = vld [vmem:[#allocation159_spill] sm:$0xff] }
 0x4fc   :  { %v3340_v59 = vsub.s32 %v3336_v37, %v3339_v35  ;;  %v2728_v29 = vmul.f32 %v9126_v54, %v9125_v41  ;;  %v2803_v32 = vmul.f32 %v2766_v39, %v9104_v11  ;;  %v3789_v49 = vrot.slane %v3768_v16, 4 }
 0x4fd   :  { %v3511_v6 = vadd.f32 %v3510_v53, %v3494_v36  ;;  %v3258_v50 = vsel %vm3175_vm8, %v3257_v31, %v3256_v52  ;;  %v3788_v57 = vadd.f32 %v3787_v45, %v3786_v27  ;;  %vm3271_vm12 = vcmp.eq.s32.totalorder %v3266_v23, 2 }
 0x4fe   :  { %v3261_v25 = vsel %vm8005_vm9, %v9108_v21, %v3258_v50  ;;  %v3342_v56 = vsub.s32 0, %v3340_v59  ;;  %v2740_v36 = vadd.f32 %v2728_v29, %v2664_v47  ;;  %vm3268_vm13 = vcmp.eq.s32.totalorder %v3266_v23, 0 }
 0x4ff   :  { %v3512_v19 = vrot.slane %v3511_v6, 2  ;;  %4054 = vcosq.f32 %v3261_v25  ;;  %vm3267_vm10 = vcmp.lt.s32.totalorder %v3266_v23, 2  ;;  %vm3265_vm14 = vweird.f32 %v9108_v21 }
 0x500   :  { %4056 = vsinq.f32 %v3261_v25  ;;  %v3854_v22 = vmin.u32 %v3342_v56, %v3340_v59  ;;  %v2815_v31 = vadd.f32 %v2803_v32, %v2740_v36  ;;  %vm3278_vm15 = vcmp.lt.s32.totalorder %v9116_v55, 0 }
 0x501   :  { %v3513_v13 = vadd.f32 %v3512_v19, %v3511_v6  ;;  %v3790_v6 = vadd.f32 %v3789_v49, %v3768_v16  ;;  %vm8039_vm0 = vcmp.le.f32.partialorder %v3276_v30, 0.7853982  ;;  %vm3823_vm1 = vcmask 1043459  }
 0x502   :  { %v3344_v2 = vclz %v3854_v22  ;;  %vm3368_vm7 = vweird.f32 %v9116_v55  ;;  %vm3825_vm4 = vcmask 1044484   ;;  %vm3827_vm8 = vcmask 1045509  }
 0x503   :  { %v3514_v0 = vrot.slane %v3513_v13, 1  ;;  %v3791_v19 = vrot.slane %v3790_v6, 2 }
 0x504   :  { %v3855_v26 = vadd.s32 4294967294, %v3344_v2 }
 0x505   :  { %v3515_v58 = vadd.f32 %v3514_v0, %v3513_v13  ;;  %v3792_v2 = vadd.f32 %v3791_v19, %v3790_v6  ;;  %v3362_v0 = vsub.s32 4, %v7998_v60 }
 0x506   :  { %vm3856_vm11 = vcmp.lt.s32.totalorder %v3855_v26, 0 }
 0x507   :  { %v3809_v7 = vadd.f32 %v3788_v57, %v3515_v58  ;;  %v3347_v34 = vsel %vm3856_vm11, 0, %v3855_v26  ;;  %v3793_v58 = vrot.slane %v3792_v2, 1  ;;  %v3363_v30 = vsel %vm3278_vm15, %v3362_v0, %v7998_v60 }
 0x508   :  { %v3348_v8 = vsub.s32 32, %v3347_v34  ;;  %v3352_v44 = vsub.s32 4294967266, %v3347_v34  ;;  %v3349_v17 = vshll.u32 %v3340_v59, %v3347_v34  ;;  %v3365_v42 = vsel %vm8039_vm0, 0, %v3363_v30 }
 0x509   :  { %v8027_v20 = vsel %vm3821_vm5, %v3809_v7, %v3820_v10  ;;  %v3794_v7 = vadd.f32 %v3793_v58, %v3792_v2  ;;  %v2653_v34 = vmul.f32 %v9129_v51, %v9068_v12  ;;  %v3369_v16 = vand.u32 3, %v3365_v42 }
 0x50a   :  { %v3350_v38 = vshrl.u32 %v3332_v28, %v3348_v8  ;;  %v3353_v24 = vadd.s32 127, %v3352_v44  ;;  %v3769_v28 = vmul.f32 %v3763_v1, %v7515_v63  ;;  %v2770_v44 = vpop.permute.xlu1 %2769  ;;  %v2729_v60 = vmul.f32 %v7933_v18, %v9125_v41 }
 0x50b   :  { %v2804_v14 = vmul.f32 %v2770_v44, %v9104_v11  ;;  %vm3374_vm2 = vcmp.eq.s32.totalorder %v3369_v16, 2  ;;  %vm3371_vm3 = vcmp.eq.s32.totalorder %v3369_v16, 0  ;;  %vm3370_vm6 = vcmp.lt.s32.totalorder %v3369_v16, 2 }
 0x50c   :  { %v4055_v37 = vpop.eup %4054  ;;  %v3351_v62 = vor.u32 %v3350_v38, %v3349_v17  ;;  %v3354_v61 = vshll.u32 %v3353_v24, 23  ;;  %v9130_v38 = vld [vmem:[#allocation141_spill] sm:$0xff] }
 0x50d   :  { %v4057_v9 = vpop.eup %4056  ;;  %v3272_v10 = vxor.u32 2147483648, %v4055_v37  ;;  %v2665_v24 = vadd.f32 %v2653_v34, %v9130_v38 }
 0x50e   :  { %v3269_v5 = vxor.u32 2147483648, %v4057_v9  ;;  %v3355_v4 = vor.u32 4788187, %v3354_v61  ;;  %v3358_v53 = vcvt.s32.f32 %v3351_v62 }
 0x50f   :  { %v3273_v48 = vsel %vm3271_vm12, %v3272_v10, %v4057_v9  ;;  %v2741_v62 = vadd.f32 %v2729_v60, %v2665_v24 }
 0x510   :  { %v3270_v52 = vsel %vm3268_vm13, %v4055_v37, %v3269_v5  ;;  %v3356_v35 = vand.u32 2147483647, %v3355_v4  ;;  %v3795_v37 = vrot.slane %v3769_v28, 4 }
 0x511   :  { %v3274_v59 = vsel %vm3267_vm10, %v3270_v52, %v3273_v48  ;;  %v2816_v9 = vadd.f32 %v2804_v14, %v2741_v62 }
 0x512   :  { %v3275_v27 = vsel %vm3265_vm14, nan, %v3274_v59  ;;  %v3359_v15 = vmul.f32 %v3358_v53, %v3356_v35  ;;  %v3796_v41 = vadd.f32 %v3795_v37, %v3769_v28 }
 0x513   :  { %v3485_v50 = vmul.f32 %v3275_v27, %v2815_v31 }
 0x514   :  { %v3360_v25 = vxor.u32 2147483648, %v3359_v15  ;;  %v3797_v32 = vrot.slane %v3796_v41, 2 }
 0x515   :  { %v3495_v56 = vmul.f32 %v9102_v46, %v3485_v50 }
 0x516   :  { %v3361_v22 = vsel %vm3278_vm15, %v3360_v25, %v3359_v15  ;;  %v3798_v49 = vadd.f32 %v3797_v32, %v3796_v41 }
 0x517   :  { %v3516_v13 = vrot.slane %v3495_v56, 4  ;;  %v3364_v21 = vsel %vm8039_vm0, %v9116_v55, %v3361_v22 }
 0x518   :  { %4058 = vcosq.f32 %v3364_v21  ;;  %v3799_v36 = vrot.slane %v3798_v49, 1 }
 0x519   :  { %v3517_v45 = vadd.f32 %v3516_v13, %v3495_v56  ;;  %4060 = vsinq.f32 %v3364_v21 }
 0x51a   :  { %v3800_v35 = vadd.f32 %v3799_v36, %v3798_v49 }
 0x51b   :  { %v3518_v40 = vrot.slane %v3517_v45, 2 }
 0x51d   :  { %v3519_v26 = vadd.f32 %v3518_v40, %v3517_v45 }
 0x51f   :  { %v3520_v57 = vrot.slane %v3519_v26, 1 }
 0x521   :  { %v3521_v33 = vadd.f32 %v3520_v57, %v3519_v26 }
 0x523   :  { %v3810_v8 = vadd.f32 %v3794_v7, %v3521_v33 }
 0x525   :  { %v4059_v39 = vpop.eup %4058  ;;  %v3824_v23 = vsel %vm3823_vm1, %v3810_v8, %v8027_v20 }
 0x526   :  { %v4061_v17 = vpop.eup %4060  ;;  %v3375_v47 = vxor.u32 2147483648, %v4059_v39 }
 0x527   :  { %v3372_v12 = vxor.u32 2147483648, %v4061_v17 }
 0x528   :  { %v3376_v63 = vsel %vm3374_vm2, %v3375_v47, %v4061_v17 }
 0x529   :  { %v3373_v61 = vsel %vm3371_vm3, %v4059_v39, %v3372_v12 }
 0x52a   :  { %v3377_v18 = vsel %vm3370_vm6, %v3373_v61, %v3376_v63 }
 0x52b   :  { %v3378_v20 = vsel %vm3368_vm7, nan, %v3377_v18 }
 0x52c   :  { %v3486_v54 = vmul.f32 %v3378_v20, %v2816_v9 }
 0x52e   :  { %v3496_v29 = vmul.f32 %v9102_v46, %v3486_v54 }
 0x530   :  { %v3522_v11 = vrot.slane %v3496_v29, 4 }
 0x532   :  { %v3523_v10 = vadd.f32 %v3522_v11, %v3496_v29 }
 0x534   :  { %v3524_v5 = vrot.slane %v3523_v10, 2 }
 0x536   :  { %v3525_v4 = vadd.f32 %v3524_v5, %v3523_v10 }
 0x538   :  { %v3526_v48 = vrot.slane %v3525_v4, 1 }
 0x53a   :  { %v3527_v52 = vadd.f32 %v3526_v48, %v3525_v4 }
 0x53c   :  { %v3811_v53 = vadd.f32 %v3800_v35, %v3527_v52 }
 0x53e   :  { %v3826_v55 = vsel %vm3825_vm4, %v3811_v53, %v3824_v23 }
 0x53f   :  { %v3828_v31 = vsel %vm3827_vm8, %v7890_v43, %v3826_v55 }
 0x540   :  { %3830 = vst [vmem:[%s8071_s4] sm:$0x3f] %v3828_v31 }
 0x541   :  { %3835 = vsyncpa [#allocation3], 1 }
 0x542   :  { %3836 = vsyncpa [#allocation5], 1 }

</bundles_post_ra>
